<compile_context>
chip_gen: v7x
topology: tpu7x:2x2x1
jax: 0.10.0
libtpu: 0.0.40
codegen_flags: <defaults>
</compile_context>

<pallas_src>
import functools

import jax
import jax.numpy as jnp
from jax import lax
from jax.experimental import pallas as pl
from jax.experimental.pallas import tpu as pltpu

EPS = 1e-5          # torch.nn.InstanceNorm2d default eps
NEG_SLOPE = 0.01    # nnUNet LeakyReLU negative_slope

# ----------------------- model configuration (small, deterministic) ----------------------
INPUT_CHANNELS = 4
BASE_FEATURES = 8
FEAT_MUL = 2
MAX_FEATURES = 32
POOL_KERNELS = [(1, 1), (2, 2), (2, 2)]      # pool_op_kernel_sizes (first-conv stride per stage)
CONV_KERNELS = [(3, 3), (3, 3), (3, 3)]      # conv_kernel_sizes
NUM_CONVS_PER_BLOCK = 2
NUM_CLASSES = 3
REDUCTION = 4                                # SE reduction
NUM_STAGES = len(POOL_KERNELS)
STAGE_FEATS = [min(BASE_FEATURES * FEAT_MUL ** s, MAX_FEATURES) for s in range(NUM_STAGES)]


# ================================ host-side layout helpers ================================

def to_padded_flat(x):
    """[N, C, H, W] (NCHW) -> zero-ring padded-flat [N, C, (H+2)*(W+2)]."""
    n, c, h, w = x.shape
    xp = jnp.pad(x, ((0, 0), (0, 0), (1, 1), (1, 1)))
    return xp.reshape(n, c, (h + 2) * (w + 2))


def interior_mask(h, w):
    """[1, (h+2)*(w+2)] f32 mask: 1 at interior positions, 0 on the zero ring."""
    m = jnp.pad(jnp.ones((h, w), jnp.float32), ((1, 1), (1, 1)))
    return m.reshape(1, (h + 2) * (w + 2))


# ================================ in-kernel conv building block ================================

def _conv3x3_block(x, w9, b, g, be, mask, Wp, inv_hw):
    """One 3x3 stride-1 conv + bias + InstanceNorm(affine) + LeakyReLU on padded-flat layout.

    x    : [Cin, S] f32 value (ring positions are zero)           S = (H+2)*(W+2)
    w9   : [9, Cout, Cin] bf16 value (per kernel-offset weights)
    b/g/be: [Cout, 1] f32, mask: [1, S] f32
    returns [Cout, S] f32 with ring re-zeroed (valid zero padding for the next conv).
    """
    cin, s_len = x.shape
    cout = w9.shape[1]
    m = Wp + 1                                   # max |flat shift| of a 3x3 neighbour
    xb = x.astype(jnp.bfloat16)                  # bf16 matmul operands (f32 accumulate)
    zpad = jnp.zeros((cin, m), jnp.bfloat16)
    x_ext = jnp.concatenate([zpad, xb, zpad], axis=1)          # [Cin, S + 2m]
    acc = jnp.zeros((cout, s_len), jnp.float32)
    for k in range(9):                            # in-kernel im2col: 9 shifted MXU matmuls
        di, dj = k // 3, k % 3
        sft = (di - 1) * Wp + (dj - 1)
        win = x_ext[:, m + sft: m + sft + s_len]               # [Cin, S]
        acc = acc + jnp.dot(w9[k], win, preferred_element_type=jnp.float32)
    y = acc + b
    # InstanceNorm over the valid (interior) positions only (biased variance, like torch).
    mean = jnp.sum(y * mask, axis=1, keepdims=True) * inv_hw
    d = (y - mean) * mask
    var = jnp.sum(d * d, axis=1, keepdims=True) * inv_hw
    z = (y - mean) * lax.rsqrt(var + EPS) * g + be
    z = jnp.where(z >= 0.0, z, NEG_SLOPE * z)                  # LeakyReLU(0.01)
    return z * mask                                            # re-zero the ring


def _make_stage_kernel(n_convs, Wp, inv_hw, with_cat_se):
    """Fused StackedConvBlock kernel: [skip-SE gate + channel concat]? then n_convs fused convs."""
    def kernel(*refs):
        i = 0
        xa_ref = refs[i]; i += 1
        if with_cat_se:
            xb_ref, w1_ref, b1_ref, w2_ref, b2_ref = refs[i:i + 5]; i += 5
        conv_refs = []
        for _ in range(n_convs):
            conv_refs.append(refs[i:i + 4]); i += 4
        m_ref = refs[i]; i += 1
        o_ref = refs[i]

        mask = m_ref[...]
        x = xa_ref[0]                                           # [Ca, S] f32
        if with_cat_se:
            xb = xb_ref[0]                                      # skip, ring is zero
            gap = jnp.sum(xb, axis=1, keepdims=True) * inv_hw   # GAP over valid positions [Cb,1]
            h1 = jnp.maximum(
                jnp.dot(w1_ref[...], gap, preferred_element_type=jnp.float32) + b1_ref[...], 0.0)
            gate = jax.nn.sigmoid(
                jnp.dot(w2_ref[...], h1, preferred_element_type=jnp.float32) + b2_ref[...])
            xb = xb * (1.0 + gate)                              # residual SE on the skip
            x = jnp.concatenate([x, xb], axis=0)                # torch.cat((x, skip), dim=1)
        for (w9_ref, b_ref, g_ref, be_ref) in conv_refs:
            x = _conv3x3_block(x, w9_ref[...], b_ref[...], g_ref[...], be_ref[...],
                               mask, Wp, inv_hw)
        o_ref[0] = x
    return kernel


def stacked_conv_stage(x_flat, H, W, conv_params, cat_se=None, skip_flat=None):
    """One pallas_call for a whole StackedConvBlock (optionally fused with skip-SE + concat)."""
    n, cin, s_len = x_flat.shape
    Wp = W + 2
    n_convs = len(conv_params)
    cout = conv_params[-1]["w9"].shape[1]
    mask = interior_mask(H, W)
    kernel = _make_stage_kernel(n_convs, Wp, 1.0 / (H * W), cat_se is not None)

    inputs = [x_flat]
    in_specs = [pl.BlockSpec((1, cin, s_len), lambda i: (i, 0, 0))]
    if cat_se is not None:
        cb = skip_flat.shape[1]
        cr = cat_se["w1"].shape[0]
        inputs += [skip_flat, cat_se["w1"], cat_se["b1"], cat_se["w2"], cat_se["b2"]]
        in_specs += [pl.BlockSpec((1, cb, s_len), lambda i: (i, 0, 0)),
                     pl.BlockSpec((cr, cb), lambda i: (0, 0)),
                     pl.BlockSpec((cr, 1), lambda i: (0, 0)),
                     pl.BlockSpec((cb, cr), lambda i: (0, 0)),
                     pl.BlockSpec((cb, 1), lambda i: (0, 0))]
    for cp in conv_params:
        co, ci = cp["w9"].shape[1], cp["w9"].shape[2]
        inputs += [cp["w9"], cp["b"], cp["gamma"], cp["beta"]]
        in_specs += [pl.BlockSpec((9, co, ci), lambda i: (0, 0, 0)),
                     pl.BlockSpec((co, 1), lambda i: (0, 0)),
                     pl.BlockSpec((co, 1), lambda i: (0, 0)),
                     pl.BlockSpec((co, 1), lambda i: (0, 0))]
    inputs.append(mask)
    in_specs.append(pl.BlockSpec((1, s_len), lambda i: (0, 0)))

    return pl.pallas_call(
        kernel,
        out_shape=jax.ShapeDtypeStruct((n, cout, s_len), jnp.float32),
        grid=(n,),
        in_specs=in_specs,
        out_specs=pl.BlockSpec((1, cout, s_len), lambda i: (i, 0, 0)),
        compiler_params=pltpu.CompilerParams(dimension_semantics=("parallel",)),
    )(*inputs)


# ================================ strided conv (stage entry) ================================

def _strided_conv_kernel(p_ref, w_ref, b_ref, g_ref, be_ref, o_ref):
    p = p_ref[0].astype(jnp.bfloat16)                            # [Cin*9, Ho*Wo]
    y = jnp.dot(w_ref[...], p, preferred_element_type=jnp.float32) + b_ref[...]
    mean = jnp.mean(y, axis=1, keepdims=True)                    # all positions valid here
    d = y - mean
    var = jnp.mean(d * d, axis=1, keepdims=True)
    z = d * lax.rsqrt(var + EPS) * g_ref[...] + be_ref[...]
    o_ref[0] = jnp.where(z >= 0.0, z, NEG_SLOPE * z)


def strided_conv(a, H, W, cp):
    """3x3 stride-2 pad-1 conv + bias + IN + LeakyReLU (the 2 encoder down-samplers).
    The stride-2 patch gather is a cheap host-side slice; the matmul+norm+act is one fused kernel."""
    n, cin, _ = a.shape
    Hp, Wp = H + 2, W + 2
    Ho, Wo = H // 2, W // 2
    x4 = a.reshape(n, cin, Hp, Wp)
    pats = []
    for di in range(3):
        for dj in range(3):
            pats.append(x4[:, :, di:di + 2 * Ho - 1:2, dj:dj + 2 * Wo - 1:2])
    P = jnp.stack(pats, axis=2).reshape(n, cin * 9, Ho * Wo)
    cout = cp["wm"].shape[0]
    y = pl.pallas_call(
        _strided_conv_kernel,
        out_shape=jax.ShapeDtypeStruct((n, cout, Ho * Wo), jnp.float32),
        grid=(n,),
        in_specs=[pl.BlockSpec((1, cin * 9, Ho * Wo), lambda i: (i, 0, 0)),
                  pl.BlockSpec((cout, cin * 9), lambda i: (0, 0)),
                  pl.BlockSpec((cout, 1), lambda i: (0, 0)),
                  pl.BlockSpec((cout, 1), lambda i: (0, 0)),
                  pl.BlockSpec((cout, 1), lambda i: (0, 0))],
        out_specs=pl.BlockSpec((1, cout, Ho * Wo), lambda i: (i, 0, 0)),
        compiler_params=pltpu.CompilerParams(dimension_semantics=("parallel",)),
    )(P, cp["wm"], cp["b"], cp["gamma"], cp["beta"])
    y4 = y.reshape(n, cout, Ho, Wo)
    return to_padded_flat(y4), Ho, Wo


# ================================ ConvTranspose (k=s=2) + decoder-side residual SE ================================

def _convt_se_kernel(x_ref, wt_ref, w1_ref, b1_ref, w2_ref, b2_ref, o_ref, *, inv_out_hw):
    x = x_ref[0].astype(jnp.bfloat16)                            # [Cb, Sb], ring is zero
    cs = wt_ref.shape[1]
    ys = []
    gap = jnp.zeros((cs, 1), jnp.float32)
    for p in range(4):                                           # 4 pixel-shuffle phases
        yp = jnp.dot(wt_ref[p], x, preferred_element_type=jnp.float32)   # [Cs, Sb]
        gap = gap + jnp.sum(yp, axis=1, keepdims=True)           # ring contributes 0
        ys.append(yp)
    gap = gap * inv_out_hw                                       # GAP over the full 2h x 2w output
    h1 = jnp.maximum(
        jnp.dot(w1_ref[...], gap, preferred_element_type=jnp.float32) + b1_ref[...], 0.0)
    gate = jax.nn.sigmoid(
        jnp.dot(w2_ref[...], h1, preferred_element_type=jnp.float32) + b2_ref[...])
    scale = 1.0 + gate                                           # residual SE gate [Cs, 1]
    o_ref[0] = jnp.stack(ys, axis=0) * scale[None, :, :]         # [4, Cs, Sb]


def convt_se(a, h, w, wt4, se):
    """ConvTranspose2d(kernel=stride=2, bias=False) fused with the decoder-side residual SE."""
    n, cb, sb = a.shape
    cs = wt4.shape[1]
    cr = se["w1"].shape[0]
    out = pl.pallas_call(
        functools.partial(_convt_se_kernel, inv_out_hw=1.0 / (4 * h * w)),
        out_shape=jax.ShapeDtypeStruct((n, 4, cs, sb), jnp.float32),
        grid=(n,),
        in_specs=[pl.BlockSpec((1, cb, sb), lambda i: (i, 0, 0)),
                  pl.BlockSpec((4, cs, cb), lambda i: (0, 0, 0)),
                  pl.BlockSpec((cr, cs), lambda i: (0, 0)),
                  pl.BlockSpec((cr, 1), lambda i: (0, 0)),
                  pl.BlockSpec((cs, cr), lambda i: (0, 0)),
                  pl.BlockSpec((cs, 1), lambda i: (0, 0))],
        out_specs=pl.BlockSpec((1, 4, cs, sb), lambda i: (i, 0, 0, 0)),
        compiler_params=pltpu.CompilerParams(dimension_semantics=("parallel",)),
    )(a, wt4, se["w1"], se["b1"], se["w2"], se["b2"])
    # pixel-shuffle the 4 phases (host-side layout reshape), crop ring, re-pad, flatten
    hp, wp = h + 2, w + 2
    o = out.reshape(n, 2, 2, cs, hp, wp)[:, :, :, :, 1:1 + h, 1:1 + w]   # [n, di, dj, c, i, j]
    o = o.transpose(0, 3, 4, 1, 5, 2).reshape(n, cs, 2 * h, 2 * w)       # [n, c, 2i+di, 2j+dj]
    return to_padded_flat(o)


# ================================ segmentation head (1x1 conv, bias=False) ================================

def _seg_kernel(x_ref, w_ref, o_ref):
    o_ref[0] = jnp.dot(w_ref[...], x_ref[0].astype(jnp.bfloat16),
                       preferred_element_type=jnp.float32)


def seg_head(a, H, W, wseg):
    n, cf, s_len = a.shape
    nc = wseg.shape[0]
    y = pl.pallas_call(
        _seg_kernel,
        out_shape=jax.ShapeDtypeStruct((n, nc, s_len), jnp.float32),
        grid=(n,),
        in_specs=[pl.BlockSpec((1, cf, s_len), lambda i: (i, 0, 0)),
                  pl.BlockSpec((nc, cf), lambda i: (0, 0))],
        out_specs=pl.BlockSpec((1, nc, s_len), lambda i: (i, 0, 0)),
        compiler_params=pltpu.CompilerParams(dimension_semantics=("parallel",)),
    )(a, wseg)
    return y.reshape(n, nc, H + 2, W + 2)[:, :, 1:1 + H, 1:1 + W]        # NCHW output


# ================================ parameters ================================

def build_params(key):
    counter = [0]

    def nxt():
        counter[0] += 1
        return jax.random.fold_in(key, counter[0])

    def winit(shape, scale=0.1):
        return scale * jax.random.normal(nxt(), shape, jnp.float32)

    def conv_block(cin, cout, strided):
        w = winit((cout, cin, 3, 3))
        p = dict(b=winit((cout,), 0.01).reshape(cout, 1),
                 gamma=jnp.ones((cout, 1), jnp.float32),
                 beta=jnp.zeros((cout, 1), jnp.float32))
        if strided:
            p["wm"] = w.reshape(cout, cin * 9).astype(jnp.bfloat16)               # (ci, di, dj) minor
        else:
            p["w9"] = w.transpose(2, 3, 0, 1).reshape(9, cout, cin).astype(jnp.bfloat16)
        return p

    # ----- encoder: one StackedConvBlock per stage; first conv strided by the pool kernel
    enc = []
    in_c = INPUT_CHANNELS
    for s in range(NUM_STAGES):
        out_c = STAGE_FEATS[s]
        convs = []
        for c in range(NUM_CONVS_PER_BLOCK):
            ci = in_c if c == 0 else out_c
            strided = (c == 0 and POOL_KERNELS[s] != (1, 1))
            convs.append(conv_block(ci, out_c, strided))
        enc.append(convs)
        in_c = out_c

    # ----- decoder: transposed conv + (shared) residual-SE + StackedConvBlock(2*skip -> skip)
    dec = []
    for s in range(NUM_STAGES - 2, -1, -1):
        f_below = STAGE_FEATS[s + 1]
        f_skip = STAGE_FEATS[s]
        kh, kw = POOL_KERNELS[s + 1]
        cr = max(1, f_skip // REDUCTION)
        wt = winit((f_below, f_skip, kh, kw))                 # torch ConvTranspose2d [Cin,Cout,kh,kw]
        tu_w4 = wt.transpose(2, 3, 1, 0).reshape(kh * kw, f_skip, f_below).astype(jnp.bfloat16)
        se = dict(w1=winit((cr, f_skip)), b1=winit((cr,), 0.01).reshape(cr, 1),
                  w2=winit((f_skip, cr)), b2=winit((f_skip,), 0.01).reshape(f_skip, 1))
        convs = [conv_block(2 * f_skip if c == 0 else f_skip, f_skip, False)
                 for c in range(NUM_CONVS_PER_BLOCK)]
        dec.append(dict(tu_w4=tu_w4, se=se, convs=convs))

    seg_w = winit((NUM_CLASSES, STAGE_FEATS[0])).astype(jnp.bfloat16)    # 1x1 conv, bias=False
    return dict(enc=enc, dec=dec, seg_w=seg_w)


# ================================ forward pass ================================

def usenet_forward(params, x):
    N, _, H, W = x.shape
    a = to_padded_flat(x.astype(jnp.float32))
    h_, w_ = H, W

    # ---- GenericUNetEncoder (one fused pallas_call per StackedConvBlock, +1 for strided entry)
    skips = []
    for si, stage in enumerate(params["enc"]):
        if POOL_KERNELS[si] == (1, 1):
            a = stacked_conv_stage(a, h_, w_, stage)
        else:
            a, h_, w_ = strided_conv(a, h_, w_, stage[0])
            a = stacked_conv_stage(a, h_, w_, stage[1:])
        skips.append((a, h_, w_))

    # ---- GenericUSENetDecoder
    skips_r = skips[::-1]
    a, h_, w_ = skips_r[0]
    for i, dp in enumerate(params["dec"]):
        skip, hs, ws = skips_r[i + 1]
        up = convt_se(a, h_, w_, dp["tu_w4"], dp["se"])                         # tus[i] + ses[i](x)
        a = stacked_conv_stage(up, hs, ws, dp["convs"],
                               cat_se=dp["se"], skip_flat=skip)                 # ses[i](skip)+cat+stage[i]
        h_, w_ = hs, ws

    # ---- segmentation_output: 1x1 conv, bias=False
    return seg_head(a, h_, w_, params["seg_w"])


# ================================ main ================================

if __name__ == "__main__":
    key = jax.random.PRNGKey(0)
    k_x, k_p = jax.random.split(key)
    x = jax.random.normal(k_x, (2, INPUT_CHANNELS, 16, 16), jnp.float32)   # NCHW
    params = build_params(k_p)

    fwd = jax.jit(usenet_forward)
    seg = jax.block_until_ready(fwd(params, x))

    assert seg.shape == (2, NUM_CLASSES, 16, 16), seg.shape
    assert seg.dtype == jnp.float32
    assert bool(jnp.all(jnp.isfinite(seg)))
    print("KERNEL_OK")
</pallas_src>

<mosaic_0001>
module attributes {stable_mosaic.version = 11 : i64} {
  func.func @kernel(%arg0: i32, %arg1: memref<1x4x324xf32, #tpu.memory_space<vmem>>, %arg2: memref<9x8x4xbf16, #tpu.memory_space<vmem>>, %arg3: memref<8x1xf32, #tpu.memory_space<vmem>>, %arg4: memref<8x1xf32, #tpu.memory_space<vmem>>, %arg5: memref<8x1xf32, #tpu.memory_space<vmem>>, %arg6: memref<9x8x8xbf16, #tpu.memory_space<vmem>>, %arg7: memref<8x1xf32, #tpu.memory_space<vmem>>, %arg8: memref<8x1xf32, #tpu.memory_space<vmem>>, %arg9: memref<8x1xf32, #tpu.memory_space<vmem>>, %arg10: memref<1x324xf32, #tpu.memory_space<vmem>>, %arg11: memref<1x8x324xf32, #tpu.memory_space<vmem>>) attributes {dimension_semantics = [#tpu.dimension_semantics<parallel>], iteration_bounds = array<i64: 2>, scalar_prefetch = 0 : i64, scratch_operands = 0 : i64, tpu.core_type = #tpu.core_type<tc>, window_params = [{transform_indices = @transform_0, window_bounds = array<i64: 1, 4, 324>}, {pipeline_mode = #tpu.pipeline_mode<synchronous>, transform_indices = @transform_1, window_bounds = array<i64: 9, 8, 4>}, {pipeline_mode = #tpu.pipeline_mode<synchronous>, transform_indices = @transform_2, window_bounds = array<i64: 8, 1>}, {pipeline_mode = #tpu.pipeline_mode<synchronous>, transform_indices = @transform_3, window_bounds = array<i64: 8, 1>}, {pipeline_mode = #tpu.pipeline_mode<synchronous>, transform_indices = @transform_4, window_bounds = array<i64: 8, 1>}, {pipeline_mode = #tpu.pipeline_mode<synchronous>, transform_indices = @transform_5, window_bounds = array<i64: 9, 8, 8>}, {pipeline_mode = #tpu.pipeline_mode<synchronous>, transform_indices = @transform_6, window_bounds = array<i64: 8, 1>}, {pipeline_mode = #tpu.pipeline_mode<synchronous>, transform_indices = @transform_7, window_bounds = array<i64: 8, 1>}, {pipeline_mode = #tpu.pipeline_mode<synchronous>, transform_indices = @transform_8, window_bounds = array<i64: 8, 1>}, {pipeline_mode = #tpu.pipeline_mode<synchronous>, transform_indices = @transform_9, window_bounds = array<i64: 1, 324>}, {transform_indices = @transform_10, window_bounds = array<i64: 1, 8, 324>}]} {
    %c0 = arith.constant 0 : index
    %c0_0 = arith.constant 0 : index
    %0 = vector.load %arg10[%c0, %c0_0] : memref<1x324xf32, #tpu.memory_space<vmem>>, vector<1x324xf32>
    %c0_1 = arith.constant 0 : index
    %c0_2 = arith.constant 0 : index
    %c0_3 = arith.constant 0 : index
    %1 = vector.load %arg1[%c0_1, %c0_2, %c0_3] : memref<1x4x324xf32, #tpu.memory_space<vmem>>, vector<1x4x324xf32>
    %2 = vector.shape_cast %1 : vector<1x4x324xf32> to vector<4x324xf32>
    %c0_4 = arith.constant 0 : index
    %c0_5 = arith.constant 0 : index
    %c0_6 = arith.constant 0 : index
    %3 = vector.load %arg2[%c0_4, %c0_5, %c0_6] : memref<9x8x4xbf16, #tpu.memory_space<vmem>>, vector<9x8x4xbf16>
    %c0_7 = arith.constant 0 : index
    %c0_8 = arith.constant 0 : index
    %4 = vector.load %arg3[%c0_7, %c0_8] : memref<8x1xf32, #tpu.memory_space<vmem>>, vector<8x1xf32>
    %c0_9 = arith.constant 0 : index
    %c0_10 = arith.constant 0 : index
    %5 = vector.load %arg4[%c0_9, %c0_10] : memref<8x1xf32, #tpu.memory_space<vmem>>, vector<8x1xf32>
    %c0_11 = arith.constant 0 : index
    %c0_12 = arith.constant 0 : index
    %6 = vector.load %arg5[%c0_11, %c0_12] : memref<8x1xf32, #tpu.memory_space<vmem>>, vector<8x1xf32>
    %7 = arith.truncf %2 : vector<4x324xf32> to vector<4x324xbf16>
    %cst = arith.constant 0.000000e+00 : bf16
    %8 = vector.broadcast %cst : bf16 to vector<4x19xbf16>
    %9 = tpu.concatenate %8, %7, %8 in 1 : vector<4x19xbf16>, vector<4x324xbf16>, vector<4x19xbf16> -> vector<4x362xbf16>
    %cst_13 = arith.constant 0.000000e+00 : f32
    %10 = vector.broadcast %cst_13 : f32 to vector<8x324xf32>
    %11 = vector.extract_strided_slice %9 {offsets = [0, 0], sizes = [4, 324], strides = [1, 1]} : vector<4x362xbf16> to vector<4x324xbf16>
    %12 = vector.extract_strided_slice %3 {offsets = [0, 0, 0], sizes = [1, 8, 4], strides = [1, 1, 1]} : vector<9x8x4xbf16> to vector<1x8x4xbf16>
    %13 = vector.shape_cast %12 : vector<1x8x4xbf16> to vector<8x4xbf16>
    %cst_14 = arith.constant dense<0.000000e+00> : vector<8x324xf32>
    %14 = tpu.matmul %13, %11, %cst_14 {dimension_numbers = #tpu.dot_dimension_numbers<[1], [0], [0], [1], [0, 0, 1, 1], [], []>} : vector<8x4xbf16>, vector<4x324xbf16>, vector<8x324xf32> -> vector<8x324xf32>
    %15 = arith.addf %10, %14 : vector<8x324xf32>
    %16 = vector.extract_strided_slice %9 {offsets = [0, 1], sizes = [4, 324], strides = [1, 1]} : vector<4x362xbf16> to vector<4x324xbf16>
    %17 = vector.extract_strided_slice %3 {offsets = [1, 0, 0], sizes = [1, 8, 4], strides = [1, 1, 1]} : vector<9x8x4xbf16> to vector<1x8x4xbf16>
    %18 = vector.shape_cast %17 : vector<1x8x4xbf16> to vector<8x4xbf16>
    %cst_15 = arith.constant dense<0.000000e+00> : vector<8x324xf32>
    %19 = tpu.matmul %18, %16, %cst_15 {dimension_numbers = #tpu.dot_dimension_numbers<[1], [0], [0], [1], [0, 0, 1, 1], [], []>} : vector<8x4xbf16>, vector<4x324xbf16>, vector<8x324xf32> -> vector<8x324xf32>
    %20 = arith.addf %15, %19 : vector<8x324xf32>
    %21 = vector.extract_strided_slice %9 {offsets = [0, 2], sizes = [4, 324], strides = [1, 1]} : vector<4x362xbf16> to vector<4x324xbf16>
    %22 = vector.extract_strided_slice %3 {offsets = [2, 0, 0], sizes = [1, 8, 4], strides = [1, 1, 1]} : vector<9x8x4xbf16> to vector<1x8x4xbf16>
    %23 = vector.shape_cast %22 : vector<1x8x4xbf16> to vector<8x4xbf16>
    %cst_16 = arith.constant dense<0.000000e+00> : vector<8x324xf32>
    %24 = tpu.matmul %23, %21, %cst_16 {dimension_numbers = #tpu.dot_dimension_numbers<[1], [0], [0], [1], [0, 0, 1, 1], [], []>} : vector<8x4xbf16>, vector<4x324xbf16>, vector<8x324xf32> -> vector<8x324xf32>
    %25 = arith.addf %20, %24 : vector<8x324xf32>
    %26 = vector.extract_strided_slice %9 {offsets = [0, 18], sizes = [4, 324], strides = [1, 1]} : vector<4x362xbf16> to vector<4x324xbf16>
    %27 = vector.extract_strided_slice %3 {offsets = [3, 0, 0], sizes = [1, 8, 4], strides = [1, 1, 1]} : vector<9x8x4xbf16> to vector<1x8x4xbf16>
    %28 = vector.shape_cast %27 : vector<1x8x4xbf16> to vector<8x4xbf16>
    %cst_17 = arith.constant dense<0.000000e+00> : vector<8x324xf32>
    %29 = tpu.matmul %28, %26, %cst_17 {dimension_numbers = #tpu.dot_dimension_numbers<[1], [0], [0], [1], [0, 0, 1, 1], [], []>} : vector<8x4xbf16>, vector<4x324xbf16>, vector<8x324xf32> -> vector<8x324xf32>
    %30 = arith.addf %25, %29 : vector<8x324xf32>
    %31 = vector.extract_strided_slice %9 {offsets = [0, 19], sizes = [4, 324], strides = [1, 1]} : vector<4x362xbf16> to vector<4x324xbf16>
    %32 = vector.extract_strided_slice %3 {offsets = [4, 0, 0], sizes = [1, 8, 4], strides = [1, 1, 1]} : vector<9x8x4xbf16> to vector<1x8x4xbf16>
    %33 = vector.shape_cast %32 : vector<1x8x4xbf16> to vector<8x4xbf16>
    %cst_18 = arith.constant dense<0.000000e+00> : vector<8x324xf32>
    %34 = tpu.matmul %33, %31, %cst_18 {dimension_numbers = #tpu.dot_dimension_numbers<[1], [0], [0], [1], [0, 0, 1, 1], [], []>} : vector<8x4xbf16>, vector<4x324xbf16>, vector<8x324xf32> -> vector<8x324xf32>
    %35 = arith.addf %30, %34 : vector<8x324xf32>
    %36 = vector.extract_strided_slice %9 {offsets = [0, 20], sizes = [4, 324], strides = [1, 1]} : vector<4x362xbf16> to vector<4x324xbf16>
    %37 = vector.extract_strided_slice %3 {offsets = [5, 0, 0], sizes = [1, 8, 4], strides = [1, 1, 1]} : vector<9x8x4xbf16> to vector<1x8x4xbf16>
    %38 = vector.shape_cast %37 : vector<1x8x4xbf16> to vector<8x4xbf16>
    %cst_19 = arith.constant dense<0.000000e+00> : vector<8x324xf32>
    %39 = tpu.matmul %38, %36, %cst_19 {dimension_numbers = #tpu.dot_dimension_numbers<[1], [0], [0], [1], [0, 0, 1, 1], [], []>} : vector<8x4xbf16>, vector<4x324xbf16>, vector<8x324xf32> -> vector<8x324xf32>
    %40 = arith.addf %35, %39 : vector<8x324xf32>
    %41 = vector.extract_strided_slice %9 {offsets = [0, 36], sizes = [4, 324], strides = [1, 1]} : vector<4x362xbf16> to vector<4x324xbf16>
    %42 = vector.extract_strided_slice %3 {offsets = [6, 0, 0], sizes = [1, 8, 4], strides = [1, 1, 1]} : vector<9x8x4xbf16> to vector<1x8x4xbf16>
    %43 = vector.shape_cast %42 : vector<1x8x4xbf16> to vector<8x4xbf16>
    %cst_20 = arith.constant dense<0.000000e+00> : vector<8x324xf32>
    %44 = tpu.matmul %43, %41, %cst_20 {dimension_numbers = #tpu.dot_dimension_numbers<[1], [0], [0], [1], [0, 0, 1, 1], [], []>} : vector<8x4xbf16>, vector<4x324xbf16>, vector<8x324xf32> -> vector<8x324xf32>
    %45 = arith.addf %40, %44 : vector<8x324xf32>
    %46 = vector.extract_strided_slice %9 {offsets = [0, 37], sizes = [4, 324], strides = [1, 1]} : vector<4x362xbf16> to vector<4x324xbf16>
    %47 = vector.extract_strided_slice %3 {offsets = [7, 0, 0], sizes = [1, 8, 4], strides = [1, 1, 1]} : vector<9x8x4xbf16> to vector<1x8x4xbf16>
    %48 = vector.shape_cast %47 : vector<1x8x4xbf16> to vector<8x4xbf16>
    %cst_21 = arith.constant dense<0.000000e+00> : vector<8x324xf32>
    %49 = tpu.matmul %48, %46, %cst_21 {dimension_numbers = #tpu.dot_dimension_numbers<[1], [0], [0], [1], [0, 0, 1, 1], [], []>} : vector<8x4xbf16>, vector<4x324xbf16>, vector<8x324xf32> -> vector<8x324xf32>
    %50 = arith.addf %45, %49 : vector<8x324xf32>
    %51 = vector.extract_strided_slice %9 {offsets = [0, 38], sizes = [4, 324], strides = [1, 1]} : vector<4x362xbf16> to vector<4x324xbf16>
    %52 = vector.extract_strided_slice %3 {offsets = [8, 0, 0], sizes = [1, 8, 4], strides = [1, 1, 1]} : vector<9x8x4xbf16> to vector<1x8x4xbf16>
    %53 = vector.shape_cast %52 : vector<1x8x4xbf16> to vector<8x4xbf16>
    %cst_22 = arith.constant dense<0.000000e+00> : vector<8x324xf32>
    %54 = tpu.matmul %53, %51, %cst_22 {dimension_numbers = #tpu.dot_dimension_numbers<[1], [0], [0], [1], [0, 0, 1, 1], [], []>} : vector<8x4xbf16>, vector<4x324xbf16>, vector<8x324xf32> -> vector<8x324xf32>
    %55 = arith.addf %50, %54 : vector<8x324xf32>
    %56 = vector.broadcast %4 : vector<8x1xf32> to vector<8x324xf32>
    %57 = arith.addf %55, %56 : vector<8x324xf32>
    %58 = vector.broadcast %0 : vector<1x324xf32> to vector<8x324xf32>
    %59 = arith.mulf %57, %58 : vector<8x324xf32>
    %cst_23 = arith.constant dense<0.000000e+00> : vector<8xf32>
    %60 = vector.multi_reduction <add>, %59, %cst_23 [1] : vector<8x324xf32> to vector<8xf32>
    %61 = vector.shape_cast %60 : vector<8xf32> to vector<8x1xf32>
    %cst_24 = arith.constant 3.906250e-03 : f32
    %62 = vector.broadcast %cst_24 : f32 to vector<8x1xf32>
    %63 = arith.mulf %61, %62 : vector<8x1xf32>
    %64 = vector.broadcast %63 : vector<8x1xf32> to vector<8x324xf32>
    %65 = arith.subf %57, %64 : vector<8x324xf32>
    %66 = vector.broadcast %0 : vector<1x324xf32> to vector<8x324xf32>
    %67 = arith.mulf %65, %66 : vector<8x324xf32>
    %68 = arith.mulf %67, %67 : vector<8x324xf32>
    %cst_25 = arith.constant dense<0.000000e+00> : vector<8xf32>
    %69 = vector.multi_reduction <add>, %68, %cst_25 [1] : vector<8x324xf32> to vector<8xf32>
    %70 = vector.shape_cast %69 : vector<8xf32> to vector<8x1xf32>
    %cst_26 = arith.constant 3.906250e-03 : f32
    %71 = vector.broadcast %cst_26 : f32 to vector<8x1xf32>
    %72 = arith.mulf %70, %71 : vector<8x1xf32>
    %73 = vector.broadcast %63 : vector<8x1xf32> to vector<8x324xf32>
    %74 = arith.subf %57, %73 : vector<8x324xf32>
    %cst_27 = arith.constant 9.99999974E-6 : f32
    %75 = vector.broadcast %cst_27 : f32 to vector<8x1xf32>
    %76 = arith.addf %72, %75 : vector<8x1xf32>
    %77 = math.rsqrt %76 : vector<8x1xf32>
    %78 = vector.broadcast %77 : vector<8x1xf32> to vector<8x324xf32>
    %79 = arith.mulf %74, %78 : vector<8x324xf32>
    %80 = vector.broadcast %5 : vector<8x1xf32> to vector<8x324xf32>
    %81 = arith.mulf %79, %80 : vector<8x324xf32>
    %82 = vector.broadcast %6 : vector<8x1xf32> to vector<8x324xf32>
    %83 = arith.addf %81, %82 : vector<8x324xf32>
    %cst_28 = arith.constant 0.000000e+00 : f32
    %84 = vector.broadcast %cst_28 : f32 to vector<8x324xf32>
    %85 = arith.cmpf oge, %83, %84 : vector<8x324xf32>
    %cst_29 = arith.constant 0.00999999977 : f32
    %86 = vector.broadcast %cst_29 : f32 to vector<8x324xf32>
    %87 = arith.mulf %86, %83 : vector<8x324xf32>
    %88 = arith.select %85, %83, %87 : vector<8x324xi1>, vector<8x324xf32>
    %89 = vector.broadcast %0 : vector<1x324xf32> to vector<8x324xf32>
    %90 = arith.mulf %88, %89 : vector<8x324xf32>
    %c0_30 = arith.constant 0 : index
    %c0_31 = arith.constant 0 : index
    %c0_32 = arith.constant 0 : index
    %91 = vector.load %arg6[%c0_30, %c0_31, %c0_32] : memref<9x8x8xbf16, #tpu.memory_space<vmem>>, vector<9x8x8xbf16>
    %c0_33 = arith.constant 0 : index
    %c0_34 = arith.constant 0 : index
    %92 = vector.load %arg7[%c0_33, %c0_34] : memref<8x1xf32, #tpu.memory_space<vmem>>, vector<8x1xf32>
    %c0_35 = arith.constant 0 : index
    %c0_36 = arith.constant 0 : index
    %93 = vector.load %arg8[%c0_35, %c0_36] : memref<8x1xf32, #tpu.memory_space<vmem>>, vector<8x1xf32>
    %c0_37 = arith.constant 0 : index
    %c0_38 = arith.constant 0 : index
    %94 = vector.load %arg9[%c0_37, %c0_38] : memref<8x1xf32, #tpu.memory_space<vmem>>, vector<8x1xf32>
    %95 = arith.truncf %90 : vector<8x324xf32> to vector<8x324xbf16>
    %cst_39 = arith.constant 0.000000e+00 : bf16
    %96 = vector.broadcast %cst_39 : bf16 to vector<8x19xbf16>
    %97 = tpu.concatenate %96, %95, %96 in 1 : vector<8x19xbf16>, vector<8x324xbf16>, vector<8x19xbf16> -> vector<8x362xbf16>
    %cst_40 = arith.constant 0.000000e+00 : f32
    %98 = vector.broadcast %cst_40 : f32 to vector<8x324xf32>
    %99 = vector.extract_strided_slice %97 {offsets = [0, 0], sizes = [8, 324], strides = [1, 1]} : vector<8x362xbf16> to vector<8x324xbf16>
    %100 = vector.extract_strided_slice %91 {offsets = [0, 0, 0], sizes = [1, 8, 8], strides = [1, 1, 1]} : vector<9x8x8xbf16> to vector<1x8x8xbf16>
    %101 = vector.shape_cast %100 : vector<1x8x8xbf16> to vector<8x8xbf16>
    %cst_41 = arith.constant dense<0.000000e+00> : vector<8x324xf32>
    %102 = tpu.matmul %101, %99, %cst_41 {dimension_numbers = #tpu.dot_dimension_numbers<[1], [0], [0], [1], [0, 0, 1, 1], [], []>} : vector<8x8xbf16>, vector<8x324xbf16>, vector<8x324xf32> -> vector<8x324xf32>
    %103 = arith.addf %98, %102 : vector<8x324xf32>
    %104 = vector.extract_strided_slice %97 {offsets = [0, 1], sizes = [8, 324], strides = [1, 1]} : vector<8x362xbf16> to vector<8x324xbf16>
    %105 = vector.extract_strided_slice %91 {offsets = [1, 0, 0], sizes = [1, 8, 8], strides = [1, 1, 1]} : vector<9x8x8xbf16> to vector<1x8x8xbf16>
    %106 = vector.shape_cast %105 : vector<1x8x8xbf16> to vector<8x8xbf16>
    %cst_42 = arith.constant dense<0.000000e+00> : vector<8x324xf32>
    %107 = tpu.matmul %106, %104, %cst_42 {dimension_numbers = #tpu.dot_dimension_numbers<[1], [0], [0], [1], [0, 0, 1, 1], [], []>} : vector<8x8xbf16>, vector<8x324xbf16>, vector<8x324xf32> -> vector<8x324xf32>
    %108 = arith.addf %103, %107 : vector<8x324xf32>
    %109 = vector.extract_strided_slice %97 {offsets = [0, 2], sizes = [8, 324], strides = [1, 1]} : vector<8x362xbf16> to vector<8x324xbf16>
    %110 = vector.extract_strided_slice %91 {offsets = [2, 0, 0], sizes = [1, 8, 8], strides = [1, 1, 1]} : vector<9x8x8xbf16> to vector<1x8x8xbf16>
    %111 = vector.shape_cast %110 : vector<1x8x8xbf16> to vector<8x8xbf16>
    %cst_43 = arith.constant dense<0.000000e+00> : vector<8x324xf32>
    %112 = tpu.matmul %111, %109, %cst_43 {dimension_numbers = #tpu.dot_dimension_numbers<[1], [0], [0], [1], [0, 0, 1, 1], [], []>} : vector<8x8xbf16>, vector<8x324xbf16>, vector<8x324xf32> -> vector<8x324xf32>
    %113 = arith.addf %108, %112 : vector<8x324xf32>
    %114 = vector.extract_strided_slice %97 {offsets = [0, 18], sizes = [8, 324], strides = [1, 1]} : vector<8x362xbf16> to vector<8x324xbf16>
    %115 = vector.extract_strided_slice %91 {offsets = [3, 0, 0], sizes = [1, 8, 8], strides = [1, 1, 1]} : vector<9x8x8xbf16> to vector<1x8x8xbf16>
    %116 = vector.shape_cast %115 : vector<1x8x8xbf16> to vector<8x8xbf16>
    %cst_44 = arith.constant dense<0.000000e+00> : vector<8x324xf32>
    %117 = tpu.matmul %116, %114, %cst_44 {dimension_numbers = #tpu.dot_dimension_numbers<[1], [0], [0], [1], [0, 0, 1, 1], [], []>} : vector<8x8xbf16>, vector<8x324xbf16>, vector<8x324xf32> -> vector<8x324xf32>
    %118 = arith.addf %113, %117 : vector<8x324xf32>
    %119 = vector.extract_strided_slice %97 {offsets = [0, 19], sizes = [8, 324], strides = [1, 1]} : vector<8x362xbf16> to vector<8x324xbf16>
    %120 = vector.extract_strided_slice %91 {offsets = [4, 0, 0], sizes = [1, 8, 8], strides = [1, 1, 1]} : vector<9x8x8xbf16> to vector<1x8x8xbf16>
    %121 = vector.shape_cast %120 : vector<1x8x8xbf16> to vector<8x8xbf16>
    %cst_45 = arith.constant dense<0.000000e+00> : vector<8x324xf32>
    %122 = tpu.matmul %121, %119, %cst_45 {dimension_numbers = #tpu.dot_dimension_numbers<[1], [0], [0], [1], [0, 0, 1, 1], [], []>} : vector<8x8xbf16>, vector<8x324xbf16>, vector<8x324xf32> -> vector<8x324xf32>
    %123 = arith.addf %118, %122 : vector<8x324xf32>
    %124 = vector.extract_strided_slice %97 {offsets = [0, 20], sizes = [8, 324], strides = [1, 1]} : vector<8x362xbf16> to vector<8x324xbf16>
    %125 = vector.extract_strided_slice %91 {offsets = [5, 0, 0], sizes = [1, 8, 8], strides = [1, 1, 1]} : vector<9x8x8xbf16> to vector<1x8x8xbf16>
    %126 = vector.shape_cast %125 : vector<1x8x8xbf16> to vector<8x8xbf16>
    %cst_46 = arith.constant dense<0.000000e+00> : vector<8x324xf32>
    %127 = tpu.matmul %126, %124, %cst_46 {dimension_numbers = #tpu.dot_dimension_numbers<[1], [0], [0], [1], [0, 0, 1, 1], [], []>} : vector<8x8xbf16>, vector<8x324xbf16>, vector<8x324xf32> -> vector<8x324xf32>
    %128 = arith.addf %123, %127 : vector<8x324xf32>
    %129 = vector.extract_strided_slice %97 {offsets = [0, 36], sizes = [8, 324], strides = [1, 1]} : vector<8x362xbf16> to vector<8x324xbf16>
    %130 = vector.extract_strided_slice %91 {offsets = [6, 0, 0], sizes = [1, 8, 8], strides = [1, 1, 1]} : vector<9x8x8xbf16> to vector<1x8x8xbf16>
    %131 = vector.shape_cast %130 : vector<1x8x8xbf16> to vector<8x8xbf16>
    %cst_47 = arith.constant dense<0.000000e+00> : vector<8x324xf32>
    %132 = tpu.matmul %131, %129, %cst_47 {dimension_numbers = #tpu.dot_dimension_numbers<[1], [0], [0], [1], [0, 0, 1, 1], [], []>} : vector<8x8xbf16>, vector<8x324xbf16>, vector<8x324xf32> -> vector<8x324xf32>
    %133 = arith.addf %128, %132 : vector<8x324xf32>
    %134 = vector.extract_strided_slice %97 {offsets = [0, 37], sizes = [8, 324], strides = [1, 1]} : vector<8x362xbf16> to vector<8x324xbf16>
    %135 = vector.extract_strided_slice %91 {offsets = [7, 0, 0], sizes = [1, 8, 8], strides = [1, 1, 1]} : vector<9x8x8xbf16> to vector<1x8x8xbf16>
    %136 = vector.shape_cast %135 : vector<1x8x8xbf16> to vector<8x8xbf16>
    %cst_48 = arith.constant dense<0.000000e+00> : vector<8x324xf32>
    %137 = tpu.matmul %136, %134, %cst_48 {dimension_numbers = #tpu.dot_dimension_numbers<[1], [0], [0], [1], [0, 0, 1, 1], [], []>} : vector<8x8xbf16>, vector<8x324xbf16>, vector<8x324xf32> -> vector<8x324xf32>
    %138 = arith.addf %133, %137 : vector<8x324xf32>
    %139 = vector.extract_strided_slice %97 {offsets = [0, 38], sizes = [8, 324], strides = [1, 1]} : vector<8x362xbf16> to vector<8x324xbf16>
    %140 = vector.extract_strided_slice %91 {offsets = [8, 0, 0], sizes = [1, 8, 8], strides = [1, 1, 1]} : vector<9x8x8xbf16> to vector<1x8x8xbf16>
    %141 = vector.shape_cast %140 : vector<1x8x8xbf16> to vector<8x8xbf16>
    %cst_49 = arith.constant dense<0.000000e+00> : vector<8x324xf32>
    %142 = tpu.matmul %141, %139, %cst_49 {dimension_numbers = #tpu.dot_dimension_numbers<[1], [0], [0], [1], [0, 0, 1, 1], [], []>} : vector<8x8xbf16>, vector<8x324xbf16>, vector<8x324xf32> -> vector<8x324xf32>
    %143 = arith.addf %138, %142 : vector<8x324xf32>
    %144 = vector.broadcast %92 : vector<8x1xf32> to vector<8x324xf32>
    %145 = arith.addf %143, %144 : vector<8x324xf32>
    %146 = vector.broadcast %0 : vector<1x324xf32> to vector<8x324xf32>
    %147 = arith.mulf %145, %146 : vector<8x324xf32>
    %cst_50 = arith.constant dense<0.000000e+00> : vector<8xf32>
    %148 = vector.multi_reduction <add>, %147, %cst_50 [1] : vector<8x324xf32> to vector<8xf32>
    %149 = vector.shape_cast %148 : vector<8xf32> to vector<8x1xf32>
    %cst_51 = arith.constant 3.906250e-03 : f32
    %150 = vector.broadcast %cst_51 : f32 to vector<8x1xf32>
    %151 = arith.mulf %149, %150 : vector<8x1xf32>
    %152 = vector.broadcast %151 : vector<8x1xf32> to vector<8x324xf32>
    %153 = arith.subf %145, %152 : vector<8x324xf32>
    %154 = vector.broadcast %0 : vector<1x324xf32> to vector<8x324xf32>
    %155 = arith.mulf %153, %154 : vector<8x324xf32>
    %156 = arith.mulf %155, %155 : vector<8x324xf32>
    %cst_52 = arith.constant dense<0.000000e+00> : vector<8xf32>
    %157 = vector.multi_reduction <add>, %156, %cst_52 [1] : vector<8x324xf32> to vector<8xf32>
    %158 = vector.shape_cast %157 : vector<8xf32> to vector<8x1xf32>
    %cst_53 = arith.constant 3.906250e-03 : f32
    %159 = vector.broadcast %cst_53 : f32 to vector<8x1xf32>
    %160 = arith.mulf %158, %159 : vector<8x1xf32>
    %161 = vector.broadcast %151 : vector<8x1xf32> to vector<8x324xf32>
    %162 = arith.subf %145, %161 : vector<8x324xf32>
    %cst_54 = arith.constant 9.99999974E-6 : f32
    %163 = vector.broadcast %cst_54 : f32 to vector<8x1xf32>
    %164 = arith.addf %160, %163 : vector<8x1xf32>
    %165 = math.rsqrt %164 : vector<8x1xf32>
    %166 = vector.broadcast %165 : vector<8x1xf32> to vector<8x324xf32>
    %167 = arith.mulf %162, %166 : vector<8x324xf32>
    %168 = vector.broadcast %93 : vector<8x1xf32> to vector<8x324xf32>
    %169 = arith.mulf %167, %168 : vector<8x324xf32>
    %170 = vector.broadcast %94 : vector<8x1xf32> to vector<8x324xf32>
    %171 = arith.addf %169, %170 : vector<8x324xf32>
    %cst_55 = arith.constant 0.000000e+00 : f32
    %172 = vector.broadcast %cst_55 : f32 to vector<8x324xf32>
    %173 = arith.cmpf oge, %171, %172 : vector<8x324xf32>
    %cst_56 = arith.constant 0.00999999977 : f32
    %174 = vector.broadcast %cst_56 : f32 to vector<8x324xf32>
    %175 = arith.mulf %174, %171 : vector<8x324xf32>
    %176 = arith.select %173, %171, %175 : vector<8x324xi1>, vector<8x324xf32>
    %177 = vector.broadcast %0 : vector<1x324xf32> to vector<8x324xf32>
    %178 = arith.mulf %176, %177 : vector<8x324xf32>
    %c0_57 = arith.constant 0 : index
    %c0_58 = arith.constant 0 : index
    %c0_59 = arith.constant 0 : index
    %179 = vector.load %arg11[%c0_57, %c0_58, %c0_59] : memref<1x8x324xf32, #tpu.memory_space<vmem>>, vector<1x8x324xf32>
    %180 = vector.shape_cast %179 : vector<1x8x324xf32> to vector<8x324xf32>
    %181 = vector.shape_cast %178 : vector<8x324xf32> to vector<1x8x324xf32>
    tpu.vector_store %arg11[%c0_57, %c0_58, %c0_59], %181 {strides = array<i32>} : memref<1x8x324xf32, #tpu.memory_space<vmem>>, vector<1x8x324xf32>,
    return
  }
  func.func @transform_0(%arg0: i32) -> (i32, i32, i32) {
    %c0_i32 = arith.constant 0 : i32
    %c0_i32_0 = arith.constant 0 : i32
    %c0_i32_1 = arith.constant 0 : i32
    return %arg0, %c0_i32, %c0_i32_0 : i32, i32, i32
  }
  func.func @transform_1(%arg0: i32) -> (i32, i32, i32) {
    %c0_i32 = arith.constant 0 : i32
    %c0_i32_0 = arith.constant 0 : i32
    %c0_i32_1 = arith.constant 0 : i32
    %c0_i32_2 = arith.constant 0 : i32
    return %c0_i32, %c0_i32_0, %c0_i32_1 : i32, i32, i32
  }
  func.func @transform_2(%arg0: i32) -> (i32, i32) {
    %c0_i32 = arith.constant 0 : i32
    %c0_i32_0 = arith.constant 0 : i32
    %c0_i32_1 = arith.constant 0 : i32
    return %c0_i32, %c0_i32_0 : i32, i32
  }
  func.func @transform_3(%arg0: i32) -> (i32, i32) {
    %c0_i32 = arith.constant 0 : i32
    %c0_i32_0 = arith.constant 0 : i32
    %c0_i32_1 = arith.constant 0 : i32
    return %c0_i32, %c0_i32_0 : i32, i32
  }
  func.func @transform_4(%arg0: i32) -> (i32, i32) {
    %c0_i32 = arith.constant 0 : i32
    %c0_i32_0 = arith.constant 0 : i32
    %c0_i32_1 = arith.constant 0 : i32
    return %c0_i32, %c0_i32_0 : i32, i32
  }
  func.func @transform_5(%arg0: i32) -> (i32, i32, i32) {
    %c0_i32 = arith.constant 0 : i32
    %c0_i32_0 = arith.constant 0 : i32
    %c0_i32_1 = arith.constant 0 : i32
    %c0_i32_2 = arith.constant 0 : i32
    return %c0_i32, %c0_i32_0, %c0_i32_1 : i32, i32, i32
  }
  func.func @transform_6(%arg0: i32) -> (i32, i32) {
    %c0_i32 = arith.constant 0 : i32
    %c0_i32_0 = arith.constant 0 : i32
    %c0_i32_1 = arith.constant 0 : i32
    return %c0_i32, %c0_i32_0 : i32, i32
  }
  func.func @transform_7(%arg0: i32) -> (i32, i32) {
    %c0_i32 = arith.constant 0 : i32
    %c0_i32_0 = arith.constant 0 : i32
    %c0_i32_1 = arith.constant 0 : i32
    return %c0_i32, %c0_i32_0 : i32, i32
  }
  func.func @transform_8(%arg0: i32) -> (i32, i32) {
    %c0_i32 = arith.constant 0 : i32
    %c0_i32_0 = arith.constant 0 : i32
    %c0_i32_1 = arith.constant 0 : i32
    return %c0_i32, %c0_i32_0 : i32, i32
  }
  func.func @transform_9(%arg0: i32) -> (i32, i32) {
    %c0_i32 = arith.constant 0 : i32
    %c0_i32_0 = arith.constant 0 : i32
    %c0_i32_1 = arith.constant 0 : i32
    return %c0_i32, %c0_i32_0 : i32, i32
  }
  func.func @transform_10(%arg0: i32) -> (i32, i32, i32) {
    %c0_i32 = arith.constant 0 : i32
    %c0_i32_0 = arith.constant 0 : i32
    %c0_i32_1 = arith.constant 0 : i32
    return %arg0, %c0_i32, %c0_i32_0 : i32, i32, i32
  }
}

module attributes {stable_mosaic.version = 11 : i64} {
  func.func @_strided_conv_kernel(%arg0: i32, %arg1: memref<1x72x64xf32, #tpu.memory_space<vmem>>, %arg2: memref<16x72xbf16, #tpu.memory_space<vmem>>, %arg3: memref<16x1xf32, #tpu.memory_space<vmem>>, %arg4: memref<16x1xf32, #tpu.memory_space<vmem>>, %arg5: memref<16x1xf32, #tpu.memory_space<vmem>>, %arg6: memref<1x16x64xf32, #tpu.memory_space<vmem>>) attributes {dimension_semantics = [#tpu.dimension_semantics<parallel>], iteration_bounds = array<i64: 2>, scalar_prefetch = 0 : i64, scratch_operands = 0 : i64, tpu.core_type = #tpu.core_type<tc>, window_params = [{transform_indices = @transform_0, window_bounds = array<i64: 1, 72, 64>}, {pipeline_mode = #tpu.pipeline_mode<synchronous>, transform_indices = @transform_1, window_bounds = array<i64: 16, 72>}, {pipeline_mode = #tpu.pipeline_mode<synchronous>, transform_indices = @transform_2, window_bounds = array<i64: 16, 1>}, {pipeline_mode = #tpu.pipeline_mode<synchronous>, transform_indices = @transform_3, window_bounds = array<i64: 16, 1>}, {pipeline_mode = #tpu.pipeline_mode<synchronous>, transform_indices = @transform_4, window_bounds = array<i64: 16, 1>}, {transform_indices = @transform_5, window_bounds = array<i64: 1, 16, 64>}]} {
    %c0 = arith.constant 0 : index
    %c0_0 = arith.constant 0 : index
    %c0_1 = arith.constant 0 : index
    %0 = vector.load %arg1[%c0, %c0_0, %c0_1] : memref<1x72x64xf32, #tpu.memory_space<vmem>>, vector<1x72x64xf32>
    %1 = vector.shape_cast %0 : vector<1x72x64xf32> to vector<72x64xf32>
    %2 = arith.truncf %1 : vector<72x64xf32> to vector<72x64xbf16>
    %c0_2 = arith.constant 0 : index
    %c0_3 = arith.constant 0 : index
    %3 = vector.load %arg2[%c0_2, %c0_3] : memref<16x72xbf16, #tpu.memory_space<vmem>>, vector<16x72xbf16>
    %cst = arith.constant dense<0.000000e+00> : vector<16x64xf32>
    %4 = tpu.matmul %3, %2, %cst {dimension_numbers = #tpu.dot_dimension_numbers<[1], [0], [0], [1], [0, 0, 1, 1], [], []>} : vector<16x72xbf16>, vector<72x64xbf16>, vector<16x64xf32> -> vector<16x64xf32>
    %c0_4 = arith.constant 0 : index
    %c0_5 = arith.constant 0 : index
    %5 = vector.load %arg3[%c0_4, %c0_5] : memref<16x1xf32, #tpu.memory_space<vmem>>, vector<16x1xf32>
    %6 = vector.broadcast %5 : vector<16x1xf32> to vector<16x64xf32>
    %7 = arith.addf %4, %6 : vector<16x64xf32>
    %cst_6 = arith.constant dense<0.000000e+00> : vector<16xf32>
    %8 = vector.multi_reduction <add>, %7, %cst_6 [1] : vector<16x64xf32> to vector<16xf32>
    %9 = vector.shape_cast %8 : vector<16xf32> to vector<16x1xf32>
    %cst_7 = arith.constant 6.400000e+01 : f32
    %10 = vector.broadcast %cst_7 : f32 to vector<16x1xf32>
    %11 = arith.divf %9, %10 : vector<16x1xf32>
    %12 = vector.broadcast %11 : vector<16x1xf32> to vector<16x64xf32>
    %13 = arith.subf %7, %12 : vector<16x64xf32>
    %14 = arith.mulf %13, %13 : vector<16x64xf32>
    %cst_8 = arith.constant dense<0.000000e+00> : vector<16xf32>
    %15 = vector.multi_reduction <add>, %14, %cst_8 [1] : vector<16x64xf32> to vector<16xf32>
    %16 = vector.shape_cast %15 : vector<16xf32> to vector<16x1xf32>
    %cst_9 = arith.constant 6.400000e+01 : f32
    %17 = vector.broadcast %cst_9 : f32 to vector<16x1xf32>
    %18 = arith.divf %16, %17 : vector<16x1xf32>
    %cst_10 = arith.constant 9.99999974E-6 : f32
    %19 = vector.broadcast %cst_10 : f32 to vector<16x1xf32>
    %20 = arith.addf %18, %19 : vector<16x1xf32>
    %21 = math.rsqrt %20 : vector<16x1xf32>
    %22 = vector.broadcast %21 : vector<16x1xf32> to vector<16x64xf32>
    %23 = arith.mulf %13, %22 : vector<16x64xf32>
    %c0_11 = arith.constant 0 : index
    %c0_12 = arith.constant 0 : index
    %24 = vector.load %arg4[%c0_11, %c0_12] : memref<16x1xf32, #tpu.memory_space<vmem>>, vector<16x1xf32>
    %25 = vector.broadcast %24 : vector<16x1xf32> to vector<16x64xf32>
    %26 = arith.mulf %23, %25 : vector<16x64xf32>
    %c0_13 = arith.constant 0 : index
    %c0_14 = arith.constant 0 : index
    %27 = vector.load %arg5[%c0_13, %c0_14] : memref<16x1xf32, #tpu.memory_space<vmem>>, vector<16x1xf32>
    %28 = vector.broadcast %27 : vector<16x1xf32> to vector<16x64xf32>
    %29 = arith.addf %26, %28 : vector<16x64xf32>
    %cst_15 = arith.constant 0.000000e+00 : f32
    %30 = vector.broadcast %cst_15 : f32 to vector<16x64xf32>
    %31 = arith.cmpf oge, %29, %30 : vector<16x64xf32>
    %cst_16 = arith.constant 0.00999999977 : f32
    %32 = vector.broadcast %cst_16 : f32 to vector<16x64xf32>
    %33 = arith.mulf %32, %29 : vector<16x64xf32>
    %34 = arith.select %31, %29, %33 : vector<16x64xi1>, vector<16x64xf32>
    %c0_17 = arith.constant 0 : index
    %c0_18 = arith.constant 0 : index
    %c0_19 = arith.constant 0 : index
    %35 = vector.load %arg6[%c0_17, %c0_18, %c0_19] : memref<1x16x64xf32, #tpu.memory_space<vmem>>, vector<1x16x64xf32>
    %36 = vector.shape_cast %35 : vector<1x16x64xf32> to vector<16x64xf32>
    %37 = vector.shape_cast %34 : vector<16x64xf32> to vector<1x16x64xf32>
    tpu.vector_store %arg6[%c0_17, %c0_18, %c0_19], %37 {strides = array<i32>} : memref<1x16x64xf32, #tpu.memory_space<vmem>>, vector<1x16x64xf32>,
    return
  }
  func.func @transform_0(%arg0: i32) -> (i32, i32, i32) {
    %c0_i32 = arith.constant 0 : i32
    %c0_i32_0 = arith.constant 0 : i32
    %c0_i32_1 = arith.constant 0 : i32
    return %arg0, %c0_i32, %c0_i32_0 : i32, i32, i32
  }
  func.func @transform_1(%arg0: i32) -> (i32, i32) {
    %c0_i32 = arith.constant 0 : i32
    %c0_i32_0 = arith.constant 0 : i32
    %c0_i32_1 = arith.constant 0 : i32
    return %c0_i32, %c0_i32_0 : i32, i32
  }
  func.func @transform_2(%arg0: i32) -> (i32, i32) {
    %c0_i32 = arith.constant 0 : i32
    %c0_i32_0 = arith.constant 0 : i32
    %c0_i32_1 = arith.constant 0 : i32
    return %c0_i32, %c0_i32_0 : i32, i32
  }
  func.func @transform_3(%arg0: i32) -> (i32, i32) {
    %c0_i32 = arith.constant 0 : i32
    %c0_i32_0 = arith.constant 0 : i32
    %c0_i32_1 = arith.constant 0 : i32
    return %c0_i32, %c0_i32_0 : i32, i32
  }
  func.func @transform_4(%arg0: i32) -> (i32, i32) {
    %c0_i32 = arith.constant 0 : i32
    %c0_i32_0 = arith.constant 0 : i32
    %c0_i32_1 = arith.constant 0 : i32
    return %c0_i32, %c0_i32_0 : i32, i32
  }
  func.func @transform_5(%arg0: i32) -> (i32, i32, i32) {
    %c0_i32 = arith.constant 0 : i32
    %c0_i32_0 = arith.constant 0 : i32
    %c0_i32_1 = arith.constant 0 : i32
    return %arg0, %c0_i32, %c0_i32_0 : i32, i32, i32
  }
}

module attributes {stable_mosaic.version = 11 : i64} {
  func.func @kernel(%arg0: i32, %arg1: memref<1x16x100xf32, #tpu.memory_space<vmem>>, %arg2: memref<9x16x16xbf16, #tpu.memory_space<vmem>>, %arg3: memref<16x1xf32, #tpu.memory_space<vmem>>, %arg4: memref<16x1xf32, #tpu.memory_space<vmem>>, %arg5: memref<16x1xf32, #tpu.memory_space<vmem>>, %arg6: memref<1x100xf32, #tpu.memory_space<vmem>>, %arg7: memref<1x16x100xf32, #tpu.memory_space<vmem>>) attributes {dimension_semantics = [#tpu.dimension_semantics<parallel>], iteration_bounds = array<i64: 2>, scalar_prefetch = 0 : i64, scratch_operands = 0 : i64, tpu.core_type = #tpu.core_type<tc>, window_params = [{transform_indices = @transform_0, window_bounds = array<i64: 1, 16, 100>}, {pipeline_mode = #tpu.pipeline_mode<synchronous>, transform_indices = @transform_1, window_bounds = array<i64: 9, 16, 16>}, {pipeline_mode = #tpu.pipeline_mode<synchronous>, transform_indices = @transform_2, window_bounds = array<i64: 16, 1>}, {pipeline_mode = #tpu.pipeline_mode<synchronous>, transform_indices = @transform_3, window_bounds = array<i64: 16, 1>}, {pipeline_mode = #tpu.pipeline_mode<synchronous>, transform_indices = @transform_4, window_bounds = array<i64: 16, 1>}, {pipeline_mode = #tpu.pipeline_mode<synchronous>, transform_indices = @transform_5, window_bounds = array<i64: 1, 100>}, {transform_indices = @transform_6, window_bounds = array<i64: 1, 16, 100>}]} {
    %c0 = arith.constant 0 : index
    %c0_0 = arith.constant 0 : index
    %0 = vector.load %arg6[%c0, %c0_0] : memref<1x100xf32, #tpu.memory_space<vmem>>, vector<1x100xf32>
    %c0_1 = arith.constant 0 : index
    %c0_2 = arith.constant 0 : index
    %c0_3 = arith.constant 0 : index
    %1 = vector.load %arg1[%c0_1, %c0_2, %c0_3] : memref<1x16x100xf32, #tpu.memory_space<vmem>>, vector<1x16x100xf32>
    %2 = vector.shape_cast %1 : vector<1x16x100xf32> to vector<16x100xf32>
    %c0_4 = arith.constant 0 : index
    %c0_5 = arith.constant 0 : index
    %c0_6 = arith.constant 0 : index
    %3 = vector.load %arg2[%c0_4, %c0_5, %c0_6] : memref<9x16x16xbf16, #tpu.memory_space<vmem>>, vector<9x16x16xbf16>
    %c0_7 = arith.constant 0 : index
    %c0_8 = arith.constant 0 : index
    %4 = vector.load %arg3[%c0_7, %c0_8] : memref<16x1xf32, #tpu.memory_space<vmem>>, vector<16x1xf32>
    %c0_9 = arith.constant 0 : index
    %c0_10 = arith.constant 0 : index
    %5 = vector.load %arg4[%c0_9, %c0_10] : memref<16x1xf32, #tpu.memory_space<vmem>>, vector<16x1xf32>
    %c0_11 = arith.constant 0 : index
    %c0_12 = arith.constant 0 : index
    %6 = vector.load %arg5[%c0_11, %c0_12] : memref<16x1xf32, #tpu.memory_space<vmem>>, vector<16x1xf32>
    %7 = arith.truncf %2 : vector<16x100xf32> to vector<16x100xbf16>
    %cst = arith.constant 0.000000e+00 : bf16
    %8 = vector.broadcast %cst : bf16 to vector<16x11xbf16>
    %9 = tpu.concatenate %8, %7, %8 in 1 : vector<16x11xbf16>, vector<16x100xbf16>, vector<16x11xbf16> -> vector<16x122xbf16>
    %cst_13 = arith.constant 0.000000e+00 : f32
    %10 = vector.broadcast %cst_13 : f32 to vector<16x100xf32>
    %11 = vector.extract_strided_slice %9 {offsets = [0, 0], sizes = [16, 100], strides = [1, 1]} : vector<16x122xbf16> to vector<16x100xbf16>
    %12 = vector.extract_strided_slice %3 {offsets = [0, 0, 0], sizes = [1, 16, 16], strides = [1, 1, 1]} : vector<9x16x16xbf16> to vector<1x16x16xbf16>
    %13 = vector.shape_cast %12 : vector<1x16x16xbf16> to vector<16x16xbf16>
    %cst_14 = arith.constant dense<0.000000e+00> : vector<16x100xf32>
    %14 = tpu.matmul %13, %11, %cst_14 {dimension_numbers = #tpu.dot_dimension_numbers<[1], [0], [0], [1], [0, 0, 1, 1], [], []>} : vector<16x16xbf16>, vector<16x100xbf16>, vector<16x100xf32> -> vector<16x100xf32>
    %15 = arith.addf %10, %14 : vector<16x100xf32>
    %16 = vector.extract_strided_slice %9 {offsets = [0, 1], sizes = [16, 100], strides = [1, 1]} : vector<16x122xbf16> to vector<16x100xbf16>
    %17 = vector.extract_strided_slice %3 {offsets = [1, 0, 0], sizes = [1, 16, 16], strides = [1, 1, 1]} : vector<9x16x16xbf16> to vector<1x16x16xbf16>
    %18 = vector.shape_cast %17 : vector<1x16x16xbf16> to vector<16x16xbf16>
    %cst_15 = arith.constant dense<0.000000e+00> : vector<16x100xf32>
    %19 = tpu.matmul %18, %16, %cst_15 {dimension_numbers = #tpu.dot_dimension_numbers<[1], [0], [0], [1], [0, 0, 1, 1], [], []>} : vector<16x16xbf16>, vector<16x100xbf16>, vector<16x100xf32> -> vector<16x100xf32>
    %20 = arith.addf %15, %19 : vector<16x100xf32>
    %21 = vector.extract_strided_slice %9 {offsets = [0, 2], sizes = [16, 100], strides = [1, 1]} : vector<16x122xbf16> to vector<16x100xbf16>
    %22 = vector.extract_strided_slice %3 {offsets = [2, 0, 0], sizes = [1, 16, 16], strides = [1, 1, 1]} : vector<9x16x16xbf16> to vector<1x16x16xbf16>
    %23 = vector.shape_cast %22 : vector<1x16x16xbf16> to vector<16x16xbf16>
    %cst_16 = arith.constant dense<0.000000e+00> : vector<16x100xf32>
    %24 = tpu.matmul %23, %21, %cst_16 {dimension_numbers = #tpu.dot_dimension_numbers<[1], [0], [0], [1], [0, 0, 1, 1], [], []>} : vector<16x16xbf16>, vector<16x100xbf16>, vector<16x100xf32> -> vector<16x100xf32>
    %25 = arith.addf %20, %24 : vector<16x100xf32>
    %26 = vector.extract_strided_slice %9 {offsets = [0, 10], sizes = [16, 100], strides = [1, 1]} : vector<16x122xbf16> to vector<16x100xbf16>
    %27 = vector.extract_strided_slice %3 {offsets = [3, 0, 0], sizes = [1, 16, 16], strides = [1, 1, 1]} : vector<9x16x16xbf16> to vector<1x16x16xbf16>
    %28 = vector.shape_cast %27 : vector<1x16x16xbf16> to vector<16x16xbf16>
    %cst_17 = arith.constant dense<0.000000e+00> : vector<16x100xf32>
    %29 = tpu.matmul %28, %26, %cst_17 {dimension_numbers = #tpu.dot_dimension_numbers<[1], [0], [0], [1], [0, 0, 1, 1], [], []>} : vector<16x16xbf16>, vector<16x100xbf16>, vector<16x100xf32> -> vector<16x100xf32>
    %30 = arith.addf %25, %29 : vector<16x100xf32>
    %31 = vector.extract_strided_slice %9 {offsets = [0, 11], sizes = [16, 100], strides = [1, 1]} : vector<16x122xbf16> to vector<16x100xbf16>
    %32 = vector.extract_strided_slice %3 {offsets = [4, 0, 0], sizes = [1, 16, 16], strides = [1, 1, 1]} : vector<9x16x16xbf16> to vector<1x16x16xbf16>
    %33 = vector.shape_cast %32 : vector<1x16x16xbf16> to vector<16x16xbf16>
    %cst_18 = arith.constant dense<0.000000e+00> : vector<16x100xf32>
    %34 = tpu.matmul %33, %31, %cst_18 {dimension_numbers = #tpu.dot_dimension_numbers<[1], [0], [0], [1], [0, 0, 1, 1], [], []>} : vector<16x16xbf16>, vector<16x100xbf16>, vector<16x100xf32> -> vector<16x100xf32>
    %35 = arith.addf %30, %34 : vector<16x100xf32>
    %36 = vector.extract_strided_slice %9 {offsets = [0, 12], sizes = [16, 100], strides = [1, 1]} : vector<16x122xbf16> to vector<16x100xbf16>
    %37 = vector.extract_strided_slice %3 {offsets = [5, 0, 0], sizes = [1, 16, 16], strides = [1, 1, 1]} : vector<9x16x16xbf16> to vector<1x16x16xbf16>
    %38 = vector.shape_cast %37 : vector<1x16x16xbf16> to vector<16x16xbf16>
    %cst_19 = arith.constant dense<0.000000e+00> : vector<16x100xf32>
    %39 = tpu.matmul %38, %36, %cst_19 {dimension_numbers = #tpu.dot_dimension_numbers<[1], [0], [0], [1], [0, 0, 1, 1], [], []>} : vector<16x16xbf16>, vector<16x100xbf16>, vector<16x100xf32> -> vector<16x100xf32>
    %40 = arith.addf %35, %39 : vector<16x100xf32>
    %41 = vector.extract_strided_slice %9 {offsets = [0, 20], sizes = [16, 100], strides = [1, 1]} : vector<16x122xbf16> to vector<16x100xbf16>
    %42 = vector.extract_strided_slice %3 {offsets = [6, 0, 0], sizes = [1, 16, 16], strides = [1, 1, 1]} : vector<9x16x16xbf16> to vector<1x16x16xbf16>
    %43 = vector.shape_cast %42 : vector<1x16x16xbf16> to vector<16x16xbf16>
    %cst_20 = arith.constant dense<0.000000e+00> : vector<16x100xf32>
    %44 = tpu.matmul %43, %41, %cst_20 {dimension_numbers = #tpu.dot_dimension_numbers<[1], [0], [0], [1], [0, 0, 1, 1], [], []>} : vector<16x16xbf16>, vector<16x100xbf16>, vector<16x100xf32> -> vector<16x100xf32>
    %45 = arith.addf %40, %44 : vector<16x100xf32>
    %46 = vector.extract_strided_slice %9 {offsets = [0, 21], sizes = [16, 100], strides = [1, 1]} : vector<16x122xbf16> to vector<16x100xbf16>
    %47 = vector.extract_strided_slice %3 {offsets = [7, 0, 0], sizes = [1, 16, 16], strides = [1, 1, 1]} : vector<9x16x16xbf16> to vector<1x16x16xbf16>
    %48 = vector.shape_cast %47 : vector<1x16x16xbf16> to vector<16x16xbf16>
    %cst_21 = arith.constant dense<0.000000e+00> : vector<16x100xf32>
    %49 = tpu.matmul %48, %46, %cst_21 {dimension_numbers = #tpu.dot_dimension_numbers<[1], [0], [0], [1], [0, 0, 1, 1], [], []>} : vector<16x16xbf16>, vector<16x100xbf16>, vector<16x100xf32> -> vector<16x100xf32>
    %50 = arith.addf %45, %49 : vector<16x100xf32>
    %51 = vector.extract_strided_slice %9 {offsets = [0, 22], sizes = [16, 100], strides = [1, 1]} : vector<16x122xbf16> to vector<16x100xbf16>
    %52 = vector.extract_strided_slice %3 {offsets = [8, 0, 0], sizes = [1, 16, 16], strides = [1, 1, 1]} : vector<9x16x16xbf16> to vector<1x16x16xbf16>
    %53 = vector.shape_cast %52 : vector<1x16x16xbf16> to vector<16x16xbf16>
    %cst_22 = arith.constant dense<0.000000e+00> : vector<16x100xf32>
    %54 = tpu.matmul %53, %51, %cst_22 {dimension_numbers = #tpu.dot_dimension_numbers<[1], [0], [0], [1], [0, 0, 1, 1], [], []>} : vector<16x16xbf16>, vector<16x100xbf16>, vector<16x100xf32> -> vector<16x100xf32>
    %55 = arith.addf %50, %54 : vector<16x100xf32>
    %56 = vector.broadcast %4 : vector<16x1xf32> to vector<16x100xf32>
    %57 = arith.addf %55, %56 : vector<16x100xf32>
    %58 = vector.broadcast %0 : vector<1x100xf32> to vector<16x100xf32>
    %59 = arith.mulf %57, %58 : vector<16x100xf32>
    %cst_23 = arith.constant dense<0.000000e+00> : vector<16xf32>
    %60 = vector.multi_reduction <add>, %59, %cst_23 [1] : vector<16x100xf32> to vector<16xf32>
    %61 = vector.shape_cast %60 : vector<16xf32> to vector<16x1xf32>
    %cst_24 = arith.constant 1.562500e-02 : f32
    %62 = vector.broadcast %cst_24 : f32 to vector<16x1xf32>
    %63 = arith.mulf %61, %62 : vector<16x1xf32>
    %64 = vector.broadcast %63 : vector<16x1xf32> to vector<16x100xf32>
    %65 = arith.subf %57, %64 : vector<16x100xf32>
    %66 = vector.broadcast %0 : vector<1x100xf32> to vector<16x100xf32>
    %67 = arith.mulf %65, %66 : vector<16x100xf32>
    %68 = arith.mulf %67, %67 : vector<16x100xf32>
    %cst_25 = arith.constant dense<0.000000e+00> : vector<16xf32>
    %69 = vector.multi_reduction <add>, %68, %cst_25 [1] : vector<16x100xf32> to vector<16xf32>
    %70 = vector.shape_cast %69 : vector<16xf32> to vector<16x1xf32>
    %cst_26 = arith.constant 1.562500e-02 : f32
    %71 = vector.broadcast %cst_26 : f32 to vector<16x1xf32>
    %72 = arith.mulf %70, %71 : vector<16x1xf32>
    %73 = vector.broadcast %63 : vector<16x1xf32> to vector<16x100xf32>
    %74 = arith.subf %57, %73 : vector<16x100xf32>
    %cst_27 = arith.constant 9.99999974E-6 : f32
    %75 = vector.broadcast %cst_27 : f32 to vector<16x1xf32>
    %76 = arith.addf %72, %75 : vector<16x1xf32>
    %77 = math.rsqrt %76 : vector<16x1xf32>
    %78 = vector.broadcast %77 : vector<16x1xf32> to vector<16x100xf32>
    %79 = arith.mulf %74, %78 : vector<16x100xf32>
    %80 = vector.broadcast %5 : vector<16x1xf32> to vector<16x100xf32>
    %81 = arith.mulf %79, %80 : vector<16x100xf32>
    %82 = vector.broadcast %6 : vector<16x1xf32> to vector<16x100xf32>
    %83 = arith.addf %81, %82 : vector<16x100xf32>
    %cst_28 = arith.constant 0.000000e+00 : f32
    %84 = vector.broadcast %cst_28 : f32 to vector<16x100xf32>
    %85 = arith.cmpf oge, %83, %84 : vector<16x100xf32>
    %cst_29 = arith.constant 0.00999999977 : f32
    %86 = vector.broadcast %cst_29 : f32 to vector<16x100xf32>
    %87 = arith.mulf %86, %83 : vector<16x100xf32>
    %88 = arith.select %85, %83, %87 : vector<16x100xi1>, vector<16x100xf32>
    %89 = vector.broadcast %0 : vector<1x100xf32> to vector<16x100xf32>
    %90 = arith.mulf %88, %89 : vector<16x100xf32>
    %c0_30 = arith.constant 0 : index
    %c0_31 = arith.constant 0 : index
    %c0_32 = arith.constant 0 : index
    %91 = vector.load %arg7[%c0_30, %c0_31, %c0_32] : memref<1x16x100xf32, #tpu.memory_space<vmem>>, vector<1x16x100xf32>
    %92 = vector.shape_cast %91 : vector<1x16x100xf32> to vector<16x100xf32>
    %93 = vector.shape_cast %90 : vector<16x100xf32> to vector<1x16x100xf32>
    tpu.vector_store %arg7[%c0_30, %c0_31, %c0_32], %93 {strides = array<i32>} : memref<1x16x100xf32, #tpu.memory_space<vmem>>, vector<1x16x100xf32>,
    return
  }
  func.func @transform_0(%arg0: i32) -> (i32, i32, i32) {
    %c0_i32 = arith.constant 0 : i32
    %c0_i32_0 = arith.constant 0 : i32
    %c0_i32_1 = arith.constant 0 : i32
    return %arg0, %c0_i32, %c0_i32_0 : i32, i32, i32
  }
  func.func @transform_1(%arg0: i32) -> (i32, i32, i32) {
    %c0_i32 = arith.constant 0 : i32
    %c0_i32_0 = arith.constant 0 : i32
    %c0_i32_1 = arith.constant 0 : i32
    %c0_i32_2 = arith.constant 0 : i32
    return %c0_i32, %c0_i32_0, %c0_i32_1 : i32, i32, i32
  }
  func.func @transform_2(%arg0: i32) -> (i32, i32) {
    %c0_i32 = arith.constant 0 : i32
    %c0_i32_0 = arith.constant 0 : i32
    %c0_i32_1 = arith.constant 0 : i32
    return %c0_i32, %c0_i32_0 : i32, i32
  }
  func.func @transform_3(%arg0: i32) -> (i32, i32) {
    %c0_i32 = arith.constant 0 : i32
    %c0_i32_0 = arith.constant 0 : i32
    %c0_i32_1 = arith.constant 0 : i32
    return %c0_i32, %c0_i32_0 : i32, i32
  }
  func.func @transform_4(%arg0: i32) -> (i32, i32) {
    %c0_i32 = arith.constant 0 : i32
    %c0_i32_0 = arith.constant 0 : i32
    %c0_i32_1 = arith.constant 0 : i32
    return %c0_i32, %c0_i32_0 : i32, i32
  }
  func.func @transform_5(%arg0: i32) -> (i32, i32) {
    %c0_i32 = arith.constant 0 : i32
    %c0_i32_0 = arith.constant 0 : i32
    %c0_i32_1 = arith.constant 0 : i32
    return %c0_i32, %c0_i32_0 : i32, i32
  }
  func.func @transform_6(%arg0: i32) -> (i32, i32, i32) {
    %c0_i32 = arith.constant 0 : i32
    %c0_i32_0 = arith.constant 0 : i32
    %c0_i32_1 = arith.constant 0 : i32
    return %arg0, %c0_i32, %c0_i32_0 : i32, i32, i32
  }
}

module attributes {stable_mosaic.version = 11 : i64} {
  func.func @_strided_conv_kernel(%arg0: i32, %arg1: memref<1x144x16xf32, #tpu.memory_space<vmem>>, %arg2: memref<32x144xbf16, #tpu.memory_space<vmem>>, %arg3: memref<32x1xf32, #tpu.memory_space<vmem>>, %arg4: memref<32x1xf32, #tpu.memory_space<vmem>>, %arg5: memref<32x1xf32, #tpu.memory_space<vmem>>, %arg6: memref<1x32x16xf32, #tpu.memory_space<vmem>>) attributes {dimension_semantics = [#tpu.dimension_semantics<parallel>], iteration_bounds = array<i64: 2>, scalar_prefetch = 0 : i64, scratch_operands = 0 : i64, tpu.core_type = #tpu.core_type<tc>, window_params = [{transform_indices = @transform_0, window_bounds = array<i64: 1, 144, 16>}, {pipeline_mode = #tpu.pipeline_mode<synchronous>, transform_indices = @transform_1, window_bounds = array<i64: 32, 144>}, {pipeline_mode = #tpu.pipeline_mode<synchronous>, transform_indices = @transform_2, window_bounds = array<i64: 32, 1>}, {pipeline_mode = #tpu.pipeline_mode<synchronous>, transform_indices = @transform_3, window_bounds = array<i64: 32, 1>}, {pipeline_mode = #tpu.pipeline_mode<synchronous>, transform_indices = @transform_4, window_bounds = array<i64: 32, 1>}, {transform_indices = @transform_5, window_bounds = array<i64: 1, 32, 16>}]} {
    %c0 = arith.constant 0 : index
    %c0_0 = arith.constant 0 : index
    %c0_1 = arith.constant 0 : index
    %0 = vector.load %arg1[%c0, %c0_0, %c0_1] : memref<1x144x16xf32, #tpu.memory_space<vmem>>, vector<1x144x16xf32>
    %1 = vector.shape_cast %0 : vector<1x144x16xf32> to vector<144x16xf32>
    %2 = arith.truncf %1 : vector<144x16xf32> to vector<144x16xbf16>
    %c0_2 = arith.constant 0 : index
    %c0_3 = arith.constant 0 : index
    %3 = vector.load %arg2[%c0_2, %c0_3] : memref<32x144xbf16, #tpu.memory_space<vmem>>, vector<32x144xbf16>
    %cst = arith.constant dense<0.000000e+00> : vector<32x16xf32>
    %4 = tpu.matmul %3, %2, %cst {dimension_numbers = #tpu.dot_dimension_numbers<[1], [0], [0], [1], [0, 0, 1, 1], [], []>} : vector<32x144xbf16>, vector<144x16xbf16>, vector<32x16xf32> -> vector<32x16xf32>
    %c0_4 = arith.constant 0 : index
    %c0_5 = arith.constant 0 : index
    %5 = vector.load %arg3[%c0_4, %c0_5] : memref<32x1xf32, #tpu.memory_space<vmem>>, vector<32x1xf32>
    %6 = vector.broadcast %5 : vector<32x1xf32> to vector<32x16xf32>
    %7 = arith.addf %4, %6 : vector<32x16xf32>
    %cst_6 = arith.constant dense<0.000000e+00> : vector<32xf32>
    %8 = vector.multi_reduction <add>, %7, %cst_6 [1] : vector<32x16xf32> to vector<32xf32>
    %9 = vector.shape_cast %8 : vector<32xf32> to vector<32x1xf32>
    %cst_7 = arith.constant 1.600000e+01 : f32
    %10 = vector.broadcast %cst_7 : f32 to vector<32x1xf32>
    %11 = arith.divf %9, %10 : vector<32x1xf32>
    %12 = vector.broadcast %11 : vector<32x1xf32> to vector<32x16xf32>
    %13 = arith.subf %7, %12 : vector<32x16xf32>
    %14 = arith.mulf %13, %13 : vector<32x16xf32>
    %cst_8 = arith.constant dense<0.000000e+00> : vector<32xf32>
    %15 = vector.multi_reduction <add>, %14, %cst_8 [1] : vector<32x16xf32> to vector<32xf32>
    %16 = vector.shape_cast %15 : vector<32xf32> to vector<32x1xf32>
    %cst_9 = arith.constant 1.600000e+01 : f32
    %17 = vector.broadcast %cst_9 : f32 to vector<32x1xf32>
    %18 = arith.divf %16, %17 : vector<32x1xf32>
    %cst_10 = arith.constant 9.99999974E-6 : f32
    %19 = vector.broadcast %cst_10 : f32 to vector<32x1xf32>
    %20 = arith.addf %18, %19 : vector<32x1xf32>
    %21 = math.rsqrt %20 : vector<32x1xf32>
    %22 = vector.broadcast %21 : vector<32x1xf32> to vector<32x16xf32>
    %23 = arith.mulf %13, %22 : vector<32x16xf32>
    %c0_11 = arith.constant 0 : index
    %c0_12 = arith.constant 0 : index
    %24 = vector.load %arg4[%c0_11, %c0_12] : memref<32x1xf32, #tpu.memory_space<vmem>>, vector<32x1xf32>
    %25 = vector.broadcast %24 : vector<32x1xf32> to vector<32x16xf32>
    %26 = arith.mulf %23, %25 : vector<32x16xf32>
    %c0_13 = arith.constant 0 : index
    %c0_14 = arith.constant 0 : index
    %27 = vector.load %arg5[%c0_13, %c0_14] : memref<32x1xf32, #tpu.memory_space<vmem>>, vector<32x1xf32>
    %28 = vector.broadcast %27 : vector<32x1xf32> to vector<32x16xf32>
    %29 = arith.addf %26, %28 : vector<32x16xf32>
    %cst_15 = arith.constant 0.000000e+00 : f32
    %30 = vector.broadcast %cst_15 : f32 to vector<32x16xf32>
    %31 = arith.cmpf oge, %29, %30 : vector<32x16xf32>
    %cst_16 = arith.constant 0.00999999977 : f32
    %32 = vector.broadcast %cst_16 : f32 to vector<32x16xf32>
    %33 = arith.mulf %32, %29 : vector<32x16xf32>
    %34 = arith.select %31, %29, %33 : vector<32x16xi1>, vector<32x16xf32>
    %c0_17 = arith.constant 0 : index
    %c0_18 = arith.constant 0 : index
    %c0_19 = arith.constant 0 : index
    %35 = vector.load %arg6[%c0_17, %c0_18, %c0_19] : memref<1x32x16xf32, #tpu.memory_space<vmem>>, vector<1x32x16xf32>
    %36 = vector.shape_cast %35 : vector<1x32x16xf32> to vector<32x16xf32>
    %37 = vector.shape_cast %34 : vector<32x16xf32> to vector<1x32x16xf32>
    tpu.vector_store %arg6[%c0_17, %c0_18, %c0_19], %37 {strides = array<i32>} : memref<1x32x16xf32, #tpu.memory_space<vmem>>, vector<1x32x16xf32>,
    return
  }
  func.func @transform_0(%arg0: i32) -> (i32, i32, i32) {
    %c0_i32 = arith.constant 0 : i32
    %c0_i32_0 = arith.constant 0 : i32
    %c0_i32_1 = arith.constant 0 : i32
    return %arg0, %c0_i32, %c0_i32_0 : i32, i32, i32
  }
  func.func @transform_1(%arg0: i32) -> (i32, i32) {
    %c0_i32 = arith.constant 0 : i32
    %c0_i32_0 = arith.constant 0 : i32
    %c0_i32_1 = arith.constant 0 : i32
    return %c0_i32, %c0_i32_0 : i32, i32
  }
  func.func @transform_2(%arg0: i32) -> (i32, i32) {
    %c0_i32 = arith.constant 0 : i32
    %c0_i32_0 = arith.constant 0 : i32
    %c0_i32_1 = arith.constant 0 : i32
    return %c0_i32, %c0_i32_0 : i32, i32
  }
  func.func @transform_3(%arg0: i32) -> (i32, i32) {
    %c0_i32 = arith.constant 0 : i32
    %c0_i32_0 = arith.constant 0 : i32
    %c0_i32_1 = arith.constant 0 : i32
    return %c0_i32, %c0_i32_0 : i32, i32
  }
  func.func @transform_4(%arg0: i32) -> (i32, i32) {
    %c0_i32 = arith.constant 0 : i32
    %c0_i32_0 = arith.constant 0 : i32
    %c0_i32_1 = arith.constant 0 : i32
    return %c0_i32, %c0_i32_0 : i32, i32
  }
  func.func @transform_5(%arg0: i32) -> (i32, i32, i32) {
    %c0_i32 = arith.constant 0 : i32
    %c0_i32_0 = arith.constant 0 : i32
    %c0_i32_1 = arith.constant 0 : i32
    return %arg0, %c0_i32, %c0_i32_0 : i32, i32, i32
  }
}

module attributes {stable_mosaic.version = 11 : i64} {
  func.func @kernel(%arg0: i32, %arg1: memref<1x32x36xf32, #tpu.memory_space<vmem>>, %arg2: memref<9x32x32xbf16, #tpu.memory_space<vmem>>, %arg3: memref<32x1xf32, #tpu.memory_space<vmem>>, %arg4: memref<32x1xf32, #tpu.memory_space<vmem>>, %arg5: memref<32x1xf32, #tpu.memory_space<vmem>>, %arg6: memref<1x36xf32, #tpu.memory_space<vmem>>, %arg7: memref<1x32x36xf32, #tpu.memory_space<vmem>>) attributes {dimension_semantics = [#tpu.dimension_semantics<parallel>], iteration_bounds = array<i64: 2>, scalar_prefetch = 0 : i64, scratch_operands = 0 : i64, tpu.core_type = #tpu.core_type<tc>, window_params = [{transform_indices = @transform_0, window_bounds = array<i64: 1, 32, 36>}, {pipeline_mode = #tpu.pipeline_mode<synchronous>, transform_indices = @transform_1, window_bounds = array<i64: 9, 32, 32>}, {pipeline_mode = #tpu.pipeline_mode<synchronous>, transform_indices = @transform_2, window_bounds = array<i64: 32, 1>}, {pipeline_mode = #tpu.pipeline_mode<synchronous>, transform_indices = @transform_3, window_bounds = array<i64: 32, 1>}, {pipeline_mode = #tpu.pipeline_mode<synchronous>, transform_indices = @transform_4, window_bounds = array<i64: 32, 1>}, {pipeline_mode = #tpu.pipeline_mode<synchronous>, transform_indices = @transform_5, window_bounds = array<i64: 1, 36>}, {transform_indices = @transform_6, window_bounds = array<i64: 1, 32, 36>}]} {
    %c0 = arith.constant 0 : index
    %c0_0 = arith.constant 0 : index
    %0 = vector.load %arg6[%c0, %c0_0] : memref<1x36xf32, #tpu.memory_space<vmem>>, vector<1x36xf32>
    %c0_1 = arith.constant 0 : index
    %c0_2 = arith.constant 0 : index
    %c0_3 = arith.constant 0 : index
    %1 = vector.load %arg1[%c0_1, %c0_2, %c0_3] : memref<1x32x36xf32, #tpu.memory_space<vmem>>, vector<1x32x36xf32>
    %2 = vector.shape_cast %1 : vector<1x32x36xf32> to vector<32x36xf32>
    %c0_4 = arith.constant 0 : index
    %c0_5 = arith.constant 0 : index
    %c0_6 = arith.constant 0 : index
    %3 = vector.load %arg2[%c0_4, %c0_5, %c0_6] : memref<9x32x32xbf16, #tpu.memory_space<vmem>>, vector<9x32x32xbf16>
    %c0_7 = arith.constant 0 : index
    %c0_8 = arith.constant 0 : index
    %4 = vector.load %arg3[%c0_7, %c0_8] : memref<32x1xf32, #tpu.memory_space<vmem>>, vector<32x1xf32>
    %c0_9 = arith.constant 0 : index
    %c0_10 = arith.constant 0 : index
    %5 = vector.load %arg4[%c0_9, %c0_10] : memref<32x1xf32, #tpu.memory_space<vmem>>, vector<32x1xf32>
    %c0_11 = arith.constant 0 : index
    %c0_12 = arith.constant 0 : index
    %6 = vector.load %arg5[%c0_11, %c0_12] : memref<32x1xf32, #tpu.memory_space<vmem>>, vector<32x1xf32>
    %7 = arith.truncf %2 : vector<32x36xf32> to vector<32x36xbf16>
    %cst = arith.constant 0.000000e+00 : bf16
    %8 = vector.broadcast %cst : bf16 to vector<32x7xbf16>
    %9 = tpu.concatenate %8, %7, %8 in 1 : vector<32x7xbf16>, vector<32x36xbf16>, vector<32x7xbf16> -> vector<32x50xbf16>
    %cst_13 = arith.constant 0.000000e+00 : f32
    %10 = vector.broadcast %cst_13 : f32 to vector<32x36xf32>
    %11 = vector.extract_strided_slice %9 {offsets = [0, 0], sizes = [32, 36], strides = [1, 1]} : vector<32x50xbf16> to vector<32x36xbf16>
    %12 = vector.extract_strided_slice %3 {offsets = [0, 0, 0], sizes = [1, 32, 32], strides = [1, 1, 1]} : vector<9x32x32xbf16> to vector<1x32x32xbf16>
    %13 = vector.shape_cast %12 : vector<1x32x32xbf16> to vector<32x32xbf16>
    %cst_14 = arith.constant dense<0.000000e+00> : vector<32x36xf32>
    %14 = tpu.matmul %13, %11, %cst_14 {dimension_numbers = #tpu.dot_dimension_numbers<[1], [0], [0], [1], [0, 0, 1, 1], [], []>} : vector<32x32xbf16>, vector<32x36xbf16>, vector<32x36xf32> -> vector<32x36xf32>
    %15 = arith.addf %10, %14 : vector<32x36xf32>
    %16 = vector.extract_strided_slice %9 {offsets = [0, 1], sizes = [32, 36], strides = [1, 1]} : vector<32x50xbf16> to vector<32x36xbf16>
    %17 = vector.extract_strided_slice %3 {offsets = [1, 0, 0], sizes = [1, 32, 32], strides = [1, 1, 1]} : vector<9x32x32xbf16> to vector<1x32x32xbf16>
    %18 = vector.shape_cast %17 : vector<1x32x32xbf16> to vector<32x32xbf16>
    %cst_15 = arith.constant dense<0.000000e+00> : vector<32x36xf32>
    %19 = tpu.matmul %18, %16, %cst_15 {dimension_numbers = #tpu.dot_dimension_numbers<[1], [0], [0], [1], [0, 0, 1, 1], [], []>} : vector<32x32xbf16>, vector<32x36xbf16>, vector<32x36xf32> -> vector<32x36xf32>
    %20 = arith.addf %15, %19 : vector<32x36xf32>
    %21 = vector.extract_strided_slice %9 {offsets = [0, 2], sizes = [32, 36], strides = [1, 1]} : vector<32x50xbf16> to vector<32x36xbf16>
    %22 = vector.extract_strided_slice %3 {offsets = [2, 0, 0], sizes = [1, 32, 32], strides = [1, 1, 1]} : vector<9x32x32xbf16> to vector<1x32x32xbf16>
    %23 = vector.shape_cast %22 : vector<1x32x32xbf16> to vector<32x32xbf16>
    %cst_16 = arith.constant dense<0.000000e+00> : vector<32x36xf32>
    %24 = tpu.matmul %23, %21, %cst_16 {dimension_numbers = #tpu.dot_dimension_numbers<[1], [0], [0], [1], [0, 0, 1, 1], [], []>} : vector<32x32xbf16>, vector<32x36xbf16>, vector<32x36xf32> -> vector<32x36xf32>
    %25 = arith.addf %20, %24 : vector<32x36xf32>
    %26 = vector.extract_strided_slice %9 {offsets = [0, 6], sizes = [32, 36], strides = [1, 1]} : vector<32x50xbf16> to vector<32x36xbf16>
    %27 = vector.extract_strided_slice %3 {offsets = [3, 0, 0], sizes = [1, 32, 32], strides = [1, 1, 1]} : vector<9x32x32xbf16> to vector<1x32x32xbf16>
    %28 = vector.shape_cast %27 : vector<1x32x32xbf16> to vector<32x32xbf16>
    %cst_17 = arith.constant dense<0.000000e+00> : vector<32x36xf32>
    %29 = tpu.matmul %28, %26, %cst_17 {dimension_numbers = #tpu.dot_dimension_numbers<[1], [0], [0], [1], [0, 0, 1, 1], [], []>} : vector<32x32xbf16>, vector<32x36xbf16>, vector<32x36xf32> -> vector<32x36xf32>
    %30 = arith.addf %25, %29 : vector<32x36xf32>
    %31 = vector.extract_strided_slice %9 {offsets = [0, 7], sizes = [32, 36], strides = [1, 1]} : vector<32x50xbf16> to vector<32x36xbf16>
    %32 = vector.extract_strided_slice %3 {offsets = [4, 0, 0], sizes = [1, 32, 32], strides = [1, 1, 1]} : vector<9x32x32xbf16> to vector<1x32x32xbf16>
    %33 = vector.shape_cast %32 : vector<1x32x32xbf16> to vector<32x32xbf16>
    %cst_18 = arith.constant dense<0.000000e+00> : vector<32x36xf32>
    %34 = tpu.matmul %33, %31, %cst_18 {dimension_numbers = #tpu.dot_dimension_numbers<[1], [0], [0], [1], [0, 0, 1, 1], [], []>} : vector<32x32xbf16>, vector<32x36xbf16>, vector<32x36xf32> -> vector<32x36xf32>
    %35 = arith.addf %30, %34 : vector<32x36xf32>
    %36 = vector.extract_strided_slice %9 {offsets = [0, 8], sizes = [32, 36], strides = [1, 1]} : vector<32x50xbf16> to vector<32x36xbf16>
    %37 = vector.extract_strided_slice %3 {offsets = [5, 0, 0], sizes = [1, 32, 32], strides = [1, 1, 1]} : vector<9x32x32xbf16> to vector<1x32x32xbf16>
    %38 = vector.shape_cast %37 : vector<1x32x32xbf16> to vector<32x32xbf16>
    %cst_19 = arith.constant dense<0.000000e+00> : vector<32x36xf32>
    %39 = tpu.matmul %38, %36, %cst_19 {dimension_numbers = #tpu.dot_dimension_numbers<[1], [0], [0], [1], [0, 0, 1, 1], [], []>} : vector<32x32xbf16>, vector<32x36xbf16>, vector<32x36xf32> -> vector<32x36xf32>
    %40 = arith.addf %35, %39 : vector<32x36xf32>
    %41 = vector.extract_strided_slice %9 {offsets = [0, 12], sizes = [32, 36], strides = [1, 1]} : vector<32x50xbf16> to vector<32x36xbf16>
    %42 = vector.extract_strided_slice %3 {offsets = [6, 0, 0], sizes = [1, 32, 32], strides = [1, 1, 1]} : vector<9x32x32xbf16> to vector<1x32x32xbf16>
    %43 = vector.shape_cast %42 : vector<1x32x32xbf16> to vector<32x32xbf16>
    %cst_20 = arith.constant dense<0.000000e+00> : vector<32x36xf32>
    %44 = tpu.matmul %43, %41, %cst_20 {dimension_numbers = #tpu.dot_dimension_numbers<[1], [0], [0], [1], [0, 0, 1, 1], [], []>} : vector<32x32xbf16>, vector<32x36xbf16>, vector<32x36xf32> -> vector<32x36xf32>
    %45 = arith.addf %40, %44 : vector<32x36xf32>
    %46 = vector.extract_strided_slice %9 {offsets = [0, 13], sizes = [32, 36], strides = [1, 1]} : vector<32x50xbf16> to vector<32x36xbf16>
    %47 = vector.extract_strided_slice %3 {offsets = [7, 0, 0], sizes = [1, 32, 32], strides = [1, 1, 1]} : vector<9x32x32xbf16> to vector<1x32x32xbf16>
    %48 = vector.shape_cast %47 : vector<1x32x32xbf16> to vector<32x32xbf16>
    %cst_21 = arith.constant dense<0.000000e+00> : vector<32x36xf32>
    %49 = tpu.matmul %48, %46, %cst_21 {dimension_numbers = #tpu.dot_dimension_numbers<[1], [0], [0], [1], [0, 0, 1, 1], [], []>} : vector<32x32xbf16>, vector<32x36xbf16>, vector<32x36xf32> -> vector<32x36xf32>
    %50 = arith.addf %45, %49 : vector<32x36xf32>
    %51 = vector.extract_strided_slice %9 {offsets = [0, 14], sizes = [32, 36], strides = [1, 1]} : vector<32x50xbf16> to vector<32x36xbf16>
    %52 = vector.extract_strided_slice %3 {offsets = [8, 0, 0], sizes = [1, 32, 32], strides = [1, 1, 1]} : vector<9x32x32xbf16> to vector<1x32x32xbf16>
    %53 = vector.shape_cast %52 : vector<1x32x32xbf16> to vector<32x32xbf16>
    %cst_22 = arith.constant dense<0.000000e+00> : vector<32x36xf32>
    %54 = tpu.matmul %53, %51, %cst_22 {dimension_numbers = #tpu.dot_dimension_numbers<[1], [0], [0], [1], [0, 0, 1, 1], [], []>} : vector<32x32xbf16>, vector<32x36xbf16>, vector<32x36xf32> -> vector<32x36xf32>
    %55 = arith.addf %50, %54 : vector<32x36xf32>
    %56 = vector.broadcast %4 : vector<32x1xf32> to vector<32x36xf32>
    %57 = arith.addf %55, %56 : vector<32x36xf32>
    %58 = vector.broadcast %0 : vector<1x36xf32> to vector<32x36xf32>
    %59 = arith.mulf %57, %58 : vector<32x36xf32>
    %cst_23 = arith.constant dense<0.000000e+00> : vector<32xf32>
    %60 = vector.multi_reduction <add>, %59, %cst_23 [1] : vector<32x36xf32> to vector<32xf32>
    %61 = vector.shape_cast %60 : vector<32xf32> to vector<32x1xf32>
    %cst_24 = arith.constant 6.250000e-02 : f32
    %62 = vector.broadcast %cst_24 : f32 to vector<32x1xf32>
    %63 = arith.mulf %61, %62 : vector<32x1xf32>
    %64 = vector.broadcast %63 : vector<32x1xf32> to vector<32x36xf32>
    %65 = arith.subf %57, %64 : vector<32x36xf32>
    %66 = vector.broadcast %0 : vector<1x36xf32> to vector<32x36xf32>
    %67 = arith.mulf %65, %66 : vector<32x36xf32>
    %68 = arith.mulf %67, %67 : vector<32x36xf32>
    %cst_25 = arith.constant dense<0.000000e+00> : vector<32xf32>
    %69 = vector.multi_reduction <add>, %68, %cst_25 [1] : vector<32x36xf32> to vector<32xf32>
    %70 = vector.shape_cast %69 : vector<32xf32> to vector<32x1xf32>
    %cst_26 = arith.constant 6.250000e-02 : f32
    %71 = vector.broadcast %cst_26 : f32 to vector<32x1xf32>
    %72 = arith.mulf %70, %71 : vector<32x1xf32>
    %73 = vector.broadcast %63 : vector<32x1xf32> to vector<32x36xf32>
    %74 = arith.subf %57, %73 : vector<32x36xf32>
    %cst_27 = arith.constant 9.99999974E-6 : f32
    %75 = vector.broadcast %cst_27 : f32 to vector<32x1xf32>
    %76 = arith.addf %72, %75 : vector<32x1xf32>
    %77 = math.rsqrt %76 : vector<32x1xf32>
    %78 = vector.broadcast %77 : vector<32x1xf32> to vector<32x36xf32>
    %79 = arith.mulf %74, %78 : vector<32x36xf32>
    %80 = vector.broadcast %5 : vector<32x1xf32> to vector<32x36xf32>
    %81 = arith.mulf %79, %80 : vector<32x36xf32>
    %82 = vector.broadcast %6 : vector<32x1xf32> to vector<32x36xf32>
    %83 = arith.addf %81, %82 : vector<32x36xf32>
    %cst_28 = arith.constant 0.000000e+00 : f32
    %84 = vector.broadcast %cst_28 : f32 to vector<32x36xf32>
    %85 = arith.cmpf oge, %83, %84 : vector<32x36xf32>
    %cst_29 = arith.constant 0.00999999977 : f32
    %86 = vector.broadcast %cst_29 : f32 to vector<32x36xf32>
    %87 = arith.mulf %86, %83 : vector<32x36xf32>
    %88 = arith.select %85, %83, %87 : vector<32x36xi1>, vector<32x36xf32>
    %89 = vector.broadcast %0 : vector<1x36xf32> to vector<32x36xf32>
    %90 = arith.mulf %88, %89 : vector<32x36xf32>
    %c0_30 = arith.constant 0 : index
    %c0_31 = arith.constant 0 : index
    %c0_32 = arith.constant 0 : index
    %91 = vector.load %arg7[%c0_30, %c0_31, %c0_32] : memref<1x32x36xf32, #tpu.memory_space<vmem>>, vector<1x32x36xf32>
    %92 = vector.shape_cast %91 : vector<1x32x36xf32> to vector<32x36xf32>
    %93 = vector.shape_cast %90 : vector<32x36xf32> to vector<1x32x36xf32>
    tpu.vector_store %arg7[%c0_30, %c0_31, %c0_32], %93 {strides = array<i32>} : memref<1x32x36xf32, #tpu.memory_space<vmem>>, vector<1x32x36xf32>,
    return
  }
  func.func @transform_0(%arg0: i32) -> (i32, i32, i32) {
    %c0_i32 = arith.constant 0 : i32
    %c0_i32_0 = arith.constant 0 : i32
    %c0_i32_1 = arith.constant 0 : i32
    return %arg0, %c0_i32, %c0_i32_0 : i32, i32, i32
  }
  func.func @transform_1(%arg0: i32) -> (i32, i32, i32) {
    %c0_i32 = arith.constant 0 : i32
    %c0_i32_0 = arith.constant 0 : i32
    %c0_i32_1 = arith.constant 0 : i32
    %c0_i32_2 = arith.constant 0 : i32
    return %c0_i32, %c0_i32_0, %c0_i32_1 : i32, i32, i32
  }
  func.func @transform_2(%arg0: i32) -> (i32, i32) {
    %c0_i32 = arith.constant 0 : i32
    %c0_i32_0 = arith.constant 0 : i32
    %c0_i32_1 = arith.constant 0 : i32
    return %c0_i32, %c0_i32_0 : i32, i32
  }
  func.func @transform_3(%arg0: i32) -> (i32, i32) {
    %c0_i32 = arith.constant 0 : i32
    %c0_i32_0 = arith.constant 0 : i32
    %c0_i32_1 = arith.constant 0 : i32
    return %c0_i32, %c0_i32_0 : i32, i32
  }
  func.func @transform_4(%arg0: i32) -> (i32, i32) {
    %c0_i32 = arith.constant 0 : i32
    %c0_i32_0 = arith.constant 0 : i32
    %c0_i32_1 = arith.constant 0 : i32
    return %c0_i32, %c0_i32_0 : i32, i32
  }
  func.func @transform_5(%arg0: i32) -> (i32, i32) {
    %c0_i32 = arith.constant 0 : i32
    %c0_i32_0 = arith.constant 0 : i32
    %c0_i32_1 = arith.constant 0 : i32
    return %c0_i32, %c0_i32_0 : i32, i32
  }
  func.func @transform_6(%arg0: i32) -> (i32, i32, i32) {
    %c0_i32 = arith.constant 0 : i32
    %c0_i32_0 = arith.constant 0 : i32
    %c0_i32_1 = arith.constant 0 : i32
    return %arg0, %c0_i32, %c0_i32_0 : i32, i32, i32
  }
}

module attributes {stable_mosaic.version = 11 : i64} {
  func.func @_convt_se_kernel(%arg0: i32, %arg1: memref<1x32x36xf32, #tpu.memory_space<vmem>>, %arg2: memref<4x16x32xbf16, #tpu.memory_space<vmem>>, %arg3: memref<4x16xf32, #tpu.memory_space<vmem>>, %arg4: memref<4x1xf32, #tpu.memory_space<vmem>>, %arg5: memref<16x4xf32, #tpu.memory_space<vmem>>, %arg6: memref<16x1xf32, #tpu.memory_space<vmem>>, %arg7: memref<1x4x16x36xf32, #tpu.memory_space<vmem>>) attributes {dimension_semantics = [#tpu.dimension_semantics<parallel>], iteration_bounds = array<i64: 2>, scalar_prefetch = 0 : i64, scratch_operands = 0 : i64, tpu.core_type = #tpu.core_type<tc>, window_params = [{transform_indices = @transform_0, window_bounds = array<i64: 1, 32, 36>}, {pipeline_mode = #tpu.pipeline_mode<synchronous>, transform_indices = @transform_1, window_bounds = array<i64: 4, 16, 32>}, {pipeline_mode = #tpu.pipeline_mode<synchronous>, transform_indices = @transform_2, window_bounds = array<i64: 4, 16>}, {pipeline_mode = #tpu.pipeline_mode<synchronous>, transform_indices = @transform_3, window_bounds = array<i64: 4, 1>}, {pipeline_mode = #tpu.pipeline_mode<synchronous>, transform_indices = @transform_4, window_bounds = array<i64: 16, 4>}, {pipeline_mode = #tpu.pipeline_mode<synchronous>, transform_indices = @transform_5, window_bounds = array<i64: 16, 1>}, {transform_indices = @transform_6, window_bounds = array<i64: 1, 4, 16, 36>}]} {
    %c0 = arith.constant 0 : index
    %c0_0 = arith.constant 0 : index
    %c0_1 = arith.constant 0 : index
    %0 = vector.load %arg1[%c0, %c0_0, %c0_1] : memref<1x32x36xf32, #tpu.memory_space<vmem>>, vector<1x32x36xf32>
    %1 = vector.shape_cast %0 : vector<1x32x36xf32> to vector<32x36xf32>
    %2 = arith.truncf %1 : vector<32x36xf32> to vector<32x36xbf16>
    %cst = arith.constant 0.000000e+00 : f32
    %3 = vector.broadcast %cst : f32 to vector<16x1xf32>
    %c0_2 = arith.constant 0 : index
    %c0_3 = arith.constant 0 : index
    %c0_4 = arith.constant 0 : index
    %4 = vector.load %arg2[%c0_2, %c0_3, %c0_4] : memref<4x16x32xbf16, #tpu.memory_space<vmem>>, vector<1x16x32xbf16>
    %5 = vector.shape_cast %4 : vector<1x16x32xbf16> to vector<16x32xbf16>
    %cst_5 = arith.constant dense<0.000000e+00> : vector<16x36xf32>
    %6 = tpu.matmul %5, %2, %cst_5 {dimension_numbers = #tpu.dot_dimension_numbers<[1], [0], [0], [1], [0, 0, 1, 1], [], []>} : vector<16x32xbf16>, vector<32x36xbf16>, vector<16x36xf32> -> vector<16x36xf32>
    %cst_6 = arith.constant dense<0.000000e+00> : vector<16xf32>
    %7 = vector.multi_reduction <add>, %6, %cst_6 [1] : vector<16x36xf32> to vector<16xf32>
    %8 = vector.shape_cast %7 : vector<16xf32> to vector<16x1xf32>
    %9 = arith.addf %3, %8 : vector<16x1xf32>
    %c1 = arith.constant 1 : index
    %c0_7 = arith.constant 0 : index
    %c0_8 = arith.constant 0 : index
    %10 = vector.load %arg2[%c1, %c0_7, %c0_8] : memref<4x16x32xbf16, #tpu.memory_space<vmem>>, vector<1x16x32xbf16>
    %11 = vector.shape_cast %10 : vector<1x16x32xbf16> to vector<16x32xbf16>
    %cst_9 = arith.constant dense<0.000000e+00> : vector<16x36xf32>
    %12 = tpu.matmul %11, %2, %cst_9 {dimension_numbers = #tpu.dot_dimension_numbers<[1], [0], [0], [1], [0, 0, 1, 1], [], []>} : vector<16x32xbf16>, vector<32x36xbf16>, vector<16x36xf32> -> vector<16x36xf32>
    %cst_10 = arith.constant dense<0.000000e+00> : vector<16xf32>
    %13 = vector.multi_reduction <add>, %12, %cst_10 [1] : vector<16x36xf32> to vector<16xf32>
    %14 = vector.shape_cast %13 : vector<16xf32> to vector<16x1xf32>
    %15 = arith.addf %9, %14 : vector<16x1xf32>
    %c2 = arith.constant 2 : index
    %c0_11 = arith.constant 0 : index
    %c0_12 = arith.constant 0 : index
    %16 = vector.load %arg2[%c2, %c0_11, %c0_12] : memref<4x16x32xbf16, #tpu.memory_space<vmem>>, vector<1x16x32xbf16>
    %17 = vector.shape_cast %16 : vector<1x16x32xbf16> to vector<16x32xbf16>
    %cst_13 = arith.constant dense<0.000000e+00> : vector<16x36xf32>
    %18 = tpu.matmul %17, %2, %cst_13 {dimension_numbers = #tpu.dot_dimension_numbers<[1], [0], [0], [1], [0, 0, 1, 1], [], []>} : vector<16x32xbf16>, vector<32x36xbf16>, vector<16x36xf32> -> vector<16x36xf32>
    %cst_14 = arith.constant dense<0.000000e+00> : vector<16xf32>
    %19 = vector.multi_reduction <add>, %18, %cst_14 [1] : vector<16x36xf32> to vector<16xf32>
    %20 = vector.shape_cast %19 : vector<16xf32> to vector<16x1xf32>
    %21 = arith.addf %15, %20 : vector<16x1xf32>
    %c3 = arith.constant 3 : index
    %c0_15 = arith.constant 0 : index
    %c0_16 = arith.constant 0 : index
    %22 = vector.load %arg2[%c3, %c0_15, %c0_16] : memref<4x16x32xbf16, #tpu.memory_space<vmem>>, vector<1x16x32xbf16>
    %23 = vector.shape_cast %22 : vector<1x16x32xbf16> to vector<16x32xbf16>
    %cst_17 = arith.constant dense<0.000000e+00> : vector<16x36xf32>
    %24 = tpu.matmul %23, %2, %cst_17 {dimension_numbers = #tpu.dot_dimension_numbers<[1], [0], [0], [1], [0, 0, 1, 1], [], []>} : vector<16x32xbf16>, vector<32x36xbf16>, vector<16x36xf32> -> vector<16x36xf32>
    %cst_18 = arith.constant dense<0.000000e+00> : vector<16xf32>
    %25 = vector.multi_reduction <add>, %24, %cst_18 [1] : vector<16x36xf32> to vector<16xf32>
    %26 = vector.shape_cast %25 : vector<16xf32> to vector<16x1xf32>
    %27 = arith.addf %21, %26 : vector<16x1xf32>
    %cst_19 = arith.constant 1.562500e-02 : f32
    %28 = vector.broadcast %cst_19 : f32 to vector<16x1xf32>
    %29 = arith.mulf %27, %28 : vector<16x1xf32>
    %c0_20 = arith.constant 0 : index
    %c0_21 = arith.constant 0 : index
    %30 = vector.load %arg3[%c0_20, %c0_21] : memref<4x16xf32, #tpu.memory_space<vmem>>, vector<4x16xf32>
    %cst_22 = arith.constant dense<0.000000e+00> : vector<4x1xf32>
    %31 = tpu.matmul %30, %29, %cst_22 {dimension_numbers = #tpu.dot_dimension_numbers<[1], [0], [0], [1], [0, 0, 1, 1], [], []>} : vector<4x16xf32>, vector<16x1xf32>, vector<4x1xf32> -> vector<4x1xf32>
    %c0_23 = arith.constant 0 : index
    %c0_24 = arith.constant 0 : index
    %32 = vector.load %arg4[%c0_23, %c0_24] : memref<4x1xf32, #tpu.memory_space<vmem>>, vector<4x1xf32>
    %33 = arith.addf %31, %32 : vector<4x1xf32>
    %cst_25 = arith.constant 0.000000e+00 : f32
    %34 = vector.broadcast %cst_25 : f32 to vector<4x1xf32>
    %35 = arith.maximumf %33, %34 : vector<4x1xf32>
    %c0_26 = arith.constant 0 : index
    %c0_27 = arith.constant 0 : index
    %36 = vector.load %arg5[%c0_26, %c0_27] : memref<16x4xf32, #tpu.memory_space<vmem>>, vector<16x4xf32>
    %cst_28 = arith.constant dense<0.000000e+00> : vector<16x1xf32>
    %37 = tpu.matmul %36, %35, %cst_28 {dimension_numbers = #tpu.dot_dimension_numbers<[1], [0], [0], [1], [0, 0, 1, 1], [], []>} : vector<16x4xf32>, vector<4x1xf32>, vector<16x1xf32> -> vector<16x1xf32>
    %c0_29 = arith.constant 0 : index
    %c0_30 = arith.constant 0 : index
    %38 = vector.load %arg6[%c0_29, %c0_30] : memref<16x1xf32, #tpu.memory_space<vmem>>, vector<16x1xf32>
    %39 = arith.addf %37, %38 : vector<16x1xf32>
    %40 = arith.negf %39 : vector<16x1xf32>
    %41 = math.exp %40 : vector<16x1xf32>
    %cst_31 = arith.constant 1.000000e+00 : f32
    %42 = vector.broadcast %cst_31 : f32 to vector<16x1xf32>
    %43 = arith.addf %42, %41 : vector<16x1xf32>
    %44 = arith.divf %42, %43 : vector<16x1xf32>
    %cst_32 = arith.constant 1.000000e+00 : f32
    %45 = vector.broadcast %cst_32 : f32 to vector<16x1xf32>
    %46 = arith.addf %45, %44 : vector<16x1xf32>
    %47 = vector.shape_cast %6 : vector<16x36xf32> to vector<1x16x36xf32>
    %48 = vector.shape_cast %12 : vector<16x36xf32> to vector<1x16x36xf32>
    %49 = vector.shape_cast %18 : vector<16x36xf32> to vector<1x16x36xf32>
    %50 = vector.shape_cast %24 : vector<16x36xf32> to vector<1x16x36xf32>
    %51 = tpu.concatenate %47, %48, %49, %50 in 0 : vector<1x16x36xf32>, vector<1x16x36xf32>, vector<1x16x36xf32>, vector<1x16x36xf32> -> vector<4x16x36xf32>
    %52 = vector.shape_cast %46 : vector<16x1xf32> to vector<1x16x1xf32>
    %53 = vector.broadcast %52 : vector<1x16x1xf32> to vector<4x16x36xf32>
    %54 = arith.mulf %51, %53 : vector<4x16x36xf32>
    %c0_33 = arith.constant 0 : index
    %c0_34 = arith.constant 0 : index
    %c0_35 = arith.constant 0 : index
    %c0_36 = arith.constant 0 : index
    %55 = vector.load %arg7[%c0_33, %c0_34, %c0_35, %c0_36] : memref<1x4x16x36xf32, #tpu.memory_space<vmem>>, vector<1x4x16x36xf32>
    %56 = vector.shape_cast %55 : vector<1x4x16x36xf32> to vector<4x16x36xf32>
    %57 = vector.shape_cast %54 : vector<4x16x36xf32> to vector<1x4x16x36xf32>
    tpu.vector_store %arg7[%c0_33, %c0_34, %c0_35, %c0_36], %57 {strides = array<i32>} : memref<1x4x16x36xf32, #tpu.memory_space<vmem>>, vector<1x4x16x36xf32>,
    return
  }
  func.func @transform_0(%arg0: i32) -> (i32, i32, i32) {
    %c0_i32 = arith.constant 0 : i32
    %c0_i32_0 = arith.constant 0 : i32
    %c0_i32_1 = arith.constant 0 : i32
    return %arg0, %c0_i32, %c0_i32_0 : i32, i32, i32
  }
  func.func @transform_1(%arg0: i32) -> (i32, i32, i32) {
    %c0_i32 = arith.constant 0 : i32
    %c0_i32_0 = arith.constant 0 : i32
    %c0_i32_1 = arith.constant 0 : i32
    %c0_i32_2 = arith.constant 0 : i32
    return %c0_i32, %c0_i32_0, %c0_i32_1 : i32, i32, i32
  }
  func.func @transform_2(%arg0: i32) -> (i32, i32) {
    %c0_i32 = arith.constant 0 : i32
    %c0_i32_0 = arith.constant 0 : i32
    %c0_i32_1 = arith.constant 0 : i32
    return %c0_i32, %c0_i32_0 : i32, i32
  }
  func.func @transform_3(%arg0: i32) -> (i32, i32) {
    %c0_i32 = arith.constant 0 : i32
    %c0_i32_0 = arith.constant 0 : i32
    %c0_i32_1 = arith.constant 0 : i32
    return %c0_i32, %c0_i32_0 : i32, i32
  }
  func.func @transform_4(%arg0: i32) -> (i32, i32) {
    %c0_i32 = arith.constant 0 : i32
    %c0_i32_0 = arith.constant 0 : i32
    %c0_i32_1 = arith.constant 0 : i32
    return %c0_i32, %c0_i32_0 : i32, i32
  }
  func.func @transform_5(%arg0: i32) -> (i32, i32) {
    %c0_i32 = arith.constant 0 : i32
    %c0_i32_0 = arith.constant 0 : i32
    %c0_i32_1 = arith.constant 0 : i32
    return %c0_i32, %c0_i32_0 : i32, i32
  }
  func.func @transform_6(%arg0: i32) -> (i32, i32, i32, i32) {
    %c0_i32 = arith.constant 0 : i32
    %c0_i32_0 = arith.constant 0 : i32
    %c0_i32_1 = arith.constant 0 : i32
    %c0_i32_2 = arith.constant 0 : i32
    return %arg0, %c0_i32, %c0_i32_0, %c0_i32_1 : i32, i32, i32, i32
  }
}

module attributes {stable_mosaic.version = 11 : i64} {
  func.func @_convt_se_kernel(%arg0: i32, %arg1: memref<1x16x100xf32, #tpu.memory_space<vmem>>, %arg2: memref<4x8x16xbf16, #tpu.memory_space<vmem>>, %arg3: memref<2x8xf32, #tpu.memory_space<vmem>>, %arg4: memref<2x1xf32, #tpu.memory_space<vmem>>, %arg5: memref<8x2xf32, #tpu.memory_space<vmem>>, %arg6: memref<8x1xf32, #tpu.memory_space<vmem>>, %arg7: memref<1x4x8x100xf32, #tpu.memory_space<vmem>>) attributes {dimension_semantics = [#tpu.dimension_semantics<parallel>], iteration_bounds = array<i64: 2>, scalar_prefetch = 0 : i64, scratch_operands = 0 : i64, tpu.core_type = #tpu.core_type<tc>, window_params = [{transform_indices = @transform_0, window_bounds = array<i64: 1, 16, 100>}, {pipeline_mode = #tpu.pipeline_mode<synchronous>, transform_indices = @transform_1, window_bounds = array<i64: 4, 8, 16>}, {pipeline_mode = #tpu.pipeline_mode<synchronous>, transform_indices = @transform_2, window_bounds = array<i64: 2, 8>}, {pipeline_mode = #tpu.pipeline_mode<synchronous>, transform_indices = @transform_3, window_bounds = array<i64: 2, 1>}, {pipeline_mode = #tpu.pipeline_mode<synchronous>, transform_indices = @transform_4, window_bounds = array<i64: 8, 2>}, {pipeline_mode = #tpu.pipeline_mode<synchronous>, transform_indices = @transform_5, window_bounds = array<i64: 8, 1>}, {transform_indices = @transform_6, window_bounds = array<i64: 1, 4, 8, 100>}]} {
    %c0 = arith.constant 0 : index
    %c0_0 = arith.constant 0 : index
    %c0_1 = arith.constant 0 : index
    %0 = vector.load %arg1[%c0, %c0_0, %c0_1] : memref<1x16x100xf32, #tpu.memory_space<vmem>>, vector<1x16x100xf32>
    %1 = vector.shape_cast %0 : vector<1x16x100xf32> to vector<16x100xf32>
    %2 = arith.truncf %1 : vector<16x100xf32> to vector<16x100xbf16>
    %cst = arith.constant 0.000000e+00 : f32
    %3 = vector.broadcast %cst : f32 to vector<8x1xf32>
    %c0_2 = arith.constant 0 : index
    %c0_3 = arith.constant 0 : index
    %c0_4 = arith.constant 0 : index
    %4 = vector.load %arg2[%c0_2, %c0_3, %c0_4] : memref<4x8x16xbf16, #tpu.memory_space<vmem>>, vector<1x8x16xbf16>
    %5 = vector.shape_cast %4 : vector<1x8x16xbf16> to vector<8x16xbf16>
    %cst_5 = arith.constant dense<0.000000e+00> : vector<8x100xf32>
    %6 = tpu.matmul %5, %2, %cst_5 {dimension_numbers = #tpu.dot_dimension_numbers<[1], [0], [0], [1], [0, 0, 1, 1], [], []>} : vector<8x16xbf16>, vector<16x100xbf16>, vector<8x100xf32> -> vector<8x100xf32>
    %cst_6 = arith.constant dense<0.000000e+00> : vector<8xf32>
    %7 = vector.multi_reduction <add>, %6, %cst_6 [1] : vector<8x100xf32> to vector<8xf32>
    %8 = vector.shape_cast %7 : vector<8xf32> to vector<8x1xf32>
    %9 = arith.addf %3, %8 : vector<8x1xf32>
    %c1 = arith.constant 1 : index
    %c0_7 = arith.constant 0 : index
    %c0_8 = arith.constant 0 : index
    %10 = vector.load %arg2[%c1, %c0_7, %c0_8] : memref<4x8x16xbf16, #tpu.memory_space<vmem>>, vector<1x8x16xbf16>
    %11 = vector.shape_cast %10 : vector<1x8x16xbf16> to vector<8x16xbf16>
    %cst_9 = arith.constant dense<0.000000e+00> : vector<8x100xf32>
    %12 = tpu.matmul %11, %2, %cst_9 {dimension_numbers = #tpu.dot_dimension_numbers<[1], [0], [0], [1], [0, 0, 1, 1], [], []>} : vector<8x16xbf16>, vector<16x100xbf16>, vector<8x100xf32> -> vector<8x100xf32>
    %cst_10 = arith.constant dense<0.000000e+00> : vector<8xf32>
    %13 = vector.multi_reduction <add>, %12, %cst_10 [1] : vector<8x100xf32> to vector<8xf32>
    %14 = vector.shape_cast %13 : vector<8xf32> to vector<8x1xf32>
    %15 = arith.addf %9, %14 : vector<8x1xf32>
    %c2 = arith.constant 2 : index
    %c0_11 = arith.constant 0 : index
    %c0_12 = arith.constant 0 : index
    %16 = vector.load %arg2[%c2, %c0_11, %c0_12] : memref<4x8x16xbf16, #tpu.memory_space<vmem>>, vector<1x8x16xbf16>
    %17 = vector.shape_cast %16 : vector<1x8x16xbf16> to vector<8x16xbf16>
    %cst_13 = arith.constant dense<0.000000e+00> : vector<8x100xf32>
    %18 = tpu.matmul %17, %2, %cst_13 {dimension_numbers = #tpu.dot_dimension_numbers<[1], [0], [0], [1], [0, 0, 1, 1], [], []>} : vector<8x16xbf16>, vector<16x100xbf16>, vector<8x100xf32> -> vector<8x100xf32>
    %cst_14 = arith.constant dense<0.000000e+00> : vector<8xf32>
    %19 = vector.multi_reduction <add>, %18, %cst_14 [1] : vector<8x100xf32> to vector<8xf32>
    %20 = vector.shape_cast %19 : vector<8xf32> to vector<8x1xf32>
    %21 = arith.addf %15, %20 : vector<8x1xf32>
    %c3 = arith.constant 3 : index
    %c0_15 = arith.constant 0 : index
    %c0_16 = arith.constant 0 : index
    %22 = vector.load %arg2[%c3, %c0_15, %c0_16] : memref<4x8x16xbf16, #tpu.memory_space<vmem>>, vector<1x8x16xbf16>
    %23 = vector.shape_cast %22 : vector<1x8x16xbf16> to vector<8x16xbf16>
    %cst_17 = arith.constant dense<0.000000e+00> : vector<8x100xf32>
    %24 = tpu.matmul %23, %2, %cst_17 {dimension_numbers = #tpu.dot_dimension_numbers<[1], [0], [0], [1], [0, 0, 1, 1], [], []>} : vector<8x16xbf16>, vector<16x100xbf16>, vector<8x100xf32> -> vector<8x100xf32>
    %cst_18 = arith.constant dense<0.000000e+00> : vector<8xf32>
    %25 = vector.multi_reduction <add>, %24, %cst_18 [1] : vector<8x100xf32> to vector<8xf32>
    %26 = vector.shape_cast %25 : vector<8xf32> to vector<8x1xf32>
    %27 = arith.addf %21, %26 : vector<8x1xf32>
    %cst_19 = arith.constant 3.906250e-03 : f32
    %28 = vector.broadcast %cst_19 : f32 to vector<8x1xf32>
    %29 = arith.mulf %27, %28 : vector<8x1xf32>
    %c0_20 = arith.constant 0 : index
    %c0_21 = arith.constant 0 : index
    %30 = vector.load %arg3[%c0_20, %c0_21] : memref<2x8xf32, #tpu.memory_space<vmem>>, vector<2x8xf32>
    %cst_22 = arith.constant dense<0.000000e+00> : vector<2x1xf32>
    %31 = tpu.matmul %30, %29, %cst_22 {dimension_numbers = #tpu.dot_dimension_numbers<[1], [0], [0], [1], [0, 0, 1, 1], [], []>} : vector<2x8xf32>, vector<8x1xf32>, vector<2x1xf32> -> vector<2x1xf32>
    %c0_23 = arith.constant 0 : index
    %c0_24 = arith.constant 0 : index
    %32 = vector.load %arg4[%c0_23, %c0_24] : memref<2x1xf32, #tpu.memory_space<vmem>>, vector<2x1xf32>
    %33 = arith.addf %31, %32 : vector<2x1xf32>
    %cst_25 = arith.constant 0.000000e+00 : f32
    %34 = vector.broadcast %cst_25 : f32 to vector<2x1xf32>
    %35 = arith.maximumf %33, %34 : vector<2x1xf32>
    %c0_26 = arith.constant 0 : index
    %c0_27 = arith.constant 0 : index
    %36 = vector.load %arg5[%c0_26, %c0_27] : memref<8x2xf32, #tpu.memory_space<vmem>>, vector<8x2xf32>
    %cst_28 = arith.constant dense<0.000000e+00> : vector<8x1xf32>
    %37 = tpu.matmul %36, %35, %cst_28 {dimension_numbers = #tpu.dot_dimension_numbers<[1], [0], [0], [1], [0, 0, 1, 1], [], []>} : vector<8x2xf32>, vector<2x1xf32>, vector<8x1xf32> -> vector<8x1xf32>
    %c0_29 = arith.constant 0 : index
    %c0_30 = arith.constant 0 : index
    %38 = vector.load %arg6[%c0_29, %c0_30] : memref<8x1xf32, #tpu.memory_space<vmem>>, vector<8x1xf32>
    %39 = arith.addf %37, %38 : vector<8x1xf32>
    %40 = arith.negf %39 : vector<8x1xf32>
    %41 = math.exp %40 : vector<8x1xf32>
    %cst_31 = arith.constant 1.000000e+00 : f32
    %42 = vector.broadcast %cst_31 : f32 to vector<8x1xf32>
    %43 = arith.addf %42, %41 : vector<8x1xf32>
    %44 = arith.divf %42, %43 : vector<8x1xf32>
    %cst_32 = arith.constant 1.000000e+00 : f32
    %45 = vector.broadcast %cst_32 : f32 to vector<8x1xf32>
    %46 = arith.addf %45, %44 : vector<8x1xf32>
    %47 = vector.shape_cast %6 : vector<8x100xf32> to vector<1x8x100xf32>
    %48 = vector.shape_cast %12 : vector<8x100xf32> to vector<1x8x100xf32>
    %49 = vector.shape_cast %18 : vector<8x100xf32> to vector<1x8x100xf32>
    %50 = vector.shape_cast %24 : vector<8x100xf32> to vector<1x8x100xf32>
    %51 = tpu.concatenate %47, %48, %49, %50 in 0 : vector<1x8x100xf32>, vector<1x8x100xf32>, vector<1x8x100xf32>, vector<1x8x100xf32> -> vector<4x8x100xf32>
    %52 = vector.shape_cast %46 : vector<8x1xf32> to vector<1x8x1xf32>
    %53 = vector.broadcast %52 : vector<1x8x1xf32> to vector<4x8x100xf32>
    %54 = arith.mulf %51, %53 : vector<4x8x100xf32>
    %c0_33 = arith.constant 0 : index
    %c0_34 = arith.constant 0 : index
    %c0_35 = arith.constant 0 : index
    %c0_36 = arith.constant 0 : index
    %55 = vector.load %arg7[%c0_33, %c0_34, %c0_35, %c0_36] : memref<1x4x8x100xf32, #tpu.memory_space<vmem>>, vector<1x4x8x100xf32>
    %56 = vector.shape_cast %55 : vector<1x4x8x100xf32> to vector<4x8x100xf32>
    %57 = vector.shape_cast %54 : vector<4x8x100xf32> to vector<1x4x8x100xf32>
    tpu.vector_store %arg7[%c0_33, %c0_34, %c0_35, %c0_36], %57 {strides = array<i32>} : memref<1x4x8x100xf32, #tpu.memory_space<vmem>>, vector<1x4x8x100xf32>,
    return
  }
  func.func @transform_0(%arg0: i32) -> (i32, i32, i32) {
    %c0_i32 = arith.constant 0 : i32
    %c0_i32_0 = arith.constant 0 : i32
    %c0_i32_1 = arith.constant 0 : i32
    return %arg0, %c0_i32, %c0_i32_0 : i32, i32, i32
  }
  func.func @transform_1(%arg0: i32) -> (i32, i32, i32) {
    %c0_i32 = arith.constant 0 : i32
    %c0_i32_0 = arith.constant 0 : i32
    %c0_i32_1 = arith.constant 0 : i32
    %c0_i32_2 = arith.constant 0 : i32
    return %c0_i32, %c0_i32_0, %c0_i32_1 : i32, i32, i32
  }
  func.func @transform_2(%arg0: i32) -> (i32, i32) {
    %c0_i32 = arith.constant 0 : i32
    %c0_i32_0 = arith.constant 0 : i32
    %c0_i32_1 = arith.constant 0 : i32
    return %c0_i32, %c0_i32_0 : i32, i32
  }
  func.func @transform_3(%arg0: i32) -> (i32, i32) {
    %c0_i32 = arith.constant 0 : i32
    %c0_i32_0 = arith.constant 0 : i32
    %c0_i32_1 = arith.constant 0 : i32
    return %c0_i32, %c0_i32_0 : i32, i32
  }
  func.func @transform_4(%arg0: i32) -> (i32, i32) {
    %c0_i32 = arith.constant 0 : i32
    %c0_i32_0 = arith.constant 0 : i32
    %c0_i32_1 = arith.constant 0 : i32
    return %c0_i32, %c0_i32_0 : i32, i32
  }
  func.func @transform_5(%arg0: i32) -> (i32, i32) {
    %c0_i32 = arith.constant 0 : i32
    %c0_i32_0 = arith.constant 0 : i32
    %c0_i32_1 = arith.constant 0 : i32
    return %c0_i32, %c0_i32_0 : i32, i32
  }
  func.func @transform_6(%arg0: i32) -> (i32, i32, i32, i32) {
    %c0_i32 = arith.constant 0 : i32
    %c0_i32_0 = arith.constant 0 : i32
    %c0_i32_1 = arith.constant 0 : i32
    %c0_i32_2 = arith.constant 0 : i32
    return %arg0, %c0_i32, %c0_i32_0, %c0_i32_1 : i32, i32, i32, i32
  }
}

module attributes {stable_mosaic.version = 11 : i64} {
  func.func @kernel(%arg0: i32, %arg1: memref<1x16x100xf32, #tpu.memory_space<vmem>>, %arg2: memref<1x16x100xf32, #tpu.memory_space<vmem>>, %arg3: memref<4x16xf32, #tpu.memory_space<vmem>>, %arg4: memref<4x1xf32, #tpu.memory_space<vmem>>, %arg5: memref<16x4xf32, #tpu.memory_space<vmem>>, %arg6: memref<16x1xf32, #tpu.memory_space<vmem>>, %arg7: memref<9x16x32xbf16, #tpu.memory_space<vmem>>, %arg8: memref<16x1xf32, #tpu.memory_space<vmem>>, %arg9: memref<16x1xf32, #tpu.memory_space<vmem>>, %arg10: memref<16x1xf32, #tpu.memory_space<vmem>>, %arg11: memref<9x16x16xbf16, #tpu.memory_space<vmem>>, %arg12: memref<16x1xf32, #tpu.memory_space<vmem>>, %arg13: memref<16x1xf32, #tpu.memory_space<vmem>>, %arg14: memref<16x1xf32, #tpu.memory_space<vmem>>, %arg15: memref<1x100xf32, #tpu.memory_space<vmem>>, %arg16: memref<1x16x100xf32, #tpu.memory_space<vmem>>) attributes {dimension_semantics = [#tpu.dimension_semantics<parallel>], iteration_bounds = array<i64: 2>, scalar_prefetch = 0 : i64, scratch_operands = 0 : i64, tpu.core_type = #tpu.core_type<tc>, window_params = [{transform_indices = @transform_0, window_bounds = array<i64: 1, 16, 100>}, {transform_indices = @transform_1, window_bounds = array<i64: 1, 16, 100>}, {pipeline_mode = #tpu.pipeline_mode<synchronous>, transform_indices = @transform_2, window_bounds = array<i64: 4, 16>}, {pipeline_mode = #tpu.pipeline_mode<synchronous>, transform_indices = @transform_3, window_bounds = array<i64: 4, 1>}, {pipeline_mode = #tpu.pipeline_mode<synchronous>, transform_indices = @transform_4, window_bounds = array<i64: 16, 4>}, {pipeline_mode = #tpu.pipeline_mode<synchronous>, transform_indices = @transform_5, window_bounds = array<i64: 16, 1>}, {pipeline_mode = #tpu.pipeline_mode<synchronous>, transform_indices = @transform_6, window_bounds = array<i64: 9, 16, 32>}, {pipeline_mode = #tpu.pipeline_mode<synchronous>, transform_indices = @transform_7, window_bounds = array<i64: 16, 1>}, {pipeline_mode = #tpu.pipeline_mode<synchronous>, transform_indices = @transform_8, window_bounds = array<i64: 16, 1>}, {pipeline_mode = #tpu.pipeline_mode<synchronous>, transform_indices = @transform_9, window_bounds = array<i64: 16, 1>}, {pipeline_mode = #tpu.pipeline_mode<synchronous>, transform_indices = @transform_10, window_bounds = array<i64: 9, 16, 16>}, {pipeline_mode = #tpu.pipeline_mode<synchronous>, transform_indices = @transform_11, window_bounds = array<i64: 16, 1>}, {pipeline_mode = #tpu.pipeline_mode<synchronous>, transform_indices = @transform_12, window_bounds = array<i64: 16, 1>}, {pipeline_mode = #tpu.pipeline_mode<synchronous>, transform_indices = @transform_13, window_bounds = array<i64: 16, 1>}, {pipeline_mode = #tpu.pipeline_mode<synchronous>, transform_indices = @transform_14, window_bounds = array<i64: 1, 100>}, {transform_indices = @transform_15, window_bounds = array<i64: 1, 16, 100>}]} {
    %c0 = arith.constant 0 : index
    %c0_0 = arith.constant 0 : index
    %0 = vector.load %arg15[%c0, %c0_0] : memref<1x100xf32, #tpu.memory_space<vmem>>, vector<1x100xf32>
    %c0_1 = arith.constant 0 : index
    %c0_2 = arith.constant 0 : index
    %c0_3 = arith.constant 0 : index
    %1 = vector.load %arg1[%c0_1, %c0_2, %c0_3] : memref<1x16x100xf32, #tpu.memory_space<vmem>>, vector<1x16x100xf32>
    %2 = vector.shape_cast %1 : vector<1x16x100xf32> to vector<16x100xf32>
    %c0_4 = arith.constant 0 : index
    %c0_5 = arith.constant 0 : index
    %c0_6 = arith.constant 0 : index
    %3 = vector.load %arg2[%c0_4, %c0_5, %c0_6] : memref<1x16x100xf32, #tpu.memory_space<vmem>>, vector<1x16x100xf32>
    %4 = vector.shape_cast %3 : vector<1x16x100xf32> to vector<16x100xf32>
    %cst = arith.constant dense<0.000000e+00> : vector<16xf32>
    %5 = vector.multi_reduction <add>, %4, %cst [1] : vector<16x100xf32> to vector<16xf32>
    %6 = vector.shape_cast %5 : vector<16xf32> to vector<16x1xf32>
    %cst_7 = arith.constant 1.562500e-02 : f32
    %7 = vector.broadcast %cst_7 : f32 to vector<16x1xf32>
    %8 = arith.mulf %6, %7 : vector<16x1xf32>
    %c0_8 = arith.constant 0 : index
    %c0_9 = arith.constant 0 : index
    %9 = vector.load %arg3[%c0_8, %c0_9] : memref<4x16xf32, #tpu.memory_space<vmem>>, vector<4x16xf32>
    %cst_10 = arith.constant dense<0.000000e+00> : vector<4x1xf32>
    %10 = tpu.matmul %9, %8, %cst_10 {dimension_numbers = #tpu.dot_dimension_numbers<[1], [0], [0], [1], [0, 0, 1, 1], [], []>} : vector<4x16xf32>, vector<16x1xf32>, vector<4x1xf32> -> vector<4x1xf32>
    %c0_11 = arith.constant 0 : index
    %c0_12 = arith.constant 0 : index
    %11 = vector.load %arg4[%c0_11, %c0_12] : memref<4x1xf32, #tpu.memory_space<vmem>>, vector<4x1xf32>
    %12 = arith.addf %10, %11 : vector<4x1xf32>
    %cst_13 = arith.constant 0.000000e+00 : f32
    %13 = vector.broadcast %cst_13 : f32 to vector<4x1xf32>
    %14 = arith.maximumf %12, %13 : vector<4x1xf32>
    %c0_14 = arith.constant 0 : index
    %c0_15 = arith.constant 0 : index
    %15 = vector.load %arg5[%c0_14, %c0_15] : memref<16x4xf32, #tpu.memory_space<vmem>>, vector<16x4xf32>
    %cst_16 = arith.constant dense<0.000000e+00> : vector<16x1xf32>
    %16 = tpu.matmul %15, %14, %cst_16 {dimension_numbers = #tpu.dot_dimension_numbers<[1], [0], [0], [1], [0, 0, 1, 1], [], []>} : vector<16x4xf32>, vector<4x1xf32>, vector<16x1xf32> -> vector<16x1xf32>
    %c0_17 = arith.constant 0 : index
    %c0_18 = arith.constant 0 : index
    %17 = vector.load %arg6[%c0_17, %c0_18] : memref<16x1xf32, #tpu.memory_space<vmem>>, vector<16x1xf32>
    %18 = arith.addf %16, %17 : vector<16x1xf32>
    %19 = arith.negf %18 : vector<16x1xf32>
    %20 = math.exp %19 : vector<16x1xf32>
    %cst_19 = arith.constant 1.000000e+00 : f32
    %21 = vector.broadcast %cst_19 : f32 to vector<16x1xf32>
    %22 = arith.addf %21, %20 : vector<16x1xf32>
    %23 = arith.divf %21, %22 : vector<16x1xf32>
    %cst_20 = arith.constant 1.000000e+00 : f32
    %24 = vector.broadcast %cst_20 : f32 to vector<16x1xf32>
    %25 = arith.addf %24, %23 : vector<16x1xf32>
    %26 = vector.broadcast %25 : vector<16x1xf32> to vector<16x100xf32>
    %27 = arith.mulf %4, %26 : vector<16x100xf32>
    %28 = tpu.concatenate %2, %27 in 0 : vector<16x100xf32>, vector<16x100xf32> -> vector<32x100xf32>
    %c0_21 = arith.constant 0 : index
    %c0_22 = arith.constant 0 : index
    %c0_23 = arith.constant 0 : index
    %29 = vector.load %arg7[%c0_21, %c0_22, %c0_23] : memref<9x16x32xbf16, #tpu.memory_space<vmem>>, vector<9x16x32xbf16>
    %c0_24 = arith.constant 0 : index
    %c0_25 = arith.constant 0 : index
    %30 = vector.load %arg8[%c0_24, %c0_25] : memref<16x1xf32, #tpu.memory_space<vmem>>, vector<16x1xf32>
    %c0_26 = arith.constant 0 : index
    %c0_27 = arith.constant 0 : index
    %31 = vector.load %arg9[%c0_26, %c0_27] : memref<16x1xf32, #tpu.memory_space<vmem>>, vector<16x1xf32>
    %c0_28 = arith.constant 0 : index
    %c0_29 = arith.constant 0 : index
    %32 = vector.load %arg10[%c0_28, %c0_29] : memref<16x1xf32, #tpu.memory_space<vmem>>, vector<16x1xf32>
    %33 = arith.truncf %28 : vector<32x100xf32> to vector<32x100xbf16>
    %cst_30 = arith.constant 0.000000e+00 : bf16
    %34 = vector.broadcast %cst_30 : bf16 to vector<32x11xbf16>
    %35 = tpu.concatenate %34, %33, %34 in 1 : vector<32x11xbf16>, vector<32x100xbf16>, vector<32x11xbf16> -> vector<32x122xbf16>
    %cst_31 = arith.constant 0.000000e+00 : f32
    %36 = vector.broadcast %cst_31 : f32 to vector<16x100xf32>
    %37 = vector.extract_strided_slice %35 {offsets = [0, 0], sizes = [32, 100], strides = [1, 1]} : vector<32x122xbf16> to vector<32x100xbf16>
    %38 = vector.extract_strided_slice %29 {offsets = [0, 0, 0], sizes = [1, 16, 32], strides = [1, 1, 1]} : vector<9x16x32xbf16> to vector<1x16x32xbf16>
    %39 = vector.shape_cast %38 : vector<1x16x32xbf16> to vector<16x32xbf16>
    %cst_32 = arith.constant dense<0.000000e+00> : vector<16x100xf32>
    %40 = tpu.matmul %39, %37, %cst_32 {dimension_numbers = #tpu.dot_dimension_numbers<[1], [0], [0], [1], [0, 0, 1, 1], [], []>} : vector<16x32xbf16>, vector<32x100xbf16>, vector<16x100xf32> -> vector<16x100xf32>
    %41 = arith.addf %36, %40 : vector<16x100xf32>
    %42 = vector.extract_strided_slice %35 {offsets = [0, 1], sizes = [32, 100], strides = [1, 1]} : vector<32x122xbf16> to vector<32x100xbf16>
    %43 = vector.extract_strided_slice %29 {offsets = [1, 0, 0], sizes = [1, 16, 32], strides = [1, 1, 1]} : vector<9x16x32xbf16> to vector<1x16x32xbf16>
    %44 = vector.shape_cast %43 : vector<1x16x32xbf16> to vector<16x32xbf16>
    %cst_33 = arith.constant dense<0.000000e+00> : vector<16x100xf32>
    %45 = tpu.matmul %44, %42, %cst_33 {dimension_numbers = #tpu.dot_dimension_numbers<[1], [0], [0], [1], [0, 0, 1, 1], [], []>} : vector<16x32xbf16>, vector<32x100xbf16>, vector<16x100xf32> -> vector<16x100xf32>
    %46 = arith.addf %41, %45 : vector<16x100xf32>
    %47 = vector.extract_strided_slice %35 {offsets = [0, 2], sizes = [32, 100], strides = [1, 1]} : vector<32x122xbf16> to vector<32x100xbf16>
    %48 = vector.extract_strided_slice %29 {offsets = [2, 0, 0], sizes = [1, 16, 32], strides = [1, 1, 1]} : vector<9x16x32xbf16> to vector<1x16x32xbf16>
    %49 = vector.shape_cast %48 : vector<1x16x32xbf16> to vector<16x32xbf16>
    %cst_34 = arith.constant dense<0.000000e+00> : vector<16x100xf32>
    %50 = tpu.matmul %49, %47, %cst_34 {dimension_numbers = #tpu.dot_dimension_numbers<[1], [0], [0], [1], [0, 0, 1, 1], [], []>} : vector<16x32xbf16>, vector<32x100xbf16>, vector<16x100xf32> -> vector<16x100xf32>
    %51 = arith.addf %46, %50 : vector<16x100xf32>
    %52 = vector.extract_strided_slice %35 {offsets = [0, 10], sizes = [32, 100], strides = [1, 1]} : vector<32x122xbf16> to vector<32x100xbf16>
    %53 = vector.extract_strided_slice %29 {offsets = [3, 0, 0], sizes = [1, 16, 32], strides = [1, 1, 1]} : vector<9x16x32xbf16> to vector<1x16x32xbf16>
    %54 = vector.shape_cast %53 : vector<1x16x32xbf16> to vector<16x32xbf16>
    %cst_35 = arith.constant dense<0.000000e+00> : vector<16x100xf32>
    %55 = tpu.matmul %54, %52, %cst_35 {dimension_numbers = #tpu.dot_dimension_numbers<[1], [0], [0], [1], [0, 0, 1, 1], [], []>} : vector<16x32xbf16>, vector<32x100xbf16>, vector<16x100xf32> -> vector<16x100xf32>
    %56 = arith.addf %51, %55 : vector<16x100xf32>
    %57 = vector.extract_strided_slice %35 {offsets = [0, 11], sizes = [32, 100], strides = [1, 1]} : vector<32x122xbf16> to vector<32x100xbf16>
    %58 = vector.extract_strided_slice %29 {offsets = [4, 0, 0], sizes = [1, 16, 32], strides = [1, 1, 1]} : vector<9x16x32xbf16> to vector<1x16x32xbf16>
    %59 = vector.shape_cast %58 : vector<1x16x32xbf16> to vector<16x32xbf16>
    %cst_36 = arith.constant dense<0.000000e+00> : vector<16x100xf32>
    %60 = tpu.matmul %59, %57, %cst_36 {dimension_numbers = #tpu.dot_dimension_numbers<[1], [0], [0], [1], [0, 0, 1, 1], [], []>} : vector<16x32xbf16>, vector<32x100xbf16>, vector<16x100xf32> -> vector<16x100xf32>
    %61 = arith.addf %56, %60 : vector<16x100xf32>
    %62 = vector.extract_strided_slice %35 {offsets = [0, 12], sizes = [32, 100], strides = [1, 1]} : vector<32x122xbf16> to vector<32x100xbf16>
    %63 = vector.extract_strided_slice %29 {offsets = [5, 0, 0], sizes = [1, 16, 32], strides = [1, 1, 1]} : vector<9x16x32xbf16> to vector<1x16x32xbf16>
    %64 = vector.shape_cast %63 : vector<1x16x32xbf16> to vector<16x32xbf16>
    %cst_37 = arith.constant dense<0.000000e+00> : vector<16x100xf32>
    %65 = tpu.matmul %64, %62, %cst_37 {dimension_numbers = #tpu.dot_dimension_numbers<[1], [0], [0], [1], [0, 0, 1, 1], [], []>} : vector<16x32xbf16>, vector<32x100xbf16>, vector<16x100xf32> -> vector<16x100xf32>
    %66 = arith.addf %61, %65 : vector<16x100xf32>
    %67 = vector.extract_strided_slice %35 {offsets = [0, 20], sizes = [32, 100], strides = [1, 1]} : vector<32x122xbf16> to vector<32x100xbf16>
    %68 = vector.extract_strided_slice %29 {offsets = [6, 0, 0], sizes = [1, 16, 32], strides = [1, 1, 1]} : vector<9x16x32xbf16> to vector<1x16x32xbf16>
    %69 = vector.shape_cast %68 : vector<1x16x32xbf16> to vector<16x32xbf16>
    %cst_38 = arith.constant dense<0.000000e+00> : vector<16x100xf32>
    %70 = tpu.matmul %69, %67, %cst_38 {dimension_numbers = #tpu.dot_dimension_numbers<[1], [0], [0], [1], [0, 0, 1, 1], [], []>} : vector<16x32xbf16>, vector<32x100xbf16>, vector<16x100xf32> -> vector<16x100xf32>
    %71 = arith.addf %66, %70 : vector<16x100xf32>
    %72 = vector.extract_strided_slice %35 {offsets = [0, 21], sizes = [32, 100], strides = [1, 1]} : vector<32x122xbf16> to vector<32x100xbf16>
    %73 = vector.extract_strided_slice %29 {offsets = [7, 0, 0], sizes = [1, 16, 32], strides = [1, 1, 1]} : vector<9x16x32xbf16> to vector<1x16x32xbf16>
    %74 = vector.shape_cast %73 : vector<1x16x32xbf16> to vector<16x32xbf16>
    %cst_39 = arith.constant dense<0.000000e+00> : vector<16x100xf32>
    %75 = tpu.matmul %74, %72, %cst_39 {dimension_numbers = #tpu.dot_dimension_numbers<[1], [0], [0], [1], [0, 0, 1, 1], [], []>} : vector<16x32xbf16>, vector<32x100xbf16>, vector<16x100xf32> -> vector<16x100xf32>
    %76 = arith.addf %71, %75 : vector<16x100xf32>
    %77 = vector.extract_strided_slice %35 {offsets = [0, 22], sizes = [32, 100], strides = [1, 1]} : vector<32x122xbf16> to vector<32x100xbf16>
    %78 = vector.extract_strided_slice %29 {offsets = [8, 0, 0], sizes = [1, 16, 32], strides = [1, 1, 1]} : vector<9x16x32xbf16> to vector<1x16x32xbf16>
    %79 = vector.shape_cast %78 : vector<1x16x32xbf16> to vector<16x32xbf16>
    %cst_40 = arith.constant dense<0.000000e+00> : vector<16x100xf32>
    %80 = tpu.matmul %79, %77, %cst_40 {dimension_numbers = #tpu.dot_dimension_numbers<[1], [0], [0], [1], [0, 0, 1, 1], [], []>} : vector<16x32xbf16>, vector<32x100xbf16>, vector<16x100xf32> -> vector<16x100xf32>
    %81 = arith.addf %76, %80 : vector<16x100xf32>
    %82 = vector.broadcast %30 : vector<16x1xf32> to vector<16x100xf32>
    %83 = arith.addf %81, %82 : vector<16x100xf32>
    %84 = vector.broadcast %0 : vector<1x100xf32> to vector<16x100xf32>
    %85 = arith.mulf %83, %84 : vector<16x100xf32>
    %cst_41 = arith.constant dense<0.000000e+00> : vector<16xf32>
    %86 = vector.multi_reduction <add>, %85, %cst_41 [1] : vector<16x100xf32> to vector<16xf32>
    %87 = vector.shape_cast %86 : vector<16xf32> to vector<16x1xf32>
    %cst_42 = arith.constant 1.562500e-02 : f32
    %88 = vector.broadcast %cst_42 : f32 to vector<16x1xf32>
    %89 = arith.mulf %87, %88 : vector<16x1xf32>
    %90 = vector.broadcast %89 : vector<16x1xf32> to vector<16x100xf32>
    %91 = arith.subf %83, %90 : vector<16x100xf32>
    %92 = vector.broadcast %0 : vector<1x100xf32> to vector<16x100xf32>
    %93 = arith.mulf %91, %92 : vector<16x100xf32>
    %94 = arith.mulf %93, %93 : vector<16x100xf32>
    %cst_43 = arith.constant dense<0.000000e+00> : vector<16xf32>
    %95 = vector.multi_reduction <add>, %94, %cst_43 [1] : vector<16x100xf32> to vector<16xf32>
    %96 = vector.shape_cast %95 : vector<16xf32> to vector<16x1xf32>
    %cst_44 = arith.constant 1.562500e-02 : f32
    %97 = vector.broadcast %cst_44 : f32 to vector<16x1xf32>
    %98 = arith.mulf %96, %97 : vector<16x1xf32>
    %99 = vector.broadcast %89 : vector<16x1xf32> to vector<16x100xf32>
    %100 = arith.subf %83, %99 : vector<16x100xf32>
    %cst_45 = arith.constant 9.99999974E-6 : f32
    %101 = vector.broadcast %cst_45 : f32 to vector<16x1xf32>
    %102 = arith.addf %98, %101 : vector<16x1xf32>
    %103 = math.rsqrt %102 : vector<16x1xf32>
    %104 = vector.broadcast %103 : vector<16x1xf32> to vector<16x100xf32>
    %105 = arith.mulf %100, %104 : vector<16x100xf32>
    %106 = vector.broadcast %31 : vector<16x1xf32> to vector<16x100xf32>
    %107 = arith.mulf %105, %106 : vector<16x100xf32>
    %108 = vector.broadcast %32 : vector<16x1xf32> to vector<16x100xf32>
    %109 = arith.addf %107, %108 : vector<16x100xf32>
    %cst_46 = arith.constant 0.000000e+00 : f32
    %110 = vector.broadcast %cst_46 : f32 to vector<16x100xf32>
    %111 = arith.cmpf oge, %109, %110 : vector<16x100xf32>
    %cst_47 = arith.constant 0.00999999977 : f32
    %112 = vector.broadcast %cst_47 : f32 to vector<16x100xf32>
    %113 = arith.mulf %112, %109 : vector<16x100xf32>
    %114 = arith.select %111, %109, %113 : vector<16x100xi1>, vector<16x100xf32>
    %115 = vector.broadcast %0 : vector<1x100xf32> to vector<16x100xf32>
    %116 = arith.mulf %114, %115 : vector<16x100xf32>
    %c0_48 = arith.constant 0 : index
    %c0_49 = arith.constant 0 : index
    %c0_50 = arith.constant 0 : index
    %117 = vector.load %arg11[%c0_48, %c0_49, %c0_50] : memref<9x16x16xbf16, #tpu.memory_space<vmem>>, vector<9x16x16xbf16>
    %c0_51 = arith.constant 0 : index
    %c0_52 = arith.constant 0 : index
    %118 = vector.load %arg12[%c0_51, %c0_52] : memref<16x1xf32, #tpu.memory_space<vmem>>, vector<16x1xf32>
    %c0_53 = arith.constant 0 : index
    %c0_54 = arith.constant 0 : index
    %119 = vector.load %arg13[%c0_53, %c0_54] : memref<16x1xf32, #tpu.memory_space<vmem>>, vector<16x1xf32>
    %c0_55 = arith.constant 0 : index
    %c0_56 = arith.constant 0 : index
    %120 = vector.load %arg14[%c0_55, %c0_56] : memref<16x1xf32, #tpu.memory_space<vmem>>, vector<16x1xf32>
    %121 = arith.truncf %116 : vector<16x100xf32> to vector<16x100xbf16>
    %cst_57 = arith.constant 0.000000e+00 : bf16
    %122 = vector.broadcast %cst_57 : bf16 to vector<16x11xbf16>
    %123 = tpu.concatenate %122, %121, %122 in 1 : vector<16x11xbf16>, vector<16x100xbf16>, vector<16x11xbf16> -> vector<16x122xbf16>
    %cst_58 = arith.constant 0.000000e+00 : f32
    %124 = vector.broadcast %cst_58 : f32 to vector<16x100xf32>
    %125 = vector.extract_strided_slice %123 {offsets = [0, 0], sizes = [16, 100], strides = [1, 1]} : vector<16x122xbf16> to vector<16x100xbf16>
    %126 = vector.extract_strided_slice %117 {offsets = [0, 0, 0], sizes = [1, 16, 16], strides = [1, 1, 1]} : vector<9x16x16xbf16> to vector<1x16x16xbf16>
    %127 = vector.shape_cast %126 : vector<1x16x16xbf16> to vector<16x16xbf16>
    %cst_59 = arith.constant dense<0.000000e+00> : vector<16x100xf32>
    %128 = tpu.matmul %127, %125, %cst_59 {dimension_numbers = #tpu.dot_dimension_numbers<[1], [0], [0], [1], [0, 0, 1, 1], [], []>} : vector<16x16xbf16>, vector<16x100xbf16>, vector<16x100xf32> -> vector<16x100xf32>
    %129 = arith.addf %124, %128 : vector<16x100xf32>
    %130 = vector.extract_strided_slice %123 {offsets = [0, 1], sizes = [16, 100], strides = [1, 1]} : vector<16x122xbf16> to vector<16x100xbf16>
    %131 = vector.extract_strided_slice %117 {offsets = [1, 0, 0], sizes = [1, 16, 16], strides = [1, 1, 1]} : vector<9x16x16xbf16> to vector<1x16x16xbf16>
    %132 = vector.shape_cast %131 : vector<1x16x16xbf16> to vector<16x16xbf16>
    %cst_60 = arith.constant dense<0.000000e+00> : vector<16x100xf32>
    %133 = tpu.matmul %132, %130, %cst_60 {dimension_numbers = #tpu.dot_dimension_numbers<[1], [0], [0], [1], [0, 0, 1, 1], [], []>} : vector<16x16xbf16>, vector<16x100xbf16>, vector<16x100xf32> -> vector<16x100xf32>
    %134 = arith.addf %129, %133 : vector<16x100xf32>
    %135 = vector.extract_strided_slice %123 {offsets = [0, 2], sizes = [16, 100], strides = [1, 1]} : vector<16x122xbf16> to vector<16x100xbf16>
    %136 = vector.extract_strided_slice %117 {offsets = [2, 0, 0], sizes = [1, 16, 16], strides = [1, 1, 1]} : vector<9x16x16xbf16> to vector<1x16x16xbf16>
    %137 = vector.shape_cast %136 : vector<1x16x16xbf16> to vector<16x16xbf16>
    %cst_61 = arith.constant dense<0.000000e+00> : vector<16x100xf32>
    %138 = tpu.matmul %137, %135, %cst_61 {dimension_numbers = #tpu.dot_dimension_numbers<[1], [0], [0], [1], [0, 0, 1, 1], [], []>} : vector<16x16xbf16>, vector<16x100xbf16>, vector<16x100xf32> -> vector<16x100xf32>
    %139 = arith.addf %134, %138 : vector<16x100xf32>
    %140 = vector.extract_strided_slice %123 {offsets = [0, 10], sizes = [16, 100], strides = [1, 1]} : vector<16x122xbf16> to vector<16x100xbf16>
    %141 = vector.extract_strided_slice %117 {offsets = [3, 0, 0], sizes = [1, 16, 16], strides = [1, 1, 1]} : vector<9x16x16xbf16> to vector<1x16x16xbf16>
    %142 = vector.shape_cast %141 : vector<1x16x16xbf16> to vector<16x16xbf16>
    %cst_62 = arith.constant dense<0.000000e+00> : vector<16x100xf32>
    %143 = tpu.matmul %142, %140, %cst_62 {dimension_numbers = #tpu.dot_dimension_numbers<[1], [0], [0], [1], [0, 0, 1, 1], [], []>} : vector<16x16xbf16>, vector<16x100xbf16>, vector<16x100xf32> -> vector<16x100xf32>
    %144 = arith.addf %139, %143 : vector<16x100xf32>
    %145 = vector.extract_strided_slice %123 {offsets = [0, 11], sizes = [16, 100], strides = [1, 1]} : vector<16x122xbf16> to vector<16x100xbf16>
    %146 = vector.extract_strided_slice %117 {offsets = [4, 0, 0], sizes = [1, 16, 16], strides = [1, 1, 1]} : vector<9x16x16xbf16> to vector<1x16x16xbf16>
    %147 = vector.shape_cast %146 : vector<1x16x16xbf16> to vector<16x16xbf16>
    %cst_63 = arith.constant dense<0.000000e+00> : vector<16x100xf32>
    %148 = tpu.matmul %147, %145, %cst_63 {dimension_numbers = #tpu.dot_dimension_numbers<[1], [0], [0], [1], [0, 0, 1, 1], [], []>} : vector<16x16xbf16>, vector<16x100xbf16>, vector<16x100xf32> -> vector<16x100xf32>
    %149 = arith.addf %144, %148 : vector<16x100xf32>
    %150 = vector.extract_strided_slice %123 {offsets = [0, 12], sizes = [16, 100], strides = [1, 1]} : vector<16x122xbf16> to vector<16x100xbf16>
    %151 = vector.extract_strided_slice %117 {offsets = [5, 0, 0], sizes = [1, 16, 16], strides = [1, 1, 1]} : vector<9x16x16xbf16> to vector<1x16x16xbf16>
    %152 = vector.shape_cast %151 : vector<1x16x16xbf16> to vector<16x16xbf16>
    %cst_64 = arith.constant dense<0.000000e+00> : vector<16x100xf32>
    %153 = tpu.matmul %152, %150, %cst_64 {dimension_numbers = #tpu.dot_dimension_numbers<[1], [0], [0], [1], [0, 0, 1, 1], [], []>} : vector<16x16xbf16>, vector<16x100xbf16>, vector<16x100xf32> -> vector<16x100xf32>
    %154 = arith.addf %149, %153 : vector<16x100xf32>
    %155 = vector.extract_strided_slice %123 {offsets = [0, 20], sizes = [16, 100], strides = [1, 1]} : vector<16x122xbf16> to vector<16x100xbf16>
    %156 = vector.extract_strided_slice %117 {offsets = [6, 0, 0], sizes = [1, 16, 16], strides = [1, 1, 1]} : vector<9x16x16xbf16> to vector<1x16x16xbf16>
    %157 = vector.shape_cast %156 : vector<1x16x16xbf16> to vector<16x16xbf16>
    %cst_65 = arith.constant dense<0.000000e+00> : vector<16x100xf32>
    %158 = tpu.matmul %157, %155, %cst_65 {dimension_numbers = #tpu.dot_dimension_numbers<[1], [0], [0], [1], [0, 0, 1, 1], [], []>} : vector<16x16xbf16>, vector<16x100xbf16>, vector<16x100xf32> -> vector<16x100xf32>
    %159 = arith.addf %154, %158 : vector<16x100xf32>
    %160 = vector.extract_strided_slice %123 {offsets = [0, 21], sizes = [16, 100], strides = [1, 1]} : vector<16x122xbf16> to vector<16x100xbf16>
    %161 = vector.extract_strided_slice %117 {offsets = [7, 0, 0], sizes = [1, 16, 16], strides = [1, 1, 1]} : vector<9x16x16xbf16> to vector<1x16x16xbf16>
    %162 = vector.shape_cast %161 : vector<1x16x16xbf16> to vector<16x16xbf16>
    %cst_66 = arith.constant dense<0.000000e+00> : vector<16x100xf32>
    %163 = tpu.matmul %162, %160, %cst_66 {dimension_numbers = #tpu.dot_dimension_numbers<[1], [0], [0], [1], [0, 0, 1, 1], [], []>} : vector<16x16xbf16>, vector<16x100xbf16>, vector<16x100xf32> -> vector<16x100xf32>
    %164 = arith.addf %159, %163 : vector<16x100xf32>
    %165 = vector.extract_strided_slice %123 {offsets = [0, 22], sizes = [16, 100], strides = [1, 1]} : vector<16x122xbf16> to vector<16x100xbf16>
    %166 = vector.extract_strided_slice %117 {offsets = [8, 0, 0], sizes = [1, 16, 16], strides = [1, 1, 1]} : vector<9x16x16xbf16> to vector<1x16x16xbf16>
    %167 = vector.shape_cast %166 : vector<1x16x16xbf16> to vector<16x16xbf16>
    %cst_67 = arith.constant dense<0.000000e+00> : vector<16x100xf32>
    %168 = tpu.matmul %167, %165, %cst_67 {dimension_numbers = #tpu.dot_dimension_numbers<[1], [0], [0], [1], [0, 0, 1, 1], [], []>} : vector<16x16xbf16>, vector<16x100xbf16>, vector<16x100xf32> -> vector<16x100xf32>
    %169 = arith.addf %164, %168 : vector<16x100xf32>
    %170 = vector.broadcast %118 : vector<16x1xf32> to vector<16x100xf32>
    %171 = arith.addf %169, %170 : vector<16x100xf32>
    %172 = vector.broadcast %0 : vector<1x100xf32> to vector<16x100xf32>
    %173 = arith.mulf %171, %172 : vector<16x100xf32>
    %cst_68 = arith.constant dense<0.000000e+00> : vector<16xf32>
    %174 = vector.multi_reduction <add>, %173, %cst_68 [1] : vector<16x100xf32> to vector<16xf32>
    %175 = vector.shape_cast %174 : vector<16xf32> to vector<16x1xf32>
    %cst_69 = arith.constant 1.562500e-02 : f32
    %176 = vector.broadcast %cst_69 : f32 to vector<16x1xf32>
    %177 = arith.mulf %175, %176 : vector<16x1xf32>
    %178 = vector.broadcast %177 : vector<16x1xf32> to vector<16x100xf32>
    %179 = arith.subf %171, %178 : vector<16x100xf32>
    %180 = vector.broadcast %0 : vector<1x100xf32> to vector<16x100xf32>
    %181 = arith.mulf %179, %180 : vector<16x100xf32>
    %182 = arith.mulf %181, %181 : vector<16x100xf32>
    %cst_70 = arith.constant dense<0.000000e+00> : vector<16xf32>
    %183 = vector.multi_reduction <add>, %182, %cst_70 [1] : vector<16x100xf32> to vector<16xf32>
    %184 = vector.shape_cast %183 : vector<16xf32> to vector<16x1xf32>
    %cst_71 = arith.constant 1.562500e-02 : f32
    %185 = vector.broadcast %cst_71 : f32 to vector<16x1xf32>
    %186 = arith.mulf %184, %185 : vector<16x1xf32>
    %187 = vector.broadcast %177 : vector<16x1xf32> to vector<16x100xf32>
    %188 = arith.subf %171, %187 : vector<16x100xf32>
    %cst_72 = arith.constant 9.99999974E-6 : f32
    %189 = vector.broadcast %cst_72 : f32 to vector<16x1xf32>
    %190 = arith.addf %186, %189 : vector<16x1xf32>
    %191 = math.rsqrt %190 : vector<16x1xf32>
    %192 = vector.broadcast %191 : vector<16x1xf32> to vector<16x100xf32>
    %193 = arith.mulf %188, %192 : vector<16x100xf32>
    %194 = vector.broadcast %119 : vector<16x1xf32> to vector<16x100xf32>
    %195 = arith.mulf %193, %194 : vector<16x100xf32>
    %196 = vector.broadcast %120 : vector<16x1xf32> to vector<16x100xf32>
    %197 = arith.addf %195, %196 : vector<16x100xf32>
    %cst_73 = arith.constant 0.000000e+00 : f32
    %198 = vector.broadcast %cst_73 : f32 to vector<16x100xf32>
    %199 = arith.cmpf oge, %197, %198 : vector<16x100xf32>
    %cst_74 = arith.constant 0.00999999977 : f32
    %200 = vector.broadcast %cst_74 : f32 to vector<16x100xf32>
    %201 = arith.mulf %200, %197 : vector<16x100xf32>
    %202 = arith.select %199, %197, %201 : vector<16x100xi1>, vector<16x100xf32>
    %203 = vector.broadcast %0 : vector<1x100xf32> to vector<16x100xf32>
    %204 = arith.mulf %202, %203 : vector<16x100xf32>
    %c0_75 = arith.constant 0 : index
    %c0_76 = arith.constant 0 : index
    %c0_77 = arith.constant 0 : index
    %205 = vector.load %arg16[%c0_75, %c0_76, %c0_77] : memref<1x16x100xf32, #tpu.memory_space<vmem>>, vector<1x16x100xf32>
    %206 = vector.shape_cast %205 : vector<1x16x100xf32> to vector<16x100xf32>
    %207 = vector.shape_cast %204 : vector<16x100xf32> to vector<1x16x100xf32>
    tpu.vector_store %arg16[%c0_75, %c0_76, %c0_77], %207 {strides = array<i32>} : memref<1x16x100xf32, #tpu.memory_space<vmem>>, vector<1x16x100xf32>,
    return
  }
  func.func @transform_0(%arg0: i32) -> (i32, i32, i32) {
    %c0_i32 = arith.constant 0 : i32
    %c0_i32_0 = arith.constant 0 : i32
    %c0_i32_1 = arith.constant 0 : i32
    return %arg0, %c0_i32, %c0_i32_0 : i32, i32, i32
  }
  func.func @transform_1(%arg0: i32) -> (i32, i32, i32) {
    %c0_i32 = arith.constant 0 : i32
    %c0_i32_0 = arith.constant 0 : i32
    %c0_i32_1 = arith.constant 0 : i32
    return %arg0, %c0_i32, %c0_i32_0 : i32, i32, i32
  }
  func.func @transform_2(%arg0: i32) -> (i32, i32) {
    %c0_i32 = arith.constant 0 : i32
    %c0_i32_0 = arith.constant 0 : i32
    %c0_i32_1 = arith.constant 0 : i32
    return %c0_i32, %c0_i32_0 : i32, i32
  }
  func.func @transform_3(%arg0: i32) -> (i32, i32) {
    %c0_i32 = arith.constant 0 : i32
    %c0_i32_0 = arith.constant 0 : i32
    %c0_i32_1 = arith.constant 0 : i32
    return %c0_i32, %c0_i32_0 : i32, i32
  }
  func.func @transform_4(%arg0: i32) -> (i32, i32) {
    %c0_i32 = arith.constant 0 : i32
    %c0_i32_0 = arith.constant 0 : i32
    %c0_i32_1 = arith.constant 0 : i32
    return %c0_i32, %c0_i32_0 : i32, i32
  }
  func.func @transform_5(%arg0: i32) -> (i32, i32) {
    %c0_i32 = arith.constant 0 : i32
    %c0_i32_0 = arith.constant 0 : i32
    %c0_i32_1 = arith.constant 0 : i32
    return %c0_i32, %c0_i32_0 : i32, i32
  }
  func.func @transform_6(%arg0: i32) -> (i32, i32, i32) {
    %c0_i32 = arith.constant 0 : i32
    %c0_i32_0 = arith.constant 0 : i32
    %c0_i32_1 = arith.constant 0 : i32
    %c0_i32_2 = arith.constant 0 : i32
    return %c0_i32, %c0_i32_0, %c0_i32_1 : i32, i32, i32
  }
  func.func @transform_7(%arg0: i32) -> (i32, i32) {
    %c0_i32 = arith.constant 0 : i32
    %c0_i32_0 = arith.constant 0 : i32
    %c0_i32_1 = arith.constant 0 : i32
    return %c0_i32, %c0_i32_0 : i32, i32
  }
  func.func @transform_8(%arg0: i32) -> (i32, i32) {
    %c0_i32 = arith.constant 0 : i32
    %c0_i32_0 = arith.constant 0 : i32
    %c0_i32_1 = arith.constant 0 : i32
    return %c0_i32, %c0_i32_0 : i32, i32
  }
  func.func @transform_9(%arg0: i32) -> (i32, i32) {
    %c0_i32 = arith.constant 0 : i32
    %c0_i32_0 = arith.constant 0 : i32
    %c0_i32_1 = arith.constant 0 : i32
    return %c0_i32, %c0_i32_0 : i32, i32
  }
  func.func @transform_10(%arg0: i32) -> (i32, i32, i32) {
    %c0_i32 = arith.constant 0 : i32
    %c0_i32_0 = arith.constant 0 : i32
    %c0_i32_1 = arith.constant 0 : i32
    %c0_i32_2 = arith.constant 0 : i32
    return %c0_i32, %c0_i32_0, %c0_i32_1 : i32, i32, i32
  }
  func.func @transform_11(%arg0: i32) -> (i32, i32) {
    %c0_i32 = arith.constant 0 : i32
    %c0_i32_0 = arith.constant 0 : i32
    %c0_i32_1 = arith.constant 0 : i32
    return %c0_i32, %c0_i32_0 : i32, i32
  }
  func.func @transform_12(%arg0: i32) -> (i32, i32) {
    %c0_i32 = arith.constant 0 : i32
    %c0_i32_0 = arith.constant 0 : i32
    %c0_i32_1 = arith.constant 0 : i32
    return %c0_i32, %c0_i32_0 : i32, i32
  }
  func.func @transform_13(%arg0: i32) -> (i32, i32) {
    %c0_i32 = arith.constant 0 : i32
    %c0_i32_0 = arith.constant 0 : i32
    %c0_i32_1 = arith.constant 0 : i32
    return %c0_i32, %c0_i32_0 : i32, i32
  }
  func.func @transform_14(%arg0: i32) -> (i32, i32) {
    %c0_i32 = arith.constant 0 : i32
    %c0_i32_0 = arith.constant 0 : i32
    %c0_i32_1 = arith.constant 0 : i32
    return %c0_i32, %c0_i32_0 : i32, i32
  }
  func.func @transform_15(%arg0: i32) -> (i32, i32, i32) {
    %c0_i32 = arith.constant 0 : i32
    %c0_i32_0 = arith.constant 0 : i32
    %c0_i32_1 = arith.constant 0 : i32
    return %arg0, %c0_i32, %c0_i32_0 : i32, i32, i32
  }
}

module attributes {stable_mosaic.version = 11 : i64} {
  func.func @_seg_kernel(%arg0: i32, %arg1: memref<1x8x324xf32, #tpu.memory_space<vmem>>, %arg2: memref<3x8xbf16, #tpu.memory_space<vmem>>, %arg3: memref<1x3x324xf32, #tpu.memory_space<vmem>>) attributes {dimension_semantics = [#tpu.dimension_semantics<parallel>], iteration_bounds = array<i64: 2>, scalar_prefetch = 0 : i64, scratch_operands = 0 : i64, tpu.core_type = #tpu.core_type<tc>, window_params = [{transform_indices = @transform_0, window_bounds = array<i64: 1, 8, 324>}, {pipeline_mode = #tpu.pipeline_mode<synchronous>, transform_indices = @transform_1, window_bounds = array<i64: 3, 8>}, {transform_indices = @transform_2, window_bounds = array<i64: 1, 3, 324>}]} {
    %c0 = arith.constant 0 : index
    %c0_0 = arith.constant 0 : index
    %0 = vector.load %arg2[%c0, %c0_0] : memref<3x8xbf16, #tpu.memory_space<vmem>>, vector<3x8xbf16>
    %c0_1 = arith.constant 0 : index
    %c0_2 = arith.constant 0 : index
    %c0_3 = arith.constant 0 : index
    %1 = vector.load %arg1[%c0_1, %c0_2, %c0_3] : memref<1x8x324xf32, #tpu.memory_space<vmem>>, vector<1x8x324xf32>
    %2 = vector.shape_cast %1 : vector<1x8x324xf32> to vector<8x324xf32>
    %3 = arith.truncf %2 : vector<8x324xf32> to vector<8x324xbf16>
    %cst = arith.constant dense<0.000000e+00> : vector<3x324xf32>
    %4 = tpu.matmul %0, %3, %cst {dimension_numbers = #tpu.dot_dimension_numbers<[1], [0], [0], [1], [0, 0, 1, 1], [], []>} : vector<3x8xbf16>, vector<8x324xbf16>, vector<3x324xf32> -> vector<3x324xf32>
    %c0_4 = arith.constant 0 : index
    %c0_5 = arith.constant 0 : index
    %c0_6 = arith.constant 0 : index
    %5 = vector.load %arg3[%c0_4, %c0_5, %c0_6] : memref<1x3x324xf32, #tpu.memory_space<vmem>>, vector<1x3x324xf32>
    %6 = vector.shape_cast %5 : vector<1x3x324xf32> to vector<3x324xf32>
    %7 = vector.shape_cast %4 : vector<3x324xf32> to vector<1x3x324xf32>
    tpu.vector_store %arg3[%c0_4, %c0_5, %c0_6], %7 {strides = array<i32>} : memref<1x3x324xf32, #tpu.memory_space<vmem>>, vector<1x3x324xf32>,
    return
  }
  func.func @transform_0(%arg0: i32) -> (i32, i32, i32) {
    %c0_i32 = arith.constant 0 : i32
    %c0_i32_0 = arith.constant 0 : i32
    %c0_i32_1 = arith.constant 0 : i32
    return %arg0, %c0_i32, %c0_i32_0 : i32, i32, i32
  }
  func.func @transform_1(%arg0: i32) -> (i32, i32) {
    %c0_i32 = arith.constant 0 : i32
    %c0_i32_0 = arith.constant 0 : i32
    %c0_i32_1 = arith.constant 0 : i32
    return %c0_i32, %c0_i32_0 : i32, i32
  }
  func.func @transform_2(%arg0: i32) -> (i32, i32, i32) {
    %c0_i32 = arith.constant 0 : i32
    %c0_i32_0 = arith.constant 0 : i32
    %c0_i32_1 = arith.constant 0 : i32
    return %arg0, %c0_i32, %c0_i32_0 : i32, i32, i32
  }
}

module attributes {stable_mosaic.version = 11 : i64} {
  func.func @kernel(%arg0: i32, %arg1: memref<1x8x324xf32, #tpu.memory_space<vmem>>, %arg2: memref<1x8x324xf32, #tpu.memory_space<vmem>>, %arg3: memref<2x8xf32, #tpu.memory_space<vmem>>, %arg4: memref<2x1xf32, #tpu.memory_space<vmem>>, %arg5: memref<8x2xf32, #tpu.memory_space<vmem>>, %arg6: memref<8x1xf32, #tpu.memory_space<vmem>>, %arg7: memref<9x8x16xbf16, #tpu.memory_space<vmem>>, %arg8: memref<8x1xf32, #tpu.memory_space<vmem>>, %arg9: memref<8x1xf32, #tpu.memory_space<vmem>>, %arg10: memref<8x1xf32, #tpu.memory_space<vmem>>, %arg11: memref<9x8x8xbf16, #tpu.memory_space<vmem>>, %arg12: memref<8x1xf32, #tpu.memory_space<vmem>>, %arg13: memref<8x1xf32, #tpu.memory_space<vmem>>, %arg14: memref<8x1xf32, #tpu.memory_space<vmem>>, %arg15: memref<1x324xf32, #tpu.memory_space<vmem>>, %arg16: memref<1x8x324xf32, #tpu.memory_space<vmem>>) attributes {dimension_semantics = [#tpu.dimension_semantics<parallel>], iteration_bounds = array<i64: 2>, scalar_prefetch = 0 : i64, scratch_operands = 0 : i64, tpu.core_type = #tpu.core_type<tc>, window_params = [{transform_indices = @transform_0, window_bounds = array<i64: 1, 8, 324>}, {transform_indices = @transform_1, window_bounds = array<i64: 1, 8, 324>}, {pipeline_mode = #tpu.pipeline_mode<synchronous>, transform_indices = @transform_2, window_bounds = array<i64: 2, 8>}, {pipeline_mode = #tpu.pipeline_mode<synchronous>, transform_indices = @transform_3, window_bounds = array<i64: 2, 1>}, {pipeline_mode = #tpu.pipeline_mode<synchronous>, transform_indices = @transform_4, window_bounds = array<i64: 8, 2>}, {pipeline_mode = #tpu.pipeline_mode<synchronous>, transform_indices = @transform_5, window_bounds = array<i64: 8, 1>}, {pipeline_mode = #tpu.pipeline_mode<synchronous>, transform_indices = @transform_6, window_bounds = array<i64: 9, 8, 16>}, {pipeline_mode = #tpu.pipeline_mode<synchronous>, transform_indices = @transform_7, window_bounds = array<i64: 8, 1>}, {pipeline_mode = #tpu.pipeline_mode<synchronous>, transform_indices = @transform_8, window_bounds = array<i64: 8, 1>}, {pipeline_mode = #tpu.pipeline_mode<synchronous>, transform_indices = @transform_9, window_bounds = array<i64: 8, 1>}, {pipeline_mode = #tpu.pipeline_mode<synchronous>, transform_indices = @transform_10, window_bounds = array<i64: 9, 8, 8>}, {pipeline_mode = #tpu.pipeline_mode<synchronous>, transform_indices = @transform_11, window_bounds = array<i64: 8, 1>}, {pipeline_mode = #tpu.pipeline_mode<synchronous>, transform_indices = @transform_12, window_bounds = array<i64: 8, 1>}, {pipeline_mode = #tpu.pipeline_mode<synchronous>, transform_indices = @transform_13, window_bounds = array<i64: 8, 1>}, {pipeline_mode = #tpu.pipeline_mode<synchronous>, transform_indices = @transform_14, window_bounds = array<i64: 1, 324>}, {transform_indices = @transform_15, window_bounds = array<i64: 1, 8, 324>}]} {
    %c0 = arith.constant 0 : index
    %c0_0 = arith.constant 0 : index
    %0 = vector.load %arg15[%c0, %c0_0] : memref<1x324xf32, #tpu.memory_space<vmem>>, vector<1x324xf32>
    %c0_1 = arith.constant 0 : index
    %c0_2 = arith.constant 0 : index
    %c0_3 = arith.constant 0 : index
    %1 = vector.load %arg1[%c0_1, %c0_2, %c0_3] : memref<1x8x324xf32, #tpu.memory_space<vmem>>, vector<1x8x324xf32>
    %2 = vector.shape_cast %1 : vector<1x8x324xf32> to vector<8x324xf32>
    %c0_4 = arith.constant 0 : index
    %c0_5 = arith.constant 0 : index
    %c0_6 = arith.constant 0 : index
    %3 = vector.load %arg2[%c0_4, %c0_5, %c0_6] : memref<1x8x324xf32, #tpu.memory_space<vmem>>, vector<1x8x324xf32>
    %4 = vector.shape_cast %3 : vector<1x8x324xf32> to vector<8x324xf32>
    %cst = arith.constant dense<0.000000e+00> : vector<8xf32>
    %5 = vector.multi_reduction <add>, %4, %cst [1] : vector<8x324xf32> to vector<8xf32>
    %6 = vector.shape_cast %5 : vector<8xf32> to vector<8x1xf32>
    %cst_7 = arith.constant 3.906250e-03 : f32
    %7 = vector.broadcast %cst_7 : f32 to vector<8x1xf32>
    %8 = arith.mulf %6, %7 : vector<8x1xf32>
    %c0_8 = arith.constant 0 : index
    %c0_9 = arith.constant 0 : index
    %9 = vector.load %arg3[%c0_8, %c0_9] : memref<2x8xf32, #tpu.memory_space<vmem>>, vector<2x8xf32>
    %cst_10 = arith.constant dense<0.000000e+00> : vector<2x1xf32>
    %10 = tpu.matmul %9, %8, %cst_10 {dimension_numbers = #tpu.dot_dimension_numbers<[1], [0], [0], [1], [0, 0, 1, 1], [], []>} : vector<2x8xf32>, vector<8x1xf32>, vector<2x1xf32> -> vector<2x1xf32>
    %c0_11 = arith.constant 0 : index
    %c0_12 = arith.constant 0 : index
    %11 = vector.load %arg4[%c0_11, %c0_12] : memref<2x1xf32, #tpu.memory_space<vmem>>, vector<2x1xf32>
    %12 = arith.addf %10, %11 : vector<2x1xf32>
    %cst_13 = arith.constant 0.000000e+00 : f32
    %13 = vector.broadcast %cst_13 : f32 to vector<2x1xf32>
    %14 = arith.maximumf %12, %13 : vector<2x1xf32>
    %c0_14 = arith.constant 0 : index
    %c0_15 = arith.constant 0 : index
    %15 = vector.load %arg5[%c0_14, %c0_15] : memref<8x2xf32, #tpu.memory_space<vmem>>, vector<8x2xf32>
    %cst_16 = arith.constant dense<0.000000e+00> : vector<8x1xf32>
    %16 = tpu.matmul %15, %14, %cst_16 {dimension_numbers = #tpu.dot_dimension_numbers<[1], [0], [0], [1], [0, 0, 1, 1], [], []>} : vector<8x2xf32>, vector<2x1xf32>, vector<8x1xf32> -> vector<8x1xf32>
    %c0_17 = arith.constant 0 : index
    %c0_18 = arith.constant 0 : index
    %17 = vector.load %arg6[%c0_17, %c0_18] : memref<8x1xf32, #tpu.memory_space<vmem>>, vector<8x1xf32>
    %18 = arith.addf %16, %17 : vector<8x1xf32>
    %19 = arith.negf %18 : vector<8x1xf32>
    %20 = math.exp %19 : vector<8x1xf32>
    %cst_19 = arith.constant 1.000000e+00 : f32
    %21 = vector.broadcast %cst_19 : f32 to vector<8x1xf32>
    %22 = arith.addf %21, %20 : vector<8x1xf32>
    %23 = arith.divf %21, %22 : vector<8x1xf32>
    %cst_20 = arith.constant 1.000000e+00 : f32
    %24 = vector.broadcast %cst_20 : f32 to vector<8x1xf32>
    %25 = arith.addf %24, %23 : vector<8x1xf32>
    %26 = vector.broadcast %25 : vector<8x1xf32> to vector<8x324xf32>
    %27 = arith.mulf %4, %26 : vector<8x324xf32>
    %28 = tpu.concatenate %2, %27 in 0 : vector<8x324xf32>, vector<8x324xf32> -> vector<16x324xf32>
    %c0_21 = arith.constant 0 : index
    %c0_22 = arith.constant 0 : index
    %c0_23 = arith.constant 0 : index
    %29 = vector.load %arg7[%c0_21, %c0_22, %c0_23] : memref<9x8x16xbf16, #tpu.memory_space<vmem>>, vector<9x8x16xbf16>
    %c0_24 = arith.constant 0 : index
    %c0_25 = arith.constant 0 : index
    %30 = vector.load %arg8[%c0_24, %c0_25] : memref<8x1xf32, #tpu.memory_space<vmem>>, vector<8x1xf32>
    %c0_26 = arith.constant 0 : index
    %c0_27 = arith.constant 0 : index
    %31 = vector.load %arg9[%c0_26, %c0_27] : memref<8x1xf32, #tpu.memory_space<vmem>>, vector<8x1xf32>
    %c0_28 = arith.constant 0 : index
    %c0_29 = arith.constant 0 : index
    %32 = vector.load %arg10[%c0_28, %c0_29] : memref<8x1xf32, #tpu.memory_space<vmem>>, vector<8x1xf32>
    %33 = arith.truncf %28 : vector<16x324xf32> to vector<16x324xbf16>
    %cst_30 = arith.constant 0.000000e+00 : bf16
    %34 = vector.broadcast %cst_30 : bf16 to vector<16x19xbf16>
    %35 = tpu.concatenate %34, %33, %34 in 1 : vector<16x19xbf16>, vector<16x324xbf16>, vector<16x19xbf16> -> vector<16x362xbf16>
    %cst_31 = arith.constant 0.000000e+00 : f32
    %36 = vector.broadcast %cst_31 : f32 to vector<8x324xf32>
    %37 = vector.extract_strided_slice %35 {offsets = [0, 0], sizes = [16, 324], strides = [1, 1]} : vector<16x362xbf16> to vector<16x324xbf16>
    %38 = vector.extract_strided_slice %29 {offsets = [0, 0, 0], sizes = [1, 8, 16], strides = [1, 1, 1]} : vector<9x8x16xbf16> to vector<1x8x16xbf16>
    %39 = vector.shape_cast %38 : vector<1x8x16xbf16> to vector<8x16xbf16>
    %cst_32 = arith.constant dense<0.000000e+00> : vector<8x324xf32>
    %40 = tpu.matmul %39, %37, %cst_32 {dimension_numbers = #tpu.dot_dimension_numbers<[1], [0], [0], [1], [0, 0, 1, 1], [], []>} : vector<8x16xbf16>, vector<16x324xbf16>, vector<8x324xf32> -> vector<8x324xf32>
    %41 = arith.addf %36, %40 : vector<8x324xf32>
    %42 = vector.extract_strided_slice %35 {offsets = [0, 1], sizes = [16, 324], strides = [1, 1]} : vector<16x362xbf16> to vector<16x324xbf16>
    %43 = vector.extract_strided_slice %29 {offsets = [1, 0, 0], sizes = [1, 8, 16], strides = [1, 1, 1]} : vector<9x8x16xbf16> to vector<1x8x16xbf16>
    %44 = vector.shape_cast %43 : vector<1x8x16xbf16> to vector<8x16xbf16>
    %cst_33 = arith.constant dense<0.000000e+00> : vector<8x324xf32>
    %45 = tpu.matmul %44, %42, %cst_33 {dimension_numbers = #tpu.dot_dimension_numbers<[1], [0], [0], [1], [0, 0, 1, 1], [], []>} : vector<8x16xbf16>, vector<16x324xbf16>, vector<8x324xf32> -> vector<8x324xf32>
    %46 = arith.addf %41, %45 : vector<8x324xf32>
    %47 = vector.extract_strided_slice %35 {offsets = [0, 2], sizes = [16, 324], strides = [1, 1]} : vector<16x362xbf16> to vector<16x324xbf16>
    %48 = vector.extract_strided_slice %29 {offsets = [2, 0, 0], sizes = [1, 8, 16], strides = [1, 1, 1]} : vector<9x8x16xbf16> to vector<1x8x16xbf16>
    %49 = vector.shape_cast %48 : vector<1x8x16xbf16> to vector<8x16xbf16>
    %cst_34 = arith.constant dense<0.000000e+00> : vector<8x324xf32>
    %50 = tpu.matmul %49, %47, %cst_34 {dimension_numbers = #tpu.dot_dimension_numbers<[1], [0], [0], [1], [0, 0, 1, 1], [], []>} : vector<8x16xbf16>, vector<16x324xbf16>, vector<8x324xf32> -> vector<8x324xf32>
    %51 = arith.addf %46, %50 : vector<8x324xf32>
    %52 = vector.extract_strided_slice %35 {offsets = [0, 18], sizes = [16, 324], strides = [1, 1]} : vector<16x362xbf16> to vector<16x324xbf16>
    %53 = vector.extract_strided_slice %29 {offsets = [3, 0, 0], sizes = [1, 8, 16], strides = [1, 1, 1]} : vector<9x8x16xbf16> to vector<1x8x16xbf16>
    %54 = vector.shape_cast %53 : vector<1x8x16xbf16> to vector<8x16xbf16>
    %cst_35 = arith.constant dense<0.000000e+00> : vector<8x324xf32>
    %55 = tpu.matmul %54, %52, %cst_35 {dimension_numbers = #tpu.dot_dimension_numbers<[1], [0], [0], [1], [0, 0, 1, 1], [], []>} : vector<8x16xbf16>, vector<16x324xbf16>, vector<8x324xf32> -> vector<8x324xf32>
    %56 = arith.addf %51, %55 : vector<8x324xf32>
    %57 = vector.extract_strided_slice %35 {offsets = [0, 19], sizes = [16, 324], strides = [1, 1]} : vector<16x362xbf16> to vector<16x324xbf16>
    %58 = vector.extract_strided_slice %29 {offsets = [4, 0, 0], sizes = [1, 8, 16], strides = [1, 1, 1]} : vector<9x8x16xbf16> to vector<1x8x16xbf16>
    %59 = vector.shape_cast %58 : vector<1x8x16xbf16> to vector<8x16xbf16>
    %cst_36 = arith.constant dense<0.000000e+00> : vector<8x324xf32>
    %60 = tpu.matmul %59, %57, %cst_36 {dimension_numbers = #tpu.dot_dimension_numbers<[1], [0], [0], [1], [0, 0, 1, 1], [], []>} : vector<8x16xbf16>, vector<16x324xbf16>, vector<8x324xf32> -> vector<8x324xf32>
    %61 = arith.addf %56, %60 : vector<8x324xf32>
    %62 = vector.extract_strided_slice %35 {offsets = [0, 20], sizes = [16, 324], strides = [1, 1]} : vector<16x362xbf16> to vector<16x324xbf16>
    %63 = vector.extract_strided_slice %29 {offsets = [5, 0, 0], sizes = [1, 8, 16], strides = [1, 1, 1]} : vector<9x8x16xbf16> to vector<1x8x16xbf16>
    %64 = vector.shape_cast %63 : vector<1x8x16xbf16> to vector<8x16xbf16>
    %cst_37 = arith.constant dense<0.000000e+00> : vector<8x324xf32>
    %65 = tpu.matmul %64, %62, %cst_37 {dimension_numbers = #tpu.dot_dimension_numbers<[1], [0], [0], [1], [0, 0, 1, 1], [], []>} : vector<8x16xbf16>, vector<16x324xbf16>, vector<8x324xf32> -> vector<8x324xf32>
    %66 = arith.addf %61, %65 : vector<8x324xf32>
    %67 = vector.extract_strided_slice %35 {offsets = [0, 36], sizes = [16, 324], strides = [1, 1]} : vector<16x362xbf16> to vector<16x324xbf16>
    %68 = vector.extract_strided_slice %29 {offsets = [6, 0, 0], sizes = [1, 8, 16], strides = [1, 1, 1]} : vector<9x8x16xbf16> to vector<1x8x16xbf16>
    %69 = vector.shape_cast %68 : vector<1x8x16xbf16> to vector<8x16xbf16>
    %cst_38 = arith.constant dense<0.000000e+00> : vector<8x324xf32>
    %70 = tpu.matmul %69, %67, %cst_38 {dimension_numbers = #tpu.dot_dimension_numbers<[1], [0], [0], [1], [0, 0, 1, 1], [], []>} : vector<8x16xbf16>, vector<16x324xbf16>, vector<8x324xf32> -> vector<8x324xf32>
    %71 = arith.addf %66, %70 : vector<8x324xf32>
    %72 = vector.extract_strided_slice %35 {offsets = [0, 37], sizes = [16, 324], strides = [1, 1]} : vector<16x362xbf16> to vector<16x324xbf16>
    %73 = vector.extract_strided_slice %29 {offsets = [7, 0, 0], sizes = [1, 8, 16], strides = [1, 1, 1]} : vector<9x8x16xbf16> to vector<1x8x16xbf16>
    %74 = vector.shape_cast %73 : vector<1x8x16xbf16> to vector<8x16xbf16>
    %cst_39 = arith.constant dense<0.000000e+00> : vector<8x324xf32>
    %75 = tpu.matmul %74, %72, %cst_39 {dimension_numbers = #tpu.dot_dimension_numbers<[1], [0], [0], [1], [0, 0, 1, 1], [], []>} : vector<8x16xbf16>, vector<16x324xbf16>, vector<8x324xf32> -> vector<8x324xf32>
    %76 = arith.addf %71, %75 : vector<8x324xf32>
    %77 = vector.extract_strided_slice %35 {offsets = [0, 38], sizes = [16, 324], strides = [1, 1]} : vector<16x362xbf16> to vector<16x324xbf16>
    %78 = vector.extract_strided_slice %29 {offsets = [8, 0, 0], sizes = [1, 8, 16], strides = [1, 1, 1]} : vector<9x8x16xbf16> to vector<1x8x16xbf16>
    %79 = vector.shape_cast %78 : vector<1x8x16xbf16> to vector<8x16xbf16>
    %cst_40 = arith.constant dense<0.000000e+00> : vector<8x324xf32>
    %80 = tpu.matmul %79, %77, %cst_40 {dimension_numbers = #tpu.dot_dimension_numbers<[1], [0], [0], [1], [0, 0, 1, 1], [], []>} : vector<8x16xbf16>, vector<16x324xbf16>, vector<8x324xf32> -> vector<8x324xf32>
    %81 = arith.addf %76, %80 : vector<8x324xf32>
    %82 = vector.broadcast %30 : vector<8x1xf32> to vector<8x324xf32>
    %83 = arith.addf %81, %82 : vector<8x324xf32>
    %84 = vector.broadcast %0 : vector<1x324xf32> to vector<8x324xf32>
    %85 = arith.mulf %83, %84 : vector<8x324xf32>
    %cst_41 = arith.constant dense<0.000000e+00> : vector<8xf32>
    %86 = vector.multi_reduction <add>, %85, %cst_41 [1] : vector<8x324xf32> to vector<8xf32>
    %87 = vector.shape_cast %86 : vector<8xf32> to vector<8x1xf32>
    %cst_42 = arith.constant 3.906250e-03 : f32
    %88 = vector.broadcast %cst_42 : f32 to vector<8x1xf32>
    %89 = arith.mulf %87, %88 : vector<8x1xf32>
    %90 = vector.broadcast %89 : vector<8x1xf32> to vector<8x324xf32>
    %91 = arith.subf %83, %90 : vector<8x324xf32>
    %92 = vector.broadcast %0 : vector<1x324xf32> to vector<8x324xf32>
    %93 = arith.mulf %91, %92 : vector<8x324xf32>
    %94 = arith.mulf %93, %93 : vector<8x324xf32>
    %cst_43 = arith.constant dense<0.000000e+00> : vector<8xf32>
    %95 = vector.multi_reduction <add>, %94, %cst_43 [1] : vector<8x324xf32> to vector<8xf32>
    %96 = vector.shape_cast %95 : vector<8xf32> to vector<8x1xf32>
    %cst_44 = arith.constant 3.906250e-03 : f32
    %97 = vector.broadcast %cst_44 : f32 to vector<8x1xf32>
    %98 = arith.mulf %96, %97 : vector<8x1xf32>
    %99 = vector.broadcast %89 : vector<8x1xf32> to vector<8x324xf32>
    %100 = arith.subf %83, %99 : vector<8x324xf32>
    %cst_45 = arith.constant 9.99999974E-6 : f32
    %101 = vector.broadcast %cst_45 : f32 to vector<8x1xf32>
    %102 = arith.addf %98, %101 : vector<8x1xf32>
    %103 = math.rsqrt %102 : vector<8x1xf32>
    %104 = vector.broadcast %103 : vector<8x1xf32> to vector<8x324xf32>
    %105 = arith.mulf %100, %104 : vector<8x324xf32>
    %106 = vector.broadcast %31 : vector<8x1xf32> to vector<8x324xf32>
    %107 = arith.mulf %105, %106 : vector<8x324xf32>
    %108 = vector.broadcast %32 : vector<8x1xf32> to vector<8x324xf32>
    %109 = arith.addf %107, %108 : vector<8x324xf32>
    %cst_46 = arith.constant 0.000000e+00 : f32
    %110 = vector.broadcast %cst_46 : f32 to vector<8x324xf32>
    %111 = arith.cmpf oge, %109, %110 : vector<8x324xf32>
    %cst_47 = arith.constant 0.00999999977 : f32
    %112 = vector.broadcast %cst_47 : f32 to vector<8x324xf32>
    %113 = arith.mulf %112, %109 : vector<8x324xf32>
    %114 = arith.select %111, %109, %113 : vector<8x324xi1>, vector<8x324xf32>
    %115 = vector.broadcast %0 : vector<1x324xf32> to vector<8x324xf32>
    %116 = arith.mulf %114, %115 : vector<8x324xf32>
    %c0_48 = arith.constant 0 : index
    %c0_49 = arith.constant 0 : index
    %c0_50 = arith.constant 0 : index
    %117 = vector.load %arg11[%c0_48, %c0_49, %c0_50] : memref<9x8x8xbf16, #tpu.memory_space<vmem>>, vector<9x8x8xbf16>
    %c0_51 = arith.constant 0 : index
    %c0_52 = arith.constant 0 : index
    %118 = vector.load %arg12[%c0_51, %c0_52] : memref<8x1xf32, #tpu.memory_space<vmem>>, vector<8x1xf32>
    %c0_53 = arith.constant 0 : index
    %c0_54 = arith.constant 0 : index
    %119 = vector.load %arg13[%c0_53, %c0_54] : memref<8x1xf32, #tpu.memory_space<vmem>>, vector<8x1xf32>
    %c0_55 = arith.constant 0 : index
    %c0_56 = arith.constant 0 : index
    %120 = vector.load %arg14[%c0_55, %c0_56] : memref<8x1xf32, #tpu.memory_space<vmem>>, vector<8x1xf32>
    %121 = arith.truncf %116 : vector<8x324xf32> to vector<8x324xbf16>
    %cst_57 = arith.constant 0.000000e+00 : bf16
    %122 = vector.broadcast %cst_57 : bf16 to vector<8x19xbf16>
    %123 = tpu.concatenate %122, %121, %122 in 1 : vector<8x19xbf16>, vector<8x324xbf16>, vector<8x19xbf16> -> vector<8x362xbf16>
    %cst_58 = arith.constant 0.000000e+00 : f32
    %124 = vector.broadcast %cst_58 : f32 to vector<8x324xf32>
    %125 = vector.extract_strided_slice %123 {offsets = [0, 0], sizes = [8, 324], strides = [1, 1]} : vector<8x362xbf16> to vector<8x324xbf16>
    %126 = vector.extract_strided_slice %117 {offsets = [0, 0, 0], sizes = [1, 8, 8], strides = [1, 1, 1]} : vector<9x8x8xbf16> to vector<1x8x8xbf16>
    %127 = vector.shape_cast %126 : vector<1x8x8xbf16> to vector<8x8xbf16>
    %cst_59 = arith.constant dense<0.000000e+00> : vector<8x324xf32>
    %128 = tpu.matmul %127, %125, %cst_59 {dimension_numbers = #tpu.dot_dimension_numbers<[1], [0], [0], [1], [0, 0, 1, 1], [], []>} : vector<8x8xbf16>, vector<8x324xbf16>, vector<8x324xf32> -> vector<8x324xf32>
    %129 = arith.addf %124, %128 : vector<8x324xf32>
    %130 = vector.extract_strided_slice %123 {offsets = [0, 1], sizes = [8, 324], strides = [1, 1]} : vector<8x362xbf16> to vector<8x324xbf16>
    %131 = vector.extract_strided_slice %117 {offsets = [1, 0, 0], sizes = [1, 8, 8], strides = [1, 1, 1]} : vector<9x8x8xbf16> to vector<1x8x8xbf16>
    %132 = vector.shape_cast %131 : vector<1x8x8xbf16> to vector<8x8xbf16>
    %cst_60 = arith.constant dense<0.000000e+00> : vector<8x324xf32>
    %133 = tpu.matmul %132, %130, %cst_60 {dimension_numbers = #tpu.dot_dimension_numbers<[1], [0], [0], [1], [0, 0, 1, 1], [], []>} : vector<8x8xbf16>, vector<8x324xbf16>, vector<8x324xf32> -> vector<8x324xf32>
    %134 = arith.addf %129, %133 : vector<8x324xf32>
    %135 = vector.extract_strided_slice %123 {offsets = [0, 2], sizes = [8, 324], strides = [1, 1]} : vector<8x362xbf16> to vector<8x324xbf16>
    %136 = vector.extract_strided_slice %117 {offsets = [2, 0, 0], sizes = [1, 8, 8], strides = [1, 1, 1]} : vector<9x8x8xbf16> to vector<1x8x8xbf16>
    %137 = vector.shape_cast %136 : vector<1x8x8xbf16> to vector<8x8xbf16>
    %cst_61 = arith.constant dense<0.000000e+00> : vector<8x324xf32>
    %138 = tpu.matmul %137, %135, %cst_61 {dimension_numbers = #tpu.dot_dimension_numbers<[1], [0], [0], [1], [0, 0, 1, 1], [], []>} : vector<8x8xbf16>, vector<8x324xbf16>, vector<8x324xf32> -> vector<8x324xf32>
    %139 = arith.addf %134, %138 : vector<8x324xf32>
    %140 = vector.extract_strided_slice %123 {offsets = [0, 18], sizes = [8, 324], strides = [1, 1]} : vector<8x362xbf16> to vector<8x324xbf16>
    %141 = vector.extract_strided_slice %117 {offsets = [3, 0, 0], sizes = [1, 8, 8], strides = [1, 1, 1]} : vector<9x8x8xbf16> to vector<1x8x8xbf16>
    %142 = vector.shape_cast %141 : vector<1x8x8xbf16> to vector<8x8xbf16>
    %cst_62 = arith.constant dense<0.000000e+00> : vector<8x324xf32>
    %143 = tpu.matmul %142, %140, %cst_62 {dimension_numbers = #tpu.dot_dimension_numbers<[1], [0], [0], [1], [0, 0, 1, 1], [], []>} : vector<8x8xbf16>, vector<8x324xbf16>, vector<8x324xf32> -> vector<8x324xf32>
    %144 = arith.addf %139, %143 : vector<8x324xf32>
    %145 = vector.extract_strided_slice %123 {offsets = [0, 19], sizes = [8, 324], strides = [1, 1]} : vector<8x362xbf16> to vector<8x324xbf16>
    %146 = vector.extract_strided_slice %117 {offsets = [4, 0, 0], sizes = [1, 8, 8], strides = [1, 1, 1]} : vector<9x8x8xbf16> to vector<1x8x8xbf16>
    %147 = vector.shape_cast %146 : vector<1x8x8xbf16> to vector<8x8xbf16>
    %cst_63 = arith.constant dense<0.000000e+00> : vector<8x324xf32>
    %148 = tpu.matmul %147, %145, %cst_63 {dimension_numbers = #tpu.dot_dimension_numbers<[1], [0], [0], [1], [0, 0, 1, 1], [], []>} : vector<8x8xbf16>, vector<8x324xbf16>, vector<8x324xf32> -> vector<8x324xf32>
    %149 = arith.addf %144, %148 : vector<8x324xf32>
    %150 = vector.extract_strided_slice %123 {offsets = [0, 20], sizes = [8, 324], strides = [1, 1]} : vector<8x362xbf16> to vector<8x324xbf16>
    %151 = vector.extract_strided_slice %117 {offsets = [5, 0, 0], sizes = [1, 8, 8], strides = [1, 1, 1]} : vector<9x8x8xbf16> to vector<1x8x8xbf16>
    %152 = vector.shape_cast %151 : vector<1x8x8xbf16> to vector<8x8xbf16>
    %cst_64 = arith.constant dense<0.000000e+00> : vector<8x324xf32>
    %153 = tpu.matmul %152, %150, %cst_64 {dimension_numbers = #tpu.dot_dimension_numbers<[1], [0], [0], [1], [0, 0, 1, 1], [], []>} : vector<8x8xbf16>, vector<8x324xbf16>, vector<8x324xf32> -> vector<8x324xf32>
    %154 = arith.addf %149, %153 : vector<8x324xf32>
    %155 = vector.extract_strided_slice %123 {offsets = [0, 36], sizes = [8, 324], strides = [1, 1]} : vector<8x362xbf16> to vector<8x324xbf16>
    %156 = vector.extract_strided_slice %117 {offsets = [6, 0, 0], sizes = [1, 8, 8], strides = [1, 1, 1]} : vector<9x8x8xbf16> to vector<1x8x8xbf16>
    %157 = vector.shape_cast %156 : vector<1x8x8xbf16> to vector<8x8xbf16>
    %cst_65 = arith.constant dense<0.000000e+00> : vector<8x324xf32>
    %158 = tpu.matmul %157, %155, %cst_65 {dimension_numbers = #tpu.dot_dimension_numbers<[1], [0], [0], [1], [0, 0, 1, 1], [], []>} : vector<8x8xbf16>, vector<8x324xbf16>, vector<8x324xf32> -> vector<8x324xf32>
    %159 = arith.addf %154, %158 : vector<8x324xf32>
    %160 = vector.extract_strided_slice %123 {offsets = [0, 37], sizes = [8, 324], strides = [1, 1]} : vector<8x362xbf16> to vector<8x324xbf16>
    %161 = vector.extract_strided_slice %117 {offsets = [7, 0, 0], sizes = [1, 8, 8], strides = [1, 1, 1]} : vector<9x8x8xbf16> to vector<1x8x8xbf16>
    %162 = vector.shape_cast %161 : vector<1x8x8xbf16> to vector<8x8xbf16>
    %cst_66 = arith.constant dense<0.000000e+00> : vector<8x324xf32>
    %163 = tpu.matmul %162, %160, %cst_66 {dimension_numbers = #tpu.dot_dimension_numbers<[1], [0], [0], [1], [0, 0, 1, 1], [], []>} : vector<8x8xbf16>, vector<8x324xbf16>, vector<8x324xf32> -> vector<8x324xf32>
    %164 = arith.addf %159, %163 : vector<8x324xf32>
    %165 = vector.extract_strided_slice %123 {offsets = [0, 38], sizes = [8, 324], strides = [1, 1]} : vector<8x362xbf16> to vector<8x324xbf16>
    %166 = vector.extract_strided_slice %117 {offsets = [8, 0, 0], sizes = [1, 8, 8], strides = [1, 1, 1]} : vector<9x8x8xbf16> to vector<1x8x8xbf16>
    %167 = vector.shape_cast %166 : vector<1x8x8xbf16> to vector<8x8xbf16>
    %cst_67 = arith.constant dense<0.000000e+00> : vector<8x324xf32>
    %168 = tpu.matmul %167, %165, %cst_67 {dimension_numbers = #tpu.dot_dimension_numbers<[1], [0], [0], [1], [0, 0, 1, 1], [], []>} : vector<8x8xbf16>, vector<8x324xbf16>, vector<8x324xf32> -> vector<8x324xf32>
    %169 = arith.addf %164, %168 : vector<8x324xf32>
    %170 = vector.broadcast %118 : vector<8x1xf32> to vector<8x324xf32>
    %171 = arith.addf %169, %170 : vector<8x324xf32>
    %172 = vector.broadcast %0 : vector<1x324xf32> to vector<8x324xf32>
    %173 = arith.mulf %171, %172 : vector<8x324xf32>
    %cst_68 = arith.constant dense<0.000000e+00> : vector<8xf32>
    %174 = vector.multi_reduction <add>, %173, %cst_68 [1] : vector<8x324xf32> to vector<8xf32>
    %175 = vector.shape_cast %174 : vector<8xf32> to vector<8x1xf32>
    %cst_69 = arith.constant 3.906250e-03 : f32
    %176 = vector.broadcast %cst_69 : f32 to vector<8x1xf32>
    %177 = arith.mulf %175, %176 : vector<8x1xf32>
    %178 = vector.broadcast %177 : vector<8x1xf32> to vector<8x324xf32>
    %179 = arith.subf %171, %178 : vector<8x324xf32>
    %180 = vector.broadcast %0 : vector<1x324xf32> to vector<8x324xf32>
    %181 = arith.mulf %179, %180 : vector<8x324xf32>
    %182 = arith.mulf %181, %181 : vector<8x324xf32>
    %cst_70 = arith.constant dense<0.000000e+00> : vector<8xf32>
    %183 = vector.multi_reduction <add>, %182, %cst_70 [1] : vector<8x324xf32> to vector<8xf32>
    %184 = vector.shape_cast %183 : vector<8xf32> to vector<8x1xf32>
    %cst_71 = arith.constant 3.906250e-03 : f32
    %185 = vector.broadcast %cst_71 : f32 to vector<8x1xf32>
    %186 = arith.mulf %184, %185 : vector<8x1xf32>
    %187 = vector.broadcast %177 : vector<8x1xf32> to vector<8x324xf32>
    %188 = arith.subf %171, %187 : vector<8x324xf32>
    %cst_72 = arith.constant 9.99999974E-6 : f32
    %189 = vector.broadcast %cst_72 : f32 to vector<8x1xf32>
    %190 = arith.addf %186, %189 : vector<8x1xf32>
    %191 = math.rsqrt %190 : vector<8x1xf32>
    %192 = vector.broadcast %191 : vector<8x1xf32> to vector<8x324xf32>
    %193 = arith.mulf %188, %192 : vector<8x324xf32>
    %194 = vector.broadcast %119 : vector<8x1xf32> to vector<8x324xf32>
    %195 = arith.mulf %193, %194 : vector<8x324xf32>
    %196 = vector.broadcast %120 : vector<8x1xf32> to vector<8x324xf32>
    %197 = arith.addf %195, %196 : vector<8x324xf32>
    %cst_73 = arith.constant 0.000000e+00 : f32
    %198 = vector.broadcast %cst_73 : f32 to vector<8x324xf32>
    %199 = arith.cmpf oge, %197, %198 : vector<8x324xf32>
    %cst_74 = arith.constant 0.00999999977 : f32
    %200 = vector.broadcast %cst_74 : f32 to vector<8x324xf32>
    %201 = arith.mulf %200, %197 : vector<8x324xf32>
    %202 = arith.select %199, %197, %201 : vector<8x324xi1>, vector<8x324xf32>
    %203 = vector.broadcast %0 : vector<1x324xf32> to vector<8x324xf32>
    %204 = arith.mulf %202, %203 : vector<8x324xf32>
    %c0_75 = arith.constant 0 : index
    %c0_76 = arith.constant 0 : index
    %c0_77 = arith.constant 0 : index
    %205 = vector.load %arg16[%c0_75, %c0_76, %c0_77] : memref<1x8x324xf32, #tpu.memory_space<vmem>>, vector<1x8x324xf32>
    %206 = vector.shape_cast %205 : vector<1x8x324xf32> to vector<8x324xf32>
    %207 = vector.shape_cast %204 : vector<8x324xf32> to vector<1x8x324xf32>
    tpu.vector_store %arg16[%c0_75, %c0_76, %c0_77], %207 {strides = array<i32>} : memref<1x8x324xf32, #tpu.memory_space<vmem>>, vector<1x8x324xf32>,
    return
  }
  func.func @transform_0(%arg0: i32) -> (i32, i32, i32) {
    %c0_i32 = arith.constant 0 : i32
    %c0_i32_0 = arith.constant 0 : i32
    %c0_i32_1 = arith.constant 0 : i32
    return %arg0, %c0_i32, %c0_i32_0 : i32, i32, i32
  }
  func.func @transform_1(%arg0: i32) -> (i32, i32, i32) {
    %c0_i32 = arith.constant 0 : i32
    %c0_i32_0 = arith.constant 0 : i32
    %c0_i32_1 = arith.constant 0 : i32
    return %arg0, %c0_i32, %c0_i32_0 : i32, i32, i32
  }
  func.func @transform_2(%arg0: i32) -> (i32, i32) {
    %c0_i32 = arith.constant 0 : i32
    %c0_i32_0 = arith.constant 0 : i32
    %c0_i32_1 = arith.constant 0 : i32
    return %c0_i32, %c0_i32_0 : i32, i32
  }
  func.func @transform_3(%arg0: i32) -> (i32, i32) {
    %c0_i32 = arith.constant 0 : i32
    %c0_i32_0 = arith.constant 0 : i32
    %c0_i32_1 = arith.constant 0 : i32
    return %c0_i32, %c0_i32_0 : i32, i32
  }
  func.func @transform_4(%arg0: i32) -> (i32, i32) {
    %c0_i32 = arith.constant 0 : i32
    %c0_i32_0 = arith.constant 0 : i32
    %c0_i32_1 = arith.constant 0 : i32
    return %c0_i32, %c0_i32_0 : i32, i32
  }
  func.func @transform_5(%arg0: i32) -> (i32, i32) {
    %c0_i32 = arith.constant 0 : i32
    %c0_i32_0 = arith.constant 0 : i32
    %c0_i32_1 = arith.constant 0 : i32
    return %c0_i32, %c0_i32_0 : i32, i32
  }
  func.func @transform_6(%arg0: i32) -> (i32, i32, i32) {
    %c0_i32 = arith.constant 0 : i32
    %c0_i32_0 = arith.constant 0 : i32
    %c0_i32_1 = arith.constant 0 : i32
    %c0_i32_2 = arith.constant 0 : i32
    return %c0_i32, %c0_i32_0, %c0_i32_1 : i32, i32, i32
  }
  func.func @transform_7(%arg0: i32) -> (i32, i32) {
    %c0_i32 = arith.constant 0 : i32
    %c0_i32_0 = arith.constant 0 : i32
    %c0_i32_1 = arith.constant 0 : i32
    return %c0_i32, %c0_i32_0 : i32, i32
  }
  func.func @transform_8(%arg0: i32) -> (i32, i32) {
    %c0_i32 = arith.constant 0 : i32
    %c0_i32_0 = arith.constant 0 : i32
    %c0_i32_1 = arith.constant 0 : i32
    return %c0_i32, %c0_i32_0 : i32, i32
  }
  func.func @transform_9(%arg0: i32) -> (i32, i32) {
    %c0_i32 = arith.constant 0 : i32
    %c0_i32_0 = arith.constant 0 : i32
    %c0_i32_1 = arith.constant 0 : i32
    return %c0_i32, %c0_i32_0 : i32, i32
  }
  func.func @transform_10(%arg0: i32) -> (i32, i32, i32) {
    %c0_i32 = arith.constant 0 : i32
    %c0_i32_0 = arith.constant 0 : i32
    %c0_i32_1 = arith.constant 0 : i32
    %c0_i32_2 = arith.constant 0 : i32
    return %c0_i32, %c0_i32_0, %c0_i32_1 : i32, i32, i32
  }
  func.func @transform_11(%arg0: i32) -> (i32, i32) {
    %c0_i32 = arith.constant 0 : i32
    %c0_i32_0 = arith.constant 0 : i32
    %c0_i32_1 = arith.constant 0 : i32
    return %c0_i32, %c0_i32_0 : i32, i32
  }
  func.func @transform_12(%arg0: i32) -> (i32, i32) {
    %c0_i32 = arith.constant 0 : i32
    %c0_i32_0 = arith.constant 0 : i32
    %c0_i32_1 = arith.constant 0 : i32
    return %c0_i32, %c0_i32_0 : i32, i32
  }
  func.func @transform_13(%arg0: i32) -> (i32, i32) {
    %c0_i32 = arith.constant 0 : i32
    %c0_i32_0 = arith.constant 0 : i32
    %c0_i32_1 = arith.constant 0 : i32
    return %c0_i32, %c0_i32_0 : i32, i32
  }
  func.func @transform_14(%arg0: i32) -> (i32, i32) {
    %c0_i32 = arith.constant 0 : i32
    %c0_i32_0 = arith.constant 0 : i32
    %c0_i32_1 = arith.constant 0 : i32
    return %c0_i32, %c0_i32_0 : i32, i32
  }
  func.func @transform_15(%arg0: i32) -> (i32, i32, i32) {
    %c0_i32 = arith.constant 0 : i32
    %c0_i32_0 = arith.constant 0 : i32
    %c0_i32_1 = arith.constant 0 : i32
    return %arg0, %c0_i32, %c0_i32_0 : i32, i32, i32
  }
}

</mosaic_0001>

<bundles_post_ra>
// kernel: usenet_forward.10
= control target key start
LH: loop header
LB: loop body
LE: loop exit
PB: predicated region body
PF: predicated region fallthrough
CT: control target
= control target key end

     0   :  { %s2803_s13 = smov 0   ;;  %s3197_s0 = inlined_call_operand.vmem [shape: f32[2,4,324], index: 0, kind: input, shape index: {}]   ;;  %s3198_s1 = inlined_call_operand.vmem [shape: bf16[9,8,4], index: 1, kind: input, shape index: {}]   ;;  %s3199_s2 = inlined_call_operand.vmem [shape: f32[8,1], index: 2, kind: input, shape index: {}]   ;;  %s3200_s3 = inlined_call_operand.vmem [shape: f32[8,1], index: 3, kind: input, shape index: {}]   ;;  %s3201_s4 = inlined_call_operand.vmem [shape: f32[8,1], index: 4, kind: input, shape index: {}]   ;;  %s3202_s5 = inlined_call_operand.vmem [shape: bf16[9,8,8], index: 5, kind: input, shape index: {}]   ;;  %s3203_s6 = inlined_call_operand.vmem [shape: f32[8,1], index: 6, kind: input, shape index: {}]   ;;  %s3204_s7 = inlined_call_operand.vmem [shape: f32[8,1], index: 7, kind: input, shape index: {}]   ;;  %s3205_s8 = inlined_call_operand.vmem [shape: f32[8,1], index: 8, kind: input, shape index: {}]   ;;  %s3206_s9 = inlined_call_operand.vmem [shape: f32[1,324], index: 9, kind: input, shape index: {}]   ;;  %s3207_s10 = inlined_call_operand.vmem [shape: f32[2,8,324], index: 10, kind: output, shape index: {}]  }
   0x1 LB: > { %s2492_s14 = sadd.s32 4294967295, %s2734_s13   ;;  %p2496_p0 = scmp.ge.s32.totalorder %s2734_s13, 1  ;;  %s2734_s13 = sphi %s2803_s13, %s20_s13  }
   0x2   : > { %p312_p1 = scmp.lt.s32.totalorder %s2734_s13, 3 }
   0x4   : > { %p313_p2 = pnand %p2496_p0, %p312_p1 }
   0x5   : > { %p350_p3 = scmp.lt.s32.totalorder (!%p313_p2), %s2492_s14, 1  ;;  %s2736_s19 = smov (!%p313_p2), 19   ;;  %v2737_v6 = vmov (!%p313_p2), 0.0   ;;  %vm391_vm0 = vcmask (!%p313_p2), 154624   ;;  %vm2738_vm1 = vmmov (!%p313_p2), 0   ;;  %v2739_v8 = vmov (!%p313_p2), 0  }
   0x6   : > { %316 = sbr.rel (%p313_p2) target bundleno = 1737 (0x6c9), region = 60  ;;  %2591 = vmatprep.subr.bf16.mxu1 (!%p313_p2), %v2737_v6  ;;  %2593 = vmatprep.mubr.msk.bf16.mxu1 (!%p313_p2), %vm2738_vm1, %v2737_v6  ;;  %s2740_s20 = smov (!%p313_p2), 127   ;;  %vm398_vm2 = vcmask (!%p313_p2), 711680   ;;  %v373_v15 = vld [vmem:[%s3199_s2] sm:$0xff] (!%p313_p2)  ;;  %vm409_vm3 = vcmask (!%p313_p2), 1039360   ;;  %vm416_vm4 = vcmask (!%p313_p2), 1041408  }
   0x7   : > { %458 = vmatprep.mubr.bf16.mxu0 (!%p313_p2), %v2739_v8  ;;  %2721 = vset.pattern.permute.xlu1 (!%p313_p2), %v2739_v8  ;;  %s2741_s21 = smov (!%p313_p2), 126   ;;  %s2742_s22 = smov (!%p313_p2), 110   ;;  %v365_v24 = vld [vmem:[%s3198_s1 + $0x4] sm:$0xf] (!%p313_p2)  ;;  %vm412_vm5 = vcmask (!%p313_p2), 31744   ;;  %vm604_vm6 = vcmask (!%p313_p2), 1031168  }
   0x8   : > { %2722 = vset.pattern.permute.xlu0 (!%p313_p2), %v2739_v8  ;;  %s2743_s23 = smov (!%p313_p2), 109   ;;  %s2744_s24 = smov (!%p313_p2), 108   ;;  %v364_v32 = vld [vmem:[%s3198_s1] sm:$0xf] (!%p313_p2)  ;;  %vm709_vm7 = vcmask (!%p313_p2), 900096   ;;  %vm814_vm8 = vcmask (!%p313_p2), 891904  }
   0x9   : > { %s2745_s25 = smov (!%p313_p2), 92   ;;  %s2746_s26 = smov (!%p313_p2), 91   ;;  %v366_v41 = vld [vmem:[%s3198_s1 + $0x8] sm:$0xf] (!%p313_p2)  ;;  %v367_v49 = vld [vmem:[%s3198_s1 + $0xc] sm:$0xf] (!%p313_p2) }
   0xa   : > { %s2747_s27 = smov (!%p313_p2), 90   ;;  %vm919_vm9 = vcmask (!%p313_p2), 883712   ;;  %v368_v57 = vld [vmem:[%s3198_s1 + $0x10] sm:$0xf] (!%p313_p2)  ;;  %vm1024_vm10 = vcmask (!%p313_p2), 752640   ;;  %vm1129_vm11 = vcmask (!%p313_p2), 744448  }
   0xb   : > { %vm1234_vm12 = vcmask (!%p313_p2), 736256   ;;  %vm1361_vm13 = vcmask (!%p313_p2), 556032  }
   0xd   : > { %s3209_s14 = smov (!%p350_p3, %s2492_s14), 1 }
   0xe   : > { %s2699_s15 = smul.u32 12, %s3209_s14 }
  0x10   : > { %s354_s18 = scalar_lea.vmem %s3197_s0, %s2699_s15 }
  0x11   : > { %v362_v0 = vld [vmem:[%s354_s18] sm:$0xff]  ;;  %v363_v3 = vld [vmem:[%s354_s18 + $0x8] sm:$0xf] }
  0x12   : > { %v379_v1 = vpack.c.bf16 %v362_v0, %v362_v0  ;;  %v377_v2 = vcombine.high %v362_v0, %v362_v0  ;;  %v381_v5 = vpack.c.bf16 %v363_v3, %v363_v3  ;;  %v369_v0 = vld [vmem:[%s3198_s1 + $0x14] sm:$0xf] }
  0x14   : > { %385 = vrot.lane.b32.xlu1 %v379_v1, %s2736_s19  ;;  %v380_v4 = vpack.c.bf16 %v377_v2, %v377_v2 }
  0x16   : > { %387 = vrot.lane.b32.xlu0 %v380_v4, %s2736_s19 }
  0x1a   : > { %389 = vrot.lane.b32.xlu0 %v381_v5, %s2736_s19 }
  0x86   : > { %v386_v7 = vpop.permute.xlu1 %385 }
  0x87   : > { %v2826_v9 = vsel %vm391_vm0, 0, %v386_v7 }
  0x88   : > { %v388_v10 = vpop.permute.xlu0 %387  ;;  %403 = vrot.lane.b32.xlu1 %v2826_v9, %s2740_s20  ;;  %v510_v28 = vsel %vm416_vm4, %v2826_v9, 0 }
  0x89   : > { %v392_v11 = vsel %vm391_vm0, %v386_v7, %v388_v10 }
  0x8a   : > { %405 = vrot.lane.b32.xlu0 %v392_v11, %s2740_s20 }
  0x8c   : > { %v390_v12 = vpop.permute.xlu0 %389 }
  0x8d   : > { %v393_v13 = vsel %vm391_vm0, %v388_v10, %v390_v12 }
  0x8e   : > { %v400_v14 = vsel %vm398_vm2, %v393_v13, 0  ;;  %598 = vrot.lane.b32.xlu0 %v2826_v9, %s2741_s21 }
  0x8f   : > { %407 = vrot.lane.b32.xlu1 %v400_v14, %s2740_s20  ;;  %v515_v27 = vsel %vm416_vm4, %v400_v14, 0 }
  0x92   : > { %602 = vrot.lane.b32.xlu0 %v400_v14, %s2741_s21 }
  0x93   : > { %600 = vrot.lane.b32.xlu1 %v392_v11, %s2741_s21 }
  0x96   : > { %705 = vrot.lane.b32.xlu0 %v392_v11, %s2742_s22 }
  0x97   : > { %703 = vrot.lane.b32.xlu1 %v2826_v9, %s2742_s22 }
  0x9a   : > { %808 = vrot.lane.b32.xlu0 %v2826_v9, %s2743_s23 }
  0x9b   : > { %707 = vrot.lane.b32.xlu1 %v400_v14, %s2742_s22 }
  0x9e   : > { %812 = vrot.lane.b32.xlu0 %v400_v14, %s2743_s23 }
  0x9f   : > { %810 = vrot.lane.b32.xlu1 %v392_v11, %s2743_s23 }
  0xa2   : > { %915 = vrot.lane.b32.xlu0 %v392_v11, %s2744_s24 }
  0xa3   : > { %913 = vrot.lane.b32.xlu1 %v2826_v9, %s2744_s24 }
  0xa6   : > { %1018 = vrot.lane.b32.xlu0 %v2826_v9, %s2745_s25 }
  0xa7   : > { %917 = vrot.lane.b32.xlu1 %v400_v14, %s2744_s24 }
  0xaa   : > { %1022 = vrot.lane.b32.xlu0 %v400_v14, %s2745_s25 }
  0xab   : > { %1020 = vrot.lane.b32.xlu1 %v392_v11, %s2745_s25 }
  0xae   : > { %1125 = vrot.lane.b32.xlu0 %v392_v11, %s2746_s26 }
  0xaf   : > { %1123 = vrot.lane.b32.xlu1 %v2826_v9, %s2746_s26 }
  0xb2   : > { %1228 = vrot.lane.b32.xlu0 %v2826_v9, %s2747_s27  ;;  %v370_v9 = vld [vmem:[%s3198_s1 + $0x18] sm:$0xf] }
  0xb3   : > { %1127 = vrot.lane.b32.xlu1 %v400_v14, %s2746_s26 }
  0xb6   : > { %1232 = vrot.lane.b32.xlu0 %v400_v14, %s2747_s27 }
  0xb7   : > { %1230 = vrot.lane.b32.xlu1 %v392_v11, %s2747_s27 }
  0xbb   : > { %1335 = vperm.xlu1 %2721, %v373_v15  }
  0xfa   : > { %v404_v16 = vpop.permute.xlu1 %403 }
  0xfc   : > { %v406_v17 = vpop.permute.xlu0 %405 }
  0xfd   : > { %v410_v19 = vsel %vm409_vm3, %v404_v16, %v406_v17  ;;  %v371_v16 = vld [vmem:[%s3198_s1 + $0x1c] sm:$0xf] }
  0xfe   : > { %v418_v23 = vsel %vm416_vm4, %v410_v19, 0 }
 0x100   : > { %v599_v18 = vpop.permute.xlu0 %598 }
 0x101   : > { %v408_v20 = vpop.permute.xlu1 %407 }
 0x102   : > { %v411_v21 = vsel %vm409_vm3, %v406_v17, %v408_v20  ;;  %v424_v22 = vsel %vm416_vm4, %v408_v20, 0  ;;  %v372_v20 = vld [vmem:[%s3198_s1 + $0x20] sm:$0xf] }
 0x103   : > { %2499 = vmatprep.subr.msk.bf16.mxu0 %vm416_vm4, %v411_v21  ;;  %2592 = vmatpush3.bf16.msra.mxu1 %v424_v22 }
 0x104   : > { %427 = vmatpush1.bf16.msra.mxu0 %v418_v23  ;;  %v603_v25 = vpop.permute.xlu0 %602  ;;  %2597 = vmatprep.subr.bf16.mxu1 %v2737_v6 }
 0x105   : > { %v601_v26 = vpop.permute.xlu1 %600  ;;  %2502 = vmatprep.subr.msk.bf16.mxu0 %vm416_vm4, %v392_v11  ;;  %v617_v36 = vsel %vm416_vm4, %v603_v25, 0 }
 0x106   : > { %2594 = vmatmul.mubr.msk.bf16.vlgmr.msra.gmra.mrb[0].mxu1 %vm412_vm5, %v365_v24  ;;  %v606_v29 = vsel %vm604_vm6, %v601_v26, %v603_v25  ;;  %v605_v33 = vsel %vm604_vm6, %v599_v18, %v601_v26 }
 0x107   : > { %2500 = vmatmul.mubr.msk.bf16.vlgmr.msra.gmra.mrb[0].mxu0 %vm412_vm5, %v365_v24  ;;  %2598 = vmatpush3.bf16.msra.mxu1 %v515_v27  ;;  %v611_v38 = vsel %vm416_vm4, %v605_v33, 0 }
 0x108   : > { %518 = vmatpush1.bf16.msra.mxu0 %v510_v28  ;;  %v706_v30 = vpop.permute.xlu0 %705  ;;  %2599 = vmatprep.mubr.msk.bf16.mxu1 %vm2738_vm1, %v2737_v6 }
 0x109   : > { %v704_v31 = vpop.permute.xlu1 %703  ;;  %2505 = vmatprep.subr.msk.bf16.mxu0 %vm416_vm4, %v606_v29  ;;  %2603 = vmatprep.subr.bf16.mxu1 %v2737_v6 }
 0x10a   : > { %549 = vmatprep.mubr.bf16.mxu0 %v2739_v8  ;;  %v710_v42 = vsel %vm709_vm7, %v704_v31, %v706_v30 }
 0x10b   : > { %v716_v45 = vsel %vm416_vm4, %v710_v42, 0 }
 0x10c   : > { %v809_v34 = vpop.permute.xlu0 %808 }
 0x10d   : > { %v708_v35 = vpop.permute.xlu1 %707 }
 0x10e   : > { %v711_v37 = vsel %vm709_vm7, %v706_v30, %v708_v35  ;;  %2600 = vmatmul.mubr.msk.bf16.vlgmr.msra.gmra.mrb[4].mxu1 %vm412_vm5, %v364_v32  ;;  %v722_v44 = vsel %vm416_vm4, %v708_v35, 0 }
 0x10f   : > { %2604 = vmatpush3.bf16.msra.mxu1 %v617_v36  ;;  %2503 = vmatmul.mubr.msk.bf16.vlgmr.msra.gmra.mrb[4].mxu0 %vm412_vm5, %v364_v32 }
 0x110   : > { %620 = vmatpush1.bf16.msra.mxu0 %v611_v38  ;;  %2605 = vmatprep.mubr.msk.bf16.mxu1 %vm2738_vm1, %v2737_v6  ;;  %v813_v39 = vpop.permute.xlu0 %812 }
 0x111   : > { %2508 = vmatprep.subr.msk.bf16.mxu0 %vm416_vm4, %v711_v37  ;;  %v811_v40 = vpop.permute.xlu1 %810  ;;  %2609 = vmatprep.subr.bf16.mxu1 %v2737_v6  ;;  %v827_v52 = vsel %vm416_vm4, %v813_v39, 0 }
 0x112   : > { %651 = vmatprep.mubr.bf16.mxu0 %v2739_v8  ;;  %v816_v47 = vsel %vm814_vm8, %v811_v40, %v813_v39  ;;  %v815_v50 = vsel %vm814_vm8, %v809_v34, %v811_v40 }
 0x113   : > { %v821_v53 = vsel %vm416_vm4, %v815_v50, 0 }
 0x114   : > { %v916_v46 = vpop.permute.xlu0 %915 }
 0x115   : > { %v914_v43 = vpop.permute.xlu1 %913 }
 0x116   : > { %2606 = vmatmul.mubr.msk.bf16.vlgmr.msra.gmra.mrb[8].mxu1 %vm412_vm5, %v366_v41  ;;  %v920_v58 = vsel %vm919_vm9, %v914_v43, %v916_v46 }
 0x117   : > { %2610 = vmatpush3.bf16.msra.mxu1 %v722_v44  ;;  %2506 = vmatmul.mubr.msk.bf16.vlgmr.msra.gmra.mrb[8].mxu0 %vm412_vm5, %v366_v41  ;;  %v926_v60 = vsel %vm416_vm4, %v920_v58, 0 }
 0x118   : > { %725 = vmatpush1.bf16.msra.mxu0 %v716_v45  ;;  %2611 = vmatprep.mubr.msk.bf16.mxu1 %vm2738_vm1, %v2737_v6  ;;  %v1019_v51 = vpop.permute.xlu0 %1018 }
 0x119   : > { %2511 = vmatprep.subr.msk.bf16.mxu0 %vm416_vm4, %v816_v47  ;;  %2615 = vmatprep.subr.bf16.mxu1 %v2737_v6  ;;  %v918_v48 = vpop.permute.xlu1 %917 }
 0x11a   : > { %756 = vmatprep.mubr.bf16.mxu0 %v2739_v8  ;;  %v921_v54 = vsel %vm919_vm9, %v916_v46, %v918_v48  ;;  %v932_v59 = vsel %vm416_vm4, %v918_v48, 0 }
 0x11c   : > { %v1023_v56 = vpop.permute.xlu0 %1022 }
 0x11d   : > { %v1021_v55 = vpop.permute.xlu1 %1020  ;;  %v1037_v3 = vsel %vm416_vm4, %v1023_v56, 0 }
 0x11e   : > { %2612 = vmatmul.mubr.msk.bf16.vlgmr.msra.gmra.mrb[12].mxu1 %vm412_vm5, %v367_v49  ;;  %v1026_v62 = vsel %vm1024_vm10, %v1021_v55, %v1023_v56  ;;  %v1025_v1 = vsel %vm1024_vm10, %v1019_v51, %v1021_v55 }
 0x11f   : > { %2616 = vmatpush3.bf16.msra.mxu1 %v827_v52  ;;  %2509 = vmatmul.mubr.msk.bf16.vlgmr.msra.gmra.mrb[12].mxu0 %vm412_vm5, %v367_v49  ;;  %v1031_v4 = vsel %vm416_vm4, %v1025_v1, 0 }
 0x120   : > { %830 = vmatpush1.bf16.msra.mxu0 %v821_v53  ;;  %2617 = vmatprep.mubr.msk.bf16.mxu1 %vm2738_vm1, %v2737_v6  ;;  %v1126_v63 = vpop.permute.xlu0 %1125 }
 0x121   : > { %2514 = vmatprep.subr.msk.bf16.mxu0 %vm416_vm4, %v921_v54  ;;  %2621 = vmatprep.subr.bf16.mxu1 %v2737_v6  ;;  %v1124_v61 = vpop.permute.xlu1 %1123 }
 0x122   : > { %861 = vmatprep.mubr.bf16.mxu0 %v2739_v8  ;;  %v1130_v10 = vsel %vm1129_vm11, %v1124_v61, %v1126_v63 }
 0x123   : > { %v1136_v14 = vsel %vm416_vm4, %v1130_v10, 0 }
 0x124   : > { %v1229_v5 = vpop.permute.xlu0 %1228 }
 0x125   : > { %v1128_v2 = vpop.permute.xlu1 %1127 }
 0x126   : > { %2618 = vmatmul.mubr.msk.bf16.vlgmr.msra.gmra.mrb[16].mxu1 %vm412_vm5, %v368_v57  ;;  %v1131_v7 = vsel %vm1129_vm11, %v1126_v63, %v1128_v2  ;;  %v1142_v13 = vsel %vm416_vm4, %v1128_v2, 0 }
 0x127   : > { %2622 = vmatpush3.bf16.msra.mxu1 %v932_v59  ;;  %2512 = vmatmul.mubr.msk.bf16.vlgmr.msra.gmra.mrb[16].mxu0 %vm412_vm5, %v368_v57 }
 0x128   : > { %935 = vmatpush1.bf16.msra.mxu0 %v926_v60  ;;  %2623 = vmatprep.mubr.msk.bf16.mxu1 %vm2738_vm1, %v2737_v6  ;;  %v1233_v11 = vpop.permute.xlu0 %1232 }
 0x129   : > { %2517 = vmatprep.subr.msk.bf16.mxu0 %vm416_vm4, %v1026_v62  ;;  %2627 = vmatprep.subr.bf16.mxu1 %v2737_v6  ;;  %v1231_v12 = vpop.permute.xlu1 %1230  ;;  %v1247_v18 = vsel %vm416_vm4, %v1233_v11, 0 }
 0x12a   : > { %966 = vmatprep.mubr.bf16.mxu0 %v2739_v8  ;;  %v1236_v15 = vsel %vm1234_vm12, %v1231_v12, %v1233_v11  ;;  %v1235_v17 = vsel %vm1234_vm12, %v1229_v5, %v1231_v12 }
 0x12b   : > { %v1241_v19 = vsel %vm416_vm4, %v1235_v17, 0 }
 0x12e   : > { %2624 = vmatmul.mubr.msk.bf16.vlgmr.msra.gmra.mrb[20].mxu1 %vm412_vm5, %v369_v0 }
 0x12f   : > { %2628 = vmatpush3.bf16.msra.mxu1 %v1037_v3  ;;  %2515 = vmatmul.mubr.msk.bf16.vlgmr.msra.gmra.mrb[20].mxu0 %vm412_vm5, %v369_v0 }
 0x130   : > { %1040 = vmatpush1.bf16.msra.mxu0 %v1031_v4  ;;  %2629 = vmatprep.mubr.msk.bf16.mxu1 %vm2738_vm1, %v2737_v6 }
 0x131   : > { %2520 = vmatprep.subr.msk.bf16.mxu0 %vm416_vm4, %v1131_v7  ;;  %2633 = vmatprep.subr.bf16.mxu1 %v2737_v6 }
 0x132   : > { %1071 = vmatprep.mubr.bf16.mxu0 %v2739_v8 }
 0x136   : > { %2630 = vmatmul.mubr.msk.bf16.vlgmr.msra.gmra.mrb[24].mxu1 %vm412_vm5, %v370_v9 }
 0x137   : > { %2634 = vmatpush3.bf16.msra.mxu1 %v1142_v13  ;;  %2518 = vmatmul.mubr.msk.bf16.vlgmr.msra.gmra.mrb[24].mxu0 %vm412_vm5, %v370_v9 }
 0x138   : > { %1145 = vmatpush1.bf16.msra.mxu0 %v1136_v14  ;;  %2635 = vmatprep.mubr.msk.bf16.mxu1 %vm2738_vm1, %v2737_v6 }
 0x139   : > { %2523 = vmatprep.subr.msk.bf16.mxu0 %vm416_vm4, %v1236_v15  ;;  %2639 = vmatprep.subr.bf16.mxu1 %v2737_v6 }
 0x13a   : > { %1176 = vmatprep.mubr.bf16.mxu0 %v2739_v8 }
 0x13e   : > { %2636 = vmatmul.mubr.msk.bf16.vlgmr.msra.gmra.mrb[28].mxu1 %vm412_vm5, %v371_v16 }
 0x13f   : > { %2640 = vmatpush3.bf16.msra.mxu1 %v1247_v18  ;;  %2521 = vmatmul.mubr.msk.bf16.vlgmr.msra.gmra.mrb[28].mxu0 %vm412_vm5, %v371_v16 }
 0x140   : > { %1250 = vmatpush1.bf16.msra.mxu0 %v1241_v19  ;;  %2641 = vmatprep.mubr.msk.bf16.mxu1 %vm2738_vm1, %v2737_v6 }
 0x141   : > { %1281 = vmatprep.mubr.bf16.mxu0 %v2739_v8  ;;  %2645 = vmatprep.subr.bf16.mxu1 %v2737_v6 }
 0x146   : > { %2642 = vmatmul.mubr.msk.bf16.vlgmr.msra.gmra.mrb[32].mxu1 %vm412_vm5, %v372_v20 }
 0x147   : > { %2524 = vmatmul.mubr.msk.bf16.vlgmr.msra.gmra.mrb[32].mxu0 %vm412_vm5, %v372_v20  ;;  %2647 = vmatprep.mubr.msk.bf16.mxu1 %vm2738_vm1, %v2737_v6 }
 0x148   : > { %1501 = vmatprep.mubr.bf16.mxu0 %v2739_v8 }
 0x1d9   : > { %v501_v21 = vpop.f32.mrb[0].mxu1 }
 0x1da   : > { %v460_v22 = vpop.f32.mrb[0].mxu0  ;;  %v2595_v23 = vpop.f32.mrb[1].mxu1 }
 0x1db   : > { %v462_v24 = vpop.f32.mrb[1].mxu0  ;;  %v504_v25 = vpop.f32.mrb[2].mxu1 }
 0x1dc   : > { %v464_v26 = vpop.f32.mrb[2].mxu0  ;;  %v2596_v27 = vpop.f32.mrb[3].mxu1 }
 0x1dd   : > { %v465_v28 = vpop.f32.mrb[3].mxu0 }
 0x1e1   : > { %v592_v29 = vpop.f32.mrb[4].mxu1 }
 0x1e2   : > { %v593_v30 = vadd.f32 %v592_v29, %v501_v21  ;;  %v551_v31 = vpop.f32.mrb[4].mxu0  ;;  %v2601_v32 = vpop.f32.mrb[5].mxu1 }
 0x1e3   : > { %v552_v33 = vadd.f32 %v551_v31, %v460_v22  ;;  %v553_v34 = vpop.f32.mrb[5].mxu0  ;;  %v595_v35 = vpop.f32.mrb[6].mxu1 }
 0x1e4   : > { %v554_v36 = vadd.f32 %v553_v34, %v462_v24  ;;  %v555_v37 = vpop.f32.mrb[6].mxu0  ;;  %v2602_v38 = vpop.f32.mrb[7].mxu1 }
 0x1e5   : > { %v556_v39 = vpop.f32.mrb[7].mxu0 }
 0x1e9   : > { %v694_v40 = vpop.f32.mrb[8].mxu1 }
 0x1ea   : > { %v702_v41 = vadd.f32 %v694_v40, %v593_v30  ;;  %v653_v42 = vpop.f32.mrb[8].mxu0  ;;  %v2607_v43 = vpop.f32.mrb[9].mxu1 }
 0x1eb   : > { %v700_v44 = vadd.f32 %v653_v42, %v552_v33  ;;  %v655_v45 = vpop.f32.mrb[9].mxu0  ;;  %v697_v46 = vpop.f32.mrb[10].mxu1  ;;  %v1342_v33 = vlaneseq }
 0x1ec   : > { %v701_v47 = vadd.f32 %v655_v45, %v554_v36  ;;  %v657_v48 = vpop.f32.mrb[10].mxu0  ;;  %v2608_v49 = vpop.f32.mrb[11].mxu1 }
 0x1ed   : > { %v658_v50 = vpop.f32.mrb[11].mxu0  ;;  %v361_v48 = vld [vmem:[%s3206_s9] sm:$0x7] }
 0x1f1   : > { %v799_v51 = vpop.f32.mrb[12].mxu1 }
 0x1f2   : > { %v807_v52 = vadd.f32 %v799_v51, %v702_v41  ;;  %v758_v53 = vpop.f32.mrb[12].mxu0  ;;  %v2613_v54 = vpop.f32.mrb[13].mxu1  ;;  %v1343_v41 = vshrl.u32 %v1342_v33, 7 }
 0x1f3   : > { %v805_v55 = vadd.f32 %v758_v53, %v700_v44  ;;  %v760_v56 = vpop.f32.mrb[13].mxu0  ;;  %v802_v57 = vpop.f32.mrb[14].mxu1 }
 0x1f4   : > { %v806_v58 = vadd.f32 %v760_v56, %v701_v47  ;;  %v762_v59 = vpop.f32.mrb[14].mxu0  ;;  %v2614_v60 = vpop.f32.mrb[15].mxu1  ;;  %v1344_v46 = vsub.s32 0, %v1343_v41  ;;  %v1352_v47 = vsub.s32 2, %v1343_v41  ;;  %v1348_v49 = vsub.s32 1, %v1343_v41 }
 0x1f5   : > { %v763_v61 = vpop.f32.mrb[15].mxu0  ;;  %v1336_v51 = vpop.permute.xlu1 %1335 }
 0x1f6   : > { %v2997_v59 = vrot.slane %v361_v48, %v1352_v47 }
 0x1f9   : > { %v904_v62 = vpop.f32.mrb[16].mxu1 }
 0x1fa   : > { %v912_v63 = vadd.f32 %v904_v62, %v807_v52  ;;  %v863_v0 = vpop.f32.mrb[16].mxu0  ;;  %v2619_v1 = vpop.f32.mrb[17].mxu1  ;;  %v2999_v62 = vrot.slane %v361_v48, %v1348_v49 }
 0x1fb   : > { %v910_v2 = vadd.f32 %v863_v0, %v805_v55  ;;  %v865_v3 = vpop.f32.mrb[17].mxu0  ;;  %v907_v4 = vpop.f32.mrb[18].mxu1 }
 0x1fc   : > { %v911_v5 = vadd.f32 %v865_v3, %v806_v58  ;;  %v867_v7 = vpop.f32.mrb[18].mxu0  ;;  %v2620_v9 = vpop.f32.mrb[19].mxu1  ;;  %v2995_v58 = vrot.slane %v361_v48, %v1344_v46 }
 0x1fd   : > { %v868_v10 = vpop.f32.mrb[19].mxu0 }
 0x201   : > { %v1009_v11 = vpop.f32.mrb[20].mxu1 }
 0x202   : > { %v1017_v12 = vadd.f32 %v1009_v11, %v912_v63  ;;  %v968_v13 = vpop.f32.mrb[20].mxu0  ;;  %v2625_v14 = vpop.f32.mrb[21].mxu1 }
 0x203   : > { %v1015_v15 = vadd.f32 %v968_v13, %v910_v2  ;;  %v970_v16 = vpop.f32.mrb[21].mxu0  ;;  %v1012_v17 = vpop.f32.mrb[22].mxu1 }
 0x204   : > { %v1016_v18 = vadd.f32 %v970_v16, %v911_v5  ;;  %v972_v19 = vpop.f32.mrb[22].mxu0  ;;  %v2626_v20 = vpop.f32.mrb[23].mxu1 }
 0x205   : > { %v973_v21 = vpop.f32.mrb[23].mxu0 }
 0x209   : > { %v1114_v22 = vpop.f32.mrb[24].mxu1 }
 0x20a   : > { %v1122_v23 = vadd.f32 %v1114_v22, %v1017_v12  ;;  %v1073_v24 = vpop.f32.mrb[24].mxu0  ;;  %v2631_v25 = vpop.f32.mrb[25].mxu1  ;;  %v374_v12 = vld [vmem:[%s3200_s3] sm:$0xff] }
 0x20b   : > { %v1120_v26 = vadd.f32 %v1073_v24, %v1015_v15  ;;  %v1075_v27 = vpop.f32.mrb[25].mxu0  ;;  %v1117_v28 = vpop.f32.mrb[26].mxu1 }
 0x20c   : > { %v1121_v29 = vadd.f32 %v1075_v27, %v1016_v18  ;;  %v1077_v30 = vpop.f32.mrb[26].mxu0  ;;  %v2632_v31 = vpop.f32.mrb[27].mxu1  ;;  %v375_v27 = vld [vmem:[%s3201_s4] sm:$0xff] }
 0x20d   : > { %v1078_v32 = vpop.f32.mrb[27].mxu0 }
 0x211   : > { %v1219_v34 = vpop.f32.mrb[28].mxu1 }
 0x212   : > { %v1227_v35 = vadd.f32 %v1219_v34, %v1122_v23  ;;  %v1178_v36 = vpop.f32.mrb[28].mxu0  ;;  %v2637_v37 = vpop.f32.mrb[29].mxu1 }
 0x213   : > { %v1225_v38 = vadd.f32 %v1178_v36, %v1120_v26  ;;  %v1180_v39 = vpop.f32.mrb[29].mxu0  ;;  %v1222_v40 = vpop.f32.mrb[30].mxu1 }
 0x214   : > { %v1226_v42 = vadd.f32 %v1180_v39, %v1121_v29  ;;  %v1182_v43 = vpop.f32.mrb[30].mxu0  ;;  %v2638_v44 = vpop.f32.mrb[31].mxu1 }
 0x215   : > { %v1183_v45 = vpop.f32.mrb[31].mxu0 }
 0x219   : > { %v1324_v50 = vpop.f32.mrb[32].mxu1 }
 0x21a   : > { %v1332_v52 = vadd.f32 %v1324_v50, %v1227_v35  ;;  %v1283_v53 = vpop.f32.mrb[32].mxu0  ;;  %v2643_v54 = vpop.f32.mrb[33].mxu1 }
 0x21b   : > { %v1330_v55 = vadd.f32 %v1283_v53, %v1225_v38  ;;  %v1285_v56 = vpop.f32.mrb[33].mxu0  ;;  %v1327_v57 = vpop.f32.mrb[34].mxu1 }
 0x21c   : > { %v1340_v60 = vadd.f32 %v1336_v51, %v1332_v52  ;;  %v1331_v61 = vadd.f32 %v1285_v56, %v1226_v42  ;;  %v1287_v63 = vpop.f32.mrb[34].mxu0  ;;  %v2644_v0 = vpop.f32.mrb[35].mxu1 }
 0x21d   : > { %v1338_v1 = vadd.f32 %v1336_v51, %v1330_v55  ;;  %v1288_v2 = vpop.f32.mrb[35].mxu0 }
 0x21e   : > { %v1339_v3 = vadd.f32 %v1336_v51, %v1331_v61  ;;  %v1359_v5 = vmul.f32 %v2997_v59, %v1340_v60 }
 0x21f   : > { %v1357_v4 = vmul.f32 %v2995_v58, %v1338_v1 }
 0x220   : > { %v1358_v7 = vmul.f32 %v2999_v62, %v1339_v3  ;;  %v1362_v10 = vsel %vm1361_vm13, %v1359_v5, 0.0 }
 0x222   : > { %v1360_v9 = vadd.f32 %v1358_v7, %v1357_v4 }
 0x224   : > { %v1363_v11 = vadd.f32 %v1362_v10, %v1360_v9 }
 0x226   : > { %1364 = vadd.xlane.f32.xlu0 %v1363_v11 }
 0x23c   : > { %1389 = vperm.xlu0 %2722, %v374_v12  }
 0x2b3   : > { %v1365_v13 = vpop.xlane.xlu0 %1364 }
 0x2b4   : > { %v1366_v14 = vmul.f32 0.00390625, %v1365_v13  ;;  %v1416_v13 = vld [vmem:[%s3202_s5 + $0x4] sm:$0xf] }
 0x2b6   : > { %v1367_v15 = vsub.f32 %v1338_v1, %v1366_v14  ;;  %v1368_v16 = vsub.f32 %v1339_v3, %v1366_v14  ;;  %v1369_v17 = vsub.f32 %v1340_v60, %v1366_v14  ;;  %v1424_v1 = vld [vmem:[%s3203_s6] sm:$0xff] }
 0x2b8   : > { %v1370_v18 = vmul.f32 %v1367_v15, %v2995_v58  ;;  %v1371_v19 = vmul.f32 %v1368_v16, %v2999_v62  ;;  %v1372_v20 = vmul.f32 %v1369_v17, %v2997_v59 }
 0x2ba   : > { %v1373_v21 = vmul.f32 %v1370_v18, %v1370_v18  ;;  %v1374_v22 = vmul.f32 %v1371_v19, %v1371_v19  ;;  %v1375_v23 = vmul.f32 %v1372_v20, %v1372_v20  ;;  %v1415_v20 = vld [vmem:[%s3202_s5] sm:$0xf] }
 0x2bb   : > { %v1390_v32 = vpop.permute.xlu0 %1389 }
 0x2bc   : > { %v1376_v24 = vadd.f32 %v1374_v22, %v1373_v21  ;;  %v1377_v25 = vsel %vm1361_vm13, %v1375_v23, 0.0 }
 0x2be   : > { %v1378_v26 = vadd.f32 %v1377_v25, %v1376_v24 }
 0x2c0   : > { %1379 = vadd.xlane.f32.xlu1 %v1378_v26 }
 0x2d1   : > { %1397 = vperm.xlu1 %2721, %v375_v27  }
 0x34d   : > { %v1380_v28 = vpop.xlane.xlu1 %1379 }
 0x34e   : > { %v1381_v29 = vmul.f32 0.00390625, %v1380_v28 }
 0x350   : > { %v1382_v30 = vadd.f32 1e-05, %v1381_v29  ;;  %v1417_v29 = vld [vmem:[%s3202_s5 + $0x8] sm:$0xf] }
 0x351   : > { %v1398_v39 = vpop.permute.xlu1 %1397 }
 0x352   : > { %2724 = vrsqrt.f32 %v1382_v30 }
 0x35c   : > { %v2725_v31 = vpop.eup %2724 }
 0x35d   : > { %v1384_v33 = vmul.f32 %v2725_v31, %v1367_v15  ;;  %v1385_v34 = vmul.f32 %v2725_v31, %v1368_v16  ;;  %v1386_v35 = vmul.f32 %v2725_v31, %v1369_v17 }
 0x35f   : > { %v1392_v36 = vmul.f32 %v1390_v32, %v1384_v33  ;;  %v1393_v37 = vmul.f32 %v1390_v32, %v1385_v34  ;;  %v1394_v38 = vmul.f32 %v1390_v32, %v1386_v35 }
 0x361   : > { %v1400_v40 = vadd.f32 %v1398_v39, %v1392_v36  ;;  %v1401_v41 = vadd.f32 %v1398_v39, %v1393_v37  ;;  %v1402_v42 = vadd.f32 %v1398_v39, %v1394_v38  ;;  %v1418_v37 = vld [vmem:[%s3202_s5 + $0xc] sm:$0xf] }
 0x363   : > { %vm1404_vm14 = vcmp.ge.f32.partialorder %v1401_v41, 0.0  ;;  %v1407_v43 = vmul.f32 0.01, %v1401_v41  ;;  %vm1405_vm15 = vcmp.ge.f32.partialorder %v1402_v42, 0.0  ;;  %v1408_v44 = vmul.f32 0.01, %v1402_v42 }
 0x364   : > { %v1406_v47 = vmul.f32 0.01, %v1400_v40  ;;  %vm1403_vm4 = vcmp.ge.f32.partialorder %v1400_v40, 0.0 }
 0x365   : > { %v1410_v45 = vsel %vm1404_vm14, %v1401_v41, %v1407_v43  ;;  %v1411_v46 = vsel %vm1405_vm15, %v1402_v42, %v1408_v44  ;;  %v1419_v44 = vld [vmem:[%s3202_s5 + $0x10] sm:$0xf] }
 0x366   : > { %v1413_v48 = vmul.f32 %v1410_v45, %v2999_v62  ;;  %v1414_v50 = vmul.f32 %v1411_v46, %v2997_v59  ;;  %v1409_v51 = vsel %vm1403_vm4, %v1400_v40, %v1406_v47 }
 0x367   : > { %v1412_v53 = vmul.f32 %v1409_v51, %v2995_v58 }
 0x368   : > { %v1428_v49 = vpack.c.bf16 %v1413_v48, %v1413_v48  ;;  %v1429_v52 = vpack.c.bf16 %v1414_v50, %v1414_v50 }
 0x369   : > { %v1427_v54 = vpack.c.bf16 %v1412_v53, %v1412_v53 }
 0x36a   : > { %1435 = vrot.lane.b32.xlu1 %v1428_v49, %s2736_s19 }
 0x36e   : > { %1437 = vrot.lane.b32.xlu1 %v1429_v52, %s2736_s19  ;;  %v1420_v52 = vld [vmem:[%s3202_s5 + $0x14] sm:$0xf] }
 0x372   : > { %1433 = vrot.lane.b32.xlu1 %v1427_v54, %s2736_s19 }
 0x3dc   : > { %v1436_v55 = vpop.permute.xlu1 %1435 }
 0x3e0   : > { %v1438_v56 = vpop.permute.xlu1 %1437 }
 0x3e1   : > { %v1440_v61 = vsel %vm391_vm0, %v1436_v55, %v1438_v56 }
 0x3e2   : > { %v1444_v63 = vsel %vm398_vm2, %v1440_v61, 0  ;;  %vm1455_vm2 = vcmask 64512   ;;  %v1421_v61 = vld [vmem:[%s3202_s5 + $0x18] sm:$0xf] }
 0x3e4   : > { %v1434_v57 = vpop.permute.xlu1 %1433 }
 0x3e5   : > { %v1442_v60 = vsel %vm391_vm0, 0, %v1434_v57  ;;  %v1439_v0 = vsel %vm391_vm0, %v1434_v57, %v1436_v55  ;;  %vm1459_vm0 = vcmask 1043456  }
 0x3e6   : > { %1641 = vrot.lane.b32.xlu0 %v1442_v60, %s2741_s21  ;;  %1447 = vrot.lane.b32.xlu1 %v1442_v60, %s2740_s20  ;;  %v1558_v15 = vsel %vm1459_vm0, %v1444_v63, 0  ;;  %v1553_v17 = vsel %vm1459_vm0, %v1442_v60, 0 }
 0x3ea   : > { %1645 = vrot.lane.b32.xlu0 %v1444_v63, %s2741_s21  ;;  %1449 = vrot.lane.b32.xlu1 %v1439_v0, %s2740_s20 }
 0x3ee   : > { %1747 = vrot.lane.b32.xlu0 %v1439_v0, %s2742_s22  ;;  %1451 = vrot.lane.b32.xlu1 %v1444_v63, %s2740_s20 }
 0x3f2   : > { %1849 = vrot.lane.b32.xlu0 %v1442_v60, %s2743_s23  ;;  %1643 = vrot.lane.b32.xlu1 %v1439_v0, %s2741_s21 }
 0x3f6   : > { %1853 = vrot.lane.b32.xlu0 %v1444_v63, %s2743_s23  ;;  %1745 = vrot.lane.b32.xlu1 %v1442_v60, %s2742_s22 }
 0x3fa   : > { %1955 = vrot.lane.b32.xlu0 %v1439_v0, %s2744_s24  ;;  %1749 = vrot.lane.b32.xlu1 %v1444_v63, %s2742_s22 }
 0x3fe   : > { %2057 = vrot.lane.b32.xlu0 %v1442_v60, %s2745_s25  ;;  %1851 = vrot.lane.b32.xlu1 %v1439_v0, %s2743_s23 }
 0x402   : > { %2061 = vrot.lane.b32.xlu0 %v1444_v63, %s2745_s25  ;;  %1953 = vrot.lane.b32.xlu1 %v1442_v60, %s2744_s24 }
 0x406   : > { %2163 = vrot.lane.b32.xlu0 %v1439_v0, %s2746_s26  ;;  %1957 = vrot.lane.b32.xlu1 %v1444_v63, %s2744_s24 }
 0x40a   : > { %2265 = vrot.lane.b32.xlu0 %v1442_v60, %s2747_s27  ;;  %2059 = vrot.lane.b32.xlu1 %v1439_v0, %s2745_s25  ;;  %s2700_s25 = smul.u32 24, %s3209_s14 }
 0x40c   : > { %s359_s18 = scalar_lea.vmem %s3207_s10, %s2700_s25 }
 0x40e   : > { %2269 = vrot.lane.b32.xlu0 %v1444_v63, %s2747_s27  ;;  %2161 = vrot.lane.b32.xlu1 %v1442_v60, %s2746_s26 }
 0x412   : > { %2165 = vrot.lane.b32.xlu1 %v1444_v63, %s2746_s26 }
 0x416   : > { %2267 = vrot.lane.b32.xlu1 %v1439_v0, %s2747_s27 }
 0x41a   : > { %2371 = vperm.xlu1 %2721, %v1424_v1  }
 0x458   : > { %v1448_v2 = vpop.permute.xlu1 %1447  ;;  %v1642_v3 = vpop.permute.xlu0 %1641 }
 0x45c   : > { %v1450_v4 = vpop.permute.xlu1 %1449  ;;  %v1646_v7 = vpop.permute.xlu0 %1645 }
 0x45d   : > { %v1453_v5 = vsel %vm409_vm3, %v1448_v2, %v1450_v4  ;;  %v1659_v24 = vsel %vm1459_vm0, %v1646_v7, 0 }
 0x45e   : > { %v1461_v12 = vsel %vm1459_vm0, %v1453_v5, 0  ;;  %v1422_v5 = vld [vmem:[%s3202_s5 + $0x1c] sm:$0xf] }
 0x460   : > { %v1452_v9 = vpop.permute.xlu1 %1451  ;;  %v1748_v16 = vpop.permute.xlu0 %1747 }
 0x461   : > { %v1454_v10 = vsel %vm409_vm3, %v1450_v4, %v1452_v9  ;;  %v1467_v11 = vsel %vm1459_vm0, %v1452_v9, 0 }
 0x462   : > { %2526 = vmatprep.subr.msk.bf16.mxu0 %vm1459_vm0, %v1454_v10  ;;  %2646 = vmatpush3.bf16.msra.mxu1 %v1467_v11  ;;  %v1423_v11 = vld [vmem:[%s3202_s5 + $0x20] sm:$0xf] }
 0x463   : > { %1470 = vmatpush1.bf16.msra.mxu0 %v1461_v12  ;;  %2651 = vmatprep.subr.bf16.mxu1 %v2737_v6 }
 0x464   : > { %2529 = vmatprep.subr.msk.bf16.mxu0 %vm1459_vm0, %v1439_v0  ;;  %v1644_v14 = vpop.permute.xlu1 %1643  ;;  %v1850_v22 = vpop.permute.xlu0 %1849 }
 0x465   : > { %2648 = vmatmul.mubr.msk.bf16.vlgmr.msra.gmra.mrb[36].mxu1 %vm1455_vm2, %v1416_v13  ;;  %v1648_v18 = vsel %vm604_vm6, %v1644_v14, %v1646_v7  ;;  %v1647_v21 = vsel %vm604_vm6, %v1642_v3, %v1644_v14 }
 0x466   : > { %2527 = vmatmul.mubr.msk.bf16.vlgmr.msra.gmra.mrb[36].mxu0 %vm1455_vm2, %v1416_v13  ;;  %2652 = vmatpush3.bf16.msra.mxu1 %v1558_v15  ;;  %v1653_v26 = vsel %vm1459_vm0, %v1647_v21, 0 }
 0x467   : > { %1561 = vmatpush1.bf16.msra.mxu0 %v1553_v17  ;;  %2653 = vmatprep.mubr.msk.bf16.mxu1 %vm2738_vm1, %v2737_v6 }
 0x468   : > { %2532 = vmatprep.subr.msk.bf16.mxu0 %vm1459_vm0, %v1648_v18  ;;  %v1746_v19 = vpop.permute.xlu1 %1745  ;;  %2657 = vmatprep.subr.bf16.mxu1 %v2737_v6  ;;  %v1854_v28 = vpop.permute.xlu0 %1853 }
 0x469   : > { %1592 = vmatprep.mubr.bf16.mxu0 %v2739_v8  ;;  %v1751_v30 = vsel %vm709_vm7, %v1746_v19, %v1748_v16  ;;  %v1867_v39 = vsel %vm1459_vm0, %v1854_v28, 0 }
 0x46a   : > { %v1757_v33 = vsel %vm1459_vm0, %v1751_v30, 0 }
 0x46c   : > { %v1750_v23 = vpop.permute.xlu1 %1749  ;;  %v1956_v35 = vpop.permute.xlu0 %1955 }
 0x46d   : > { %v1752_v25 = vsel %vm709_vm7, %v1748_v16, %v1750_v23  ;;  %2654 = vmatmul.mubr.msk.bf16.vlgmr.msra.gmra.mrb[40].mxu1 %vm1455_vm2, %v1415_v20  ;;  %v1763_v32 = vsel %vm1459_vm0, %v1750_v23, 0 }
 0x46e   : > { %2658 = vmatpush3.bf16.msra.mxu1 %v1659_v24  ;;  %2530 = vmatmul.mubr.msk.bf16.vlgmr.msra.gmra.mrb[40].mxu0 %vm1455_vm2, %v1415_v20 }
 0x46f   : > { %1662 = vmatpush1.bf16.msra.mxu0 %v1653_v26  ;;  %2659 = vmatprep.mubr.msk.bf16.mxu1 %vm2738_vm1, %v2737_v6 }
 0x470   : > { %2535 = vmatprep.subr.msk.bf16.mxu0 %vm1459_vm0, %v1752_v25  ;;  %v1852_v27 = vpop.permute.xlu1 %1851  ;;  %2663 = vmatprep.subr.bf16.mxu1 %v2737_v6  ;;  %v2058_v40 = vpop.permute.xlu0 %2057 }
 0x471   : > { %1693 = vmatprep.mubr.bf16.mxu0 %v2739_v8  ;;  %v1856_v34 = vsel %vm814_vm8, %v1852_v27, %v1854_v28  ;;  %v1855_v38 = vsel %vm814_vm8, %v1850_v22, %v1852_v27 }
 0x472   : > { %v1861_v41 = vsel %vm1459_vm0, %v1855_v38, 0 }
 0x474   : > { %v1954_v31 = vpop.permute.xlu1 %1953  ;;  %v2062_v46 = vpop.permute.xlu0 %2061 }
 0x475   : > { %2660 = vmatmul.mubr.msk.bf16.vlgmr.msra.gmra.mrb[44].mxu1 %vm1455_vm2, %v1417_v29  ;;  %v1959_v45 = vsel %vm919_vm9, %v1954_v31, %v1956_v35  ;;  %v2075_v55 = vsel %vm1459_vm0, %v2062_v46, 0 }
 0x476   : > { %2664 = vmatpush3.bf16.msra.mxu1 %v1763_v32  ;;  %2533 = vmatmul.mubr.msk.bf16.vlgmr.msra.gmra.mrb[44].mxu0 %vm1455_vm2, %v1417_v29  ;;  %v1965_v48 = vsel %vm1459_vm0, %v1959_v45, 0 }
 0x477   : > { %1766 = vmatpush1.bf16.msra.mxu0 %v1757_v33  ;;  %2665 = vmatprep.mubr.msk.bf16.mxu1 %vm2738_vm1, %v2737_v6 }
 0x478   : > { %2538 = vmatprep.subr.msk.bf16.mxu0 %vm1459_vm0, %v1856_v34  ;;  %2669 = vmatprep.subr.bf16.mxu1 %v2737_v6  ;;  %v1958_v36 = vpop.permute.xlu1 %1957  ;;  %v2164_v51 = vpop.permute.xlu0 %2163 }
 0x479   : > { %1797 = vmatprep.mubr.bf16.mxu0 %v2739_v8  ;;  %v1960_v42 = vsel %vm919_vm9, %v1956_v35, %v1958_v36  ;;  %v1971_v47 = vsel %vm1459_vm0, %v1958_v36, 0 }
 0x47c   : > { %v2060_v43 = vpop.permute.xlu1 %2059  ;;  %v2266_v60 = vpop.permute.xlu0 %2265 }
 0x47d   : > { %2666 = vmatmul.mubr.msk.bf16.vlgmr.msra.gmra.mrb[48].mxu1 %vm1455_vm2, %v1418_v37  ;;  %v2064_v50 = vsel %vm1024_vm10, %v2060_v43, %v2062_v46  ;;  %v2063_v53 = vsel %vm1024_vm10, %v2058_v40, %v2060_v43 }
 0x47e   : > { %2670 = vmatpush3.bf16.msra.mxu1 %v1867_v39  ;;  %2536 = vmatmul.mubr.msk.bf16.vlgmr.msra.gmra.mrb[48].mxu0 %vm1455_vm2, %v1418_v37  ;;  %v2069_v56 = vsel %vm1459_vm0, %v2063_v53, 0 }
 0x47f   : > { %1870 = vmatpush1.bf16.msra.mxu0 %v1861_v41  ;;  %2671 = vmatprep.mubr.msk.bf16.mxu1 %vm2738_vm1, %v2737_v6 }
 0x480   : > { %2541 = vmatprep.subr.msk.bf16.mxu0 %vm1459_vm0, %v1960_v42  ;;  %2675 = vmatprep.subr.bf16.mxu1 %v2737_v6  ;;  %v2162_v49 = vpop.permute.xlu1 %2161  ;;  %v2270_v2 = vpop.permute.xlu0 %2269 }
 0x481   : > { %1901 = vmatprep.mubr.bf16.mxu0 %v2739_v8  ;;  %v2167_v63 = vsel %vm1129_vm11, %v2162_v49, %v2164_v51  ;;  %v2283_v9 = vsel %vm1459_vm0, %v2270_v2, 0 }
 0x482   : > { %v2173_v3 = vsel %vm1459_vm0, %v2167_v63, 0 }
 0x484   : > { %v2166_v54 = vpop.permute.xlu1 %2165 }
 0x485   : > { %2672 = vmatmul.mubr.msk.bf16.vlgmr.msra.gmra.mrb[52].mxu1 %vm1455_vm2, %v1419_v44  ;;  %v2168_v57 = vsel %vm1129_vm11, %v2164_v51, %v2166_v54  ;;  %v2179_v1 = vsel %vm1459_vm0, %v2166_v54, 0 }
 0x486   : > { %2676 = vmatpush3.bf16.msra.mxu1 %v1971_v47  ;;  %2539 = vmatmul.mubr.msk.bf16.vlgmr.msra.gmra.mrb[52].mxu0 %vm1455_vm2, %v1419_v44 }
 0x487   : > { %1974 = vmatpush1.bf16.msra.mxu0 %v1965_v48  ;;  %2677 = vmatprep.mubr.msk.bf16.mxu1 %vm2738_vm1, %v2737_v6 }
 0x488   : > { %2544 = vmatprep.subr.msk.bf16.mxu0 %vm1459_vm0, %v2064_v50  ;;  %2681 = vmatprep.subr.bf16.mxu1 %v2737_v6  ;;  %v2268_v0 = vpop.permute.xlu1 %2267 }
 0x489   : > { %2005 = vmatprep.mubr.bf16.mxu0 %v2739_v8  ;;  %v2272_v4 = vsel %vm1234_vm12, %v2268_v0, %v2270_v2  ;;  %v2271_v7 = vsel %vm1234_vm12, %v2266_v60, %v2268_v0 }
 0x48a   : > { %v2277_v10 = vsel %vm1459_vm0, %v2271_v7, 0 }
 0x48d   : > { %2678 = vmatmul.mubr.msk.bf16.vlgmr.msra.gmra.mrb[56].mxu1 %vm1455_vm2, %v1420_v52 }
 0x48e   : > { %2682 = vmatpush3.bf16.msra.mxu1 %v2075_v55  ;;  %2542 = vmatmul.mubr.msk.bf16.vlgmr.msra.gmra.mrb[56].mxu0 %vm1455_vm2, %v1420_v52 }
 0x48f   : > { %2078 = vmatpush1.bf16.msra.mxu0 %v2069_v56  ;;  %2683 = vmatprep.mubr.msk.bf16.mxu1 %vm2738_vm1, %v2737_v6 }
 0x490   : > { %2547 = vmatprep.subr.msk.bf16.mxu0 %vm1459_vm0, %v2168_v57  ;;  %2687 = vmatprep.subr.bf16.mxu1 %v2737_v6 }
 0x491   : > { %2109 = vmatprep.mubr.bf16.mxu0 %v2739_v8 }
 0x495   : > { %2684 = vmatmul.mubr.msk.bf16.vlgmr.msra.gmra.mrb[60].mxu1 %vm1455_vm2, %v1421_v61 }
 0x496   : > { %2688 = vmatpush3.bf16.msra.mxu1 %v2179_v1  ;;  %2545 = vmatmul.mubr.msk.bf16.vlgmr.msra.gmra.mrb[60].mxu0 %vm1455_vm2, %v1421_v61 }
 0x497   : > { %2182 = vmatpush1.bf16.msra.mxu0 %v2173_v3  ;;  %2689 = vmatprep.mubr.msk.bf16.mxu1 %vm2738_vm1, %v2737_v6 }
 0x498   : > { %2550 = vmatprep.subr.msk.bf16.mxu0 %vm1459_vm0, %v2272_v4  ;;  %2693 = vmatprep.subr.bf16.mxu1 %v2737_v6 }
 0x499   : > { %2213 = vmatprep.mubr.bf16.mxu0 %v2739_v8 }
 0x49d   : > { %2690 = vmatmul.mubr.msk.bf16.vlgmr.msra.gmra.mrb[64].mxu1 %vm1455_vm2, %v1422_v5 }
 0x49e   : > { %2694 = vmatpush3.bf16.msra.mxu1 %v2283_v9  ;;  %2548 = vmatmul.mubr.msk.bf16.vlgmr.msra.gmra.mrb[64].mxu0 %vm1455_vm2, %v1422_v5 }
 0x49f   : > { %2286 = vmatpush1.bf16.msra.mxu0 %v2277_v10  ;;  %2695 = vmatprep.mubr.msk.bf16.mxu1 %vm2738_vm1, %v2737_v6 }
 0x4a0   : > { %2317 = vmatprep.mubr.bf16.mxu0 %v2739_v8 }
 0x4a5   : > { %2696 = vmatmul.mubr.msk.bf16.vlgmr.msra.gmra.mrb[68].mxu1 %vm1455_vm2, %v1423_v11 }
 0x4a6   : > { %2551 = vmatmul.mubr.msk.bf16.vlgmr.msra.gmra.mrb[68].mxu0 %vm1455_vm2, %v1423_v11 }
 0x538   : > { %v1544_v12 = vpop.f32.mrb[36].mxu1 }
 0x539   : > { %v1503_v13 = vpop.f32.mrb[36].mxu0  ;;  %v2649_v14 = vpop.f32.mrb[37].mxu1 }
 0x53a   : > { %v1505_v15 = vpop.f32.mrb[37].mxu0  ;;  %v1547_v16 = vpop.f32.mrb[38].mxu1 }
 0x53b   : > { %v1507_v17 = vpop.f32.mrb[38].mxu0  ;;  %v2650_v18 = vpop.f32.mrb[39].mxu1 }
 0x53c   : > { %v1508_v19 = vpop.f32.mrb[39].mxu0 }
 0x540   : > { %v1635_v20 = vpop.f32.mrb[40].mxu1 }
 0x541   : > { %v1636_v6 = vadd.f32 %v1635_v20, %v1544_v12  ;;  %v1594_v21 = vpop.f32.mrb[40].mxu0  ;;  %v2655_v8 = vpop.f32.mrb[41].mxu1 }
 0x542   : > { %v1595_v22 = vadd.f32 %v1594_v21, %v1503_v13  ;;  %v1596_v23 = vpop.f32.mrb[41].mxu0  ;;  %v1638_v24 = vpop.f32.mrb[42].mxu1 }
 0x543   : > { %v1597_v25 = vadd.f32 %v1596_v23, %v1505_v15  ;;  %v1598_v26 = vpop.f32.mrb[42].mxu0  ;;  %v2656_v27 = vpop.f32.mrb[43].mxu1 }
 0x544   : > { %v1599_v28 = vpop.f32.mrb[43].mxu0 }
 0x548   : > { %v1736_v29 = vpop.f32.mrb[44].mxu1 }
 0x549   : > { %v1744_v30 = vadd.f32 %v1736_v29, %v1636_v6  ;;  %v1695_v31 = vpop.f32.mrb[44].mxu0  ;;  %v2661_v32 = vpop.f32.mrb[45].mxu1 }
 0x54a   : > { %v1742_v33 = vadd.f32 %v1695_v31, %v1595_v22  ;;  %v1697_v34 = vpop.f32.mrb[45].mxu0  ;;  %v1739_v35 = vpop.f32.mrb[46].mxu1 }
 0x54b   : > { %v1743_v36 = vadd.f32 %v1697_v34, %v1597_v25  ;;  %v1699_v37 = vpop.f32.mrb[46].mxu0  ;;  %v2662_v38 = vpop.f32.mrb[47].mxu1 }
 0x54c   : > { %v1700_v39 = vpop.f32.mrb[47].mxu0  ;;  %v2372_v34 = vpop.permute.xlu1 %2371 }
 0x550   : > { %v1840_v40 = vpop.f32.mrb[48].mxu1 }
 0x551   : > { %v1848_v41 = vadd.f32 %v1840_v40, %v1744_v30  ;;  %v1799_v42 = vpop.f32.mrb[48].mxu0  ;;  %v2667_v43 = vpop.f32.mrb[49].mxu1 }
 0x552   : > { %v1846_v44 = vadd.f32 %v1799_v42, %v1742_v33  ;;  %v1801_v45 = vpop.f32.mrb[49].mxu0  ;;  %v1843_v46 = vpop.f32.mrb[50].mxu1 }
 0x553   : > { %v1847_v47 = vadd.f32 %v1801_v45, %v1743_v36  ;;  %v1803_v48 = vpop.f32.mrb[50].mxu0  ;;  %v2668_v49 = vpop.f32.mrb[51].mxu1 }
 0x554   : > { %v1804_v50 = vpop.f32.mrb[51].mxu0 }
 0x558   : > { %v1944_v51 = vpop.f32.mrb[52].mxu1 }
 0x559   : > { %v1952_v52 = vadd.f32 %v1944_v51, %v1848_v41  ;;  %v1903_v53 = vpop.f32.mrb[52].mxu0  ;;  %v2673_v54 = vpop.f32.mrb[53].mxu1 }
 0x55a   : > { %v1950_v55 = vadd.f32 %v1903_v53, %v1846_v44  ;;  %v1905_v56 = vpop.f32.mrb[53].mxu0  ;;  %v1947_v57 = vpop.f32.mrb[54].mxu1 }
 0x55b   : > { %v1951_v60 = vadd.f32 %v1905_v56, %v1847_v47  ;;  %v1907_v61 = vpop.f32.mrb[54].mxu0  ;;  %v2674_v63 = vpop.f32.mrb[55].mxu1 }
 0x55c   : > { %v1908_v0 = vpop.f32.mrb[55].mxu0 }
 0x560   : > { %v2048_v1 = vpop.f32.mrb[56].mxu1 }
 0x561   : > { %v2056_v2 = vadd.f32 %v2048_v1, %v1952_v52  ;;  %v2007_v3 = vpop.f32.mrb[56].mxu0  ;;  %v2679_v4 = vpop.f32.mrb[57].mxu1 }
 0x562   : > { %v2054_v5 = vadd.f32 %v2007_v3, %v1950_v55  ;;  %v2009_v7 = vpop.f32.mrb[57].mxu0  ;;  %v2051_v9 = vpop.f32.mrb[58].mxu1  ;;  %v1425_v55 = vld [vmem:[%s3204_s7] sm:$0xff] }
 0x563   : > { %v2055_v10 = vadd.f32 %v2009_v7, %v1951_v60  ;;  %v2011_v11 = vpop.f32.mrb[58].mxu0  ;;  %v2680_v12 = vpop.f32.mrb[59].mxu1 }
 0x564   : > { %v2012_v13 = vpop.f32.mrb[59].mxu0  ;;  %v1426_v11 = vld [vmem:[%s3205_s8] sm:$0xff] }
 0x568   : > { %v2152_v14 = vpop.f32.mrb[60].mxu1 }
 0x569   : > { %v2160_v15 = vadd.f32 %v2152_v14, %v2056_v2  ;;  %v2111_v16 = vpop.f32.mrb[60].mxu0  ;;  %v2685_v17 = vpop.f32.mrb[61].mxu1 }
 0x56a   : > { %v2158_v18 = vadd.f32 %v2111_v16, %v2054_v5  ;;  %v2113_v19 = vpop.f32.mrb[61].mxu0  ;;  %v2155_v20 = vpop.f32.mrb[62].mxu1 }
 0x56b   : > { %v2159_v6 = vadd.f32 %v2113_v19, %v2055_v10  ;;  %v2115_v21 = vpop.f32.mrb[62].mxu0  ;;  %v2686_v8 = vpop.f32.mrb[63].mxu1 }
 0x56c   : > { %v2116_v22 = vpop.f32.mrb[63].mxu0 }
 0x570   : > { %v2256_v23 = vpop.f32.mrb[64].mxu1 }
 0x571   : > { %v2264_v24 = vadd.f32 %v2256_v23, %v2160_v15  ;;  %v2215_v25 = vpop.f32.mrb[64].mxu0  ;;  %v2691_v26 = vpop.f32.mrb[65].mxu1 }
 0x572   : > { %v2262_v27 = vadd.f32 %v2215_v25, %v2158_v18  ;;  %v2217_v28 = vpop.f32.mrb[65].mxu0  ;;  %v2259_v29 = vpop.f32.mrb[66].mxu1 }
 0x573   : > { %v2263_v30 = vadd.f32 %v2217_v28, %v2159_v6  ;;  %v2219_v31 = vpop.f32.mrb[66].mxu0  ;;  %v2692_v32 = vpop.f32.mrb[67].mxu1 }
 0x574   : > { %v2220_v33 = vpop.f32.mrb[67].mxu0 }
 0x578   : > { %v2360_v35 = vpop.f32.mrb[68].mxu1 }
 0x579   : > { %v2368_v36 = vadd.f32 %v2360_v35, %v2264_v24  ;;  %v2319_v37 = vpop.f32.mrb[68].mxu0  ;;  %v2697_v38 = vpop.f32.mrb[69].mxu1 }
 0x57a   : > { %v2366_v39 = vadd.f32 %v2319_v37, %v2262_v27  ;;  %v2321_v40 = vpop.f32.mrb[69].mxu0  ;;  %v2363_v41 = vpop.f32.mrb[70].mxu1 }
 0x57b   : > { %v2376_v42 = vadd.f32 %v2372_v34, %v2368_v36  ;;  %v2367_v43 = vadd.f32 %v2321_v40, %v2263_v30  ;;  %v2323_v44 = vpop.f32.mrb[70].mxu0  ;;  %v2698_v45 = vpop.f32.mrb[71].mxu1 }
 0x57c   : > { %v2374_v46 = vadd.f32 %v2372_v34, %v2366_v39  ;;  %v2324_v47 = vpop.f32.mrb[71].mxu0 }
 0x57d   : > { %v2375_v48 = vadd.f32 %v2372_v34, %v2367_v43  ;;  %v2379_v50 = vmul.f32 %v2376_v42, %v2997_v59 }
 0x57e   : > { %v2377_v49 = vmul.f32 %v2374_v46, %v2995_v58 }
 0x57f   : > { %v2378_v51 = vmul.f32 %v2375_v48, %v2999_v62  ;;  %v2381_v53 = vsel %vm1361_vm13, %v2379_v50, 0.0 }
 0x581   : > { %v2380_v52 = vadd.f32 %v2378_v51, %v2377_v49 }
 0x583   : > { %v2382_v54 = vadd.f32 %v2381_v53, %v2380_v52 }
 0x585   : > { %2383 = vadd.xlane.f32.xlu0 %v2382_v54 }
 0x59b   : > { %2408 = vperm.xlu0 %2722, %v1425_v55  }
 0x612   : > { %v2384_v56 = vpop.xlane.xlu0 %2383 }
 0x613   : > { %v2385_v57 = vmul.f32 0.00390625, %v2384_v56 }
 0x615   : > { %v2386_v60 = vsub.f32 %v2374_v46, %v2385_v57  ;;  %v2387_v61 = vsub.f32 %v2375_v48, %v2385_v57  ;;  %v2388_v63 = vsub.f32 %v2376_v42, %v2385_v57 }
 0x617   : > { %v2389_v0 = vmul.f32 %v2386_v60, %v2995_v58  ;;  %v2390_v1 = vmul.f32 %v2387_v61, %v2999_v62  ;;  %v2391_v2 = vmul.f32 %v2388_v63, %v2997_v59 }
 0x619   : > { %v2392_v3 = vmul.f32 %v2389_v0, %v2389_v0  ;;  %v2393_v4 = vmul.f32 %v2390_v1, %v2390_v1  ;;  %v2394_v5 = vmul.f32 %v2391_v2, %v2391_v2 }
 0x61a   : > { %v2409_v19 = vpop.permute.xlu0 %2408 }
 0x61b   : > { %v2395_v7 = vadd.f32 %v2393_v4, %v2392_v3  ;;  %v2396_v9 = vsel %vm1361_vm13, %v2394_v5, 0.0 }
 0x61d   : > { %v2397_v10 = vadd.f32 %v2396_v9, %v2395_v7 }
 0x61f   : > { %2398 = vadd.xlane.f32.xlu1 %v2397_v10 }
 0x630   : > { %2416 = vperm.xlu1 %2721, %v1426_v11  }
 0x6ac   : > { %v2399_v12 = vpop.xlane.xlu1 %2398 }
 0x6ad   : > { %v2400_v13 = vmul.f32 0.00390625, %v2399_v12 }
 0x6af   : > { %v2401_v14 = vadd.f32 1e-05, %v2400_v13 }
 0x6b0   : > { %v2417_v8 = vpop.permute.xlu1 %2416 }
 0x6b1   : > { %2726 = vrsqrt.f32 %v2401_v14 }
 0x6bb   : > { %v2727_v15 = vpop.eup %2726 }
 0x6bc   : > { %v2403_v16 = vmul.f32 %v2727_v15, %v2386_v60  ;;  %v2404_v17 = vmul.f32 %v2727_v15, %v2387_v61  ;;  %v2405_v18 = vmul.f32 %v2727_v15, %v2388_v63 }
 0x6be   : > { %v2411_v20 = vmul.f32 %v2409_v19, %v2403_v16  ;;  %v2412_v6 = vmul.f32 %v2409_v19, %v2404_v17  ;;  %v2413_v21 = vmul.f32 %v2409_v19, %v2405_v18 }
 0x6c0   : > { %v2419_v22 = vadd.f32 %v2417_v8, %v2411_v20  ;;  %v2420_v23 = vadd.f32 %v2417_v8, %v2412_v6  ;;  %v2421_v24 = vadd.f32 %v2417_v8, %v2413_v21 }
 0x6c2   : > { %vm2422_vm1 = vcmp.ge.f32.partialorder %v2419_v22, 0.0  ;;  %vm2423_vm3 = vcmp.ge.f32.partialorder %v2420_v23, 0.0  ;;  %vm2424_vm5 = vcmp.ge.f32.partialorder %v2421_v24, 0.0  ;;  %v2425_v25 = vmul.f32 0.01, %v2419_v22 }
 0x6c3   : > { %v2426_v26 = vmul.f32 0.01, %v2420_v23  ;;  %v2427_v27 = vmul.f32 0.01, %v2421_v24 }
 0x6c4   : > { %v2428_v28 = vsel %vm2422_vm1, %v2419_v22, %v2425_v25 }
 0x6c5   : > { %v2429_v29 = vsel %vm2423_vm3, %v2420_v23, %v2426_v26  ;;  %v2430_v30 = vsel %vm2424_vm5, %v2421_v24, %v2427_v27  ;;  %v2431_v31 = vmul.f32 %v2428_v28, %v2995_v58 }
 0x6c6   : > { %v2432_v32 = vmul.f32 %v2429_v29, %v2999_v62  ;;  %v2433_v33 = vmul.f32 %v2430_v30, %v2997_v59 }
 0x6c7   : > { %2434 = vst [vmem:[%s359_s18] sm:$0xff] %v2431_v31 }
 0x6c8   : > { %2435 = vst [vmem:[%s359_s18 + $0x8] sm:$0xff] %v2432_v32  ;;  %2436 = vst.msk [vmem:[%s359_s18 + $0x10] sm:$0xff] %vm1361_vm13, %v2433_v33 }
 0x6c9 PF: > { %s20_s13 = sadd.s32 1, %s2734_s13  }
 0x6ca   : > { %p17_p4 = scmp.ge.s32.totalorder %s20_s13, 4  }
 0x6cc   :  { %19 = sbr.rel (!%p17_p4) target bundleno = 1 (0x1), region = 90 }

// kernel: usenet_forward.11
= control target key start
LH: loop header
LB: loop body
LE: loop exit
PB: predicated region body
PF: predicated region fallthrough
CT: control target
= control target key end

     0   :  { %s520_s18 = smov 0   ;;  %s568_s0 = inlined_call_operand.vmem [shape: f32[2,72,64], index: 0, kind: input, shape index: {}]   ;;  %s569_s1 = inlined_call_operand.vmem [shape: bf16[16,72], index: 1, kind: input, shape index: {}]   ;;  %s570_s2 = inlined_call_operand.vmem [shape: f32[16,1], index: 2, kind: input, shape index: {}]   ;;  %s571_s3 = inlined_call_operand.vmem [shape: f32[16,1], index: 3, kind: input, shape index: {}]   ;;  %s572_s4 = inlined_call_operand.vmem [shape: f32[16,1], index: 4, kind: input, shape index: {}]   ;;  %s573_s5 = inlined_call_operand.vmem [shape: f32[2,16,64], index: 5, kind: output, shape index: {}]  }
   0x1 LB: > { %s427_s19 = sadd.s32 4294967295, %s485_s18   ;;  %p431_p0 = scmp.ge.s32.totalorder %s485_s18, 1  ;;  %s485_s18 = sphi %s520_s18, %s15_s18  }
   0x2   : > { %p187_p1 = scmp.lt.s32.totalorder %s485_s18, 3 }
   0x4   : > { %p188_p2 = pnand %p431_p0, %p187_p1 }
   0x5   : > { %p215_p3 = scmp.lt.s32.totalorder (!%p188_p2), %s427_s19, 1  ;;  %v487_v0 = vmov (!%p188_p2), 0.0   ;;  %vm488_vm0 = vmmov (!%p188_p2), 0   ;;  %v242_v1 = vld [vmem:[%s570_s2] sm:$0xff] (!%p188_p2)  ;;  %v489_v2 = vmov (!%p188_p2), 0   ;;  %v243_v3 = vld [vmem:[%s570_s2 + $0x8] sm:$0xff] (!%p188_p2) }
   0x6   : > { %191 = sbr.rel (%p188_p2) target bundleno = 574 (0x23e), region = 40  ;;  %446 = vmatprep.subr.bf16.mxu0 (!%p188_p2), %v487_v0  ;;  %456 = vmatprep.mubr.msk.bf16.mxu0 (!%p188_p2), %vm488_vm0, %v487_v0  ;;  %vm263_vm1 = vcmask (!%p188_p2), 1043456   ;;  %v474_v19 = vld [vmem:[%s569_s1] sm:$0xff] (!%p188_p2)   ;;  %vm259_vm2 = vcmask (!%p188_p2), 588800   ;;  %vm308_vm3 = vcmask (!%p188_p2), 523264   ;;  %v337_v31 = vld [vmem:[%s571_s3 + $0x8] sm:$0xff] (!%p188_p2) }
   0x7   : > { %472 = vset.pattern.permute.xlu0 (!%p188_p2), %v489_v2  ;;  %473 = vset.pattern.permute.xlu1 (!%p188_p2), %v489_v2  ;;  %v336_v30 = vld [vmem:[%s571_s3] sm:$0xff] (!%p188_p2)  ;;  %v351_v43 = vld [vmem:[%s572_s4 + $0x8] sm:$0xff] (!%p188_p2) }
   0x8   : > { %246 = vperm.xlu0 (!%p188_p2), %472, %v242_v1   ;;  %v350_v32 = vld [vmem:[%s572_s4] sm:$0xff] (!%p188_p2) }
   0xc   : > { %251 = vperm.xlu0 (!%p188_p2), %472, %v243_v3  }
   0xd   : > { %s575_s19 = smov (!%p215_p3, %s427_s19), 1 }
   0xe   : > { %s460_s22 = smul.u32 72, %s575_s19  ;;  %s439_s13 = sshll.u32 %s575_s19, 4 }
   0xf   : > { %s224_s16 = scalar_lea.vmem %s573_s5, %s439_s13 }
  0x10   : > { %s219_s27 = scalar_lea.vmem %s568_s0, %s460_s22 }
  0x11   : > { %v226_v4 = vld [vmem:[%s219_s27] sm:$0xff]  ;;  %v227_v5 = vld [vmem:[%s219_s27 + $0x8] sm:$0xff]  ;;  %v228_v6 = vld [vmem:[%s219_s27 + $0x10] sm:$0xff] }
  0x12   : > { %v235_v7 = vpack.c.bf16 %v227_v5, %v226_v4  ;;  %v229_v8 = vld [vmem:[%s219_s27 + $0x18] sm:$0xff]  ;;  %v230_v10 = vld [vmem:[%s219_s27 + $0x20] sm:$0xff]  ;;  %v231_v11 = vld [vmem:[%s219_s27 + $0x28] sm:$0xff] }
  0x13   : > { %v236_v9 = vpack.c.bf16 %v229_v8, %v228_v6  ;;  %v237_v12 = vpack.c.bf16 %v231_v11, %v230_v10  ;;  %v232_v13 = vld [vmem:[%s219_s27 + $0x30] sm:$0xff]  ;;  %v233_v14 = vld [vmem:[%s219_s27 + $0x38] sm:$0xff]  ;;  %v234_v15 = vld [vmem:[%s219_s27 + $0x40] sm:$0xff] }
  0x14   : > { %447 = vmatpush3.bf16.msra.mxu0 %v235_v7  ;;  %v238_v16 = vpack.c.bf16 %v233_v14, %v232_v13  ;;  %v239_v17 = vpack.c.bf16 %v234_v15, %v234_v15 }
  0x15   : > { %448 = vmatprep.subr.bf16.mxu0 %v487_v0 }
  0x16   : > { %v265_v18 = vsel %vm263_vm1, %v239_v17, 0 }
  0x18   : > { %449 = vmatpush3.bf16.msra.mxu0 %v236_v9 }
  0x19   : > { %450 = vmatprep.subr.bf16.mxu0 %v487_v0 }
  0x1c   : > { %451 = vmatpush3.bf16.msra.mxu0 %v237_v12 }
  0x1d   : > { %452 = vmatprep.subr.bf16.mxu0 %v487_v0 }
  0x20   : > { %453 = vmatpush3.bf16.msra.mxu0 %v238_v16 }
  0x21   : > { %454 = vmatprep.subr.bf16.mxu0 %v487_v0 }
  0x24   : > { %455 = vmatpush3.bf16.msra.mxu0 %v265_v18 }
  0x27   : > { %457 = vmatmul.mubr.msk.bf16.vlgmr.msra.gmra.mrb[0].mxu0 %vm259_vm2, %v474_v19 }
  0x87   : > { %v247_v20 = vpop.permute.xlu0 %246 }
  0x8b   : > { %v252_v24 = vpop.permute.xlu0 %251 }
  0xfa   : > { %v301_v21 = vpop.f32.mrb[0].mxu0 }
  0xfb   : > { %v302_v22 = vadd.f32 %v301_v21, %v247_v20  ;;  %v458_v23 = vpop.f32.mrb[1].mxu0 }
  0xfc   : > { %v304_v25 = vpop.f32.mrb[2].mxu0 }
  0xfd   : > { %v305_v26 = vadd.f32 %v304_v25, %v252_v24  ;;  %v459_v27 = vpop.f32.mrb[3].mxu0  ;;  %v309_v28 = vsel %vm308_vm3, %v302_v22, 0.0 }
  0xfe   : > { %310 = vadd.xlane.f32.xlu1 %v309_v28 }
  0xff   : > { %v312_v29 = vsel %vm308_vm3, %v305_v26, 0.0 }
 0x102   : > { %313 = vadd.xlane.f32.xlu1 %v312_v29 }
 0x113   : > { %340 = vperm.xlu1 %473, %v336_v30  }
 0x117   : > { %345 = vperm.xlu1 %473, %v337_v31  }
 0x11b   : > { %354 = vperm.xlu1 %473, %v350_v32  }
 0x18b   : > { %v311_v33 = vpop.xlane.xlu1 %310 }
 0x18c   : > { %v316_v34 = vmul.f32 0.015625, %v311_v33 }
 0x18e   : > { %v318_v35 = vsub.f32 %v302_v22, %v316_v34 }
 0x18f   : > { %v314_v36 = vpop.xlane.xlu1 %313 }
 0x190   : > { %v317_v37 = vmul.f32 0.015625, %v314_v36  ;;  %v320_v38 = vmul.f32 %v318_v35, %v318_v35 }
 0x192   : > { %v319_v39 = vsub.f32 %v305_v26, %v317_v37  ;;  %v322_v40 = vsel %vm308_vm3, %v320_v38, 0.0 }
 0x193   : > { %323 = vadd.xlane.f32.xlu0 %v322_v40  ;;  %v341_v44 = vpop.permute.xlu1 %340 }
 0x194   : > { %v321_v41 = vmul.f32 %v319_v39, %v319_v39 }
 0x196   : > { %v325_v42 = vsel %vm308_vm3, %v321_v41, 0.0 }
 0x197   : > { %326 = vadd.xlane.f32.xlu1 %v325_v42  ;;  %v346_v45 = vpop.permute.xlu1 %345 }
 0x19b   : > { %v355_v46 = vpop.permute.xlu1 %354 }
 0x1a8   : > { %359 = vperm.xlu1 %473, %v351_v43  }
 0x220   : > { %v324_v47 = vpop.xlane.xlu0 %323 }
 0x221   : > { %v328_v48 = vmul.f32 0.015625, %v324_v47 }
 0x223   : > { %v330_v49 = vadd.f32 1e-05, %v328_v48 }
 0x224   : > { %v327_v50 = vpop.xlane.xlu1 %326 }
 0x225   : > { %475 = vrsqrt.f32 %v330_v49  ;;  %v329_v51 = vmul.f32 0.015625, %v327_v50 }
 0x227   : > { %v331_v52 = vadd.f32 1e-05, %v329_v51 }
 0x228   : > { %v360_v61 = vpop.permute.xlu1 %359 }
 0x229   : > { %477 = vrsqrt.f32 %v331_v52 }
 0x22f   : > { %v476_v53 = vpop.eup %475 }
 0x230   : > { %v334_v54 = vmul.f32 %v476_v53, %v318_v35 }
 0x232   : > { %v348_v55 = vmul.f32 %v341_v44, %v334_v54 }
 0x233   : > { %v478_v56 = vpop.eup %477 }
 0x234   : > { %v362_v57 = vadd.f32 %v355_v46, %v348_v55  ;;  %v335_v58 = vmul.f32 %v478_v56, %v319_v39 }
 0x236   : > { %v349_v59 = vmul.f32 %v346_v45, %v335_v58  ;;  %vm364_vm4 = vcmp.ge.f32.partialorder %v362_v57, 0.0  ;;  %v366_v60 = vmul.f32 0.01, %v362_v57 }
 0x238   : > { %v368_v62 = vsel %vm364_vm4, %v362_v57, %v366_v60  ;;  %v363_v63 = vadd.f32 %v360_v61, %v349_v59 }
 0x239   : > { %370 = vst.msk [vmem:[%s224_s16] sm:$0xff] %vm308_vm3, %v368_v62 }
 0x23a   : > { %vm365_vm5 = vcmp.ge.f32.partialorder %v363_v63, 0.0  ;;  %v367_v0 = vmul.f32 0.01, %v363_v63 }
 0x23c   : > { %v369_v1 = vsel %vm365_vm5, %v363_v63, %v367_v0 }
 0x23d   : > { %371 = vst.msk [vmem:[%s224_s16 + $0x8] sm:$0xff] %vm308_vm3, %v369_v1 }
 0x23e PF: > { %s15_s18 = sadd.s32 1, %s485_s18  }
 0x23f   : > { %p12_p4 = scmp.ge.s32.totalorder %s15_s18, 4  }
 0x241   :  { %14 = sbr.rel (!%p12_p4) target bundleno = 1 (0x1), region = 70 }

// kernel: usenet_forward.12
= control target key start
LH: loop header
LB: loop body
LE: loop exit
PB: predicated region body
PF: predicated region fallthrough
CT: control target
= control target key end

     0   :  { %s1104_s21 = smov 0   ;;  %s1226_s0 = inlined_call_operand.vmem [shape: f32[2,16,100], index: 0, kind: input, shape index: {}]   ;;  %s1227_s1 = inlined_call_operand.vmem [shape: bf16[9,16,16], index: 1, kind: input, shape index: {}]   ;;  %s1228_s2 = inlined_call_operand.vmem [shape: f32[16,1], index: 2, kind: input, shape index: {}]   ;;  %s1229_s3 = inlined_call_operand.vmem [shape: f32[16,1], index: 3, kind: input, shape index: {}]   ;;  %s1230_s4 = inlined_call_operand.vmem [shape: f32[16,1], index: 4, kind: input, shape index: {}]   ;;  %s1231_s5 = inlined_call_operand.vmem [shape: f32[1,100], index: 5, kind: input, shape index: {}]   ;;  %s1232_s6 = inlined_call_operand.vmem [shape: f32[2,16,100], index: 6, kind: output, shape index: {}]  }
   0x1 LB: > { %s910_s22 = sadd.s32 4294967295, %s1055_s21   ;;  %p914_p0 = scmp.ge.s32.totalorder %s1055_s21, 1  ;;  %s1055_s21 = sphi %s1104_s21, %s16_s21  }
   0x2   : > { %p212_p1 = scmp.lt.s32.totalorder %s1055_s21, 3 }
   0x4   : > { %p213_p2 = pnand %p914_p0, %p212_p1 }
   0x5   : > { %p242_p3 = scmp.lt.s32.totalorder (!%p213_p2), %s910_s22, 1  ;;  %v1057_v0 = vmov (!%p213_p2), 0.0   ;;  %s1058_s27 = smov (!%p213_p2), 11   ;;  %vm1059_vm0 = vmmov (!%p213_p2), 0   ;;  %vm284_vm1 = vcmask (!%p213_p2), 89088   ;;  %vm288_vm2 = vcmask (!%p213_p2), 908288  }
   0x6   : > { %216 = sbr.rel (%p213_p2) target bundleno = 827 (0x33b), region = 44  ;;  %966 = vmatprep.subr.bf16.mxu1 (!%p213_p2), %v1057_v0  ;;  %960 = vmatprep.subr.bf16.mxu0 (!%p213_p2), %v1057_v0  ;;  %s1060_s28 = smov (!%p213_p2), 126   ;;  %v1036_v7 = vld [vmem:[%s1227_s1] sm:$0xff] (!%p213_p2)   ;;  %vm300_vm3 = vcmask (!%p213_p2), 130048   ;;  %v275_v9 = vld [vmem:[%s1228_s2 + $0x8] sm:$0xff] (!%p213_p2)  ;;  %v1068_v10 = vmov (!%p213_p2), 0  }
   0x7   : > { %968 = vmatprep.mubr.msk.bf16.mxu1 (!%p213_p2), %vm1059_vm0, %v1057_v0  ;;  %962 = vmatprep.mubr.msk.bf16.mxu0 (!%p213_p2), %vm1059_vm0, %v1057_v0  ;;  %s1061_s29 = smov (!%p213_p2), 127   ;;  %s1062_s8 = smov (!%p213_p2), 118   ;;  %v274_v8 = vld [vmem:[%s1228_s2] sm:$0xff] (!%p213_p2)  ;;  %v1037_v13 = vld [vmem:[%s1227_s1 + $0x8] sm:$0xff] (!%p213_p2)   ;;  %v1038_v15 = vld [vmem:[%s1227_s1 + $0x18] sm:$0xff] (!%p213_p2)   ;;  %vm792_vm4 = vcmask (!%p213_p2), 818176  }
   0x8   : > { %s1063_s9 = smov (!%p213_p2), 117   ;;  %s1064_s10 = smov (!%p213_p2), 116   ;;  %1034 = vset.pattern.permute.xlu1 (!%p213_p2), %v1068_v10  ;;  %1035 = vset.pattern.permute.xlu0 (!%p213_p2), %v1068_v10  ;;  %v1039_v17 = vld [vmem:[%s1227_s1 + $0x10] sm:$0xff] (!%p213_p2)   ;;  %v1040_v19 = vld [vmem:[%s1227_s1 + $0x28] sm:$0xff] (!%p213_p2)   ;;  %v1041_v21 = vld [vmem:[%s1227_s1 + $0x20] sm:$0xff] (!%p213_p2)  }
   0x9   : > { %s1065_s11 = smov (!%p213_p2), 108   ;;  %s1066_s12 = smov (!%p213_p2), 107   ;;  %v1043_v23 = vld [vmem:[%s1227_s1 + $0x38] sm:$0xff] (!%p213_p2)   ;;  %v1042_v24 = vld [vmem:[%s1227_s1 + $0x30] sm:$0xff] (!%p213_p2)   ;;  %v1044_v26 = vld [vmem:[%s1227_s1 + $0x40] sm:$0xff] (!%p213_p2)  }
   0xa   : > { %s1067_s13 = smov (!%p213_p2), 106  }
   0xd   : > { %s1234_s22 = smov (!%p242_p3, %s910_s22), 1 }
   0xe   : > { %s940_s23 = sshll.u32 %s1234_s22, 4 }
   0xf   : > { %s246_s26 = scalar_lea.vmem %s1226_s0, %s940_s23 }
  0x10   : > { %v254_v1 = vld [vmem:[%s246_s26] sm:$0xff]  ;;  %v255_v2 = vld [vmem:[%s246_s26 + $0x8] sm:$0xff] }
  0x11   : > { %v280_v3 = vpack.c.bf16 %v255_v2, %v254_v1 }
  0x13   : > { %282 = vrot.lane.b32.xlu0 %v280_v3, %s1058_s27 }
  0x85   : > { %v283_v4 = vpop.permute.xlu0 %282 }
  0x86   : > { %v287_v5 = vsel %vm284_vm1, 0, %v283_v4 }
  0x87   : > { %v289_v6 = vsel %vm288_vm2, %v287_v5, 0 }
  0x88   : > { %399 = vrot.lane.b32.xlu1 %v289_v6, %s1060_s28  ;;  %297 = vrot.lane.b32.xlu0 %v289_v6, %s1061_s29  ;;  %s251_s28 = scalar_lea.vmem %s1232_s6, %s940_s23 }
  0x89   : > { %967 = vmatpush3.bf16.msra.mxu1 %v289_v6 }
  0x8a   : > { %978 = vmatprep.subr.bf16.mxu1 %v1057_v0 }
  0x8c   : > { %453 = vrot.lane.b32.xlu1 %v289_v6, %s1062_s8  ;;  %507 = vrot.lane.b32.xlu0 %v289_v6, %s1063_s9 }
  0x8d   : > { %969 = vmatmul.mubr.msk.bf16.vlgmr.msra.gmra.mrb[0].mxu1 %vm300_vm3, %v1036_v7 }
  0x8e   : > { %980 = vmatprep.mubr.msk.bf16.mxu1 %vm1059_vm0, %v1057_v0 }
  0x90   : > { %561 = vrot.lane.b32.xlu1 %v289_v6, %s1064_s10  ;;  %615 = vrot.lane.b32.xlu0 %v289_v6, %s1065_s11 }
  0x94   : > { %669 = vrot.lane.b32.xlu1 %v289_v6, %s1066_s12  ;;  %723 = vrot.lane.b32.xlu0 %v289_v6, %s1067_s13 }
  0x98   : > { %774 = vperm.xlu1 %1034, %v274_v8   ;;  %779 = vperm.xlu0 %1035, %v275_v9  }
  0xfa   : > { %v400_v11 = vpop.permute.xlu1 %399  ;;  %v298_v12 = vpop.permute.xlu0 %297 }
  0xfb   : > { %961 = vmatpush3.bf16.msra.mxu0 %v298_v12 }
  0xfc   : > { %972 = vmatprep.subr.bf16.mxu0 %v1057_v0 }
  0xfe   : > { %v454_v14 = vpop.permute.xlu1 %453  ;;  %963 = vmatmul.mubr.msk.bf16.vlgmr.msra.gmra.mrb[0].mxu0 %vm300_vm3, %v1037_v13  ;;  %v508_v18 = vpop.permute.xlu0 %507 }
  0xff   : > { %973 = vmatpush3.bf16.msra.mxu0 %v400_v11  ;;  %979 = vmatpush3.bf16.msra.mxu1 %v454_v14 }
 0x100   : > { %990 = vmatprep.subr.bf16.mxu1 %v1057_v0  ;;  %974 = vmatprep.mubr.msk.bf16.mxu0 %vm1059_vm0, %v1057_v0 }
 0x101   : > { %984 = vmatprep.subr.bf16.mxu0 %v1057_v0 }
 0x102   : > { %v562_v16 = vpop.permute.xlu1 %561  ;;  %981 = vmatmul.mubr.msk.bf16.vlgmr.msra.gmra.mrb[4].mxu1 %vm300_vm3, %v1038_v15  ;;  %v616_v22 = vpop.permute.xlu0 %615  ;;  %v1192_v15 = vld [vmem:[%s1231_s5] ss:$0 sm:$0xff] }
 0x103   : > { %991 = vmatpush3.bf16.msra.mxu1 %v562_v16  ;;  %992 = vmatprep.mubr.msk.bf16.mxu1 %vm1059_vm0, %v1057_v0 }
 0x104   : > { %1002 = vmatprep.subr.bf16.mxu1 %v1057_v0 }
 0x106   : > { %975 = vmatmul.mubr.msk.bf16.vlgmr.msra.gmra.mrb[4].mxu0 %vm300_vm3, %v1039_v17  ;;  %v670_v20 = vpop.permute.xlu1 %669  ;;  %v724_v25 = vpop.permute.xlu0 %723 }
 0x107   : > { %985 = vmatpush3.bf16.msra.mxu0 %v508_v18  ;;  %986 = vmatprep.mubr.msk.bf16.mxu0 %vm1059_vm0, %v1057_v0 }
 0x108   : > { %996 = vmatprep.subr.bf16.mxu0 %v1057_v0 }
 0x10a   : > { %993 = vmatmul.mubr.msk.bf16.vlgmr.msra.gmra.mrb[8].mxu1 %vm300_vm3, %v1040_v19 }
 0x10b   : > { %1003 = vmatpush3.bf16.msra.mxu1 %v670_v20  ;;  %1004 = vmatprep.mubr.msk.bf16.mxu1 %vm1059_vm0, %v1057_v0 }
 0x10e   : > { %987 = vmatmul.mubr.msk.bf16.vlgmr.msra.gmra.mrb[8].mxu0 %vm300_vm3, %v1041_v21 }
 0x10f   : > { %997 = vmatpush3.bf16.msra.mxu0 %v616_v22  ;;  %998 = vmatprep.mubr.msk.bf16.mxu0 %vm1059_vm0, %v1057_v0 }
 0x110   : > { %1008 = vmatprep.subr.bf16.mxu0 %v1057_v0 }
 0x112   : > { %1005 = vmatmul.mubr.msk.bf16.vlgmr.msra.gmra.mrb[12].mxu1 %vm300_vm3, %v1043_v23 }
 0x116   : > { %999 = vmatmul.mubr.msk.bf16.vlgmr.msra.gmra.mrb[12].mxu0 %vm300_vm3, %v1042_v24  ;;  %v276_v24 = vld [vmem:[%s1229_s3] sm:$0xff] }
 0x117   : > { %1009 = vmatpush3.bf16.msra.mxu0 %v724_v25  ;;  %1010 = vmatprep.mubr.msk.bf16.mxu0 %vm1059_vm0, %v1057_v0  ;;  %v775_v10 = vpop.permute.xlu1 %774  ;;  %v780_v14 = vpop.permute.xlu0 %779 }
 0x11e   : > { %1011 = vmatmul.mubr.msk.bf16.vlgmr.msra.gmra.mrb[16].mxu0 %vm300_vm3, %v1044_v26 }
 0x160   : > { %v387_v27 = vpop.f32.mrb[0].mxu1 }
 0x161   : > { %v970_v28 = vpop.f32.mrb[1].mxu1 }
 0x162   : > { %v390_v29 = vpop.f32.mrb[2].mxu1 }
 0x163   : > { %v971_v30 = vpop.f32.mrb[3].mxu1 }
 0x1d1   : > { %v338_v31 = vpop.f32.mrb[0].mxu0 }
 0x1d2   : > { %v388_v32 = vadd.f32 %v387_v27, %v338_v31  ;;  %v964_v33 = vpop.f32.mrb[1].mxu0 }
 0x1d3   : > { %v341_v34 = vpop.f32.mrb[2].mxu0 }
 0x1d4   : > { %v391_v35 = vadd.f32 %v390_v29, %v341_v34  ;;  %v965_v36 = vpop.f32.mrb[3].mxu0 }
 0x1d5   : > { %v493_v37 = vpop.f32.mrb[4].mxu1 }
 0x1d6   : > { %v982_v38 = vpop.f32.mrb[5].mxu1 }
 0x1d7   : > { %v496_v39 = vpop.f32.mrb[6].mxu1  ;;  %v279_v38 = vld [vmem:[%s1230_s4 + $0x8] sm:$0xff] }
 0x1d8   : > { %v983_v40 = vpop.f32.mrb[7].mxu1 }
 0x1d9   : > { %v439_v41 = vpop.f32.mrb[4].mxu0 }
 0x1da   : > { %v446_v42 = vadd.f32 %v439_v41, %v388_v32  ;;  %v976_v43 = vpop.f32.mrb[5].mxu0 }
 0x1db   : > { %v442_v44 = vpop.f32.mrb[6].mxu0 }
 0x1dc   : > { %v447_v45 = vadd.f32 %v442_v44, %v391_v35  ;;  %v500_v46 = vadd.f32 %v493_v37, %v446_v42  ;;  %v977_v47 = vpop.f32.mrb[7].mxu0  ;;  %v278_v37 = vld [vmem:[%s1230_s4] sm:$0xff] }
 0x1dd   : > { %v601_v48 = vpop.f32.mrb[8].mxu1 }
 0x1de   : > { %v501_v49 = vadd.f32 %v496_v39, %v447_v45  ;;  %v994_v50 = vpop.f32.mrb[9].mxu1  ;;  %v277_v39 = vld [vmem:[%s1229_s3 + $0x8] sm:$0xff] }
 0x1df   : > { %v604_v51 = vpop.f32.mrb[10].mxu1 }
 0x1e0   : > { %v995_v52 = vpop.f32.mrb[11].mxu1 }
 0x1e1   : > { %v547_v53 = vpop.f32.mrb[8].mxu0 }
 0x1e2   : > { %v554_v54 = vadd.f32 %v547_v53, %v500_v46  ;;  %v988_v55 = vpop.f32.mrb[9].mxu0 }
 0x1e3   : > { %v550_v56 = vpop.f32.mrb[10].mxu0 }
 0x1e4   : > { %v555_v57 = vadd.f32 %v550_v56, %v501_v49  ;;  %v608_v58 = vadd.f32 %v601_v48, %v554_v54  ;;  %v989_v59 = vpop.f32.mrb[11].mxu0 }
 0x1e5   : > { %v709_v60 = vpop.f32.mrb[12].mxu1 }
 0x1e6   : > { %v609_v61 = vadd.f32 %v604_v51, %v555_v57  ;;  %v1006_v62 = vpop.f32.mrb[13].mxu1 }
 0x1e7   : > { %v712_v63 = vpop.f32.mrb[14].mxu1 }
 0x1e8   : > { %v1007_v0 = vpop.f32.mrb[15].mxu1 }
 0x1e9   : > { %v655_v1 = vpop.f32.mrb[12].mxu0 }
 0x1ea   : > { %v662_v2 = vadd.f32 %v655_v1, %v608_v58  ;;  %v1000_v3 = vpop.f32.mrb[13].mxu0 }
 0x1eb   : > { %v658_v4 = vpop.f32.mrb[14].mxu0 }
 0x1ec   : > { %v663_v5 = vadd.f32 %v658_v4, %v609_v61  ;;  %v716_v6 = vadd.f32 %v709_v60, %v662_v2  ;;  %v1001_v7 = vpop.f32.mrb[15].mxu0 }
 0x1ee   : > { %v717_v8 = vadd.f32 %v712_v63, %v663_v5 }
 0x1f1   : > { %v763_v9 = vpop.f32.mrb[16].mxu0 }
 0x1f2   : > { %v770_v11 = vadd.f32 %v763_v9, %v716_v6  ;;  %v1012_v12 = vpop.f32.mrb[17].mxu0 }
 0x1f3   : > { %v766_v13 = vpop.f32.mrb[18].mxu0 }
 0x1f4   : > { %v782_v16 = vadd.f32 %v775_v10, %v770_v11  ;;  %v771_v17 = vadd.f32 %v766_v13, %v717_v8  ;;  %v1013_v18 = vpop.f32.mrb[19].mxu0 }
 0x1f6   : > { %v783_v19 = vadd.f32 %v780_v14, %v771_v17  ;;  %v790_v20 = vmul.f32 %v1192_v15, %v782_v16 }
 0x1f8   : > { %v793_v21 = vsel %vm792_vm4, %v790_v20, 0.0  ;;  %v791_v22 = vmul.f32 %v1192_v15, %v783_v19 }
 0x1f9   : > { %794 = vadd.xlane.f32.xlu1 %v793_v21 }
 0x1fa   : > { %v796_v23 = vsel %vm792_vm4, %v791_v22, 0.0 }
 0x1fb   : > { %797 = vadd.xlane.f32.xlu0 %v796_v23 }
 0x20a   : > { %823 = vperm.xlu1 %1034, %v276_v24  }
 0x286   : > { %v795_v25 = vpop.xlane.xlu1 %794 }
 0x287   : > { %v799_v26 = vmul.f32 0.015625, %v795_v25 }
 0x288   : > { %v798_v27 = vpop.xlane.xlu0 %797 }
 0x289   : > { %v801_v28 = vsub.f32 %v782_v16, %v799_v26  ;;  %v800_v29 = vmul.f32 0.015625, %v798_v27 }
 0x28a   : > { %v824_v40 = vpop.permute.xlu1 %823 }
 0x28b   : > { %v802_v30 = vsub.f32 %v783_v19, %v800_v29  ;;  %v803_v31 = vmul.f32 %v1192_v15, %v801_v28 }
 0x28d   : > { %v805_v32 = vmul.f32 %v803_v31, %v803_v31  ;;  %v804_v33 = vmul.f32 %v1192_v15, %v802_v30 }
 0x28f   : > { %v807_v34 = vsel %vm792_vm4, %v805_v32, 0.0  ;;  %v806_v35 = vmul.f32 %v804_v33, %v804_v33 }
 0x290   : > { %808 = vadd.xlane.f32.xlu1 %v807_v34 }
 0x291   : > { %v810_v36 = vsel %vm792_vm4, %v806_v35, 0.0 }
 0x292   : > { %811 = vadd.xlane.f32.xlu0 %v810_v36 }
 0x2a1   : > { %835 = vperm.xlu1 %1034, %v278_v37  }
 0x2a5   : > { %840 = vperm.xlu1 %1034, %v279_v38  }
 0x2a8   : > { %828 = vperm.xlu0 %1035, %v277_v39  }
 0x31d   : > { %v809_v41 = vpop.xlane.xlu1 %808 }
 0x31e   : > { %v813_v42 = vmul.f32 0.015625, %v809_v41 }
 0x31f   : > { %v812_v43 = vpop.xlane.xlu0 %811 }
 0x320   : > { %v815_v44 = vadd.f32 1e-05, %v813_v42  ;;  %v814_v45 = vmul.f32 0.015625, %v812_v43 }
 0x321   : > { %v836_v48 = vpop.permute.xlu1 %835 }
 0x322   : > { %1045 = vrsqrt.f32 %v815_v44  ;;  %v816_v46 = vadd.f32 1e-05, %v814_v45 }
 0x324   : > { %1047 = vrsqrt.f32 %v816_v46 }
 0x325   : > { %v841_v56 = vpop.permute.xlu1 %840 }
 0x327   : > { %v829_v53 = vpop.permute.xlu0 %828 }
 0x32c   : > { %v1046_v47 = vpop.eup %1045 }
 0x32d   : > { %v819_v49 = vmul.f32 %v1046_v47, %v801_v28 }
 0x32e   : > { %v1048_v50 = vpop.eup %1047 }
 0x32f   : > { %v831_v51 = vmul.f32 %v824_v40, %v819_v49  ;;  %v820_v52 = vmul.f32 %v1048_v50, %v802_v30 }
 0x331   : > { %v843_v54 = vadd.f32 %v836_v48, %v831_v51  ;;  %v832_v55 = vmul.f32 %v829_v53, %v820_v52 }
 0x333   : > { %vm845_vm5 = vcmp.ge.f32.partialorder %v843_v54, 0.0  ;;  %v847_v57 = vmul.f32 0.01, %v843_v54  ;;  %v844_v58 = vadd.f32 %v841_v56, %v832_v55 }
 0x335   : > { %v849_v59 = vsel %vm845_vm5, %v843_v54, %v847_v57  ;;  %vm846_vm6 = vcmp.ge.f32.partialorder %v844_v58, 0.0  ;;  %v848_v60 = vmul.f32 0.01, %v844_v58 }
 0x336   : > { %v851_v61 = vmul.f32 %v1192_v15, %v849_v59 }
 0x337   : > { %v850_v62 = vsel %vm846_vm6, %v844_v58, %v848_v60 }
 0x338   : > { %853 = vst.msk [vmem:[%s251_s28] sm:$0xff] %vm792_vm4, %v851_v61  ;;  %v852_v63 = vmul.f32 %v1192_v15, %v850_v62 }
 0x33a   : > { %854 = vst.msk [vmem:[%s251_s28 + $0x8] sm:$0xff] %vm792_vm4, %v852_v63 }
 0x33b PF: > { %s16_s21 = sadd.s32 1, %s1055_s21  }
 0x33c   : > { %p13_p4 = scmp.ge.s32.totalorder %s16_s21, 4  }
 0x33e   :  { %15 = sbr.rel (!%p13_p4) target bundleno = 1 (0x1), region = 74 }

// kernel: usenet_forward.13
= control target key start
LH: loop header
LB: loop body
LE: loop exit
PB: predicated region body
PF: predicated region fallthrough
CT: control target
= control target key end

     0   :  { %s635_s18 = smov 0   ;;  %s758_s0 = inlined_call_operand.vmem [shape: f32[2,144,16], index: 0, kind: input, shape index: {}]   ;;  %s759_s1 = inlined_call_operand.vmem [shape: bf16[32,144], index: 1, kind: input, shape index: {}]   ;;  %s760_s2 = inlined_call_operand.vmem [shape: f32[32,1], index: 2, kind: input, shape index: {}]   ;;  %s761_s3 = inlined_call_operand.vmem [shape: f32[32,1], index: 3, kind: input, shape index: {}]   ;;  %s762_s4 = inlined_call_operand.vmem [shape: f32[32,1], index: 4, kind: input, shape index: {}]   ;;  %s763_s5 = inlined_call_operand.vmem [shape: f32[2,32,16], index: 5, kind: output, shape index: {}]  }
   0x1 LB: > { %s535_s19 = sadd.s32 4294967295, %s602_s18   ;;  %p539_p0 = scmp.ge.s32.totalorder %s602_s18, 1  ;;  %s602_s18 = sphi %s635_s18, %s15_s18  }
   0x2   : > { %p187_p1 = scmp.lt.s32.totalorder %s602_s18, 3 }
   0x4   : > { %p188_p2 = pnand %p539_p0, %p187_p1 }
   0x5   : > { %p215_p3 = scmp.lt.s32.totalorder (!%p188_p2), %s535_s19, 1  ;;  %v604_v0 = vmov (!%p188_p2), 0   ;;  %v584_v1 = vld [vmem:[%s759_s1 + $0x4] ss:$8 sps:$4 sm:$0xff] (!%p188_p2)   ;;  %vm299_vm0 = vcmask (!%p188_p2), 130048   ;;  %v259_v4 = vld [vmem:[%s760_s2 + $0x10] sm:$0xff] (!%p188_p2) }
   0x6   : > { %191 = sbr.rel (%p188_p2) target bundleno = 594 (0x252), region = 40  ;;  %306 = vmatprep.subr.bf16.mxu0 (!%p188_p2), %v604_v0  ;;  %552 = vmatprep.subr.bf16.mxu1 (!%p188_p2), %v604_v0  ;;  %v587_v2 = vld [vmem:[%s759_s1 + $0x14] ss:$8 sps:$4 sm:$0xff] (!%p188_p2)   ;;  %v257_v3 = vld [vmem:[%s760_s2] sm:$0xff] (!%p188_p2)  ;;  %v258_v5 = vld [vmem:[%s760_s2 + $0x8] sm:$0xff] (!%p188_p2) }
   0x7   : > { %580 = vset.pattern.permute.xlu0 (!%p188_p2), %v604_v0  ;;  %581 = vset.pattern.permute.xlu1 (!%p188_p2), %v604_v0  ;;  %v260_v6 = vld [vmem:[%s760_s2 + $0x18] sm:$0xff] (!%p188_p2)  ;;  %v582_v34 = vld [vmem:[%s759_s1] ss:$8 sps:$4 sm:$0xff] (!%p188_p2)   ;;  %v410_v57 = vld [vmem:[%s761_s3 + $0x10] sm:$0xff] (!%p188_p2) }
   0x8   : > { %547 = vmatprep.mubr.msk.bf16.mxu0 (!%p188_p2), %vm299_vm0, %v584_v1  ;;  %263 = vperm.xlu0 (!%p188_p2), %580, %v257_v3   ;;  %v585_v35 = vld [vmem:[%s759_s1 + $0x10] ss:$8 sps:$4 sm:$0xff] (!%p188_p2)   ;;  %v408_v56 = vld [vmem:[%s761_s3] sm:$0xff] (!%p188_p2)  ;;  %v409_v59 = vld [vmem:[%s761_s3 + $0x8] sm:$0xff] (!%p188_p2) }
   0x9   : > { %548 = vmatprep.mubr.msk.bf16.mxu1 (!%p188_p2), %vm299_vm0, %v587_v2  ;;  %273 = vperm.xlu1 (!%p188_p2), %581, %v259_v4   ;;  %v411_v58 = vld [vmem:[%s761_s3 + $0x18] sm:$0xff] (!%p188_p2)  ;;  %v437_v60 = vld [vmem:[%s762_s4 + $0x8] sm:$0xff] (!%p188_p2)  ;;  %v436_v61 = vld [vmem:[%s762_s4] sm:$0xff] (!%p188_p2) }
   0xc   : > { %268 = vperm.xlu0 (!%p188_p2), %580, %v258_v5  }
   0xd   : > { %s765_s19 = smov (!%p215_p3, %s535_s19), 1  ;;  %278 = vperm.xlu1 %581, %v260_v6  }
   0xe   : > { %s570_s28 = smul.u32 144, %s765_s19  ;;  %s551_s8 = sshll.u32 %s765_s19, 5 }
   0xf   : > { %s224_s11 = scalar_lea.vmem %s763_s5, %s551_s8 }
  0x10   : > { %s673_s10 = scalar_lea.vmem %s758_s0, %s570_s28 }
  0x11   : > { %v226_v7 = vld [vmem:[%s673_s10] sm:$0xff]  ;;  %v227_v8 = vld [vmem:[%s673_s10 + $0x8] sm:$0xff]  ;;  %v228_v9 = vld [vmem:[%s673_s10 + $0x10] sm:$0xff] }
  0x12   : > { %v244_v10 = vpack.c.bf16 %v227_v8, %v226_v7  ;;  %v229_v11 = vld [vmem:[%s673_s10 + $0x18] sm:$0xff]  ;;  %v230_v13 = vld [vmem:[%s673_s10 + $0x20] sm:$0xff]  ;;  %v231_v14 = vld [vmem:[%s673_s10 + $0x28] sm:$0xff] }
  0x13   : > { %v245_v12 = vpack.c.bf16 %v229_v11, %v228_v9  ;;  %v246_v15 = vpack.c.bf16 %v231_v14, %v230_v13  ;;  %v232_v16 = vld [vmem:[%s673_s10 + $0x30] sm:$0xff]  ;;  %v233_v17 = vld [vmem:[%s673_s10 + $0x38] sm:$0xff]  ;;  %v234_v19 = vld [vmem:[%s673_s10 + $0x40] sm:$0xff] }
  0x14   : > { %307 = vmatpush1.bf16.msra.mxu0 %v244_v10  ;;  %561 = vmatpush1.bf16.msra.mxu1 %v244_v10  ;;  %v247_v18 = vpack.c.bf16 %v233_v17, %v232_v16  ;;  %v235_v20 = vld [vmem:[%s673_s10 + $0x48] sm:$0xff]  ;;  %v236_v22 = vld [vmem:[%s673_s10 + $0x50] sm:$0xff]  ;;  %v237_v23 = vld [vmem:[%s673_s10 + $0x58] sm:$0xff] }
  0x15   : > { %308 = vmatprep.subr.bf16.mxu0 %v604_v0  ;;  %553 = vmatprep.subr.bf16.mxu1 %v604_v0  ;;  %v248_v21 = vpack.c.bf16 %v235_v20, %v234_v19  ;;  %v249_v24 = vpack.c.bf16 %v237_v23, %v236_v22  ;;  %v238_v25 = vld [vmem:[%s673_s10 + $0x60] sm:$0xff]  ;;  %v239_v26 = vld [vmem:[%s673_s10 + $0x68] sm:$0xff]  ;;  %v240_v28 = vld [vmem:[%s673_s10 + $0x70] sm:$0xff] }
  0x16   : > { %v250_v27 = vpack.c.bf16 %v239_v26, %v238_v25  ;;  %v241_v29 = vld [vmem:[%s673_s10 + $0x78] sm:$0xff]  ;;  %v242_v31 = vld [vmem:[%s673_s10 + $0x80] sm:$0xff]  ;;  %v243_v32 = vld [vmem:[%s673_s10 + $0x88] sm:$0xff] }
  0x17   : > { %v251_v30 = vpack.c.bf16 %v241_v29, %v240_v28  ;;  %v252_v33 = vpack.c.bf16 %v243_v32, %v242_v31  ;;  %v438_v19 = vld [vmem:[%s762_s4 + $0x10] sm:$0xff] }
  0x18   : > { %309 = vmatpush1.bf16.msra.mxu0 %v245_v12  ;;  %562 = vmatpush1.bf16.msra.mxu1 %v245_v12 }
  0x19   : > { %310 = vmatprep.subr.bf16.mxu0 %v604_v0  ;;  %554 = vmatprep.subr.bf16.mxu1 %v604_v0 }
  0x1c   : > { %311 = vmatpush1.bf16.msra.mxu0 %v246_v15  ;;  %563 = vmatpush1.bf16.msra.mxu1 %v246_v15 }
  0x1d   : > { %312 = vmatprep.subr.bf16.mxu0 %v604_v0  ;;  %555 = vmatprep.subr.bf16.mxu1 %v604_v0 }
  0x20   : > { %313 = vmatpush1.bf16.msra.mxu0 %v247_v18  ;;  %564 = vmatpush1.bf16.msra.mxu1 %v247_v18  ;;  %v439_v18 = vld [vmem:[%s762_s4 + $0x18] sm:$0xff] }
  0x21   : > { %314 = vmatprep.subr.bf16.mxu0 %v604_v0  ;;  %556 = vmatprep.subr.bf16.mxu1 %v604_v0 }
  0x24   : > { %315 = vmatpush1.bf16.msra.mxu0 %v248_v21  ;;  %565 = vmatpush1.bf16.msra.mxu1 %v248_v21 }
  0x25   : > { %316 = vmatprep.subr.bf16.mxu0 %v604_v0  ;;  %557 = vmatprep.subr.bf16.mxu1 %v604_v0 }
  0x28   : > { %317 = vmatpush1.bf16.msra.mxu0 %v249_v24  ;;  %566 = vmatpush1.bf16.msra.mxu1 %v249_v24 }
  0x29   : > { %318 = vmatprep.subr.bf16.mxu0 %v604_v0  ;;  %558 = vmatprep.subr.bf16.mxu1 %v604_v0 }
  0x2c   : > { %319 = vmatpush1.bf16.msra.mxu0 %v250_v27  ;;  %567 = vmatpush1.bf16.msra.mxu1 %v250_v27 }
  0x2d   : > { %320 = vmatprep.subr.bf16.mxu0 %v604_v0  ;;  %559 = vmatprep.subr.bf16.mxu1 %v604_v0 }
  0x30   : > { %321 = vmatpush1.bf16.msra.mxu0 %v251_v30  ;;  %568 = vmatpush1.bf16.msra.mxu1 %v251_v30 }
  0x31   : > { %322 = vmatprep.subr.bf16.mxu0 %v604_v0  ;;  %560 = vmatprep.subr.bf16.mxu1 %v604_v0 }
  0x34   : > { %323 = vmatpush1.bf16.msra.mxu0 %v252_v33  ;;  %569 = vmatpush1.bf16.msra.mxu1 %v252_v33 }
  0x37   : > { %339 = vmatmul.mubr.bf16.vlgmr.msra.gmra.mrb[0].mxu0 %v582_v34  ;;  %347 = vmatmul.mubr.bf16.vlgmr.msra.gmra.mrb[0].mxu1 %v585_v35 }
  0x87   : > { %v264_v36 = vpop.permute.xlu0 %263 }
  0x88   : > { %v274_v37 = vpop.permute.xlu1 %273 }
  0x8b   : > { %v269_v38 = vpop.permute.xlu0 %268 }
  0x8c   : > { %v279_v51 = vpop.permute.xlu1 %278 }
 0x10a   : > { %v340_v39 = vpop.f32.mrb[0].mxu0  ;;  %v348_v40 = vpop.f32.mrb[0].mxu1 }
 0x10b   : > { %v341_v41 = vadd.f32 %v340_v39, %v264_v36  ;;  %v342_v42 = vpop.f32.mrb[1].mxu0  ;;  %v349_v43 = vadd.f32 %v348_v40, %v274_v37  ;;  %v350_v44 = vpop.f32.mrb[1].mxu1 }
 0x10c   : > { %v343_v45 = vpop.f32.mrb[2].mxu0  ;;  %v351_v46 = vpop.f32.mrb[2].mxu1 }
 0x10d   : > { %v344_v47 = vadd.f32 %v343_v45, %v269_v38  ;;  %v345_v48 = vpop.f32.mrb[3].mxu0  ;;  %v353_v49 = vpop.f32.mrb[3].mxu1  ;;  %v355_v50 = vsel %vm299_vm0, %v341_v41, 0.0  ;;  %v361_v53 = vsel %vm299_vm0, %v349_v43, 0.0  ;;  %v352_v54 = vadd.f32 %v351_v46, %v279_v51 }
 0x10e   : > { %356 = vadd.xlane.f32.xlu0 %v355_v50 }
 0x10f   : > { %v358_v52 = vsel %vm299_vm0, %v344_v47, 0.0  ;;  %v364_v55 = vsel %vm299_vm0, %v352_v54, 0.0 }
 0x110   : > { %359 = vadd.xlane.f32.xlu1 %v358_v52 }
 0x112   : > { %362 = vadd.xlane.f32.xlu0 %v361_v53 }
 0x116   : > { %365 = vadd.xlane.f32.xlu0 %v364_v55 }
 0x121   : > { %414 = vperm.xlu1 %581, %v408_v56  }
 0x125   : > { %424 = vperm.xlu1 %581, %v410_v57  }
 0x129   : > { %429 = vperm.xlu1 %581, %v411_v58  }
 0x12c   : > { %419 = vperm.xlu0 %580, %v409_v59  }
 0x12d   : > { %447 = vperm.xlu1 %581, %v437_v60  }
 0x130   : > { %442 = vperm.xlu0 %580, %v436_v61  }
 0x19b   : > { %v357_v62 = vpop.xlane.xlu0 %356 }
 0x19c   : > { %v368_v63 = vmul.f32 0.0625, %v357_v62 }
 0x19d   : > { %v360_v0 = vpop.xlane.xlu1 %359 }
 0x19e   : > { %v372_v1 = vsub.f32 %v341_v41, %v368_v63  ;;  %v369_v2 = vmul.f32 0.0625, %v360_v0 }
 0x19f   : > { %v363_v3 = vpop.xlane.xlu0 %362 }
 0x1a0   : > { %v373_v4 = vsub.f32 %v344_v47, %v369_v2  ;;  %v370_v5 = vmul.f32 0.0625, %v363_v3  ;;  %v376_v6 = vmul.f32 %v372_v1, %v372_v1 }
 0x1a1   : > { %v415_v20 = vpop.permute.xlu1 %414 }
 0x1a2   : > { %v374_v7 = vsub.f32 %v349_v43, %v370_v5  ;;  %v380_v8 = vsel %vm299_vm0, %v376_v6, 0.0  ;;  %v377_v9 = vmul.f32 %v373_v4, %v373_v4 }
 0x1a3   : > { %381 = vadd.xlane.f32.xlu1 %v380_v8  ;;  %v366_v10 = vpop.xlane.xlu0 %365 }
 0x1a4   : > { %v371_v11 = vmul.f32 0.0625, %v366_v10  ;;  %v383_v12 = vsel %vm299_vm0, %v377_v9, 0.0  ;;  %v378_v13 = vmul.f32 %v374_v7, %v374_v7 }
 0x1a5   : > { %384 = vadd.xlane.f32.xlu0 %v383_v12  ;;  %v425_v21 = vpop.permute.xlu1 %424 }
 0x1a6   : > { %v375_v14 = vsub.f32 %v352_v54, %v371_v11  ;;  %v386_v15 = vsel %vm299_vm0, %v378_v13, 0.0 }
 0x1a7   : > { %387 = vadd.xlane.f32.xlu1 %v386_v15 }
 0x1a8   : > { %v379_v16 = vmul.f32 %v375_v14, %v375_v14 }
 0x1a9   : > { %v430_v22 = vpop.permute.xlu1 %429 }
 0x1aa   : > { %v389_v17 = vsel %vm299_vm0, %v379_v16, 0.0 }
 0x1ab   : > { %390 = vadd.xlane.f32.xlu0 %v389_v17  ;;  %v420_v23 = vpop.permute.xlu0 %419 }
 0x1ad   : > { %v448_v24 = vpop.permute.xlu1 %447 }
 0x1af   : > { %v443_v25 = vpop.permute.xlu0 %442 }
 0x1b8   : > { %457 = vperm.xlu1 %581, %v439_v18  }
 0x1c1   : > { %452 = vperm.xlu0 %580, %v438_v19  }
 0x230   : > { %v382_v26 = vpop.xlane.xlu1 %381 }
 0x231   : > { %v392_v27 = vmul.f32 0.0625, %v382_v26 }
 0x232   : > { %v385_v28 = vpop.xlane.xlu0 %384 }
 0x233   : > { %v396_v29 = vadd.f32 1e-05, %v392_v27  ;;  %v393_v30 = vmul.f32 0.0625, %v385_v28 }
 0x234   : > { %v388_v31 = vpop.xlane.xlu1 %387 }
 0x235   : > { %588 = vrsqrt.f32 %v396_v29  ;;  %v397_v32 = vadd.f32 1e-05, %v393_v30  ;;  %v394_v33 = vmul.f32 0.0625, %v388_v31 }
 0x237   : > { %590 = vrsqrt.f32 %v397_v32  ;;  %v398_v34 = vadd.f32 1e-05, %v394_v33 }
 0x238   : > { %v391_v35 = vpop.xlane.xlu0 %390  ;;  %v458_v58 = vpop.permute.xlu1 %457 }
 0x239   : > { %592 = vrsqrt.f32 %v398_v34  ;;  %v395_v36 = vmul.f32 0.0625, %v391_v35 }
 0x23b   : > { %v399_v37 = vadd.f32 1e-05, %v395_v36 }
 0x23d   : > { %594 = vrsqrt.f32 %v399_v37 }
 0x23f   : > { %v589_v38 = vpop.eup %588 }
 0x240   : > { %v404_v39 = vmul.f32 %v589_v38, %v372_v1  ;;  %v453_v54 = vpop.permute.xlu0 %452 }
 0x241   : > { %v591_v40 = vpop.eup %590 }
 0x242   : > { %v432_v41 = vmul.f32 %v415_v20, %v404_v39  ;;  %v405_v42 = vmul.f32 %v591_v40, %v373_v4 }
 0x243   : > { %v593_v43 = vpop.eup %592 }
 0x244   : > { %v460_v44 = vadd.f32 %v443_v25, %v432_v41  ;;  %v433_v45 = vmul.f32 %v420_v23, %v405_v42  ;;  %v406_v46 = vmul.f32 %v593_v43, %v374_v7 }
 0x246   : > { %v468_v47 = vmul.f32 0.01, %v460_v44  ;;  %v461_v48 = vadd.f32 %v448_v24, %v433_v45  ;;  %v434_v49 = vmul.f32 %v425_v21, %v406_v46  ;;  %vm464_vm1 = vcmp.ge.f32.partialorder %v460_v44, 0.0 }
 0x247   : > { %v595_v50 = vpop.eup %594 }
 0x248   : > { %v469_v51 = vmul.f32 0.01, %v461_v48  ;;  %v407_v52 = vmul.f32 %v595_v50, %v375_v14  ;;  %vm465_vm2 = vcmp.ge.f32.partialorder %v461_v48, 0.0  ;;  %v472_v53 = vsel %vm464_vm1, %v460_v44, %v468_v47 }
 0x249   : > { %476 = vst.msk [vmem:[%s224_s11] sm:$0xff] %vm299_vm0, %v472_v53  ;;  %v462_v55 = vadd.f32 %v453_v54, %v434_v49 }
 0x24a   : > { %v435_v56 = vmul.f32 %v430_v22, %v407_v52  ;;  %v473_v57 = vsel %vm465_vm2, %v461_v48, %v469_v51 }
 0x24b   : > { %477 = vst.msk [vmem:[%s224_s11 + $0x8] sm:$0xff] %vm299_vm0, %v473_v57  ;;  %vm466_vm3 = vcmp.ge.f32.partialorder %v462_v55, 0.0  ;;  %v470_v59 = vmul.f32 0.01, %v462_v55 }
 0x24c   : > { %v463_v60 = vadd.f32 %v458_v58, %v435_v56 }
 0x24d   : > { %v474_v61 = vsel %vm466_vm3, %v462_v55, %v470_v59 }
 0x24e   : > { %v471_v62 = vmul.f32 0.01, %v463_v60  ;;  %vm467_vm4 = vcmp.ge.f32.partialorder %v463_v60, 0.0  ;;  %478 = vst.msk [vmem:[%s224_s11 + $0x10] sm:$0xff] %vm299_vm0, %v474_v61 }
 0x250   : > { %v475_v63 = vsel %vm467_vm4, %v463_v60, %v471_v62 }
 0x251   : > { %479 = vst.msk [vmem:[%s224_s11 + $0x18] sm:$0xff] %vm299_vm0, %v475_v63 }
 0x252 PF: > { %s15_s18 = sadd.s32 1, %s602_s18  }
 0x253   : > { %p12_p4 = scmp.ge.s32.totalorder %s15_s18, 4  }
 0x255   :  { %14 = sbr.rel (!%p12_p4) target bundleno = 1 (0x1), region = 70 }

// kernel: usenet_forward.15
= control target key start
LH: loop header
LB: loop body
LE: loop exit
PB: predicated region body
PF: predicated region fallthrough
CT: control target
= control target key end

     0   :  { %s935_s21 = smov 0   ;;  %s1043_s0 = inlined_call_operand.vmem [shape: f32[2,32,36], index: 0, kind: input, shape index: {}]   ;;  %s1044_s1 = inlined_call_operand.vmem [shape: bf16[4,16,32], index: 1, kind: input, shape index: {}]   ;;  %s1045_s2 = inlined_call_operand.vmem [shape: f32[4,16], index: 2, kind: input, shape index: {}]   ;;  %s1046_s3 = inlined_call_operand.vmem [shape: f32[4,1], index: 3, kind: input, shape index: {}]   ;;  %s1047_s4 = inlined_call_operand.vmem [shape: f32[16,4], index: 4, kind: input, shape index: {}]   ;;  %s1048_s5 = inlined_call_operand.vmem [shape: f32[16,1], index: 5, kind: input, shape index: {}]   ;;  %s1049_s6 = inlined_call_operand.vmem [shape: f32[2,4,16,36], index: 6, kind: output, shape index: {}]  }
   0x1 LB: > { %s764_s22 = sadd.s32 4294967295, %s894_s21   ;;  %p768_p0 = scmp.ge.s32.totalorder %s894_s21, 1  ;;  %s894_s21 = sphi %s935_s21, %s16_s21  }
   0x2   : > { %p212_p1 = scmp.lt.s32.totalorder %s894_s21, 3 }
   0x4   : > { %p213_p2 = pnand %p768_p0, %p212_p1 }
   0x5   : > { %p242_p3 = scmp.lt.s32.totalorder (!%p213_p2), %s764_s22, 1  ;;  %v896_v0 = vmov (!%p213_p2), 0.0   ;;  %vm897_vm0 = vmmov (!%p213_p2), 0   ;;  %v876_v7 = vld [vmem:[%s1044_s1] sm:$0xff] (!%p213_p2)   ;;  %v877_v8 = vld [vmem:[%s1044_s1 + $0x8] sm:$0xff] (!%p213_p2)   ;;  %vm266_vm1 = vcmask (!%p213_p2), 261120  }
   0x6   : > { %216 = sbr.rel (%p213_p2) target bundleno = 998 (0x3e6), region = 44  ;;  %815 = vmatprep.subr.bf16.mxu0 (!%p213_p2), %v896_v0  ;;  %823 = vmatprep.subr.bf16.mxu1 (!%p213_p2), %v896_v0  ;;  %v878_v9 = vld [vmem:[%s1044_s1 + $0x10] sm:$0xff] (!%p213_p2)   ;;  %v879_v10 = vld [vmem:[%s1044_s1 + $0x18] sm:$0xff] (!%p213_p2)   ;;  %vm311_vm2 = vcmask (!%p213_p2), 293888   ;;  %v898_v35 = vmov (!%p213_p2), 0.0|0.0   ;;  %vm504_vm3 = vcmask (!%p213_p2), 130048  }
   0x7   : > { %819 = vmatprep.mubr.msk.bf16.mxu0 (!%p213_p2), %vm897_vm0, %v896_v0  ;;  %827 = vmatprep.mubr.msk.bf16.mxu1 (!%p213_p2), %vm897_vm0, %v896_v0  ;;  %v502_v53 = vld [vmem:[%s1045_s2] sm:$0xf] (!%p213_p2)  ;;  %vm583_vm4 = vcmask (!%p213_p2), 31744   ;;  %vm590_vm5 = vcmask (!%p213_p2), 1043456   ;;  %v580_v60 = vld [vmem:[%s1047_s4 + $0x8] sm:$0xff] (!%p213_p2)  ;;  %v899_v61 = vmov (!%p213_p2), 0  }
   0x8   : > { %v579_v54 = vld [vmem:[%s1047_s4] sm:$0xff] (!%p213_p2)  ;;  %875 = vset.pattern.permute.xlu1 (!%p213_p2), %v899_v61  ;;  %874 = vset.pattern.permute.xlu0 (!%p213_p2), %v899_v61  ;;  %v582_v62 = vld [vmem:[%s1048_s5 + $0x8] sm:$0xff] (!%p213_p2) }
   0x9   : > { %v503_v55 = vld [vmem:[%s1046_s3] sm:$0xf] (!%p213_p2) }
   0xa   : > { %v581_v63 = vld [vmem:[%s1048_s5] sm:$0xff] (!%p213_p2) }
   0xd   : > { %s1051_s22 = smov (!%p242_p3, %s764_s22), 1 }
   0xe   : > { %s795_s23 = sshll.u32 %s1051_s22, 5  ;;  %s796_s25 = sshll.u32 %s1051_s22, 6 }
   0xf   : > { %s246_s26 = scalar_lea.vmem %s1043_s0, %s795_s23  ;;  %s251_s28 = scalar_lea.vmem %s1049_s6, %s796_s25 }
  0x10   : > { %v253_v1 = vld [vmem:[%s246_s26] sm:$0xff]  ;;  %v254_v2 = vld [vmem:[%s246_s26 + $0x8] sm:$0xff]  ;;  %v255_v3 = vld [vmem:[%s246_s26 + $0x10] sm:$0xff] }
  0x11   : > { %v257_v4 = vpack.c.bf16 %v254_v2, %v253_v1  ;;  %v256_v5 = vld [vmem:[%s246_s26 + $0x18] sm:$0xff] }
  0x12   : > { %v258_v6 = vpack.c.bf16 %v256_v5, %v255_v3 }
  0x13   : > { %816 = vmatpush3.bf16.msra.mxu0 %v257_v4  ;;  %824 = vmatpush3.bf16.msra.mxu1 %v257_v4 }
  0x14   : > { %817 = vmatprep.subr.bf16.mxu0 %v896_v0  ;;  %825 = vmatprep.subr.bf16.mxu1 %v896_v0 }
  0x17   : > { %818 = vmatpush3.bf16.msra.mxu0 %v258_v6  ;;  %826 = vmatpush3.bf16.msra.mxu1 %v258_v6 }
  0x18   : > { %831 = vmatprep.subr.bf16.mxu0 %v896_v0  ;;  %839 = vmatprep.subr.bf16.mxu1 %v896_v0 }
  0x1a   : > { %820 = vmatmul.mubr.msk.bf16.vlgmr.msra.gmra.mrb[0].mxu0 %vm266_vm1, %v876_v7  ;;  %828 = vmatmul.mubr.msk.bf16.vlgmr.msra.gmra.mrb[0].mxu1 %vm266_vm1, %v877_v8 }
  0x1b   : > { %832 = vmatpush3.bf16.msra.mxu0 %v257_v4  ;;  %840 = vmatpush3.bf16.msra.mxu1 %v257_v4 }
  0x1c   : > { %833 = vmatprep.subr.bf16.mxu0 %v896_v0  ;;  %841 = vmatprep.subr.bf16.mxu1 %v896_v0 }
  0x1d   : > { %835 = vmatprep.mubr.msk.bf16.mxu0 %vm897_vm0, %v896_v0  ;;  %843 = vmatprep.mubr.msk.bf16.mxu1 %vm897_vm0, %v896_v0 }
  0x1f   : > { %834 = vmatpush3.bf16.msra.mxu0 %v258_v6  ;;  %842 = vmatpush3.bf16.msra.mxu1 %v258_v6 }
  0x20   : > { %859 = vmatprep.subr.bf16.mxu0 %v898_v35 }
  0x22   : > { %836 = vmatmul.mubr.msk.bf16.vlgmr.msra.gmra.mrb[4].mxu0 %vm266_vm1, %v878_v9  ;;  %844 = vmatmul.mubr.msk.bf16.vlgmr.msra.gmra.mrb[4].mxu1 %vm266_vm1, %v879_v10 }
  0x23   : > { %851 = vmatprep.mubr.msk.f32.mxu0 %vm897_vm0, %v896_v0  ;;  %856 = vmatprep.mubr.msk.f32.mxu1 %vm583_vm4, %v579_v54 }
  0xed   : > { %v970_v11 = vpop.f32.mrb[0].mxu0  ;;  %v972_v12 = vpop.f32.mrb[0].mxu1 }
  0xee   : > { %v821_v13 = vpop.f32.mrb[1].mxu0  ;;  %v829_v14 = vpop.f32.mrb[1].mxu1  ;;  %v372_v15 = vsel %vm311_vm2, %v972_v12, 0.0  ;;  %v312_v16 = vsel %vm311_vm2, %v970_v11, 0.0 }
  0xef   : > { %373 = vadd.xlane.f32.xlu1 %v372_v15  ;;  %v978_v17 = vpop.f32.mrb[2].mxu1  ;;  %313 = vadd.xlane.f32.xlu0 %v312_v16  ;;  %v980_v18 = vpop.f32.mrb[2].mxu0 }
  0xf0   : > { %v822_v19 = vpop.f32.mrb[3].mxu0  ;;  %v830_v20 = vpop.f32.mrb[3].mxu1  ;;  %v375_v21 = vsel %vm311_vm2, %v978_v17, 0.0  ;;  %v315_v22 = vsel %vm311_vm2, %v980_v18, 0.0 }
  0xf3   : > { %376 = vadd.xlane.f32.xlu1 %v375_v21  ;;  %316 = vadd.xlane.f32.xlu0 %v315_v22 }
  0xf5   : > { %v986_v23 = vpop.f32.mrb[4].mxu0  ;;  %v988_v24 = vpop.f32.mrb[4].mxu1 }
  0xf6   : > { %v837_v25 = vpop.f32.mrb[5].mxu0  ;;  %v845_v26 = vpop.f32.mrb[5].mxu1  ;;  %v432_v27 = vsel %vm311_vm2, %v986_v23, 0.0  ;;  %v492_v33 = vsel %vm311_vm2, %v988_v24, 0.0 }
  0xf7   : > { %433 = vadd.xlane.f32.xlu0 %v432_v27  ;;  %v992_v28 = vpop.f32.mrb[6].mxu0  ;;  %v994_v29 = vpop.f32.mrb[6].mxu1 }
  0xf8   : > { %v838_v30 = vpop.f32.mrb[7].mxu0  ;;  %v846_v31 = vpop.f32.mrb[7].mxu1  ;;  %v435_v32 = vsel %vm311_vm2, %v992_v28, 0.0  ;;  %v495_v34 = vsel %vm311_vm2, %v994_v29, 0.0 }
  0xf9   : > { %436 = vadd.xlane.f32.xlu1 %v435_v32 }
  0xfb   : > { %493 = vadd.xlane.f32.xlu0 %v492_v33 }
  0xfd   : > { %496 = vadd.xlane.f32.xlu1 %v495_v34 }
 0x17c   : > { %v374_v36 = vpop.xlane.xlu1 %373  ;;  %v314_v37 = vpop.xlane.xlu0 %313 }
 0x17d   : > { %v378_v41 = vadd.f32 %v374_v36, %v314_v37 }
 0x180   : > { %v317_v38 = vpop.xlane.xlu0 %316  ;;  %v377_v39 = vpop.xlane.xlu1 %376 }
 0x181   : > { %v379_v43 = vadd.f32 %v377_v39, %v317_v38 }
 0x184   : > { %v434_v40 = vpop.xlane.xlu0 %433 }
 0x185   : > { %v438_v44 = vadd.f32 %v434_v40, %v378_v41 }
 0x186   : > { %v437_v42 = vpop.xlane.xlu1 %436 }
 0x187   : > { %v439_v46 = vadd.f32 %v437_v42, %v379_v43 }
 0x188   : > { %v494_v45 = vpop.xlane.xlu0 %493 }
 0x189   : > { %v498_v47 = vadd.f32 %v494_v45, %v438_v44 }
 0x18a   : > { %v497_v48 = vpop.xlane.xlu1 %496 }
 0x18b   : > { %v499_v49 = vadd.f32 %v497_v48, %v439_v46  ;;  %v500_v50 = vmul.f32 0.015625, %v498_v47 }
 0x18d   : > { %v501_v51 = vmul.f32 0.015625, %v499_v49 }
 0x18f   : > { %v860_v52 = vpack.c.bf16 %v501_v51, %v500_v50 }
 0x191   : > { %861 = vmatpush3.bf16.msra.mxu0 %v860_v52 }
 0x194   : > { %852 = vmatmul.mubr.msk.f32.vlgmr.msra.gmra.mrb[8].mxu0 %vm504_vm3, %v502_v53 }
 0x267   : > { %v574_v56 = vpop.f32.mrb[8].mxu0 }
 0x268   : > { %v575_v57 = vadd.f32 %v574_v56, %v503_v55  ;;  %v853_v58 = vpop.f32.mrb[9].mxu0 }
 0x26a   : > { %v578_v59 = vmax.f32 %v575_v57, 0.0 }
 0x26c   : > { %854 = vmatprep.subr.msk.mxu1 %vm590_vm5, %v578_v59 }
 0x26d   : > { %855 = vmatpush3.msk.msra.mxu1 %vm590_vm5, %v578_v59 }
 0x26e   : > { %857 = vmatmul.mubr.msk.f32.vlgmr.msra.gmra.mrb[8].mxu1 %vm583_vm4, %v580_v60 }
 0x341   : > { %v858_v0 = vpop.f32.mrb[8].mxu1 }
 0x342   : > { %v666_v1 = vadd.f32 %v858_v0, %v582_v62  ;;  %v660_v2 = vpop.f32.mrb[9].mxu1 }
 0x343   : > { %v661_v3 = vadd.f32 %v660_v2, %v581_v63 }
 0x344   : > { %v792_v4 = vmul.f32 -1.442695, %v666_v1 }
 0x345   : > { %v791_v5 = vmul.f32 -1.442695, %v661_v3 }
 0x346   : > { %880 = vpow2.f32 %v792_v4 }
 0x347   : > { %882 = vpow2.f32 %v791_v5 }
 0x350   : > { %v881_v6 = vpop.eup %880 }
 0x351   : > { %v883_v7 = vpop.eup %882  ;;  %v676_v8 = vadd.f32 1.0, %v881_v6 }
 0x352   : > { %v675_v9 = vadd.f32 1.0, %v883_v7 }
 0x353   : > { %884 = vrcp.f32 %v676_v8 }
 0x354   : > { %886 = vrcp.f32 %v675_v9 }
 0x35d   : > { %v885_v10 = vpop.eup %884 }
 0x35e   : > { %v887_v13 = vpop.eup %886  ;;  %v682_v14 = vadd.f32 1.0, %v885_v10 }
 0x35f   : > { %v681_v15 = vadd.f32 1.0, %v887_v13 }
 0x360   : > { %690 = vperm.xlu1 %875, %v682_v14  }
 0x361   : > { %685 = vperm.xlu0 %874, %v681_v15  }
 0x3df   : > { %v691_v16 = vpop.permute.xlu1 %690 }
 0x3e0   : > { %v694_v19 = vmul.f32 %v691_v16, %v980_v18  ;;  %v696_v20 = vmul.f32 %v691_v16, %v978_v17  ;;  %v698_v21 = vmul.f32 %v691_v16, %v992_v28  ;;  %v700_v22 = vmul.f32 %v691_v16, %v994_v29  ;;  %v686_v25 = vpop.permute.xlu0 %685 }
 0x3e1   : > { %v693_v26 = vmul.f32 %v686_v25, %v970_v11  ;;  %v695_v27 = vmul.f32 %v686_v25, %v972_v12  ;;  %v697_v30 = vmul.f32 %v686_v25, %v986_v23  ;;  %v699_v31 = vmul.f32 %v686_v25, %v988_v24 }
 0x3e2   : > { %702 = vst.msk [vmem:[%s251_s28 + $0x8] sm:$0xff] %vm311_vm2, %v694_v19  ;;  %704 = vst.msk [vmem:[%s251_s28 + $0x18] sm:$0xff] %vm311_vm2, %v696_v20 }
 0x3e3   : > { %706 = vst.msk [vmem:[%s251_s28 + $0x28] sm:$0xff] %vm311_vm2, %v698_v21  ;;  %708 = vst.msk [vmem:[%s251_s28 + $0x38] sm:$0xff] %vm311_vm2, %v700_v22 }
 0x3e4   : > { %701 = vst.msk [vmem:[%s251_s28] sm:$0xff] %vm311_vm2, %v693_v26  ;;  %703 = vst.msk [vmem:[%s251_s28 + $0x10] sm:$0xff] %vm311_vm2, %v695_v27 }
 0x3e5   : > { %705 = vst.msk [vmem:[%s251_s28 + $0x20] sm:$0xff] %vm311_vm2, %v697_v30  ;;  %707 = vst.msk [vmem:[%s251_s28 + $0x30] sm:$0xff] %vm311_vm2, %v699_v31 }
 0x3e6 PF: > { %s16_s21 = sadd.s32 1, %s894_s21  }
 0x3e7   : > { %p13_p4 = scmp.ge.s32.totalorder %s16_s21, 4  }
 0x3e9   :  { %15 = sbr.rel (!%p13_p4) target bundleno = 1 (0x1), region = 77 }

// kernel: usenet_forward.14
= control target key start
LH: loop header
LB: loop body
LE: loop exit
PB: predicated region body
PF: predicated region fallthrough
CT: control target
= control target key end

     0   :  { %s1494_s21 = smov 0   ;;  %s1659_s0 = inlined_call_operand.vmem [shape: f32[2,32,36], index: 0, kind: input, shape index: {}]   ;;  %s1660_s1 = inlined_call_operand.vmem [shape: bf16[9,32,32], index: 1, kind: input, shape index: {}]   ;;  %s1661_s2 = inlined_call_operand.vmem [shape: f32[32,1], index: 2, kind: input, shape index: {}]   ;;  %s1662_s3 = inlined_call_operand.vmem [shape: f32[32,1], index: 3, kind: input, shape index: {}]   ;;  %s1663_s4 = inlined_call_operand.vmem [shape: f32[32,1], index: 4, kind: input, shape index: {}]   ;;  %s1664_s5 = inlined_call_operand.vmem [shape: f32[1,36], index: 5, kind: input, shape index: {}]   ;;  %s1665_s6 = inlined_call_operand.vmem [shape: f32[2,32,36], index: 6, kind: output, shape index: {}]  }
   0x1 LB: > { %s1203_s22 = sadd.s32 4294967295, %s1447_s21   ;;  %p1207_p0 = scmp.ge.s32.totalorder %s1447_s21, 1  ;;  %s1447_s21 = sphi %s1494_s21, %s16_s21  }
   0x2   : > { %p212_p1 = scmp.lt.s32.totalorder %s1447_s21, 3 }
   0x4   : > { %p213_p2 = pnand %p1207_p0, %p212_p1 }
   0x5   : > { %p242_p3 = scmp.lt.s32.totalorder (!%p213_p2), %s1203_s22, 1  ;;  %s1449_s27 = smov (!%p213_p2), 7   ;;  %v1415_v6 = vld [vmem:[%s1660_s1 + $0x10] sm:$0xff] (!%p213_p2)   ;;  %v1416_v7 = vld [vmem:[%s1660_s1 + $0x40] sm:$0xff] (!%p213_p2)   ;;  %vm343_vm0 = vcmask (!%p213_p2), 261120   ;;  %vm314_vm1 = vcmask (!%p213_p2), 56320  }
   0x6   : > { %216 = sbr.rel (%p213_p2) target bundleno = 857 (0x359), region = 44  ;;  %1293 = vmatprep.mubr.msk.bf16.mxu1 (!%p213_p2), %vm343_vm0, %v1415_v6  ;;  %1325 = vmatprep.mubr.msk.bf16.mxu0 (!%p213_p2), %vm343_vm0, %v1416_v7  ;;  %vm320_vm2 = vcmask (!%p213_p2), 351232   ;;  %s1450_s8 = smov (!%p213_p2), 127   ;;  %v295_v14 = vld [vmem:[%s1661_s2 + $0x8] sm:$0xff] (!%p213_p2)  ;;  %v294_v15 = vld [vmem:[%s1661_s2] sm:$0xff] (!%p213_p2)  ;;  %v1458_v16 = vmov (!%p213_p2), 0  }
   0x7   : > { %s1451_s9 = smov (!%p213_p2), 121   ;;  %s1452_s10 = smov (!%p213_p2), 116   ;;  %1414 = vset.pattern.permute.xlu1 (!%p213_p2), %v1458_v16  ;;  %1413 = vset.pattern.permute.xlu0 (!%p213_p2), %v1458_v16  ;;  %v296_v17 = vld [vmem:[%s1661_s2 + $0x10] sm:$0xff] (!%p213_p2)  ;;  %v297_v18 = vld [vmem:[%s1661_s2 + $0x18] sm:$0xff] (!%p213_p2)  ;;  %v1418_v24 = vld [vmem:[%s1660_s1 + $0x48] sm:$0xff] (!%p213_p2)   ;;  %vm1023_vm3 = vcmask (!%p213_p2), 293888  }
   0x8   : > { %s1453_s11 = smov (!%p213_p2), 120   ;;  %s1454_s12 = smov (!%p213_p2), 126   ;;  %v1417_v23 = vld [vmem:[%s1660_s1 + $0x18] sm:$0xff] (!%p213_p2)   ;;  %v1419_v27 = vld [vmem:[%s1660_s1 + $0x50] sm:$0xff] (!%p213_p2)   ;;  %v1420_v28 = vld [vmem:[%s1660_s1] sm:$0xff] (!%p213_p2)  }
   0x9   : > { %s1455_s13 = smov (!%p213_p2), 122   ;;  %s1456_s14 = smov (!%p213_p2), 115   ;;  %v1421_v31 = vld [vmem:[%s1660_s1 + $0x8] sm:$0xff] (!%p213_p2)   ;;  %v1422_v32 = vld [vmem:[%s1660_s1 + $0x58] sm:$0xff] (!%p213_p2)   ;;  %v1423_v35 = vld [vmem:[%s1660_s1 + $0x60] sm:$0xff] (!%p213_p2)  }
   0xa   : > { %s1457_s15 = smov (!%p213_p2), 114   ;;  %v1424_v36 = vld [vmem:[%s1660_s1 + $0x20] sm:$0xff] (!%p213_p2)   ;;  %v1425_v39 = vld [vmem:[%s1660_s1 + $0x28] sm:$0xff] (!%p213_p2)   ;;  %v1427_v42 = vld [vmem:[%s1660_s1 + $0x30] sm:$0xff] (!%p213_p2)  }
   0xb   : > { %v1426_v40 = vld [vmem:[%s1660_s1 + $0x68] sm:$0xff] (!%p213_p2)   ;;  %v1428_v43 = vld [vmem:[%s1660_s1 + $0x70] sm:$0xff] (!%p213_p2)   ;;  %v1429_v46 = vld [vmem:[%s1660_s1 + $0x38] sm:$0xff] (!%p213_p2)  }
   0xc   : > { %v1430_v47 = vld [vmem:[%s1660_s1 + $0x78] sm:$0xff] (!%p213_p2)   ;;  %v1431_v48 = vld [vmem:[%s1660_s1 + $0x80] sm:$0xff] (!%p213_p2)   ;;  %v1432_v50 = vld [vmem:[%s1660_s1 + $0x88] sm:$0xff] (!%p213_p2)  }
   0xd   : > { %s1667_s22 = smov (!%p242_p3, %s1203_s22), 1  ;;  %v299_v16 = vld [vmem:[%s1662_s3 + $0x8] sm:$0xff] }
   0xe   : > { %s1251_s23 = sshll.u32 %s1667_s22, 5 }
   0xf   : > { %s246_s26 = scalar_lea.vmem %s1659_s0, %s1251_s23 }
  0x10   : > { %v254_v0 = vld [vmem:[%s246_s26] sm:$0xff]  ;;  %v255_v1 = vld [vmem:[%s246_s26 + $0x8] sm:$0xff]  ;;  %v256_v2 = vld [vmem:[%s246_s26 + $0x10] sm:$0xff] }
  0x11   : > { %v306_v3 = vpack.c.bf16 %v255_v1, %v254_v0  ;;  %v257_v4 = vld [vmem:[%s246_s26 + $0x18] sm:$0xff] }
  0x12   : > { %v307_v5 = vpack.c.bf16 %v257_v4, %v256_v2  ;;  %v1601_v2 = vld [vmem:[%s1664_s5] ss:$0 sm:$0xff] }
  0x13   : > { %310 = vrot.lane.b32.xlu0 %v306_v3, %s1449_s27 }
  0x17   : > { %312 = vrot.lane.b32.xlu0 %v307_v5, %s1449_s27 }
  0x85   : > { %v311_v8 = vpop.permute.xlu0 %310 }
  0x86   : > { %v317_v9 = vsel %vm314_vm1, 0, %v311_v8 }
  0x87   : > { %v321_v10 = vsel %vm320_vm2, %v317_v9, 0 }
  0x88   : > { %337 = vrot.lane.b32.xlu0 %v321_v10, %s1450_s8  ;;  %624 = vrot.lane.b32.xlu1 %v321_v10, %s1451_s9 }
  0x89   : > { %v313_v11 = vpop.permute.xlu0 %312 }
  0x8a   : > { %v319_v12 = vsel %vm314_vm1, 0, %v313_v11 }
  0x8b   : > { %v323_v13 = vsel %vm320_vm2, %v319_v12, 0 }
  0x8c   : > { %339 = vrot.lane.b32.xlu0 %v323_v13, %s1450_s8  ;;  %626 = vrot.lane.b32.xlu1 %v323_v13, %s1451_s9 }
  0x90   : > { %774 = vrot.lane.b32.xlu0 %v321_v10, %s1452_s10  ;;  %699 = vrot.lane.b32.xlu1 %v321_v10, %s1453_s11 }
  0x94   : > { %474 = vrot.lane.b32.xlu0 %v321_v10, %s1454_s12  ;;  %701 = vrot.lane.b32.xlu1 %v323_v13, %s1453_s11 }
  0x98   : > { %476 = vrot.lane.b32.xlu0 %v323_v13, %s1454_s12  ;;  %776 = vrot.lane.b32.xlu1 %v323_v13, %s1452_s10 }
  0x9c   : > { %549 = vrot.lane.b32.xlu0 %v321_v10, %s1455_s13  ;;  %849 = vrot.lane.b32.xlu1 %v321_v10, %s1456_s14 }
  0xa0   : > { %551 = vrot.lane.b32.xlu0 %v323_v13, %s1455_s13  ;;  %851 = vrot.lane.b32.xlu1 %v323_v13, %s1456_s14  ;;  %s251_s13 = scalar_lea.vmem %s1665_s6, %s1251_s23 }
  0xa4   : > { %924 = vrot.lane.b32.xlu1 %v321_v10, %s1457_s15  ;;  %991 = vperm.xlu0 %1413, %v294_v15  }
  0xa8   : > { %926 = vrot.lane.b32.xlu1 %v323_v13, %s1457_s15  ;;  %1006 = vperm.xlu0 %1413, %v297_v18   ;;  %v298_v18 = vld [vmem:[%s1662_s3] sm:$0xff] }
  0xac   : > { %996 = vperm.xlu1 %1414, %v295_v14  }
  0xb0   : > { %1001 = vperm.xlu1 %1414, %v296_v17   ;;  %v300_v17 = vld [vmem:[%s1662_s3 + $0x10] sm:$0xff] }
  0xfa   : > { %v625_v19 = vpop.permute.xlu1 %624  ;;  %v338_v20 = vpop.permute.xlu0 %337 }
  0xfb   : > { %1289 = vmatprep.subr.bf16.mxu1 %v338_v20  ;;  %1321 = vmatprep.subr.bf16.mxu0 %v625_v19 }
  0xfc   : > { %1290 = vmatpush3.bf16.msra.mxu1 %v338_v20  ;;  %1322 = vmatpush3.bf16.msra.mxu0 %v625_v19  ;;  %v302_v19 = vld [vmem:[%s1663_s4] sm:$0xff]  ;;  %v301_v20 = vld [vmem:[%s1662_s3 + $0x18] sm:$0xff] }
  0xfe   : > { %v627_v21 = vpop.permute.xlu1 %626  ;;  %v340_v22 = vpop.permute.xlu0 %339 }
  0xff   : > { %1291 = vmatprep.subr.bf16.mxu1 %v340_v22  ;;  %1323 = vmatprep.subr.bf16.mxu0 %v627_v21 }
 0x100   : > { %1292 = vmatpush3.bf16.msra.mxu1 %v340_v22  ;;  %1324 = vmatpush3.bf16.msra.mxu0 %v627_v21  ;;  %v303_v21 = vld [vmem:[%s1663_s4 + $0x8] sm:$0xff] }
 0x101   : > { %1393 = vmatprep.subr.msk.bf16.mxu1 %vm320_vm2, %v317_v9 }
 0x102   : > { %v700_v25 = vpop.permute.xlu1 %699  ;;  %v775_v26 = vpop.permute.xlu0 %774 }
 0x103   : > { %1294 = vmatmul.mubr.msk.bf16.vlgmr.msra.gmra.mrb[0].mxu1 %vm343_vm0, %v1417_v23  ;;  %1326 = vmatmul.mubr.msk.bf16.vlgmr.msra.gmra.mrb[0].mxu0 %vm343_vm0, %v1418_v24 }
 0x104   : > { %1329 = vmatprep.subr.bf16.mxu0 %v700_v25  ;;  %1298 = vmatpush3.bf16.msra.mxu1 %v321_v10 }
 0x105   : > { %1330 = vmatpush3.bf16.msra.mxu0 %v700_v25  ;;  %1394 = vmatprep.subr.msk.bf16.mxu1 %vm320_vm2, %v319_v12 }
 0x106   : > { %v702_v29 = vpop.permute.xlu1 %701  ;;  %1333 = vmatprep.mubr.msk.bf16.mxu0 %vm343_vm0, %v1419_v27  ;;  %1301 = vmatprep.mubr.msk.bf16.mxu1 %vm343_vm0, %v1420_v28  ;;  %v475_v30 = vpop.permute.xlu0 %474 }
 0x107   : > { %1331 = vmatprep.subr.bf16.mxu0 %v702_v29 }
 0x108   : > { %1300 = vmatpush3.bf16.msra.mxu1 %v323_v13 }
 0x109   : > { %1332 = vmatpush3.bf16.msra.mxu0 %v702_v29  ;;  %1305 = vmatprep.subr.bf16.mxu1 %v475_v30 }
 0x10a   : > { %1337 = vmatprep.subr.bf16.mxu0 %v775_v26  ;;  %v777_v33 = vpop.permute.xlu1 %776  ;;  %v477_v34 = vpop.permute.xlu0 %476 }
 0x10e   : > { %v850_v37 = vpop.permute.xlu1 %849  ;;  %v550_v38 = vpop.permute.xlu0 %549 }
 0x10f   : > { %1302 = vmatmul.mubr.msk.bf16.vlgmr.msra.gmra.mrb[0].mxu1 %vm343_vm0, %v1421_v31  ;;  %1334 = vmatmul.mubr.msk.bf16.vlgmr.msra.gmra.mrb[0].mxu0 %vm343_vm0, %v1422_v32 }
 0x110   : > { %1306 = vmatpush3.bf16.msra.mxu1 %v475_v30  ;;  %1338 = vmatpush3.bf16.msra.mxu0 %v775_v26 }
 0x111   : > { %1307 = vmatprep.subr.bf16.mxu1 %v477_v34  ;;  %1339 = vmatprep.subr.bf16.mxu0 %v777_v33 }
 0x112   : > { %1341 = vmatprep.mubr.msk.bf16.mxu0 %vm343_vm0, %v1423_v35  ;;  %1309 = vmatprep.mubr.msk.bf16.mxu1 %vm343_vm0, %v1424_v36  ;;  %v852_v41 = vpop.permute.xlu1 %851  ;;  %v552_v44 = vpop.permute.xlu0 %551 }
 0x114   : > { %1308 = vmatpush3.bf16.msra.mxu1 %v477_v34  ;;  %1340 = vmatpush3.bf16.msra.mxu0 %v777_v33 }
 0x115   : > { %1313 = vmatprep.subr.bf16.mxu1 %v550_v38  ;;  %1345 = vmatprep.subr.bf16.mxu0 %v850_v37 }
 0x116   : > { %v925_v45 = vpop.permute.xlu1 %924 }
 0x11a   : > { %v927_v49 = vpop.permute.xlu1 %926 }
 0x11b   : > { %1310 = vmatmul.mubr.msk.bf16.vlgmr.msra.gmra.mrb[0].mxu1 %vm343_vm0, %v1425_v39  ;;  %1342 = vmatmul.mubr.msk.bf16.vlgmr.msra.gmra.mrb[0].mxu0 %vm343_vm0, %v1426_v40 }
 0x11c   : > { %1314 = vmatpush3.bf16.msra.mxu1 %v550_v38  ;;  %1346 = vmatpush3.bf16.msra.mxu0 %v850_v37 }
 0x11d   : > { %1315 = vmatprep.subr.bf16.mxu1 %v552_v44  ;;  %1347 = vmatprep.subr.bf16.mxu0 %v852_v41 }
 0x11e   : > { %1317 = vmatprep.mubr.msk.bf16.mxu1 %vm343_vm0, %v1427_v42  ;;  %1349 = vmatprep.mubr.msk.bf16.mxu0 %vm343_vm0, %v1428_v43 }
 0x120   : > { %1316 = vmatpush3.bf16.msra.mxu1 %v552_v44  ;;  %1348 = vmatpush3.bf16.msra.mxu0 %v852_v41 }
 0x121   : > { %1353 = vmatprep.subr.bf16.mxu0 %v925_v45 }
 0x123   : > { %v992_v55 = vpop.permute.xlu0 %991 }
 0x127   : > { %1318 = vmatmul.mubr.msk.bf16.vlgmr.msra.gmra.mrb[0].mxu1 %vm343_vm0, %v1429_v46  ;;  %1350 = vmatmul.mubr.msk.bf16.vlgmr.msra.gmra.mrb[0].mxu0 %vm343_vm0, %v1430_v47  ;;  %v1007_v62 = vpop.permute.xlu0 %1006  ;;  %v304_v46 = vld [vmem:[%s1663_s4 + $0x10] sm:$0xff]  ;;  %v305_v47 = vld [vmem:[%s1663_s4 + $0x18] sm:$0xff] }
 0x128   : > { %1354 = vmatpush3.bf16.msra.mxu0 %v925_v45  ;;  %1357 = vmatprep.mubr.msk.bf16.mxu0 %vm343_vm0, %v1431_v48 }
 0x129   : > { %1355 = vmatprep.subr.bf16.mxu0 %v927_v49 }
 0x12b   : > { %v997_v56 = vpop.permute.xlu1 %996 }
 0x12c   : > { %1356 = vmatpush3.bf16.msra.mxu0 %v927_v49 }
 0x12f   : > { %v1002_v63 = vpop.permute.xlu1 %1001 }
 0x133   : > { %1358 = vmatmul.mubr.msk.bf16.vlgmr.msra.gmra.mrb[0].mxu0 %vm343_vm0, %v1432_v50 }
 0x1fa   : > { %v1319_v51 = vpop.f32.mrb[0].mxu1 }
 0x1fb   : > { %v595_v52 = vpop.f32.mrb[1].mxu1 }
 0x1fc   : > { %v1320_v53 = vpop.f32.mrb[2].mxu1 }
 0x1fd   : > { %v598_v54 = vpop.f32.mrb[3].mxu1 }
 0x206   : > { %v1359_v57 = vpop.f32.mrb[0].mxu0 }
 0x207   : > { %v1361_v58 = vadd.f32 %v1359_v57, %v1319_v51  ;;  %v970_v59 = vpop.f32.mrb[1].mxu0 }
 0x208   : > { %v1362_v60 = vadd.f32 %v970_v59, %v595_v52  ;;  %v1360_v61 = vpop.f32.mrb[2].mxu0 }
 0x209   : > { %v1363_v0 = vadd.f32 %v1360_v61, %v1320_v53  ;;  %v973_v1 = vpop.f32.mrb[3].mxu0  ;;  %v1011_v6 = vadd.f32 %v1361_v58, %v1002_v63 }
 0x20a   : > { %v1009_v3 = vadd.f32 %v1362_v60, %v992_v55  ;;  %v1364_v4 = vadd.f32 %v973_v1, %v598_v54 }
 0x20b   : > { %v1012_v5 = vadd.f32 %v1363_v0, %v1007_v62  ;;  %v1021_v13 = vmul.f32 %v1601_v2, %v1011_v6 }
 0x20c   : > { %v1010_v7 = vadd.f32 %v1364_v4, %v997_v56  ;;  %v1019_v8 = vmul.f32 %v1601_v2, %v1009_v3 }
 0x20d   : > { %v1022_v11 = vmul.f32 %v1601_v2, %v1012_v5  ;;  %v1030_v15 = vsel %vm1023_vm3, %v1021_v13, 0.0 }
 0x20e   : > { %v1024_v9 = vsel %vm1023_vm3, %v1019_v8, 0.0  ;;  %v1020_v10 = vmul.f32 %v1601_v2, %v1010_v7 }
 0x20f   : > { %1025 = vadd.xlane.f32.xlu1 %v1024_v9  ;;  %v1033_v14 = vsel %vm1023_vm3, %v1022_v11, 0.0 }
 0x210   : > { %v1027_v12 = vsel %vm1023_vm3, %v1020_v10, 0.0 }
 0x211   : > { %1028 = vadd.xlane.f32.xlu0 %v1027_v12 }
 0x213   : > { %1034 = vadd.xlane.f32.xlu1 %v1033_v14 }
 0x215   : > { %1031 = vadd.xlane.f32.xlu0 %v1030_v15 }
 0x224   : > { %1087 = vperm.xlu1 %1414, %v299_v16  }
 0x228   : > { %1092 = vperm.xlu1 %1414, %v300_v17  }
 0x22b   : > { %1082 = vperm.xlu0 %1413, %v298_v18  }
 0x22c   : > { %1106 = vperm.xlu1 %1414, %v302_v19  }
 0x22f   : > { %1097 = vperm.xlu0 %1413, %v301_v20  }
 0x233   : > { %1111 = vperm.xlu0 %1413, %v303_v21  }
 0x29c   : > { %v1026_v22 = vpop.xlane.xlu1 %1025 }
 0x29d   : > { %v1036_v24 = vmul.f32 0.0625, %v1026_v22 }
 0x29e   : > { %v1029_v23 = vpop.xlane.xlu0 %1028 }
 0x29f   : > { %v1037_v25 = vmul.f32 0.0625, %v1029_v23  ;;  %v1040_v30 = vsub.f32 %v1009_v3, %v1036_v24 }
 0x2a0   : > { %v1035_v26 = vpop.xlane.xlu1 %1034 }
 0x2a1   : > { %v1041_v27 = vsub.f32 %v1010_v7, %v1037_v25  ;;  %v1039_v28 = vmul.f32 0.0625, %v1035_v26  ;;  %v1044_v38 = vmul.f32 %v1601_v2, %v1040_v30 }
 0x2a2   : > { %v1032_v29 = vpop.xlane.xlu0 %1031 }
 0x2a3   : > { %v1043_v31 = vsub.f32 %v1012_v5, %v1039_v28  ;;  %v1038_v32 = vmul.f32 0.0625, %v1032_v29  ;;  %v1045_v35 = vmul.f32 %v1601_v2, %v1041_v27  ;;  %v1048_v43 = vmul.f32 %v1044_v38, %v1044_v38 }
 0x2a4   : > { %v1088_v48 = vpop.permute.xlu1 %1087 }
 0x2a5   : > { %v1042_v33 = vsub.f32 %v1011_v6, %v1038_v32  ;;  %v1047_v34 = vmul.f32 %v1601_v2, %v1043_v31  ;;  %v1049_v41 = vmul.f32 %v1045_v35, %v1045_v35  ;;  %v1052_v45 = vsel %vm1023_vm3, %v1048_v43, 0.0 }
 0x2a7   : > { %v1051_v36 = vmul.f32 %v1047_v34, %v1047_v34  ;;  %v1046_v37 = vmul.f32 %v1601_v2, %v1042_v33  ;;  %v1055_v44 = vsel %vm1023_vm3, %v1049_v41, 0.0 }
 0x2a8   : > { %v1093_v50 = vpop.permute.xlu1 %1092 }
 0x2a9   : > { %v1061_v39 = vsel %vm1023_vm3, %v1051_v36, 0.0  ;;  %v1050_v40 = vmul.f32 %v1046_v37, %v1046_v37 }
 0x2aa   : > { %1062 = vadd.xlane.f32.xlu1 %v1061_v39  ;;  %v1083_v49 = vpop.permute.xlu0 %1082 }
 0x2ab   : > { %v1058_v42 = vsel %vm1023_vm3, %v1050_v40, 0.0 }
 0x2ac   : > { %1059 = vadd.xlane.f32.xlu0 %v1058_v42  ;;  %v1107_v52 = vpop.permute.xlu1 %1106 }
 0x2ae   : > { %1056 = vadd.xlane.f32.xlu1 %v1055_v44  ;;  %v1098_v51 = vpop.permute.xlu0 %1097 }
 0x2b0   : > { %1053 = vadd.xlane.f32.xlu0 %v1052_v45 }
 0x2b2   : > { %v1112_v53 = vpop.permute.xlu0 %1111 }
 0x2bf   : > { %1116 = vperm.xlu1 %1414, %v304_v46  }
 0x2c6   : > { %1121 = vperm.xlu0 %1413, %v305_v47  }
 0x337   : > { %v1063_v54 = vpop.xlane.xlu1 %1062 }
 0x338   : > { %v1067_v55 = vmul.f32 0.0625, %v1063_v54 }
 0x339   : > { %v1060_v56 = vpop.xlane.xlu0 %1059 }
 0x33a   : > { %v1071_v57 = vadd.f32 1e-05, %v1067_v55  ;;  %v1066_v58 = vmul.f32 0.0625, %v1060_v56 }
 0x33b   : > { %v1057_v59 = vpop.xlane.xlu1 %1056 }
 0x33c   : > { %1433 = vrsqrt.f32 %v1071_v57  ;;  %v1070_v60 = vadd.f32 1e-05, %v1066_v58  ;;  %v1065_v61 = vmul.f32 0.0625, %v1057_v59 }
 0x33d   : > { %v1054_v62 = vpop.xlane.xlu0 %1053 }
 0x33e   : > { %1435 = vrsqrt.f32 %v1070_v60  ;;  %v1069_v63 = vadd.f32 1e-05, %v1065_v61  ;;  %v1064_v0 = vmul.f32 0.0625, %v1054_v62 }
 0x33f   : > { %v1117_v14 = vpop.permute.xlu1 %1116 }
 0x340   : > { %1437 = vrsqrt.f32 %v1069_v63  ;;  %v1068_v1 = vadd.f32 1e-05, %v1064_v0 }
 0x342   : > { %1439 = vrsqrt.f32 %v1068_v1 }
 0x345   : > { %v1122_v9 = vpop.permute.xlu0 %1121 }
 0x346   : > { %v1434_v3 = vpop.eup %1433 }
 0x347   : > { %v1079_v4 = vmul.f32 %v1434_v3, %v1043_v31 }
 0x348   : > { %v1436_v5 = vpop.eup %1435 }
 0x349   : > { %v1078_v6 = vmul.f32 %v1436_v5, %v1042_v33  ;;  %v1103_v7 = vmul.f32 %v1098_v51, %v1079_v4 }
 0x34a   : > { %v1438_v8 = vpop.eup %1437 }
 0x34b   : > { %v1077_v10 = vmul.f32 %v1438_v8, %v1041_v27  ;;  %v1102_v11 = vmul.f32 %v1093_v50, %v1078_v6  ;;  %v1127_v12 = vadd.f32 %v1122_v9, %v1103_v7 }
 0x34c   : > { %v1440_v13 = vpop.eup %1439 }
 0x34d   : > { %v1101_v15 = vmul.f32 %v1088_v48, %v1077_v10  ;;  %v1076_v16 = vmul.f32 %v1440_v13, %v1040_v30  ;;  %v1126_v17 = vadd.f32 %v1117_v14, %v1102_v11  ;;  %vm1131_vm4 = vcmp.ge.f32.partialorder %v1127_v12, 0.0 }
 0x34e   : > { %v1135_v18 = vmul.f32 0.01, %v1127_v12 }
 0x34f   : > { %v1125_v19 = vadd.f32 %v1112_v53, %v1101_v15  ;;  %v1100_v20 = vmul.f32 %v1083_v49, %v1076_v16  ;;  %vm1130_vm5 = vcmp.ge.f32.partialorder %v1126_v17, 0.0  ;;  %v1134_v21 = vmul.f32 0.01, %v1126_v17 }
 0x350   : > { %v1139_v22 = vsel %vm1131_vm4, %v1127_v12, %v1135_v18 }
 0x351   : > { %vm1129_vm6 = vcmp.ge.f32.partialorder %v1125_v19, 0.0  ;;  %v1133_v23 = vmul.f32 0.01, %v1125_v19  ;;  %v1124_v24 = vadd.f32 %v1107_v52, %v1100_v20  ;;  %v1138_v25 = vsel %vm1130_vm5, %v1126_v17, %v1134_v21 }
 0x352   : > { %v1142_v26 = vmul.f32 %v1601_v2, %v1138_v25  ;;  %v1143_v27 = vmul.f32 %v1601_v2, %v1139_v22 }
 0x353   : > { %v1137_v28 = vsel %vm1129_vm6, %v1125_v19, %v1133_v23  ;;  %vm1128_vm7 = vcmp.ge.f32.partialorder %v1124_v24, 0.0  ;;  %v1132_v29 = vmul.f32 0.01, %v1124_v24 }
 0x354   : > { %v1141_v30 = vmul.f32 %v1601_v2, %v1137_v28  ;;  %1146 = vst.msk [vmem:[%s251_s13 + $0x10] sm:$0xff] %vm1023_vm3, %v1142_v26  ;;  %1147 = vst.msk [vmem:[%s251_s13 + $0x18] sm:$0xff] %vm1023_vm3, %v1143_v27 }
 0x355   : > { %v1136_v31 = vsel %vm1128_vm7, %v1124_v24, %v1132_v29 }
 0x356   : > { %1145 = vst.msk [vmem:[%s251_s13 + $0x8] sm:$0xff] %vm1023_vm3, %v1141_v30  ;;  %v1140_v32 = vmul.f32 %v1601_v2, %v1136_v31 }
 0x358   : > { %1144 = vst.msk [vmem:[%s251_s13] sm:$0xff] %vm1023_vm3, %v1140_v32 }
 0x359 PF: > { %s16_s21 = sadd.s32 1, %s1447_s21  }
 0x35a   : > { %p13_p4 = scmp.ge.s32.totalorder %s16_s21, 4  }
 0x35c   :  { %15 = sbr.rel (!%p13_p4) target bundleno = 1 (0x1), region = 74 }

// kernel: usenet_forward.17
= control target key start
LH: loop header
LB: loop body
LE: loop exit
PB: predicated region body
PF: predicated region fallthrough
CT: control target
= control target key end

     0   :  { %s818_s21 = smov 0   ;;  %s885_s0 = inlined_call_operand.vmem [shape: f32[2,16,100], index: 0, kind: input, shape index: {}]   ;;  %s886_s1 = inlined_call_operand.vmem [shape: bf16[4,8,16], index: 1, kind: input, shape index: {}]   ;;  %s887_s2 = inlined_call_operand.vmem [shape: f32[2,8], index: 2, kind: input, shape index: {}]   ;;  %s888_s3 = inlined_call_operand.vmem [shape: f32[2,1], index: 3, kind: input, shape index: {}]   ;;  %s889_s4 = inlined_call_operand.vmem [shape: f32[8,2], index: 4, kind: input, shape index: {}]   ;;  %s890_s5 = inlined_call_operand.vmem [shape: f32[8,1], index: 5, kind: input, shape index: {}]   ;;  %s891_s6 = inlined_call_operand.vmem [shape: f32[2,4,8,100], index: 6, kind: output, shape index: {}]  }
   0x1 LB: > { %s686_s22 = sadd.s32 4294967295, %s778_s21   ;;  %p690_p0 = scmp.ge.s32.totalorder %s778_s21, 1  ;;  %s778_s21 = sphi %s818_s21, %s16_s21  }
   0x2   : > { %p212_p1 = scmp.lt.s32.totalorder %s778_s21, 3 }
   0x4   : > { %p213_p2 = pnand %p690_p0, %p212_p1 }
   0x5   : > { %p242_p3 = scmp.lt.s32.totalorder (!%p213_p2), %s686_s22, 1  ;;  %v780_v0 = vmov (!%p213_p2), 0.0   ;;  %vm781_vm0 = vmmov (!%p213_p2), 0   ;;  %v256_v4 = vld [vmem:[%s886_s1] sm:$0xf] (!%p213_p2)  ;;  %vm257_vm1 = vcmask (!%p213_p2), 130048  }
   0x6   : > { %216 = sbr.rel (%p213_p2) target bundleno = 985 (0x3d9), region = 44  ;;  %722 = vmatprep.subr.bf16.mxu0 (!%p213_p2), %v780_v0  ;;  %728 = vmatprep.subr.bf16.mxu1 (!%p213_p2), %v780_v0  ;;  %v696_v5 = vld [vmem:[%s886_s1 + $0x4] sm:$0xf] (!%p213_p2)  ;;  %v698_v6 = vld [vmem:[%s886_s1 + $0x8] sm:$0xf] (!%p213_p2)  ;;  %vm301_vm2 = vcmask (!%p213_p2), 818176  }
   0x7   : > { %724 = vmatprep.mubr.msk.bf16.mxu0 (!%p213_p2), %vm781_vm0, %v780_v0  ;;  %730 = vmatprep.mubr.msk.bf16.mxu1 (!%p213_p2), %vm781_vm0, %v780_v0  ;;  %v700_v7 = vld [vmem:[%s886_s1 + $0xc] sm:$0xf] (!%p213_p2)  ;;  %v454_v36 = vld [vmem:[%s887_s2] sm:$0x3] (!%p213_p2)  ;;  %vm456_vm3 = vcmask (!%p213_p2), 64512   ;;  %vm537_vm4 = vcmask (!%p213_p2), 1041408  }
   0x8   : > { %v455_v37 = vld [vmem:[%s888_s3] sm:$0x3] (!%p213_p2)  ;;  %vm533_vm5 = vcmask (!%p213_p2), 15360   ;;  %v782_v43 = vmov (!%p213_p2), 0  }
   0x9   : > { %v531_v42 = vld [vmem:[%s889_s4] sm:$0xff] (!%p213_p2)  ;;  %767 = vset.pattern.permute.xlu0 (!%p213_p2), %v782_v43 }
   0xa   : > { %v532_v44 = vld [vmem:[%s890_s5] sm:$0xff] (!%p213_p2) }
   0xd   : > { %s893_s22 = smov (!%p242_p3, %s686_s22), 1 }
   0xe   : > { %s708_s23 = sshll.u32 %s893_s22, 4  ;;  %s709_s19 = sshll.u32 %s893_s22, 5 }
   0xf   : > { %s246_s26 = scalar_lea.vmem %s885_s0, %s708_s23  ;;  %s251_s24 = scalar_lea.vmem %s891_s6, %s709_s19 }
  0x10   : > { %v253_v1 = vld [vmem:[%s246_s26] sm:$0xff]  ;;  %v254_v2 = vld [vmem:[%s246_s26 + $0x8] sm:$0xff] }
  0x11   : > { %v255_v3 = vpack.c.bf16 %v254_v2, %v253_v1 }
  0x13   : > { %723 = vmatpush3.bf16.msra.mxu0 %v255_v3  ;;  %729 = vmatpush3.bf16.msra.mxu1 %v255_v3 }
  0x14   : > { %734 = vmatprep.subr.bf16.mxu0 %v780_v0  ;;  %740 = vmatprep.subr.bf16.mxu1 %v780_v0 }
  0x16   : > { %725 = vmatmul.mubr.msk.bf16.vlgmr.msra.gmra.mrb[0].mxu0 %vm257_vm1, %v256_v4  ;;  %731 = vmatmul.mubr.msk.bf16.vlgmr.msra.gmra.mrb[0].mxu1 %vm257_vm1, %v696_v5 }
  0x17   : > { %735 = vmatpush3.bf16.msra.mxu0 %v255_v3  ;;  %741 = vmatpush3.bf16.msra.mxu1 %v255_v3 }
  0x18   : > { %736 = vmatprep.mubr.msk.bf16.mxu0 %vm781_vm0, %v780_v0  ;;  %742 = vmatprep.mubr.msk.bf16.mxu1 %vm781_vm0, %v780_v0 }
  0x19   : > { %746 = vmatprep.subr.mxu0 %v780_v0  ;;  %751 = vmatprep.subr.mxu1 %v780_v0 }
  0x1e   : > { %737 = vmatmul.mubr.msk.bf16.vlgmr.msra.gmra.mrb[4].mxu0 %vm257_vm1, %v698_v6  ;;  %743 = vmatmul.mubr.msk.bf16.vlgmr.msra.gmra.mrb[4].mxu1 %vm257_vm1, %v700_v7 }
  0x1f   : > { %748 = vmatprep.mubr.msk.f32.mxu0 %vm781_vm0, %v780_v0  ;;  %753 = vmatprep.mubr.msk.f32.mxu1 %vm781_vm0, %v780_v0 }
  0xe9   : > { %v850_v8 = vpop.f32.mrb[0].mxu0  ;;  %v852_v9 = vpop.f32.mrb[0].mxu1 }
  0xea   : > { %v726_v10 = vpop.f32.mrb[1].mxu0  ;;  %v732_v11 = vpop.f32.mrb[1].mxu1  ;;  %v302_v12 = vsel %vm301_vm2, %v850_v8, 0.0  ;;  %v351_v17 = vsel %vm301_vm2, %v852_v9, 0.0 }
  0xeb   : > { %303 = vadd.xlane.f32.xlu0 %v302_v12  ;;  %v298_v13 = vpop.f32.mrb[2].mxu0  ;;  %v348_v14 = vpop.f32.mrb[2].mxu1 }
  0xec   : > { %v727_v15 = vpop.f32.mrb[3].mxu0  ;;  %v733_v16 = vpop.f32.mrb[3].mxu1 }
  0xef   : > { %352 = vadd.xlane.f32.xlu0 %v351_v17 }
  0xf1   : > { %v394_v18 = vpop.f32.mrb[4].mxu0  ;;  %v443_v19 = vpop.f32.mrb[4].mxu1 }
  0xf2   : > { %v738_v20 = vpop.f32.mrb[5].mxu0  ;;  %v744_v21 = vpop.f32.mrb[5].mxu1  ;;  %v400_v22 = vsel %vm301_vm2, %v394_v18, 0.0  ;;  %v449_v27 = vsel %vm301_vm2, %v443_v19, 0.0 }
  0xf3   : > { %401 = vadd.xlane.f32.xlu1 %v400_v22  ;;  %v397_v23 = vpop.f32.mrb[6].mxu0  ;;  %v446_v24 = vpop.f32.mrb[6].mxu1 }
  0xf4   : > { %v739_v25 = vpop.f32.mrb[7].mxu0  ;;  %v745_v26 = vpop.f32.mrb[7].mxu1 }
  0xf7   : > { %450 = vadd.xlane.f32.xlu1 %v449_v27 }
 0x178   : > { %v304_v28 = vpop.xlane.xlu0 %303 }
 0x17c   : > { %v353_v29 = vpop.xlane.xlu0 %352 }
 0x17d   : > { %v354_v31 = vadd.f32 %v353_v29, %v304_v28 }
 0x180   : > { %v402_v30 = vpop.xlane.xlu1 %401 }
 0x181   : > { %v403_v32 = vadd.f32 %v402_v30, %v354_v31 }
 0x184   : > { %v451_v33 = vpop.xlane.xlu1 %450 }
 0x185   : > { %v452_v34 = vadd.f32 %v451_v33, %v403_v32 }
 0x187   : > { %v453_v35 = vmul.f32 0.00390625, %v452_v34 }
 0x189   : > { %747 = vmatpush3.msra.mxu0 %v453_v35 }
 0x18a   : > { %749 = vmatmul.mubr.msk.f32.vlgmr.msra.gmra.mrb[8].mxu0 %vm456_vm3, %v454_v36 }
 0x25d   : > { %v526_v38 = vpop.f32.mrb[8].mxu0 }
 0x25e   : > { %v527_v39 = vadd.f32 %v526_v38, %v455_v37  ;;  %v750_v40 = vpop.f32.mrb[9].mxu0 }
 0x260   : > { %v530_v41 = vmax.f32 %v527_v39, 0.0 }
 0x262   : > { %752 = vmatpush3.msk.msra.mxu1 %vm537_vm4, %v530_v41 }
 0x263   : > { %754 = vmatmul.mubr.msk.f32.vlgmr.msra.gmra.mrb[8].mxu1 %vm533_vm5, %v531_v42 }
 0x336   : > { %v607_v45 = vpop.f32.mrb[8].mxu1 }
 0x337   : > { %v608_v46 = vadd.f32 %v607_v45, %v532_v44  ;;  %v755_v47 = vpop.f32.mrb[9].mxu1 }
 0x339   : > { %v705_v48 = vmul.f32 -1.442695, %v608_v46 }
 0x33b   : > { %768 = vpow2.f32 %v705_v48 }
 0x345   : > { %v769_v49 = vpop.eup %768 }
 0x346   : > { %v614_v50 = vadd.f32 1.0, %v769_v49 }
 0x348   : > { %770 = vrcp.f32 %v614_v50 }
 0x352   : > { %v771_v51 = vpop.eup %770 }
 0x353   : > { %v617_v52 = vadd.f32 1.0, %v771_v51 }
 0x355   : > { %620 = vperm.xlu0 %767, %v617_v52  }
 0x3d4   : > { %v621_v53 = vpop.permute.xlu0 %620 }
 0x3d5   : > { %v623_v54 = vmul.f32 %v621_v53, %v850_v8  ;;  %v624_v55 = vmul.f32 %v621_v53, %v852_v9  ;;  %v625_v56 = vmul.f32 %v621_v53, %v394_v18  ;;  %v626_v57 = vmul.f32 %v621_v53, %v443_v19 }
 0x3d7   : > { %627 = vst.msk [vmem:[%s251_s24] sm:$0xff] %vm301_vm2, %v623_v54  ;;  %628 = vst.msk [vmem:[%s251_s24 + $0x8] sm:$0xff] %vm301_vm2, %v624_v55 }
 0x3d8   : > { %629 = vst.msk [vmem:[%s251_s24 + $0x10] sm:$0xff] %vm301_vm2, %v625_v56  ;;  %630 = vst.msk [vmem:[%s251_s24 + $0x18] sm:$0xff] %vm301_vm2, %v626_v57 }
 0x3d9 PF: > { %s16_s21 = sadd.s32 1, %s778_s21  }
 0x3da   : > { %p13_p4 = scmp.ge.s32.totalorder %s16_s21, 4  }
 0x3dc   :  { %15 = sbr.rel (!%p13_p4) target bundleno = 1 (0x1), region = 77 }

// kernel: usenet_forward.16
= control target key start
LH: loop header
LB: loop body
LE: loop exit
PB: predicated region body
PF: predicated region fallthrough
CT: control target
= control target key end

     0   :  { %s2416_s18 = smov 0   ;;  %s2703_s0 = inlined_call_operand.vmem [shape: f32[2,16,100], index: 0, kind: input, shape index: {}]   ;;  %s2704_s1 = inlined_call_operand.vmem [shape: f32[2,16,100], index: 1, kind: input, shape index: {}]   ;;  %s2705_s2 = inlined_call_operand.vmem [shape: f32[4,16], index: 2, kind: input, shape index: {}]   ;;  %s2706_s3 = inlined_call_operand.vmem [shape: f32[4,1], index: 3, kind: input, shape index: {}]   ;;  %s2707_s4 = inlined_call_operand.vmem [shape: f32[16,4], index: 4, kind: input, shape index: {}]   ;;  %s2708_s5 = inlined_call_operand.vmem [shape: f32[16,1], index: 5, kind: input, shape index: {}]   ;;  %s2709_s6 = inlined_call_operand.vmem [shape: bf16[9,16,32], index: 6, kind: input, shape index: {}]   ;;  %s2710_s7 = inlined_call_operand.vmem [shape: f32[16,1], index: 7, kind: input, shape index: {}]   ;;  %s2711_s8 = inlined_call_operand.vmem [shape: f32[16,1], index: 8, kind: input, shape index: {}]   ;;  %s2712_s9 = inlined_call_operand.vmem [shape: f32[16,1], index: 9, kind: input, shape index: {}]   ;;  %s2713_s10 = inlined_call_operand.vmem [shape: bf16[9,16,16], index: 10, kind: input, shape index: {}]   ;;  %s2714_s11 = inlined_call_operand.vmem [shape: f32[16,1], index: 11, kind: input, shape index: {}]   ;;  %s2715_s12 = inlined_call_operand.vmem [shape: f32[16,1], index: 12, kind: input, shape index: {}]   ;;  %s2716_s13 = inlined_call_operand.vmem [shape: f32[16,1], index: 13, kind: input, shape index: {}]   ;;  %s2717_s14 = inlined_call_operand.vmem [shape: f32[1,100], index: 14, kind: input, shape index: {}]   ;;  %s2718_s15 = inlined_call_operand.vmem [shape: f32[2,16,100], index: 15, kind: output, shape index: {}]  }
   0x1 LB: > { %s2007_s19 = sadd.s32 4294967295, %s2321_s18   ;;  %p2011_p0 = scmp.ge.s32.totalorder %s2321_s18, 1  ;;  %s2321_s18 = sphi %s2416_s18, %s25_s18  }
   0x2   : > { %p447_p1 = scmp.lt.s32.totalorder %s2321_s18, 3 }
   0x4   : > { %p448_p2 = pnand %p2011_p0, %p447_p1 }
   0x5   : > { %p500_p3 = scmp.lt.s32.totalorder (!%p448_p2), %s2007_s19, 1  ;;  %vm521_vm0 = vcmask (!%p448_p2), 818176   ;;  %v2323_v4 = vmov (!%p448_p2), 0.0|0.0   ;;  %vm2324_vm1 = vmmov (!%p448_p2), 0   ;;  %v2325_v5 = vmov (!%p448_p2), 0.0   ;;  %v607_v12 = vld [vmem:[%s2707_s4] sm:$0xff] (!%p448_p2) }
   0x6   : > { %451 = sbr.rel (%p448_p2) target bundleno = 2387 (0x953), region = 80  ;;  %2255 = vmatprep.subr.bf16.mxu0 (!%p448_p2), %v2323_v4  ;;  %2121 = vmatprep.mubr.msk.f32.mxu0 (!%p448_p2), %vm2324_vm1, %v2325_v5  ;;  %v530_v11 = vld [vmem:[%s2705_s2] sm:$0xf] (!%p448_p2)  ;;  %vm532_vm2 = vcmask (!%p448_p2), 130048   ;;  %vm611_vm3 = vcmask (!%p448_p2), 31744   ;;  %vm618_vm4 = vcmask (!%p448_p2), 1043456  }
   0x7   : > { %2126 = vmatprep.mubr.msk.f32.mxu1 (!%p448_p2), %vm611_vm3, %v607_v12  ;;  %v531_v13 = vld [vmem:[%s2706_s3] sm:$0xf] (!%p448_p2)  ;;  %v608_v18 = vld [vmem:[%s2707_s4 + $0x8] sm:$0xff] (!%p448_p2)  ;;  %v2326_v19 = vmov (!%p448_p2), 0   ;;  %s2327_s26 = smov (!%p448_p2), 11   ;;  %vm755_vm5 = vcmask (!%p448_p2), 89088  }
   0x8   : > { %2279 = vset.pattern.permute.xlu1 (!%p448_p2), %v2326_v19  ;;  %2280 = vset.pattern.permute.xlu0 (!%p448_p2), %v2326_v19  ;;  %v610_v20 = vld [vmem:[%s2708_s5 + $0x8] sm:$0xff] (!%p448_p2)  ;;  %v609_v21 = vld [vmem:[%s2708_s5] sm:$0xff] (!%p448_p2)  ;;  %vm761_vm6 = vcmask (!%p448_p2), 908288   ;;  %s2328_s27 = smov (!%p448_p2), 117   ;;  %s2329_s28 = smov (!%p448_p2), 127   ;;  %vm779_vm7 = vcmask (!%p448_p2), 261120  }
   0x9   : > { %v2282_v51 = vld [vmem:[%s2709_s6] sm:$0xff] (!%p448_p2)   ;;  %s2720_s16 = smov (!%p448_p2), 108   ;;  %s2331_s17 = smov (!%p448_p2), 126   ;;  %v742_v53 = vld [vmem:[%s2710_s7 + $0x8] sm:$0xff] (!%p448_p2)  ;;  %v2283_v60 = vld [vmem:[%s2709_s6 + $0x10] sm:$0xff] (!%p448_p2)  }
   0xa   : > { %s2333_s21 = smov (!%p448_p2), 118   ;;  %s2334_s22 = smov (!%p448_p2), 116   ;;  %v741_v52 = vld [vmem:[%s2710_s7] sm:$0xff] (!%p448_p2)  ;;  %v2281_v55 = vld [vmem:[%s2709_s6 + $0x8] sm:$0xff] (!%p448_p2)   ;;  %v2288_v12 = vld [vmem:[%s2709_s6 + $0x38] sm:$0xff] (!%p448_p2)  }
   0xd   : > { %s2724_s19 = smov (!%p500_p3, %s2007_s19), 1 }
   0xe   : > { %s2424_s20 = sshll.u32 %s2724_s19, 4  ;;  %s2719_s19 = smov 106  }
   0xf   : > { %s509_s23 = scalar_lea.vmem %s2704_s1, %s2424_s20  ;;  %s504_s25 = scalar_lea.vmem %s2703_s0, %s2424_s20 }
  0x10   : > { %v2430_v0 = vld [vmem:[%s509_s23] sm:$0xff]  ;;  %v2432_v1 = vld [vmem:[%s509_s23 + $0x8] sm:$0xff]  ;;  %s2335_s23 = smov 107  }
  0x11   : > { %v522_v2 = vsel %vm521_vm0, %v2430_v0, 0.0  ;;  %v525_v3 = vsel %vm521_vm0, %v2432_v1, 0.0  ;;  %v517_v35 = vld [vmem:[%s504_s25] sm:$0xff]  ;;  %v518_v36 = vld [vmem:[%s504_s25 + $0x8] sm:$0xff] }
  0x12   : > { %523 = vadd.xlane.f32.xlu0 %v522_v2  ;;  %v747_v38 = vpack.c.bf16 %v518_v36, %v517_v35 }
  0x16   : > { %526 = vadd.xlane.f32.xlu0 %v525_v3 }
  0x2c   : > { %751 = vrot.lane.b32.xlu0 %v747_v38, %s2327_s26 }
  0x9f   : > { %v524_v6 = vpop.xlane.xlu0 %523 }
  0xa0   : > { %v528_v8 = vmul.f32 0.015625, %v524_v6  ;;  %v2286_v6 = vld [vmem:[%s2709_s6 + $0x30] sm:$0xff]  }
  0xa3   : > { %v527_v7 = vpop.xlane.xlu0 %526 }
  0xa4   : > { %v529_v9 = vmul.f32 0.015625, %v527_v7  ;;  %v2287_v7 = vld [vmem:[%s2709_s6 + $0x28] sm:$0xff]  }
  0xa6   : > { %v2256_v10 = vpack.c.bf16 %v529_v9, %v528_v8 }
  0xa7   : > { %v752_v39 = vpop.permute.xlu0 %751 }
  0xa8   : > { %2257 = vmatpush3.bf16.msra.mxu0 %v2256_v10  ;;  %v758_v40 = vsel %vm755_vm5, 0, %v752_v39 }
  0xa9   : > { %2137 = vmatprep.subr.bf16.mxu0 %v2325_v5  ;;  %v762_v41 = vsel %vm761_vm6, %v758_v40, 0 }
  0xaa   : > { %992 = vrot.lane.b32.xlu0 %v762_v41, %s2328_s27 }
  0xab   : > { %2122 = vmatmul.mubr.msk.f32.vlgmr.msra.gmra.mrb[0].mxu0 %vm532_vm2, %v530_v11 }
  0xac   : > { %2141 = vmatprep.mubr.msk.bf16.mxu0 %vm2324_vm1, %v2325_v5  ;;  %2138 = vmatpush3.bf16.msra.mxu0 %v762_v41 }
  0xad   : > { %2139 = vmatprep.subr.bf16.mxu0 %v2325_v5 }
 0x11c   : > { %v993_v56 = vpop.permute.xlu0 %992 }
 0x17e   : > { %v602_v14 = vpop.f32.mrb[0].mxu0 }
 0x17f   : > { %v603_v15 = vadd.f32 %v602_v14, %v531_v13  ;;  %v2123_v16 = vpop.f32.mrb[1].mxu0  ;;  %v2289_v13 = vld [vmem:[%s2709_s6 + $0x40] sm:$0xff]  }
 0x181   : > { %v606_v17 = vmax.f32 %v603_v15, 0.0 }
 0x183   : > { %2124 = vmatprep.subr.msk.mxu1 %vm618_vm4, %v606_v17 }
 0x184   : > { %2125 = vmatpush3.msk.msra.mxu1 %vm618_vm4, %v606_v17 }
 0x185   : > { %2127 = vmatmul.mubr.msk.f32.vlgmr.msra.gmra.mrb[0].mxu1 %vm611_vm3, %v608_v18  ;;  %2129 = vmatprep.subr.bf16.mxu1 %v2325_v5 }
 0x186   : > { %2133 = vmatprep.mubr.msk.bf16.mxu1 %vm2324_vm1, %v2325_v5 }
 0x258   : > { %v2128_v22 = vpop.f32.mrb[0].mxu1 }
 0x259   : > { %v694_v23 = vadd.f32 %v2128_v22, %v610_v20  ;;  %v688_v24 = vpop.f32.mrb[1].mxu1 }
 0x25a   : > { %v689_v25 = vadd.f32 %v688_v24, %v609_v21 }
 0x25b   : > { %v2023_v26 = vmul.f32 -1.442695, %v694_v23 }
 0x25c   : > { %v2022_v27 = vmul.f32 -1.442695, %v689_v25 }
 0x25d   : > { %2299 = vpow2.f32 %v2023_v26 }
 0x25e   : > { %2301 = vpow2.f32 %v2022_v27 }
 0x267   : > { %v2300_v28 = vpop.eup %2299 }
 0x268   : > { %v2302_v29 = vpop.eup %2301  ;;  %v704_v30 = vadd.f32 1.0, %v2300_v28 }
 0x269   : > { %v703_v31 = vadd.f32 1.0, %v2302_v29 }
 0x26b   : > { %2303 = vrcp.f32 %v703_v31 }
 0x26c   : > { %2305 = vrcp.f32 %v704_v30 }
 0x275   : > { %v2304_v32 = vpop.eup %2303 }
 0x276   : > { %v709_v33 = vadd.f32 1.0, %v2304_v32  ;;  %v2306_v34 = vpop.eup %2305 }
 0x277   : > { %v710_v37 = vadd.f32 1.0, %v2306_v34 }
 0x278   : > { %713 = vperm.xlu1 %2279, %v709_v33  }
 0x27c   : > { %718 = vperm.xlu1 %2279, %v710_v37  }
 0x2f7   : > { %v714_v42 = vpop.permute.xlu1 %713 }
 0x2f8   : > { %v721_v44 = vmul.f32 %v714_v42, %v2430_v0  ;;  %v2284_v0 = vld [vmem:[%s2709_s6 + $0x20] sm:$0xff]  }
 0x2fb   : > { %v719_v43 = vpop.permute.xlu1 %718 }
 0x2fc   : > { %v722_v45 = vmul.f32 %v719_v43, %v2432_v1  ;;  %v2285_v1 = vld [vmem:[%s2709_s6 + $0x18] sm:$0xff]  }
 0x2fe   : > { %v748_v46 = vpack.c.bf16 %v722_v45, %v721_v44 }
 0x300   : > { %753 = vrot.lane.b32.xlu1 %v748_v46, %s2327_s26 }
 0x304   : > { %773 = vrot.lane.b32.xlu1 %v762_v41, %s2329_s28 }
 0x372   : > { %v754_v47 = vpop.permute.xlu1 %753 }
 0x373   : > { %v760_v48 = vsel %vm755_vm5, 0, %v754_v47 }
 0x374   : > { %v764_v49 = vsel %vm761_vm6, %v760_v48, 0 }
 0x375   : > { %994 = vrot.lane.b32.xlu0 %v764_v49, %s2328_s27  ;;  %775 = vrot.lane.b32.xlu1 %v764_v49, %s2329_s28 }
 0x376   : > { %2140 = vmatpush3.bf16.msra.mxu0 %v764_v49  ;;  %v774_v50 = vpop.permute.xlu1 %773 }
 0x377   : > { %2130 = vmatpush3.bf16.msra.mxu1 %v774_v50  ;;  %2153 = vmatprep.subr.bf16.mxu0 %v2325_v5 }
 0x378   : > { %2131 = vmatprep.subr.bf16.mxu1 %v2325_v5 }
 0x379   : > { %1106 = vrot.lane.b32.xlu0 %v762_v41, %s2720_s16  ;;  %878 = vrot.lane.b32.xlu1 %v762_v41, %s2331_s17 }
 0x37a   : > { %2142 = vmatmul.mubr.msk.bf16.vlgmr.msra.gmra.mrb[4].mxu0 %vm779_vm7, %v2282_v51 }
 0x37b   : > { %2157 = vmatprep.mubr.msk.bf16.mxu0 %vm2324_vm1, %v2325_v5 }
 0x37d   : > { %1108 = vrot.lane.b32.xlu0 %v764_v49, %s2720_s16  ;;  %880 = vrot.lane.b32.xlu1 %v764_v49, %s2331_s17 }
 0x381   : > { %1220 = vrot.lane.b32.xlu0 %v762_v41, %s2719_s19  ;;  %935 = vrot.lane.b32.xlu1 %v762_v41, %s2333_s21 }
 0x385   : > { %1222 = vrot.lane.b32.xlu0 %v764_v49, %s2719_s19  ;;  %937 = vrot.lane.b32.xlu1 %v764_v49, %s2333_s21 }
 0x389   : > { %1049 = vrot.lane.b32.xlu1 %v762_v41, %s2334_s22  ;;  %1279 = vperm.xlu0 %2280, %v742_v53  }
 0x38d   : > { %1051 = vrot.lane.b32.xlu1 %v764_v49, %s2334_s22 }
 0x391   : > { %1163 = vrot.lane.b32.xlu1 %v762_v41, %s2335_s23 }
 0x395   : > { %1165 = vrot.lane.b32.xlu1 %v764_v49, %s2335_s23 }
 0x399   : > { %1274 = vperm.xlu1 %2279, %v741_v52  }
 0x3e7   : > { %v776_v54 = vpop.permute.xlu1 %775  ;;  %v995_v58 = vpop.permute.xlu0 %994 }
 0x3e8   : > { %2132 = vmatpush3.bf16.msra.mxu1 %v776_v54 }
 0x3e9   : > { %2145 = vmatprep.subr.bf16.mxu1 %v2325_v5 }
 0x3eb   : > { %2134 = vmatmul.mubr.msk.bf16.vlgmr.msra.gmra.mrb[4].mxu1 %vm779_vm7, %v2281_v55  ;;  %v879_v57 = vpop.permute.xlu1 %878  ;;  %v1107_v62 = vpop.permute.xlu0 %1106 }
 0x3ec   : > { %2146 = vmatpush3.bf16.msra.mxu1 %v879_v57  ;;  %2149 = vmatprep.mubr.msk.bf16.mxu1 %vm2324_vm1, %v2325_v5 }
 0x3ed   : > { %2147 = vmatprep.subr.bf16.mxu1 %v2325_v5 }
 0x3ef   : > { %v881_v59 = vpop.permute.xlu1 %880  ;;  %v1109_v2 = vpop.permute.xlu0 %1108 }
 0x3f0   : > { %2148 = vmatpush3.bf16.msra.mxu1 %v881_v59 }
 0x3f1   : > { %2161 = vmatprep.subr.bf16.mxu1 %v2325_v5 }
 0x3f3   : > { %2150 = vmatmul.mubr.msk.bf16.vlgmr.msra.gmra.mrb[8].mxu1 %vm779_vm7, %v2283_v60  ;;  %v936_v61 = vpop.permute.xlu1 %935  ;;  %v1221_v8 = vpop.permute.xlu0 %1220 }
 0x3f4   : > { %2154 = vmatpush3.bf16.msra.mxu0 %v936_v61  ;;  %2162 = vmatpush3.bf16.msra.mxu1 %v993_v56 }
 0x3f5   : > { %2163 = vmatprep.subr.bf16.mxu1 %v2325_v5  ;;  %2155 = vmatprep.subr.bf16.mxu0 %v2325_v5 }
 0x3f6   : > { %2165 = vmatprep.mubr.msk.bf16.mxu1 %vm2324_vm1, %v2325_v5 }
 0x3f7   : > { %v938_v63 = vpop.permute.xlu1 %937  ;;  %v1223_v10 = vpop.permute.xlu0 %1222 }
 0x3f8   : > { %2156 = vmatpush3.bf16.msra.mxu0 %v938_v63  ;;  %2164 = vmatpush3.bf16.msra.mxu1 %v995_v58 }
 0x3f9   : > { %2177 = vmatprep.subr.bf16.mxu1 %v2325_v5  ;;  %2169 = vmatprep.subr.bf16.mxu0 %v2325_v5 }
 0x3fb   : > { %2166 = vmatmul.mubr.msk.bf16.vlgmr.msra.gmra.mrb[12].mxu1 %vm779_vm7, %v2284_v0  ;;  %v1050_v3 = vpop.permute.xlu1 %1049  ;;  %2158 = vmatmul.mubr.msk.bf16.vlgmr.msra.gmra.mrb[8].mxu0 %vm779_vm7, %v2285_v1 }
 0x3fc   : > { %2170 = vmatpush3.bf16.msra.mxu0 %v1050_v3  ;;  %2178 = vmatpush3.bf16.msra.mxu1 %v1107_v62  ;;  %v2574_v3 = vld [vmem:[%s2717_s14] ss:$0 sm:$0xff] }
 0x3fd   : > { %2179 = vmatprep.subr.bf16.mxu1 %v2325_v5  ;;  %2171 = vmatprep.subr.bf16.mxu0 %v2325_v5 }
 0x3fe   : > { %2173 = vmatprep.mubr.msk.bf16.mxu0 %vm2324_vm1, %v2325_v5  ;;  %2181 = vmatprep.mubr.msk.bf16.mxu1 %vm2324_vm1, %v2325_v5 }
 0x3ff   : > { %v1052_v4 = vpop.permute.xlu1 %1051 }
 0x400   : > { %2172 = vmatpush3.bf16.msra.mxu0 %v1052_v4  ;;  %2180 = vmatpush3.bf16.msra.mxu1 %v1109_v2 }
 0x401   : > { %2193 = vmatprep.subr.bf16.mxu1 %v2325_v5  ;;  %2185 = vmatprep.subr.bf16.mxu0 %v2325_v5 }
 0x403   : > { %2182 = vmatmul.mubr.msk.bf16.vlgmr.msra.gmra.mrb[16].mxu1 %vm779_vm7, %v2286_v6  ;;  %v1164_v9 = vpop.permute.xlu1 %1163  ;;  %2174 = vmatmul.mubr.msk.bf16.vlgmr.msra.gmra.mrb[12].mxu0 %vm779_vm7, %v2287_v7 }
 0x404   : > { %2186 = vmatpush3.bf16.msra.mxu0 %v1164_v9  ;;  %2194 = vmatpush3.bf16.msra.mxu1 %v1221_v8 }
 0x405   : > { %2195 = vmatprep.subr.bf16.mxu1 %v2325_v5  ;;  %2187 = vmatprep.subr.bf16.mxu0 %v2325_v5 }
 0x406   : > { %2189 = vmatprep.mubr.msk.bf16.mxu0 %vm2324_vm1, %v2325_v5  ;;  %2197 = vmatprep.mubr.msk.bf16.mxu1 %vm2324_vm1, %v2325_v5 }
 0x407   : > { %v1166_v11 = vpop.permute.xlu1 %1165 }
 0x408   : > { %2188 = vmatpush3.bf16.msra.mxu0 %v1166_v11  ;;  %2196 = vmatpush3.bf16.msra.mxu1 %v1223_v10  ;;  %v1280_v2 = vpop.permute.xlu0 %1279 }
 0x409   : > { %2207 = vmatprep.subr.bf16.mxu1 %v2325_v5  ;;  %2201 = vmatprep.subr.bf16.mxu0 %v2325_v5 }
 0x40b   : > { %2190 = vmatmul.mubr.msk.bf16.vlgmr.msra.gmra.mrb[16].mxu0 %vm779_vm7, %v2288_v12  ;;  %2198 = vmatmul.mubr.msk.bf16.vlgmr.msra.gmra.mrb[20].mxu1 %vm779_vm7, %v2289_v13  ;;  %v743_v12 = vld [vmem:[%s2711_s8] sm:$0xff] }
 0x40c   : > { %2209 = vmatprep.mubr.msk.bf16.mxu1 %vm2324_vm1, %v2325_v5  ;;  %2203 = vmatprep.mubr.msk.bf16.mxu0 %vm2324_vm1, %v2325_v5 }
 0x418   : > { %v1275_v1 = vpop.permute.xlu1 %1274 }
 0x44d   : > { %v866_v14 = vpop.f32.mrb[4].mxu0 }
 0x44e   : > { %v2143_v15 = vpop.f32.mrb[5].mxu0 }
 0x44f   : > { %v869_v16 = vpop.f32.mrb[6].mxu0 }
 0x450   : > { %v2144_v17 = vpop.f32.mrb[7].mxu0 }
 0x4be   : > { %v817_v18 = vpop.f32.mrb[4].mxu1 }
 0x4bf   : > { %v867_v19 = vadd.f32 %v866_v14, %v817_v18  ;;  %v2135_v20 = vpop.f32.mrb[5].mxu1 }
 0x4c0   : > { %v820_v21 = vpop.f32.mrb[6].mxu1 }
 0x4c1   : > { %v870_v22 = vadd.f32 %v869_v16, %v820_v21  ;;  %v2136_v23 = vpop.f32.mrb[7].mxu1 }
 0x4c6   : > { %v921_v24 = vpop.f32.mrb[8].mxu1 }
 0x4c7   : > { %v928_v25 = vadd.f32 %v921_v24, %v867_v19  ;;  %v2151_v26 = vpop.f32.mrb[9].mxu1 }
 0x4c8   : > { %v924_v27 = vpop.f32.mrb[10].mxu1  ;;  %v746_v26 = vld [vmem:[%s2712_s9 + $0x8] sm:$0xff] }
 0x4c9   : > { %v929_v28 = vadd.f32 %v924_v27, %v870_v22  ;;  %v2152_v29 = vpop.f32.mrb[11].mxu1  ;;  %v744_v27 = vld [vmem:[%s2711_s8 + $0x8] sm:$0xff] }
 0x4ce   : > { %v978_v30 = vpop.f32.mrb[8].mxu0  ;;  %v1035_v31 = vpop.f32.mrb[12].mxu1 }
 0x4cf   : > { %v985_v32 = vadd.f32 %v978_v30, %v928_v25  ;;  %v2159_v33 = vpop.f32.mrb[9].mxu0  ;;  %v2167_v34 = vpop.f32.mrb[13].mxu1  ;;  %v745_v25 = vld [vmem:[%s2712_s9] sm:$0xff] }
 0x4d0   : > { %v981_v35 = vpop.f32.mrb[10].mxu0  ;;  %v1038_v36 = vpop.f32.mrb[14].mxu1 }
 0x4d1   : > { %v1042_v37 = vadd.f32 %v1035_v31, %v985_v32  ;;  %v986_v38 = vadd.f32 %v981_v35, %v929_v28  ;;  %v2160_v39 = vpop.f32.mrb[11].mxu0  ;;  %v2168_v40 = vpop.f32.mrb[15].mxu1 }
 0x4d3   : > { %v1043_v41 = vadd.f32 %v1038_v36, %v986_v38 }
 0x4d6   : > { %v1092_v42 = vpop.f32.mrb[12].mxu0  ;;  %v1149_v43 = vpop.f32.mrb[16].mxu1 }
 0x4d7   : > { %v1099_v44 = vadd.f32 %v1092_v42, %v1042_v37  ;;  %v2175_v45 = vpop.f32.mrb[13].mxu0  ;;  %v2183_v46 = vpop.f32.mrb[17].mxu1 }
 0x4d8   : > { %v1095_v47 = vpop.f32.mrb[14].mxu0  ;;  %v1152_v48 = vpop.f32.mrb[18].mxu1 }
 0x4d9   : > { %v1156_v49 = vadd.f32 %v1149_v43, %v1099_v44  ;;  %v1100_v50 = vadd.f32 %v1095_v47, %v1043_v41  ;;  %v2176_v51 = vpop.f32.mrb[15].mxu0  ;;  %v2184_v52 = vpop.f32.mrb[19].mxu1 }
 0x4db   : > { %v1157_v53 = vadd.f32 %v1152_v48, %v1100_v50 }
 0x4de   : > { %v1206_v54 = vpop.f32.mrb[16].mxu0  ;;  %v1263_v55 = vpop.f32.mrb[20].mxu1 }
 0x4df   : > { %v1213_v56 = vadd.f32 %v1206_v54, %v1156_v49  ;;  %v2191_v57 = vpop.f32.mrb[17].mxu0  ;;  %v2199_v58 = vpop.f32.mrb[21].mxu1 }
 0x4e0   : > { %v1209_v59 = vpop.f32.mrb[18].mxu0  ;;  %v1266_v60 = vpop.f32.mrb[22].mxu1  ;;  %v1371_v57 = vld [vmem:[%s2714_s11 + $0x8] sm:$0xff]  ;;  %v1370_v58 = vld [vmem:[%s2714_s11] sm:$0xff] }
 0x4e1   : > { %v1270_v61 = vadd.f32 %v1263_v55, %v1213_v56  ;;  %v1214_v62 = vadd.f32 %v1209_v59, %v1157_v53  ;;  %v2192_v63 = vpop.f32.mrb[19].mxu0  ;;  %v2200_v0 = vpop.f32.mrb[23].mxu1  ;;  %v2290_v56 = vld [vmem:[%s2713_s10] sm:$0xff]  }
 0x4e2   : > { %v2292_v63 = vld [vmem:[%s2713_s10 + $0x18] sm:$0xff]  }
 0x4e3   : > { %v1282_v4 = vadd.f32 %v1275_v1, %v1270_v61  ;;  %v1271_v6 = vadd.f32 %v1266_v60, %v1214_v62  ;;  %v2291_v60 = vld [vmem:[%s2713_s10 + $0x8] sm:$0xff]   ;;  %v2293_v1 = vld [vmem:[%s2713_s10 + $0x10] sm:$0xff]  }
 0x4e5   : > { %v1283_v7 = vadd.f32 %v1280_v2, %v1271_v6  ;;  %v1290_v8 = vmul.f32 %v2574_v3, %v1282_v4 }
 0x4e7   : > { %v1292_v9 = vsel %vm521_vm0, %v1290_v8, 0.0  ;;  %v1291_v10 = vmul.f32 %v2574_v3, %v1283_v7 }
 0x4e8   : > { %1293 = vadd.xlane.f32.xlu1 %v1292_v9  ;;  %v2297_v9 = vld [vmem:[%s2713_s10 + $0x38] sm:$0xff]  }
 0x4e9   : > { %v1295_v11 = vsel %vm521_vm0, %v1291_v10, 0.0  ;;  %v2296_v10 = vld [vmem:[%s2713_s10 + $0x30] sm:$0xff]  }
 0x4ea   : > { %1296 = vadd.xlane.f32.xlu0 %v1295_v11 }
 0x4f9   : > { %1322 = vperm.xlu1 %2279, %v743_v12   ;;  %v2298_v12 = vld [vmem:[%s2713_s10 + $0x40] sm:$0xff]  }
 0x575   : > { %v1294_v13 = vpop.xlane.xlu1 %1293 }
 0x576   : > { %v1298_v14 = vmul.f32 0.015625, %v1294_v13 }
 0x577   : > { %v1297_v15 = vpop.xlane.xlu0 %1296 }
 0x578   : > { %v1300_v16 = vsub.f32 %v1282_v4, %v1298_v14  ;;  %v1299_v17 = vmul.f32 0.015625, %v1297_v15  ;;  %v2294_v4 = vld [vmem:[%s2713_s10 + $0x28] sm:$0xff]  }
 0x579   : > { %v1323_v28 = vpop.permute.xlu1 %1322 }
 0x57a   : > { %v1301_v18 = vsub.f32 %v1283_v7, %v1299_v17  ;;  %v1302_v19 = vmul.f32 %v2574_v3, %v1300_v16  ;;  %v2295_v7 = vld [vmem:[%s2713_s10 + $0x20] sm:$0xff]  }
 0x57c   : > { %v1304_v20 = vmul.f32 %v1302_v19, %v1302_v19  ;;  %v1303_v21 = vmul.f32 %v2574_v3, %v1301_v18 }
 0x57e   : > { %v1306_v22 = vsel %vm521_vm0, %v1304_v20, 0.0  ;;  %v1305_v23 = vmul.f32 %v1303_v21, %v1303_v21 }
 0x57f   : > { %1307 = vadd.xlane.f32.xlu1 %v1306_v22 }
 0x580   : > { %v1309_v24 = vsel %vm521_vm0, %v1305_v23, 0.0 }
 0x581   : > { %1310 = vadd.xlane.f32.xlu0 %v1309_v24 }
 0x590   : > { %1334 = vperm.xlu1 %2279, %v745_v25  }
 0x594   : > { %1339 = vperm.xlu1 %2279, %v746_v26  }
 0x597   : > { %1327 = vperm.xlu0 %2280, %v744_v27  }
 0x60c   : > { %v1308_v29 = vpop.xlane.xlu1 %1307 }
 0x60d   : > { %v1312_v30 = vmul.f32 0.015625, %v1308_v29 }
 0x60e   : > { %v1311_v31 = vpop.xlane.xlu0 %1310 }
 0x60f   : > { %v1314_v32 = vadd.f32 1e-05, %v1312_v30  ;;  %v1313_v33 = vmul.f32 0.015625, %v1311_v31 }
 0x610   : > { %v1335_v36 = vpop.permute.xlu1 %1334 }
 0x611   : > { %2307 = vrsqrt.f32 %v1314_v32  ;;  %v1315_v34 = vadd.f32 1e-05, %v1313_v33 }
 0x613   : > { %2309 = vrsqrt.f32 %v1315_v34 }
 0x614   : > { %v1340_v44 = vpop.permute.xlu1 %1339 }
 0x616   : > { %v1328_v41 = vpop.permute.xlu0 %1327 }
 0x61b   : > { %v2308_v35 = vpop.eup %2307 }
 0x61c   : > { %v1318_v37 = vmul.f32 %v2308_v35, %v1300_v16 }
 0x61d   : > { %v2310_v38 = vpop.eup %2309 }
 0x61e   : > { %v1330_v39 = vmul.f32 %v1323_v28, %v1318_v37  ;;  %v1319_v40 = vmul.f32 %v2310_v38, %v1301_v18 }
 0x620   : > { %v1342_v42 = vadd.f32 %v1335_v36, %v1330_v39  ;;  %v1331_v43 = vmul.f32 %v1328_v41, %v1319_v40 }
 0x622   : > { %vm1344_vm8 = vcmp.ge.f32.partialorder %v1342_v42, 0.0  ;;  %v1346_v45 = vmul.f32 0.01, %v1342_v42  ;;  %v1343_v46 = vadd.f32 %v1340_v44, %v1331_v43 }
 0x624   : > { %v1348_v47 = vsel %vm1344_vm8, %v1342_v42, %v1346_v45  ;;  %vm1345_vm9 = vcmp.ge.f32.partialorder %v1343_v46, 0.0  ;;  %v1347_v48 = vmul.f32 0.01, %v1343_v46 }
 0x625   : > { %v1350_v50 = vmul.f32 %v2574_v3, %v1348_v47 }
 0x626   : > { %v1349_v49 = vsel %vm1345_vm9, %v1343_v46, %v1347_v48 }
 0x627   : > { %v1351_v51 = vmul.f32 %v2574_v3, %v1349_v49 }
 0x629   : > { %v1376_v52 = vpack.c.bf16 %v1351_v51, %v1350_v50 }
 0x62b   : > { %1378 = vrot.lane.b32.xlu0 %v1376_v52, %s2327_s26  ;;  %s2721_s26 = smov 108  }
 0x69d   : > { %v1379_v53 = vpop.permute.xlu0 %1378 }
 0x69e   : > { %v1381_v54 = vsel %vm755_vm5, 0, %v1379_v53 }
 0x69f   : > { %v1382_v55 = vsel %vm761_vm6, %v1381_v54, 0 }
 0x6a0   : > { %1491 = vrot.lane.b32.xlu0 %v1382_v55, %s2331_s17  ;;  %1390 = vrot.lane.b32.xlu1 %v1382_v55, %s2329_s28  ;;  %s2722_s28 = smov 106  }
 0x6a1   : > { %2208 = vmatpush3.bf16.msra.mxu1 %v1382_v55 }
 0x6a2   : > { %2219 = vmatprep.subr.bf16.mxu1 %v2325_v5 }
 0x6a4   : > { %1599 = vrot.lane.b32.xlu0 %v1382_v55, %s2328_s27  ;;  %1545 = vrot.lane.b32.xlu1 %v1382_v55, %s2333_s21  ;;  %s514_s21 = scalar_lea.vmem %s2718_s15, %s2424_s20 }
 0x6a5   : > { %2210 = vmatmul.mubr.msk.bf16.vlgmr.msra.gmra.mrb[24].mxu1 %vm532_vm2, %v2290_v56 }
 0x6a6   : > { %2221 = vmatprep.mubr.msk.bf16.mxu1 %vm2324_vm1, %v2325_v5 }
 0x6a8   : > { %1707 = vrot.lane.b32.xlu0 %v1382_v55, %s2721_s26  ;;  %1653 = vrot.lane.b32.xlu1 %v1382_v55, %s2334_s22 }
 0x6ac   : > { %1815 = vrot.lane.b32.xlu0 %v1382_v55, %s2722_s28  ;;  %1761 = vrot.lane.b32.xlu1 %v1382_v55, %s2335_s23 }
 0x6b0   : > { %1871 = vperm.xlu0 %2280, %v1371_v57   ;;  %1866 = vperm.xlu1 %2279, %v1370_v58  }
 0x712   : > { %v1391_v59 = vpop.permute.xlu1 %1390  ;;  %v1492_v61 = vpop.permute.xlu0 %1491 }
 0x713   : > { %2202 = vmatpush3.bf16.msra.mxu0 %v1391_v59 }
 0x714   : > { %2213 = vmatprep.subr.bf16.mxu0 %v2325_v5 }
 0x716   : > { %2204 = vmatmul.mubr.msk.bf16.vlgmr.msra.gmra.mrb[20].mxu0 %vm532_vm2, %v2291_v60  ;;  %v1546_v62 = vpop.permute.xlu1 %1545  ;;  %v1600_v2 = vpop.permute.xlu0 %1599 }
 0x717   : > { %2214 = vmatpush3.bf16.msra.mxu0 %v1492_v61  ;;  %2220 = vmatpush3.bf16.msra.mxu1 %v1546_v62 }
 0x718   : > { %2231 = vmatprep.subr.bf16.mxu1 %v2325_v5  ;;  %2215 = vmatprep.mubr.msk.bf16.mxu0 %vm2324_vm1, %v2325_v5 }
 0x719   : > { %2225 = vmatprep.subr.bf16.mxu0 %v2325_v5 }
 0x71a   : > { %v1654_v0 = vpop.permute.xlu1 %1653  ;;  %2222 = vmatmul.mubr.msk.bf16.vlgmr.msra.gmra.mrb[28].mxu1 %vm532_vm2, %v2292_v63  ;;  %v1708_v8 = vpop.permute.xlu0 %1707 }
 0x71b   : > { %2232 = vmatpush3.bf16.msra.mxu1 %v1654_v0  ;;  %2233 = vmatprep.mubr.msk.bf16.mxu1 %vm2324_vm1, %v2325_v5 }
 0x71c   : > { %2243 = vmatprep.subr.bf16.mxu1 %v2325_v5 }
 0x71e   : > { %2216 = vmatmul.mubr.msk.bf16.vlgmr.msra.gmra.mrb[24].mxu0 %vm532_vm2, %v2293_v1  ;;  %v1762_v6 = vpop.permute.xlu1 %1761  ;;  %v1816_v11 = vpop.permute.xlu0 %1815 }
 0x71f   : > { %2226 = vmatpush3.bf16.msra.mxu0 %v1600_v2  ;;  %2227 = vmatprep.mubr.msk.bf16.mxu0 %vm2324_vm1, %v2325_v5 }
 0x720   : > { %2237 = vmatprep.subr.bf16.mxu0 %v2325_v5 }
 0x722   : > { %2234 = vmatmul.mubr.msk.bf16.vlgmr.msra.gmra.mrb[32].mxu1 %vm532_vm2, %v2294_v4 }
 0x723   : > { %2244 = vmatpush3.bf16.msra.mxu1 %v1762_v6  ;;  %2245 = vmatprep.mubr.msk.bf16.mxu1 %vm2324_vm1, %v2325_v5 }
 0x726   : > { %2228 = vmatmul.mubr.msk.bf16.vlgmr.msra.gmra.mrb[28].mxu0 %vm532_vm2, %v2295_v7 }
 0x727   : > { %2238 = vmatpush3.bf16.msra.mxu0 %v1708_v8  ;;  %2239 = vmatprep.mubr.msk.bf16.mxu0 %vm2324_vm1, %v2325_v5 }
 0x728   : > { %2249 = vmatprep.subr.bf16.mxu0 %v2325_v5 }
 0x72a   : > { %2246 = vmatmul.mubr.msk.bf16.vlgmr.msra.gmra.mrb[36].mxu1 %vm532_vm2, %v2297_v9 }
 0x72e   : > { %2240 = vmatmul.mubr.msk.bf16.vlgmr.msra.gmra.mrb[32].mxu0 %vm532_vm2, %v2296_v10  ;;  %v1373_v10 = vld [vmem:[%s2715_s12 + $0x8] sm:$0xff] }
 0x72f   : > { %2250 = vmatpush3.bf16.msra.mxu0 %v1816_v11  ;;  %2251 = vmatprep.mubr.msk.bf16.mxu0 %vm2324_vm1, %v2325_v5  ;;  %v1867_v61 = vpop.permute.xlu1 %1866  ;;  %v1872_v2 = vpop.permute.xlu0 %1871  ;;  %v1372_v11 = vld [vmem:[%s2715_s12] sm:$0xff] }
 0x736   : > { %2252 = vmatmul.mubr.msk.bf16.vlgmr.msra.gmra.mrb[36].mxu0 %vm532_vm2, %v2298_v12 }
 0x778   : > { %v1479_v13 = vpop.f32.mrb[24].mxu1 }
 0x779   : > { %v2211_v14 = vpop.f32.mrb[25].mxu1 }
 0x77a   : > { %v1482_v15 = vpop.f32.mrb[26].mxu1 }
 0x77b   : > { %v2212_v16 = vpop.f32.mrb[27].mxu1 }
 0x7e9   : > { %v1430_v17 = vpop.f32.mrb[20].mxu0 }
 0x7ea   : > { %v2205_v18 = vpop.f32.mrb[21].mxu0  ;;  %v1480_v19 = vadd.f32 %v1479_v13, %v1430_v17 }
 0x7eb   : > { %v1433_v20 = vpop.f32.mrb[22].mxu0 }
 0x7ec   : > { %v2206_v21 = vpop.f32.mrb[23].mxu0  ;;  %v1483_v22 = vadd.f32 %v1482_v15, %v1433_v20 }
 0x7ed   : > { %v1585_v23 = vpop.f32.mrb[28].mxu1 }
 0x7ee   : > { %v2223_v24 = vpop.f32.mrb[29].mxu1 }
 0x7ef   : > { %v1588_v25 = vpop.f32.mrb[30].mxu1  ;;  %v1374_v24 = vld [vmem:[%s2716_s13] sm:$0xff] }
 0x7f0   : > { %v2224_v5 = vpop.f32.mrb[31].mxu1 }
 0x7f1   : > { %v1531_v26 = vpop.f32.mrb[24].mxu0 }
 0x7f2   : > { %v1538_v27 = vadd.f32 %v1531_v26, %v1480_v19  ;;  %v2217_v28 = vpop.f32.mrb[25].mxu0 }
 0x7f3   : > { %v1534_v29 = vpop.f32.mrb[26].mxu0 }
 0x7f4   : > { %v1539_v30 = vadd.f32 %v1534_v29, %v1483_v22  ;;  %v1592_v31 = vadd.f32 %v1585_v23, %v1538_v27  ;;  %v2218_v32 = vpop.f32.mrb[27].mxu0 }
 0x7f5   : > { %v1693_v33 = vpop.f32.mrb[32].mxu1 }
 0x7f6   : > { %v1593_v34 = vadd.f32 %v1588_v25, %v1539_v30  ;;  %v2235_v35 = vpop.f32.mrb[33].mxu1  ;;  %v1375_v25 = vld [vmem:[%s2716_s13 + $0x8] sm:$0xff] }
 0x7f7   : > { %v1696_v36 = vpop.f32.mrb[34].mxu1 }
 0x7f8   : > { %v2236_v37 = vpop.f32.mrb[35].mxu1 }
 0x7f9   : > { %v1639_v38 = vpop.f32.mrb[28].mxu0 }
 0x7fa   : > { %v1646_v39 = vadd.f32 %v1639_v38, %v1592_v31  ;;  %v2229_v40 = vpop.f32.mrb[29].mxu0 }
 0x7fb   : > { %v1642_v41 = vpop.f32.mrb[30].mxu0 }
 0x7fc   : > { %v1647_v42 = vadd.f32 %v1642_v41, %v1593_v34  ;;  %v1700_v43 = vadd.f32 %v1693_v33, %v1646_v39  ;;  %v2230_v44 = vpop.f32.mrb[31].mxu0 }
 0x7fd   : > { %v1801_v45 = vpop.f32.mrb[36].mxu1 }
 0x7fe   : > { %v1701_v46 = vadd.f32 %v1696_v36, %v1647_v42  ;;  %v2247_v47 = vpop.f32.mrb[37].mxu1 }
 0x7ff   : > { %v1804_v48 = vpop.f32.mrb[38].mxu1 }
 0x800   : > { %v2248_v49 = vpop.f32.mrb[39].mxu1 }
 0x801   : > { %v1747_v50 = vpop.f32.mrb[32].mxu0 }
 0x802   : > { %v1754_v51 = vadd.f32 %v1747_v50, %v1700_v43  ;;  %v2241_v52 = vpop.f32.mrb[33].mxu0 }
 0x803   : > { %v1750_v53 = vpop.f32.mrb[34].mxu0 }
 0x804   : > { %v1755_v54 = vadd.f32 %v1750_v53, %v1701_v46  ;;  %v1808_v55 = vadd.f32 %v1801_v45, %v1754_v51  ;;  %v2242_v56 = vpop.f32.mrb[35].mxu0 }
 0x806   : > { %v1809_v57 = vadd.f32 %v1804_v48, %v1755_v54 }
 0x809   : > { %v1855_v58 = vpop.f32.mrb[36].mxu0 }
 0x80a   : > { %v1862_v59 = vadd.f32 %v1855_v58, %v1808_v55  ;;  %v2253_v60 = vpop.f32.mrb[37].mxu0 }
 0x80b   : > { %v1858_v62 = vpop.f32.mrb[38].mxu0 }
 0x80c   : > { %v1874_v63 = vadd.f32 %v1867_v61, %v1862_v59  ;;  %v1863_v0 = vadd.f32 %v1858_v62, %v1809_v57  ;;  %v2254_v1 = vpop.f32.mrb[39].mxu0 }
 0x80e   : > { %v1875_v4 = vadd.f32 %v1872_v2, %v1863_v0  ;;  %v1876_v6 = vmul.f32 %v2574_v3, %v1874_v63 }
 0x810   : > { %v1878_v7 = vsel %vm521_vm0, %v1876_v6, 0.0  ;;  %v1877_v8 = vmul.f32 %v2574_v3, %v1875_v4 }
 0x811   : > { %1879 = vadd.xlane.f32.xlu1 %v1878_v7 }
 0x812   : > { %v1881_v9 = vsel %vm521_vm0, %v1877_v8, 0.0 }
 0x813   : > { %1882 = vadd.xlane.f32.xlu0 %v1881_v9 }
 0x822   : > { %1913 = vperm.xlu1 %2279, %v1373_v10  }
 0x829   : > { %1908 = vperm.xlu0 %2280, %v1372_v11  }
 0x89e   : > { %v1880_v12 = vpop.xlane.xlu1 %1879 }
 0x89f   : > { %v1884_v13 = vmul.f32 0.015625, %v1880_v12 }
 0x8a0   : > { %v1883_v14 = vpop.xlane.xlu0 %1882 }
 0x8a1   : > { %v1886_v15 = vsub.f32 %v1874_v63, %v1884_v13  ;;  %v1885_v16 = vmul.f32 0.015625, %v1883_v14 }
 0x8a2   : > { %v1914_v26 = vpop.permute.xlu1 %1913 }
 0x8a3   : > { %v1887_v17 = vsub.f32 %v1875_v4, %v1885_v16  ;;  %v1888_v18 = vmul.f32 %v2574_v3, %v1886_v15 }
 0x8a5   : > { %v1890_v19 = vmul.f32 %v1888_v18, %v1888_v18  ;;  %v1889_v20 = vmul.f32 %v2574_v3, %v1887_v17 }
 0x8a7   : > { %v1892_v21 = vsel %vm521_vm0, %v1890_v19, 0.0  ;;  %v1891_v22 = vmul.f32 %v1889_v20, %v1889_v20 }
 0x8a8   : > { %1893 = vadd.xlane.f32.xlu0 %v1892_v21  ;;  %v1909_v5 = vpop.permute.xlu0 %1908 }
 0x8a9   : > { %v1895_v23 = vsel %vm521_vm0, %v1891_v22, 0.0 }
 0x8aa   : > { %1896 = vadd.xlane.f32.xlu1 %v1895_v23 }
 0x8bb   : > { %1920 = vperm.xlu1 %2279, %v1374_v24  }
 0x8be   : > { %1925 = vperm.xlu0 %2280, %v1375_v25  }
 0x935   : > { %v1894_v27 = vpop.xlane.xlu0 %1893 }
 0x936   : > { %v1898_v28 = vmul.f32 0.015625, %v1894_v27 }
 0x937   : > { %v1897_v29 = vpop.xlane.xlu1 %1896 }
 0x938   : > { %v1900_v30 = vadd.f32 1e-05, %v1898_v28  ;;  %v1899_v31 = vmul.f32 0.015625, %v1897_v29 }
 0x93a   : > { %2311 = vrsqrt.f32 %v1900_v30  ;;  %v1901_v32 = vadd.f32 1e-05, %v1899_v31 }
 0x93b   : > { %v1921_v38 = vpop.permute.xlu1 %1920 }
 0x93c   : > { %2313 = vrsqrt.f32 %v1901_v32 }
 0x93d   : > { %v1926_v41 = vpop.permute.xlu0 %1925 }
 0x944   : > { %v2312_v33 = vpop.eup %2311 }
 0x945   : > { %v1904_v34 = vmul.f32 %v2312_v33, %v1886_v15 }
 0x946   : > { %v2314_v35 = vpop.eup %2313 }
 0x947   : > { %v1916_v36 = vmul.f32 %v1909_v5, %v1904_v34  ;;  %v1905_v37 = vmul.f32 %v2314_v35, %v1887_v17 }
 0x949   : > { %v1928_v39 = vadd.f32 %v1921_v38, %v1916_v36  ;;  %v1917_v40 = vmul.f32 %v1914_v26, %v1905_v37 }
 0x94b   : > { %vm1930_vm10 = vcmp.ge.f32.partialorder %v1928_v39, 0.0  ;;  %v1932_v42 = vmul.f32 0.01, %v1928_v39  ;;  %v1929_v43 = vadd.f32 %v1926_v41, %v1917_v40 }
 0x94d   : > { %v1934_v44 = vsel %vm1930_vm10, %v1928_v39, %v1932_v42  ;;  %vm1931_vm11 = vcmp.ge.f32.partialorder %v1929_v43, 0.0  ;;  %v1933_v45 = vmul.f32 0.01, %v1929_v43 }
 0x94e   : > { %v1936_v46 = vmul.f32 %v2574_v3, %v1934_v44 }
 0x94f   : > { %v1935_v47 = vsel %vm1931_vm11, %v1929_v43, %v1933_v45 }
 0x950   : > { %1938 = vst.msk [vmem:[%s514_s21] sm:$0xff] %vm521_vm0, %v1936_v46  ;;  %v1937_v48 = vmul.f32 %v2574_v3, %v1935_v47 }
 0x952   : > { %1939 = vst.msk [vmem:[%s514_s21 + $0x8] sm:$0xff] %vm521_vm0, %v1937_v48 }
 0x953 PF: > { %s25_s18 = sadd.s32 1, %s2321_s18  }
 0x954   : > { %p22_p4 = scmp.ge.s32.totalorder %s25_s18, 4  }
 0x956   :  { %24 = sbr.rel (!%p22_p4) target bundleno = 1 (0x1), region = 113 }

// kernel: usenet_forward.19
= control target key start
LH: loop header
LB: loop body
LE: loop exit
PB: predicated region body
PF: predicated region fallthrough
CT: control target
= control target key end

     0   :  { %s368_s9 = smov 0   ;;  %s388_s0 = inlined_call_operand.vmem [shape: f32[2,8,324], index: 0, kind: input, shape index: {}]   ;;  %s389_s1 = inlined_call_operand.vmem [shape: bf16[3,8], index: 1, kind: input, shape index: {}]   ;;  %s390_s2 = inlined_call_operand.vmem [shape: f32[2,3,324], index: 2, kind: output, shape index: {}]  }
   0x1 LB: > { %s309_s10 = sadd.s32 4294967295, %s348_s9   ;;  %p313_p0 = scmp.ge.s32.totalorder %s348_s9, 1  ;;  %s348_s9 = sphi %s368_s9, %s12_s9  }
   0x2   : > { %p112_p1 = scmp.lt.s32.totalorder %s348_s9, 3 }
   0x4   : > { %p113_p2 = pnand %p313_p0, %p112_p1 }
   0x5   : > { %p134_p3 = scmp.lt.s32.totalorder (!%p113_p2), %s309_s10, 1  ;;  %v350_v0 = vmov (!%p113_p2), 0.0   ;;  %v351_v1 = vmov (!%p113_p2), 0   ;;  %vm352_vm0 = vmmov (!%p113_p2), 0   ;;  %vm156_vm1 = vcmask (!%p113_p2), 1043456  }
   0x6   : > { %116 = sbr.rel (%p113_p2) target bundleno = 240 (0xf0), region = 28  ;;  %323 = vmatprep.subr.bf16.mxu1 (!%p113_p2), %v350_v0  ;;  %198 = vmatprep.mubr.bf16.mxu0 (!%p113_p2), %v351_v1  ;;  %v145_v10 = vld [vmem:[%s389_s1] sm:$0x3] (!%p113_p2)  ;;  %vm152_vm2 = vcmask (!%p113_p2), 64512   ;;  %vm252_vm3 = vcmask (!%p113_p2), 550912  }
   0x7   : > { %325 = vmatprep.mubr.msk.bf16.mxu1 (!%p113_p2), %vm352_vm0, %v350_v0 }
   0xd   : > { %s392_s10 = smov (!%p134_p3, %s309_s10), 1 }
   0xe   : > { %s329_s11 = smul.u32 24, %s392_s10 }
   0xf   : > { %s330_s17 = smul.u32 12, %s392_s10 }
  0x10   : > { %s138_s14 = scalar_lea.vmem %s388_s0, %s329_s11 }
  0x11   : > { %v147_v2 = vld [vmem:[%s138_s14 + $0x8] sm:$0xff]  ;;  %v146_v3 = vld [vmem:[%s138_s14] sm:$0xff]  ;;  %v148_v4 = vld [vmem:[%s138_s14 + $0x10] sm:$0xff]  ;;  %s143_s20 = scalar_lea.vmem %s390_s2, %s330_s17 }
  0x12   : > { %v150_v5 = vpack.c.bf16 %v147_v2, %v147_v2  ;;  %v149_v6 = vpack.c.bf16 %v146_v3, %v146_v3  ;;  %v151_v7 = vpack.c.bf16 %v148_v4, %v148_v4 }
  0x14   : > { %316 = vmatprep.subr.msk.bf16.mxu0 %vm156_vm1, %v150_v5  ;;  %v158_v8 = vsel %vm156_vm1, %v149_v6, 0  ;;  %v164_v9 = vsel %vm156_vm1, %v151_v7, 0 }
  0x15   : > { %167 = vmatpush1.bf16.msra.mxu0 %v158_v8  ;;  %324 = vmatpush3.bf16.msra.mxu1 %v164_v9 }
  0x18   : > { %317 = vmatmul.mubr.msk.bf16.vlgmr.msra.gmra.mrb[0].mxu0 %vm152_vm2, %v145_v10  ;;  %326 = vmatmul.mubr.msk.bf16.vlgmr.msra.gmra.mrb[0].mxu1 %vm152_vm2, %v145_v10 }
  0xeb   : > { %v200_v11 = vpop.f32.mrb[0].mxu0  ;;  %v241_v12 = vpop.f32.mrb[0].mxu1 }
  0xec   : > { %253 = vst.msk [vmem:[%s143_s20 + $0x8] sm:$0x7] %vm252_vm3, %v241_v12  ;;  %v202_v13 = vpop.f32.mrb[1].mxu0  ;;  %v327_v14 = vpop.f32.mrb[1].mxu1 }
  0xed   : > { %v249_v15 = vcombine.low %v200_v11, %v202_v13  ;;  %v204_v16 = vpop.f32.mrb[2].mxu0  ;;  %v244_v17 = vpop.f32.mrb[2].mxu1 }
  0xee   : > { %v205_v18 = vpop.f32.mrb[3].mxu0  ;;  %v328_v19 = vpop.f32.mrb[3].mxu1 }
  0xef   : > { %251 = vst [vmem:[%s143_s20] sm:$0x77] %v249_v15 }
  0xf0 PF: > { %s12_s9 = sadd.s32 1, %s348_s9  }
  0xf1   : > { %p9_p4 = scmp.ge.s32.totalorder %s12_s9, 4  }
  0xf3   :  { %11 = sbr.rel (!%p9_p4) target bundleno = 1 (0x1), region = 58 }

// kernel: usenet_forward.18
= control target key start
LH: loop header
LB: loop body
LE: loop exit
PB: predicated region body
PF: predicated region fallthrough
CT: control target
= control target key end

     0   :  { %s3134_s18 = smov 0   ;;  %s3515_s0 = inlined_call_operand.vmem [shape: f32[2,8,324], index: 0, kind: input, shape index: {}]   ;;  %s3516_s1 = inlined_call_operand.vmem [shape: f32[2,8,324], index: 1, kind: input, shape index: {}]   ;;  %s3517_s2 = inlined_call_operand.vmem [shape: f32[2,8], index: 2, kind: input, shape index: {}]   ;;  %s3518_s3 = inlined_call_operand.vmem [shape: f32[2,1], index: 3, kind: input, shape index: {}]   ;;  %s3519_s4 = inlined_call_operand.vmem [shape: f32[8,2], index: 4, kind: input, shape index: {}]   ;;  %s3520_s5 = inlined_call_operand.vmem [shape: f32[8,1], index: 5, kind: input, shape index: {}]   ;;  %s3521_s6 = inlined_call_operand.vmem [shape: bf16[9,8,16], index: 6, kind: input, shape index: {}]   ;;  %s3522_s7 = inlined_call_operand.vmem [shape: f32[8,1], index: 7, kind: input, shape index: {}]   ;;  %s3523_s8 = inlined_call_operand.vmem [shape: f32[8,1], index: 8, kind: input, shape index: {}]   ;;  %s3524_s9 = inlined_call_operand.vmem [shape: f32[8,1], index: 9, kind: input, shape index: {}]   ;;  %s3525_s10 = inlined_call_operand.vmem [shape: bf16[9,8,8], index: 10, kind: input, shape index: {}]   ;;  %s3526_s11 = inlined_call_operand.vmem [shape: f32[8,1], index: 11, kind: input, shape index: {}]   ;;  %s3527_s12 = inlined_call_operand.vmem [shape: f32[8,1], index: 12, kind: input, shape index: {}]   ;;  %s3528_s13 = inlined_call_operand.vmem [shape: f32[8,1], index: 13, kind: input, shape index: {}]   ;;  %s3529_s14 = inlined_call_operand.vmem [shape: f32[1,324], index: 14, kind: input, shape index: {}]   ;;  %s3530_s15 = inlined_call_operand.vmem [shape: f32[2,8,324], index: 15, kind: output, shape index: {}]  }
   0x1 LB: > { %s2784_s19 = sadd.s32 4294967295, %s3040_s18   ;;  %p2788_p0 = scmp.ge.s32.totalorder %s3040_s18, 1  ;;  %s3040_s18 = sphi %s3134_s18, %s25_s18  }
   0x2   : > { %p447_p1 = scmp.lt.s32.totalorder %s3040_s18, 3 }
   0x4   : > { %p448_p2 = pnand %p2788_p0, %p447_p1 }
   0x5   : > { %p500_p3 = scmp.lt.s32.totalorder (!%p448_p2), %s2784_s19, 1  ;;  %vm524_vm0 = vcmask (!%p448_p2), 556032   ;;  %v3042_v6 = vmov (!%p448_p2), 0.0   ;;  %vm3043_vm1 = vmmov (!%p448_p2), 0   ;;  %v530_v9 = vld [vmem:[%s3517_s2] sm:$0x3] (!%p448_p2) }
   0x6   : > { %451 = sbr.rel (%p448_p2) target bundleno = 2475 (0x9ab), region = 80  ;;  %2885 = vmatprep.subr.mxu0 (!%p448_p2), %v3042_v6  ;;  %2890 = vmatprep.subr.mxu1 (!%p448_p2), %v3042_v6  ;;  %vm532_vm2 = vcmask (!%p448_p2), 64512   ;;  %v531_v10 = vld [vmem:[%s3518_s3] sm:$0x3] (!%p448_p2)  ;;  %vm613_vm3 = vcmask (!%p448_p2), 1041408   ;;  %vm609_vm4 = vcmask (!%p448_p2), 15360  }
   0x7   : > { %2887 = vmatprep.mubr.msk.f32.mxu0 (!%p448_p2), %vm3043_vm1, %v3042_v6  ;;  %2892 = vmatprep.mubr.msk.f32.mxu1 (!%p448_p2), %vm3043_vm1, %v3042_v6  ;;  %v607_v15 = vld [vmem:[%s3519_s4] sm:$0xff] (!%p448_p2)  ;;  %v3044_v16 = vmov (!%p448_p2), 0   ;;  %s3045_s22 = smov (!%p448_p2), 19   ;;  %vm726_vm5 = vcmask (!%p448_p2), 154624   ;;  %vm735_vm6 = vcmask (!%p448_p2), 711680   ;;  %s3047_s24 = smov (!%p448_p2), 127  }
   0x8   : > { %3024 = vset.pattern.permute.xlu0 (!%p448_p2), %v3044_v16  ;;  %3025 = vset.pattern.permute.xlu1 (!%p448_p2), %v3044_v16  ;;  %v608_v17 = vld [vmem:[%s3520_s5] sm:$0xff] (!%p448_p2)  ;;  %s3048_s25 = smov (!%p448_p2), 108   ;;  %s3049_s26 = smov (!%p448_p2), 92   ;;  %vm747_vm7 = vcmask (!%p448_p2), 1039360   ;;  %vm753_vm8 = vcmask (!%p448_p2), 130048   ;;  %vm2798_vm9 = vmneg (!%p448_p2), %vm726_vm5  ;;  %vm928_vm10 = vcmask (!%p448_p2), 1031168  }
   0x9   : > { %s3050_s27 = smov (!%p448_p2), 126   ;;  %s3051_s28 = smov (!%p448_p2), 91   ;;  %v711_v43 = vld [vmem:[%s3522_s7] sm:$0xff] (!%p448_p2)  ;;  %v704_v55 = vld [vmem:[%s3521_s6 + $0x8] sm:$0xf] (!%p448_p2)  ;;  %vm1027_vm11 = vcmask (!%p448_p2), 900096  }
   0xa   : > { %s3052_s29 = smov (!%p448_p2), 90   ;;  %s3053_s30 = smov (!%p448_p2), 110   ;;  %v703_v47 = vld [vmem:[%s3521_s6 + $0x4] sm:$0xf] (!%p448_p2)  ;;  %v702_v51 = vld [vmem:[%s3521_s6] sm:$0xf] (!%p448_p2) }
   0xb   : > { %v705_v62 = vld [vmem:[%s3521_s6 + $0xc] sm:$0xf] (!%p448_p2)  ;;  %vm1126_vm12 = vcmask (!%p448_p2), 891904   ;;  %vm1225_vm13 = vcmask (!%p448_p2), 883712   ;;  %vm1324_vm14 = vcmask (!%p448_p2), 752640   ;;  %vm1423_vm15 = vcmask (!%p448_p2), 744448  }
   0xd   : > { %s3532_s19 = smov (!%p500_p3, %s2784_s19), 1 }
   0xe   : > { %s3142_s20 = smul.u32 24, %s3532_s19 }
  0x10   : > { %s509_s23 = scalar_lea.vmem %s3516_s1, %s3142_s20  ;;  %s504_s21 = scalar_lea.vmem %s3515_s0, %s3142_s20 }
  0x11   : > { %v520_v0 = vld [vmem:[%s509_s23] sm:$0xff]  ;;  %v521_v1 = vld [vmem:[%s509_s23 + $0x8] sm:$0xff]  ;;  %v522_v2 = vld [vmem:[%s509_s23 + $0x10] sm:$0xff]  ;;  %s3046_s23 = smov 109  }
  0x12   : > { %v523_v3 = vadd.f32 %v521_v1, %v520_v0  ;;  %v525_v4 = vsel %vm524_vm0, %v522_v2, 0.0  ;;  %v518_v27 = vld [vmem:[%s504_s21 + $0x8] sm:$0xff]  ;;  %v519_v31 = vld [vmem:[%s504_s21 + $0x10] sm:$0xff]  ;;  %v517_v34 = vld [vmem:[%s504_s21] sm:$0xff] }
  0x14   : > { %v526_v5 = vadd.f32 %v525_v4, %v523_v3  ;;  %v706_v4 = vld [vmem:[%s3521_s6 + $0x10] sm:$0xf] }
  0x16   : > { %527 = vadd.xlane.f32.xlu0 %v526_v5 }
  0xa3   : > { %v528_v7 = vpop.xlane.xlu0 %527 }
  0xa4   : > { %v529_v8 = vmul.f32 0.00390625, %v528_v7 }
  0xa6   : > { %2886 = vmatpush3.msra.mxu0 %v529_v8 }
  0xa7   : > { %2888 = vmatmul.mubr.msk.f32.vlgmr.msra.gmra.mrb[0].mxu0 %vm532_vm2, %v530_v9 }
  0xa8   : > { %789 = vmatprep.mubr.bf16.mxu0 %v3044_v16 }
 0x17a   : > { %v602_v11 = vpop.f32.mrb[0].mxu0 }
 0x17b   : > { %v603_v12 = vadd.f32 %v602_v11, %v531_v10  ;;  %v2889_v13 = vpop.f32.mrb[1].mxu0 }
 0x17d   : > { %v606_v14 = vmax.f32 %v603_v12, 0.0  ;;  %v707_v12 = vld [vmem:[%s3521_s6 + $0x14] sm:$0xf] }
 0x17f   : > { %2891 = vmatpush3.msk.msra.mxu1 %vm613_vm3, %v606_v14  ;;  %vm1522_vm3 = vcmask 736256  }
 0x180   : > { %2893 = vmatmul.mubr.msk.f32.vlgmr.msra.gmra.mrb[0].mxu1 %vm609_vm4, %v607_v15  ;;  %2895 = vmatprep.subr.bf16.mxu1 %v3042_v6 }
 0x181   : > { %2897 = vmatprep.mubr.msk.bf16.mxu1 %vm3043_vm1, %v3042_v6 }
 0x253   : > { %v683_v18 = vpop.f32.mrb[0].mxu1 }
 0x254   : > { %v684_v19 = vadd.f32 %v683_v18, %v608_v17  ;;  %v2894_v20 = vpop.f32.mrb[1].mxu1 }
 0x256   : > { %v2795_v21 = vmul.f32 -1.442695, %v684_v19 }
 0x258   : > { %3026 = vpow2.f32 %v2795_v21  ;;  %v708_v21 = vld [vmem:[%s3521_s6 + $0x18] sm:$0xf] }
 0x262   : > { %v3027_v22 = vpop.eup %3026 }
 0x263   : > { %v690_v23 = vadd.f32 1.0, %v3027_v22 }
 0x265   : > { %3028 = vrcp.f32 %v690_v23 }
 0x26f   : > { %v3029_v24 = vpop.eup %3028 }
 0x270   : > { %v693_v25 = vadd.f32 1.0, %v3029_v24 }
 0x272   : > { %696 = vperm.xlu0 %3024, %v693_v25  }
 0x2f1   : > { %v697_v26 = vpop.permute.xlu0 %696 }
 0x2f2   : > { %v700_v28 = vmul.f32 %v697_v26, %v521_v1  ;;  %v701_v29 = vmul.f32 %v697_v26, %v522_v2  ;;  %v699_v32 = vmul.f32 %v697_v26, %v520_v0 }
 0x2f4   : > { %v715_v30 = vpack.c.bf16 %v700_v28, %v518_v27  ;;  %v716_v33 = vpack.c.bf16 %v701_v29, %v519_v31  ;;  %v714_v35 = vpack.c.bf16 %v699_v32, %v517_v34  ;;  %v709_v27 = vld [vmem:[%s3521_s6 + $0x1c] sm:$0xf] }
 0x2f6   : > { %722 = vrot.lane.b32.xlu1 %v715_v30, %s3045_s22  ;;  %v710_v30 = vld [vmem:[%s3521_s6 + $0x20] sm:$0xf] }
 0x2fa   : > { %724 = vrot.lane.b32.xlu1 %v716_v33, %s3045_s22 }
 0x2fe   : > { %720 = vrot.lane.b32.xlu1 %v714_v35, %s3045_s22 }
 0x368   : > { %v723_v36 = vpop.permute.xlu1 %722 }
 0x36c   : > { %v725_v37 = vpop.permute.xlu1 %724 }
 0x36d   : > { %v728_v40 = vsel %vm726_vm5, %v723_v36, %v725_v37 }
 0x36e   : > { %v737_v41 = vsel %vm735_vm6, %v728_v40, 0 }
 0x370   : > { %v721_v38 = vpop.permute.xlu1 %720 }
 0x371   : > { %v727_v39 = vsel %vm726_vm5, %v721_v38, %v723_v36  ;;  %v733_v42 = vsel %vm726_vm5, 0, %v721_v38 }
 0x372   : > { %1122 = vrot.lane.b32.xlu0 %v727_v39, %s3046_s23  ;;  %743 = vrot.lane.b32.xlu1 %v727_v39, %s3047_s24 }
 0x376   : > { %1120 = vrot.lane.b32.xlu0 %v733_v42, %s3046_s23  ;;  %745 = vrot.lane.b32.xlu1 %v737_v41, %s3047_s24 }
 0x37a   : > { %1223 = vrot.lane.b32.xlu0 %v737_v41, %s3048_s25  ;;  %741 = vrot.lane.b32.xlu1 %v733_v42, %s3047_s24 }
 0x37e   : > { %1320 = vrot.lane.b32.xlu0 %v727_v39, %s3049_s26  ;;  %924 = vrot.lane.b32.xlu1 %v727_v39, %s3050_s27 }
 0x382   : > { %1318 = vrot.lane.b32.xlu0 %v733_v42, %s3049_s26  ;;  %922 = vrot.lane.b32.xlu1 %v733_v42, %s3050_s27 }
 0x386   : > { %1421 = vrot.lane.b32.xlu0 %v737_v41, %s3051_s28  ;;  %926 = vrot.lane.b32.xlu1 %v737_v41, %s3050_s27 }
 0x38a   : > { %1518 = vrot.lane.b32.xlu0 %v727_v39, %s3052_s29  ;;  %1023 = vrot.lane.b32.xlu1 %v727_v39, %s3053_s30 }
 0x38e   : > { %1516 = vrot.lane.b32.xlu0 %v733_v42, %s3052_s29  ;;  %1025 = vrot.lane.b32.xlu1 %v737_v41, %s3053_s30 }
 0x392   : > { %1021 = vrot.lane.b32.xlu1 %v733_v42, %s3053_s30 }
 0x396   : > { %1124 = vrot.lane.b32.xlu1 %v737_v41, %s3046_s23 }
 0x39a   : > { %1221 = vrot.lane.b32.xlu1 %v727_v39, %s3048_s25 }
 0x39e   : > { %1219 = vrot.lane.b32.xlu1 %v733_v42, %s3048_s25 }
 0x3a2   : > { %1322 = vrot.lane.b32.xlu1 %v737_v41, %s3049_s26 }
 0x3a6   : > { %1419 = vrot.lane.b32.xlu1 %v727_v39, %s3051_s28 }
 0x3aa   : > { %1417 = vrot.lane.b32.xlu1 %v733_v42, %s3051_s28 }
 0x3ae   : > { %1520 = vrot.lane.b32.xlu1 %v737_v41, %s3052_s29 }
 0x3b2   : > { %1617 = vperm.xlu1 %3025, %v711_v43  }
 0x3e4   : > { %v744_v44 = vpop.permute.xlu1 %743  ;;  %v1123_v56 = vpop.permute.xlu0 %1122 }
 0x3e8   : > { %v746_v45 = vpop.permute.xlu1 %745  ;;  %v1121_v59 = vpop.permute.xlu0 %1120 }
 0x3e9   : > { %2896 = vmatpush3.bf16.msra.mxu1 %v746_v45  ;;  %v749_v46 = vsel %vm747_vm7, %v744_v44, %v746_v45  ;;  %v1127_v5 = vsel %vm1126_vm12, %v1121_v59, %v1123_v56 }
 0x3ea   : > { %757 = vmatprep.subr.bf16.mxu0 %v749_v46  ;;  %2901 = vmatprep.subr.bf16.mxu1 %v3042_v6 }
 0x3ec   : > { %2898 = vmatmul.mubr.msk.bf16.vlgmr.msra.gmra.mrb[4].mxu1 %vm753_vm8, %v703_v47  ;;  %v742_v48 = vpop.permute.xlu1 %741  ;;  %v1224_v1 = vpop.permute.xlu0 %1223 }
 0x3ed   : > { %v748_v49 = vsel %vm747_vm7, %v742_v48, %v744_v44  ;;  %2902 = vmatpush3.bf16.msra.mxu1 %v737_v41  ;;  %2903 = vmatprep.mubr.msk.bf16.mxu1 %vm3043_vm1, %v3042_v6 }
 0x3ee   : > { %758 = vmatpush1.bf16.msra.mxu0 %v748_v49  ;;  %2907 = vmatprep.subr.bf16.mxu1 %v3042_v6 }
 0x3ef   : > { %841 = vmatprep.subr.bf16.mxu0 %v727_v39 }
 0x3f0   : > { %v925_v50 = vpop.permute.xlu1 %924  ;;  %v1321_v7 = vpop.permute.xlu0 %1320 }
 0x3f1   : > { %2796 = vmatmul.mubr.msk.bf16.vlgmr.msra.gmra.mrb[4].mxu0 %vm753_vm8, %v703_v47 }
 0x3f2   : > { %2799 = vmatpush1.bf16.msk.msra.mxu0 %vm2798_vm9, %v721_v38  ;;  %873 = vmatprep.mubr.bf16.mxu0 %v3044_v16 }
 0x3f4   : > { %2904 = vmatmul.mubr.msk.bf16.vlgmr.msra.gmra.mrb[8].mxu1 %vm753_vm8, %v702_v51  ;;  %v923_v52 = vpop.permute.xlu1 %922  ;;  %v1319_v13 = vpop.permute.xlu0 %1318 }
 0x3f5   : > { %2909 = vmatprep.mubr.msk.bf16.mxu1 %vm3043_vm1, %v3042_v6  ;;  %v929_v57 = vsel %vm928_vm10, %v923_v52, %v925_v50  ;;  %v1325_v19 = vsel %vm1324_vm14, %v1319_v13, %v1321_v7 }
 0x3f8   : > { %v927_v53 = vpop.permute.xlu1 %926  ;;  %v1422_v17 = vpop.permute.xlu0 %1421 }
 0x3f9   : > { %2800 = vmatmul.mubr.msk.bf16.vlgmr.msra.gmra.mrb[8].mxu0 %vm753_vm8, %v702_v51  ;;  %2908 = vmatpush3.bf16.msra.mxu1 %v927_v53  ;;  %v930_v54 = vsel %vm928_vm10, %v925_v50, %v927_v53 }
 0x3fa   : > { %937 = vmatprep.subr.bf16.mxu0 %v930_v54  ;;  %969 = vmatprep.mubr.bf16.mxu0 %v3044_v16 }
 0x3fb   : > { %938 = vmatpush1.bf16.msra.mxu0 %v929_v57  ;;  %2913 = vmatprep.subr.bf16.mxu1 %v3042_v6 }
 0x3fc   : > { %2910 = vmatmul.mubr.msk.bf16.vlgmr.msra.gmra.mrb[12].mxu1 %vm753_vm8, %v704_v55  ;;  %v1024_v58 = vpop.permute.xlu1 %1023  ;;  %v1519_v23 = vpop.permute.xlu0 %1518 }
 0x3fd   : > { %2915 = vmatprep.mubr.msk.bf16.mxu1 %vm3043_vm1, %v3042_v6 }
 0x400   : > { %v1026_v60 = vpop.permute.xlu1 %1025  ;;  %v1517_v28 = vpop.permute.xlu0 %1516 }
 0x401   : > { %2802 = vmatmul.mubr.msk.bf16.vlgmr.msra.gmra.mrb[12].mxu0 %vm753_vm8, %v704_v55  ;;  %2914 = vmatpush3.bf16.msra.mxu1 %v1026_v60  ;;  %v1029_v61 = vsel %vm1027_vm11, %v1024_v58, %v1026_v60  ;;  %v1523_v29 = vsel %vm1522_vm3, %v1517_v28, %v1519_v23 }
 0x402   : > { %1036 = vmatprep.subr.bf16.mxu0 %v1029_v61  ;;  %1068 = vmatprep.mubr.bf16.mxu0 %v3044_v16 }
 0x403   : > { %2919 = vmatprep.subr.bf16.mxu1 %v3042_v6 }
 0x404   : > { %2916 = vmatmul.mubr.msk.bf16.vlgmr.msra.gmra.mrb[16].mxu1 %vm753_vm8, %v705_v62  ;;  %v1022_v63 = vpop.permute.xlu1 %1021 }
 0x405   : > { %v1028_v0 = vsel %vm1027_vm11, %v1022_v63, %v1024_v58  ;;  %2921 = vmatprep.mubr.msk.bf16.mxu1 %vm3043_vm1, %v3042_v6 }
 0x406   : > { %1037 = vmatpush1.bf16.msra.mxu0 %v1028_v0 }
 0x408   : > { %v1125_v2 = vpop.permute.xlu1 %1124 }
 0x409   : > { %2804 = vmatmul.mubr.msk.bf16.vlgmr.msra.gmra.mrb[16].mxu0 %vm753_vm8, %v705_v62  ;;  %2920 = vmatpush3.bf16.msra.mxu1 %v1125_v2  ;;  %v1128_v3 = vsel %vm1126_vm12, %v1123_v56, %v1125_v2 }
 0x40a   : > { %1135 = vmatprep.subr.bf16.mxu0 %v1128_v3  ;;  %2925 = vmatprep.subr.bf16.mxu1 %v3042_v6 }
 0x40b   : > { %1136 = vmatpush1.bf16.msra.mxu0 %v1127_v5  ;;  %1167 = vmatprep.mubr.bf16.mxu0 %v3044_v16 }
 0x40c   : > { %2922 = vmatmul.mubr.msk.bf16.vlgmr.msra.gmra.mrb[20].mxu1 %vm753_vm8, %v706_v4  ;;  %v1222_v8 = vpop.permute.xlu1 %1221 }
 0x40d   : > { %2926 = vmatpush3.bf16.msra.mxu1 %v1224_v1  ;;  %v1227_v9 = vsel %vm1225_vm13, %v1222_v8, %v1224_v1  ;;  %2927 = vmatprep.mubr.msk.bf16.mxu1 %vm3043_vm1, %v3042_v6 }
 0x40e   : > { %1234 = vmatprep.subr.bf16.mxu0 %v1227_v9  ;;  %2931 = vmatprep.subr.bf16.mxu1 %v3042_v6 }
 0x410   : > { %v1220_v10 = vpop.permute.xlu1 %1219 }
 0x411   : > { %v1226_v11 = vsel %vm1225_vm13, %v1220_v10, %v1222_v8  ;;  %2806 = vmatmul.mubr.msk.bf16.vlgmr.msra.gmra.mrb[20].mxu0 %vm753_vm8, %v706_v4 }
 0x412   : > { %1235 = vmatpush1.bf16.msra.mxu0 %v1226_v11  ;;  %1266 = vmatprep.mubr.bf16.mxu0 %v3044_v16 }
 0x414   : > { %2928 = vmatmul.mubr.msk.bf16.vlgmr.msra.gmra.mrb[24].mxu1 %vm753_vm8, %v707_v12  ;;  %v1323_v14 = vpop.permute.xlu1 %1322 }
 0x415   : > { %2932 = vmatpush3.bf16.msra.mxu1 %v1323_v14  ;;  %v1326_v15 = vsel %vm1324_vm14, %v1321_v7, %v1323_v14  ;;  %2933 = vmatprep.mubr.msk.bf16.mxu1 %vm3043_vm1, %v3042_v6 }
 0x416   : > { %1333 = vmatprep.subr.bf16.mxu0 %v1326_v15  ;;  %2937 = vmatprep.subr.bf16.mxu1 %v3042_v6 }
 0x418   : > { %v1420_v18 = vpop.permute.xlu1 %1419 }
 0x419   : > { %2808 = vmatmul.mubr.msk.bf16.vlgmr.msra.gmra.mrb[24].mxu0 %vm753_vm8, %v707_v12  ;;  %v1425_v20 = vsel %vm1423_vm15, %v1420_v18, %v1422_v17 }
 0x41a   : > { %1334 = vmatpush1.bf16.msra.mxu0 %v1325_v19  ;;  %1365 = vmatprep.mubr.bf16.mxu0 %v3044_v16 }
 0x41b   : > { %1432 = vmatprep.subr.bf16.mxu0 %v1425_v20 }
 0x41c   : > { %2934 = vmatmul.mubr.msk.bf16.vlgmr.msra.gmra.mrb[28].mxu1 %vm753_vm8, %v708_v21  ;;  %v1418_v22 = vpop.permute.xlu1 %1417 }
 0x41d   : > { %2938 = vmatpush3.bf16.msra.mxu1 %v1422_v17  ;;  %2939 = vmatprep.mubr.msk.bf16.mxu1 %vm3043_vm1, %v3042_v6  ;;  %v1424_v25 = vsel %vm1423_vm15, %v1418_v22, %v1420_v18 }
 0x41e   : > { %2943 = vmatprep.subr.bf16.mxu1 %v3042_v6 }
 0x420   : > { %v1521_v24 = vpop.permute.xlu1 %1520 }
 0x421   : > { %2810 = vmatmul.mubr.msk.bf16.vlgmr.msra.gmra.mrb[28].mxu0 %vm753_vm8, %v708_v21  ;;  %v1524_v26 = vsel %vm1522_vm3, %v1519_v23, %v1521_v24 }
 0x422   : > { %1433 = vmatpush1.bf16.msra.mxu0 %v1424_v25  ;;  %1464 = vmatprep.mubr.bf16.mxu0 %v3044_v16 }
 0x423   : > { %1531 = vmatprep.subr.bf16.mxu0 %v1524_v26 }
 0x424   : > { %2940 = vmatmul.mubr.msk.bf16.vlgmr.msra.gmra.mrb[32].mxu1 %vm753_vm8, %v709_v27 }
 0x425   : > { %2944 = vmatpush3.bf16.msra.mxu1 %v1521_v24  ;;  %2945 = vmatprep.mubr.msk.bf16.mxu1 %vm3043_vm1, %v3042_v6 }
 0x426   : > { %2949 = vmatprep.subr.bf16.mxu1 %v3042_v6 }
 0x429   : > { %2812 = vmatmul.mubr.msk.bf16.vlgmr.msra.gmra.mrb[32].mxu0 %vm753_vm8, %v709_v27 }
 0x42a   : > { %1532 = vmatpush1.bf16.msra.mxu0 %v1523_v29  ;;  %1563 = vmatprep.mubr.bf16.mxu0 %v3044_v16 }
 0x42c   : > { %2946 = vmatmul.mubr.msk.bf16.vlgmr.msra.gmra.mrb[36].mxu1 %vm753_vm8, %v710_v30 }
 0x42d   : > { %2951 = vmatprep.mubr.msk.bf16.mxu1 %vm3043_vm1, %v3042_v6 }
 0x431   : > { %2814 = vmatmul.mubr.msk.bf16.vlgmr.msra.gmra.mrb[36].mxu0 %vm753_vm8, %v710_v30 }
 0x432   : > { %1781 = vmatprep.mubr.bf16.mxu0 %v3044_v16 }
 0x4bf   : > { %v832_v31 = vpop.f32.mrb[4].mxu1 }
 0x4c0   : > { %v2899_v32 = vpop.f32.mrb[5].mxu1 }
 0x4c1   : > { %v835_v33 = vpop.f32.mrb[6].mxu1 }
 0x4c2   : > { %v2900_v34 = vpop.f32.mrb[7].mxu1 }
 0x4c4   : > { %v791_v35 = vpop.f32.mrb[4].mxu0 }
 0x4c5   : > { %v793_v36 = vpop.f32.mrb[5].mxu0 }
 0x4c6   : > { %v795_v37 = vpop.f32.mrb[6].mxu0 }
 0x4c7   : > { %v796_v38 = vpop.f32.mrb[7].mxu0  ;;  %v916_v39 = vpop.f32.mrb[8].mxu1 }
 0x4c8   : > { %v917_v40 = vadd.f32 %v916_v39, %v832_v31  ;;  %v2905_v41 = vpop.f32.mrb[9].mxu1 }
 0x4c9   : > { %v919_v42 = vpop.f32.mrb[10].mxu1 }
 0x4ca   : > { %v2906_v43 = vpop.f32.mrb[11].mxu1 }
 0x4cc   : > { %v875_v44 = vpop.f32.mrb[8].mxu0 }
 0x4cd   : > { %v876_v45 = vadd.f32 %v875_v44, %v791_v35  ;;  %v877_v46 = vpop.f32.mrb[9].mxu0 }
 0x4ce   : > { %v878_v47 = vadd.f32 %v877_v46, %v793_v36  ;;  %v879_v48 = vpop.f32.mrb[10].mxu0 }
 0x4cf   : > { %v880_v49 = vpop.f32.mrb[11].mxu0  ;;  %v1012_v50 = vpop.f32.mrb[12].mxu1 }
 0x4d0   : > { %v1020_v51 = vadd.f32 %v1012_v50, %v917_v40  ;;  %v2911_v52 = vpop.f32.mrb[13].mxu1 }
 0x4d1   : > { %v1015_v53 = vpop.f32.mrb[14].mxu1 }
 0x4d2   : > { %v2912_v54 = vpop.f32.mrb[15].mxu1 }
 0x4d4   : > { %v971_v55 = vpop.f32.mrb[12].mxu0 }
 0x4d5   : > { %v1018_v56 = vadd.f32 %v971_v55, %v876_v45  ;;  %v973_v57 = vpop.f32.mrb[13].mxu0 }
 0x4d6   : > { %v1019_v58 = vadd.f32 %v973_v57, %v878_v47  ;;  %v975_v59 = vpop.f32.mrb[14].mxu0  ;;  %v1624_v47 = vlaneseq }
 0x4d7   : > { %v976_v60 = vpop.f32.mrb[15].mxu0  ;;  %v1111_v61 = vpop.f32.mrb[16].mxu1 }
 0x4d8   : > { %v1119_v62 = vadd.f32 %v1111_v61, %v1020_v51  ;;  %v2917_v63 = vpop.f32.mrb[17].mxu1  ;;  %v1625_v52 = vshrl.u32 %v1624_v47, 7 }
 0x4d9   : > { %v1114_v0 = vpop.f32.mrb[18].mxu1  ;;  %v516_v63 = vld [vmem:[%s3529_s14] sm:$0x7] }
 0x4da   : > { %v2918_v1 = vpop.f32.mrb[19].mxu1  ;;  %v1626_v59 = vsub.s32 0, %v1625_v52  ;;  %v1634_v61 = vsub.s32 2, %v1625_v52  ;;  %v1630_v0 = vsub.s32 1, %v1625_v52 }
 0x4dc   : > { %v1070_v2 = vpop.f32.mrb[16].mxu0 }
 0x4dd   : > { %v1117_v3 = vadd.f32 %v1070_v2, %v1018_v56  ;;  %v1072_v4 = vpop.f32.mrb[17].mxu0 }
 0x4de   : > { %v1118_v5 = vadd.f32 %v1072_v4, %v1019_v58  ;;  %v1074_v7 = vpop.f32.mrb[18].mxu0 }
 0x4df   : > { %v1075_v8 = vpop.f32.mrb[19].mxu0  ;;  %v1210_v9 = vpop.f32.mrb[20].mxu1 }
 0x4e0   : > { %v1218_v10 = vadd.f32 %v1210_v9, %v1119_v62  ;;  %v2923_v11 = vpop.f32.mrb[21].mxu1  ;;  %v1618_v62 = vpop.permute.xlu1 %1617  ;;  %v3315_v8 = vrot.slane %v516_v63, %v1634_v61 }
 0x4e1   : > { %v1213_v12 = vpop.f32.mrb[22].mxu1 }
 0x4e2   : > { %v2924_v13 = vpop.f32.mrb[23].mxu1 }
 0x4e4   : > { %v1169_v14 = vpop.f32.mrb[20].mxu0 }
 0x4e5   : > { %v1216_v15 = vadd.f32 %v1169_v14, %v1117_v3  ;;  %v1171_v17 = vpop.f32.mrb[21].mxu0 }
 0x4e6   : > { %v1217_v18 = vadd.f32 %v1171_v17, %v1118_v5  ;;  %v1173_v19 = vpop.f32.mrb[22].mxu0  ;;  %v3313_v5 = vrot.slane %v516_v63, %v1626_v59 }
 0x4e7   : > { %v1174_v20 = vpop.f32.mrb[23].mxu0  ;;  %v1309_v21 = vpop.f32.mrb[24].mxu1 }
 0x4e8   : > { %v1317_v22 = vadd.f32 %v1309_v21, %v1218_v10  ;;  %v2929_v23 = vpop.f32.mrb[25].mxu1  ;;  %v3317_v10 = vrot.slane %v516_v63, %v1630_v0 }
 0x4e9   : > { %v1312_v24 = vpop.f32.mrb[26].mxu1 }
 0x4ea   : > { %v2930_v25 = vpop.f32.mrb[27].mxu1 }
 0x4ec   : > { %v1268_v26 = vpop.f32.mrb[24].mxu0 }
 0x4ed   : > { %v1315_v27 = vadd.f32 %v1268_v26, %v1216_v15  ;;  %v1270_v28 = vpop.f32.mrb[25].mxu0 }
 0x4ee   : > { %v1316_v29 = vadd.f32 %v1270_v28, %v1217_v18  ;;  %v1272_v30 = vpop.f32.mrb[26].mxu0 }
 0x4ef   : > { %v1273_v31 = vpop.f32.mrb[27].mxu0  ;;  %v1408_v32 = vpop.f32.mrb[28].mxu1 }
 0x4f0   : > { %v1416_v33 = vadd.f32 %v1408_v32, %v1317_v22  ;;  %v2935_v34 = vpop.f32.mrb[29].mxu1  ;;  %v712_v22 = vld [vmem:[%s3523_s8] sm:$0xff] }
 0x4f1   : > { %v1411_v35 = vpop.f32.mrb[30].mxu1 }
 0x4f2   : > { %v2936_v36 = vpop.f32.mrb[31].mxu1 }
 0x4f4   : > { %v1367_v37 = vpop.f32.mrb[28].mxu0 }
 0x4f5   : > { %v1414_v38 = vadd.f32 %v1367_v37, %v1315_v27  ;;  %v1369_v39 = vpop.f32.mrb[29].mxu0  ;;  %v713_v37 = vld [vmem:[%s3524_s9] sm:$0xff] }
 0x4f6   : > { %v1415_v40 = vadd.f32 %v1369_v39, %v1316_v29  ;;  %v1371_v41 = vpop.f32.mrb[30].mxu0 }
 0x4f7   : > { %v1372_v42 = vpop.f32.mrb[31].mxu0  ;;  %v1507_v43 = vpop.f32.mrb[32].mxu1 }
 0x4f8   : > { %v1515_v44 = vadd.f32 %v1507_v43, %v1416_v33  ;;  %v2941_v45 = vpop.f32.mrb[33].mxu1 }
 0x4f9   : > { %v1510_v46 = vpop.f32.mrb[34].mxu1 }
 0x4fa   : > { %v2942_v48 = vpop.f32.mrb[35].mxu1 }
 0x4fc   : > { %v1466_v49 = vpop.f32.mrb[32].mxu0 }
 0x4fd   : > { %v1513_v50 = vadd.f32 %v1466_v49, %v1414_v38  ;;  %v1468_v51 = vpop.f32.mrb[33].mxu0 }
 0x4fe   : > { %v1514_v53 = vadd.f32 %v1468_v51, %v1415_v40  ;;  %v1470_v54 = vpop.f32.mrb[34].mxu0 }
 0x4ff   : > { %v1471_v55 = vpop.f32.mrb[35].mxu0  ;;  %v1606_v56 = vpop.f32.mrb[36].mxu1 }
 0x500   : > { %v1614_v57 = vadd.f32 %v1606_v56, %v1515_v44  ;;  %v2947_v58 = vpop.f32.mrb[37].mxu1 }
 0x501   : > { %v1609_v60 = vpop.f32.mrb[38].mxu1 }
 0x502   : > { %v2948_v1 = vpop.f32.mrb[39].mxu1  ;;  %v1622_v3 = vadd.f32 %v1618_v62, %v1614_v57 }
 0x504   : > { %v1565_v2 = vpop.f32.mrb[36].mxu0  ;;  %v1641_v17 = vmul.f32 %v3315_v8, %v1622_v3 }
 0x505   : > { %v1612_v4 = vadd.f32 %v1565_v2, %v1513_v50  ;;  %v1567_v7 = vpop.f32.mrb[37].mxu0 }
 0x506   : > { %v1613_v9 = vadd.f32 %v1567_v7, %v1514_v53  ;;  %v1569_v11 = vpop.f32.mrb[38].mxu0  ;;  %v1643_v20 = vsel %vm524_vm0, %v1641_v17, 0.0 }
 0x507   : > { %v1620_v12 = vadd.f32 %v1618_v62, %v1612_v4  ;;  %v1570_v13 = vpop.f32.mrb[39].mxu0 }
 0x508   : > { %v1621_v14 = vadd.f32 %v1618_v62, %v1613_v9 }
 0x509   : > { %v1639_v15 = vmul.f32 %v3313_v5, %v1620_v12 }
 0x50a   : > { %v1640_v18 = vmul.f32 %v3317_v10, %v1621_v14 }
 0x50c   : > { %v1642_v19 = vadd.f32 %v1640_v18, %v1639_v15 }
 0x50e   : > { %v1644_v21 = vadd.f32 %v1643_v20, %v1642_v19 }
 0x510   : > { %1645 = vadd.xlane.f32.xlu0 %v1644_v21 }
 0x526   : > { %1670 = vperm.xlu0 %3024, %v712_v22   ;;  %v1697_v22 = vld [vmem:[%s3525_s10 + $0x4] sm:$0xf] }
 0x59d   : > { %v1646_v23 = vpop.xlane.xlu0 %1645 }
 0x59e   : > { %v1647_v24 = vmul.f32 0.00390625, %v1646_v23 }
 0x5a0   : > { %v1648_v25 = vsub.f32 %v1620_v12, %v1647_v24  ;;  %v1649_v26 = vsub.f32 %v1621_v14, %v1647_v24  ;;  %v1650_v27 = vsub.f32 %v1622_v3, %v1647_v24  ;;  %v1705_v12 = vld [vmem:[%s3526_s11] sm:$0xff] }
 0x5a2   : > { %v1651_v28 = vmul.f32 %v1648_v25, %v3313_v5  ;;  %v1652_v29 = vmul.f32 %v1649_v26, %v3317_v10  ;;  %v1653_v30 = vmul.f32 %v1650_v27, %v3315_v8 }
 0x5a4   : > { %v1654_v31 = vmul.f32 %v1651_v28, %v1651_v28  ;;  %v1655_v32 = vmul.f32 %v1652_v29, %v1652_v29  ;;  %v1656_v33 = vmul.f32 %v1653_v30, %v1653_v30  ;;  %v1696_v30 = vld [vmem:[%s3525_s10] sm:$0xf] }
 0x5a5   : > { %v1671_v45 = vpop.permute.xlu0 %1670 }
 0x5a6   : > { %v1657_v34 = vadd.f32 %v1655_v32, %v1654_v31  ;;  %v1658_v35 = vsel %vm524_vm0, %v1656_v33, 0.0 }
 0x5a8   : > { %v1659_v36 = vadd.f32 %v1658_v35, %v1657_v34 }
 0x5aa   : > { %1660 = vadd.xlane.f32.xlu1 %v1659_v36 }
 0x5bb   : > { %1678 = vperm.xlu1 %3025, %v713_v37  }
 0x637   : > { %v1661_v38 = vpop.xlane.xlu1 %1660 }
 0x638   : > { %v1662_v39 = vmul.f32 0.00390625, %v1661_v38 }
 0x63a   : > { %v1663_v40 = vadd.f32 1e-05, %v1662_v39  ;;  %v1698_v39 = vld [vmem:[%s3525_s10 + $0x8] sm:$0xf] }
 0x63b   : > { %v1679_v49 = vpop.permute.xlu1 %1678 }
 0x63c   : > { %3030 = vrsqrt.f32 %v1663_v40 }
 0x646   : > { %v3031_v41 = vpop.eup %3030 }
 0x647   : > { %v1665_v42 = vmul.f32 %v3031_v41, %v1648_v25  ;;  %v1666_v43 = vmul.f32 %v3031_v41, %v1649_v26  ;;  %v1667_v44 = vmul.f32 %v3031_v41, %v1650_v27 }
 0x649   : > { %v1673_v46 = vmul.f32 %v1671_v45, %v1665_v42  ;;  %v1674_v47 = vmul.f32 %v1671_v45, %v1666_v43  ;;  %v1675_v48 = vmul.f32 %v1671_v45, %v1667_v44 }
 0x64b   : > { %v1681_v50 = vadd.f32 %v1679_v49, %v1673_v46  ;;  %v1682_v51 = vadd.f32 %v1679_v49, %v1674_v47  ;;  %v1683_v52 = vadd.f32 %v1679_v49, %v1675_v48  ;;  %v1699_v47 = vld [vmem:[%s3525_s10 + $0xc] sm:$0xf] }
 0x64d   : > { %v1687_v53 = vmul.f32 0.01, %v1681_v50  ;;  %v1688_v54 = vmul.f32 0.01, %v1682_v51  ;;  %v1689_v55 = vmul.f32 0.01, %v1683_v52 }
 0x64e   : > { %vm1686_vm4 = vcmp.ge.f32.partialorder %v1683_v52, 0.0  ;;  %vm1685_vm8 = vcmp.ge.f32.partialorder %v1682_v51, 0.0  ;;  %vm1684_vm9 = vcmp.ge.f32.partialorder %v1681_v50, 0.0 }
 0x64f   : > { %v1692_v56 = vsel %vm1686_vm4, %v1683_v52, %v1689_v55  ;;  %v1691_v57 = vsel %vm1685_vm8, %v1682_v51, %v1688_v54  ;;  %v1690_v58 = vsel %vm1684_vm9, %v1681_v50, %v1687_v53  ;;  %v1700_v55 = vld [vmem:[%s3525_s10 + $0x10] sm:$0xf] }
 0x650   : > { %v1695_v59 = vmul.f32 %v1692_v56, %v3315_v8  ;;  %v1694_v60 = vmul.f32 %v1691_v57, %v3317_v10  ;;  %v1693_v63 = vmul.f32 %v1690_v58, %v3313_v5 }
 0x652   : > { %v1710_v61 = vpack.c.bf16 %v1695_v59, %v1695_v59  ;;  %v1709_v62 = vpack.c.bf16 %v1694_v60, %v1694_v60  ;;  %v1708_v0 = vpack.c.bf16 %v1693_v63, %v1693_v63 }
 0x654   : > { %1718 = vrot.lane.b32.xlu1 %v1710_v61, %s3045_s22  ;;  %1716 = vrot.lane.b32.xlu0 %v1709_v62, %s3045_s22  ;;  %v1701_v62 = vld [vmem:[%s3525_s10 + $0x14] sm:$0xf] }
 0x658   : > { %1714 = vrot.lane.b32.xlu0 %v1708_v0, %s3045_s22  ;;  %s514_s22 = scalar_lea.vmem %s3530_s15, %s3142_s20 }
 0x6c6   : > { %v1717_v1 = vpop.permute.xlu0 %1716  ;;  %v1719_v2 = vpop.permute.xlu1 %1718 }
 0x6c7   : > { %v1721_v9 = vsel %vm726_vm5, %v1717_v1, %v1719_v2 }
 0x6c8   : > { %v1725_v11 = vsel %vm735_vm6, %v1721_v9, 0 }
 0x6ca   : > { %v1715_v3 = vpop.permute.xlu0 %1714 }
 0x6cb   : > { %v1720_v4 = vsel %vm726_vm5, %v1715_v3, %v1717_v1  ;;  %v1723_v7 = vsel %vm726_vm5, 0, %v1715_v3  ;;  %vm1739_vm5 = vcmask 1043456  }
 0x6cc   : > { %1728 = vrot.lane.b32.xlu1 %v1723_v7, %s3047_s24  ;;  %1730 = vrot.lane.b32.xlu0 %v1720_v4, %s3047_s24  ;;  %v1838_v25 = vsel %vm1739_vm5, %v1725_v11, 0  ;;  %v1833_v26 = vsel %vm1739_vm5, %v1723_v7, 0 }
 0x6d0   : > { %1732 = vrot.lane.b32.xlu1 %v1725_v11, %s3047_s24  ;;  %1921 = vrot.lane.b32.xlu0 %v1723_v7, %s3050_s27 }
 0x6d4   : > { %1923 = vrot.lane.b32.xlu1 %v1720_v4, %s3050_s27  ;;  %1925 = vrot.lane.b32.xlu0 %v1725_v11, %s3050_s27 }
 0x6d8   : > { %2025 = vrot.lane.b32.xlu1 %v1723_v7, %s3053_s30  ;;  %2027 = vrot.lane.b32.xlu0 %v1720_v4, %s3053_s30 }
 0x6dc   : > { %2029 = vrot.lane.b32.xlu1 %v1725_v11, %s3053_s30  ;;  %2129 = vrot.lane.b32.xlu0 %v1723_v7, %s3046_s23 }
 0x6e0   : > { %2131 = vrot.lane.b32.xlu1 %v1720_v4, %s3046_s23  ;;  %2133 = vrot.lane.b32.xlu0 %v1725_v11, %s3046_s23 }
 0x6e4   : > { %2233 = vrot.lane.b32.xlu1 %v1723_v7, %s3048_s25  ;;  %2235 = vrot.lane.b32.xlu0 %v1720_v4, %s3048_s25 }
 0x6e8   : > { %2237 = vrot.lane.b32.xlu1 %v1725_v11, %s3048_s25  ;;  %2337 = vrot.lane.b32.xlu0 %v1723_v7, %s3049_s26 }
 0x6ec   : > { %2339 = vrot.lane.b32.xlu1 %v1720_v4, %s3049_s26  ;;  %2341 = vrot.lane.b32.xlu0 %v1725_v11, %s3049_s26 }
 0x6f0   : > { %2441 = vrot.lane.b32.xlu1 %v1723_v7, %s3051_s28  ;;  %2443 = vrot.lane.b32.xlu0 %v1720_v4, %s3051_s28 }
 0x6f4   : > { %2445 = vrot.lane.b32.xlu1 %v1725_v11, %s3051_s28  ;;  %2545 = vrot.lane.b32.xlu0 %v1723_v7, %s3052_s29  ;;  %v1702_v7 = vld [vmem:[%s3525_s10 + $0x18] sm:$0xf] }
 0x6f8   : > { %2547 = vrot.lane.b32.xlu1 %v1720_v4, %s3052_s29  ;;  %2549 = vrot.lane.b32.xlu0 %v1725_v11, %s3052_s29 }
 0x6fc   : > { %2651 = vperm.xlu1 %3025, %v1705_v12  }
 0x73e   : > { %v1729_v13 = vpop.permute.xlu1 %1728  ;;  %v1731_v14 = vpop.permute.xlu0 %1730 }
 0x73f   : > { %v1734_v15 = vsel %vm747_vm7, %v1729_v13, %v1731_v14 }
 0x740   : > { %v1741_v21 = vsel %vm1739_vm5, %v1734_v15, 0 }
 0x742   : > { %v1733_v17 = vpop.permute.xlu1 %1732  ;;  %v1922_v18 = vpop.permute.xlu0 %1921 }
 0x743   : > { %v1735_v19 = vsel %vm747_vm7, %v1731_v14, %v1733_v17  ;;  %v1747_v20 = vsel %vm1739_vm5, %v1733_v17, 0  ;;  %v1703_v17 = vld [vmem:[%s3525_s10 + $0x1c] sm:$0xf] }
 0x744   : > { %2816 = vmatprep.subr.msk.bf16.mxu0 %vm1739_vm5, %v1735_v19  ;;  %2950 = vmatpush3.bf16.msra.mxu1 %v1747_v20 }
 0x745   : > { %1750 = vmatpush1.bf16.msra.mxu0 %v1741_v21  ;;  %2955 = vmatprep.subr.bf16.mxu1 %v3042_v6  ;;  %v1704_v21 = vld [vmem:[%s3525_s10 + $0x20] sm:$0xf] }
 0x746   : > { %v1924_v23 = vpop.permute.xlu1 %1923  ;;  %2819 = vmatprep.subr.msk.bf16.mxu0 %vm1739_vm5, %v1720_v4  ;;  %v1926_v24 = vpop.permute.xlu0 %1925 }
 0x747   : > { %2952 = vmatmul.mubr.msk.bf16.vlgmr.msra.gmra.mrb[40].mxu1 %vm532_vm2, %v1697_v22  ;;  %v1928_v27 = vsel %vm928_vm10, %v1924_v23, %v1926_v24  ;;  %v1927_v31 = vsel %vm928_vm10, %v1922_v18, %v1924_v23  ;;  %v1939_v34 = vsel %vm1739_vm5, %v1926_v24, 0 }
 0x748   : > { %2817 = vmatmul.mubr.msk.bf16.vlgmr.msra.gmra.mrb[40].mxu0 %vm532_vm2, %v1697_v22  ;;  %2956 = vmatpush3.bf16.msra.mxu1 %v1838_v25  ;;  %v1933_v36 = vsel %vm1739_vm5, %v1927_v31, 0 }
 0x749   : > { %1841 = vmatpush1.bf16.msra.mxu0 %v1833_v26  ;;  %2957 = vmatprep.mubr.msk.bf16.mxu1 %vm3043_vm1, %v3042_v6 }
 0x74a   : > { %v2026_v28 = vpop.permute.xlu1 %2025  ;;  %2822 = vmatprep.subr.msk.bf16.mxu0 %vm1739_vm5, %v1928_v27  ;;  %v2028_v29 = vpop.permute.xlu0 %2027  ;;  %2961 = vmatprep.subr.bf16.mxu1 %v3042_v6 }
 0x74b   : > { %1872 = vmatprep.mubr.bf16.mxu0 %v3044_v16  ;;  %v2031_v40 = vsel %vm1027_vm11, %v2026_v28, %v2028_v29 }
 0x74c   : > { %v2037_v43 = vsel %vm1739_vm5, %v2031_v40, 0 }
 0x74e   : > { %v2030_v32 = vpop.permute.xlu1 %2029  ;;  %v2130_v33 = vpop.permute.xlu0 %2129 }
 0x74f   : > { %v2032_v35 = vsel %vm1027_vm11, %v2028_v29, %v2030_v32  ;;  %2958 = vmatmul.mubr.msk.bf16.vlgmr.msra.gmra.mrb[44].mxu1 %vm532_vm2, %v1696_v30  ;;  %v2043_v42 = vsel %vm1739_vm5, %v2030_v32, 0 }
 0x750   : > { %2962 = vmatpush3.bf16.msra.mxu1 %v1939_v34  ;;  %2820 = vmatmul.mubr.msk.bf16.vlgmr.msra.gmra.mrb[44].mxu0 %vm532_vm2, %v1696_v30 }
 0x751   : > { %1942 = vmatpush1.bf16.msra.mxu0 %v1933_v36  ;;  %2963 = vmatprep.mubr.msk.bf16.mxu1 %vm3043_vm1, %v3042_v6 }
 0x752   : > { %2825 = vmatprep.subr.msk.bf16.mxu0 %vm1739_vm5, %v2032_v35  ;;  %v2132_v37 = vpop.permute.xlu1 %2131  ;;  %v2134_v38 = vpop.permute.xlu0 %2133  ;;  %2967 = vmatprep.subr.bf16.mxu1 %v3042_v6 }
 0x753   : > { %1973 = vmatprep.mubr.bf16.mxu0 %v3044_v16  ;;  %v2136_v45 = vsel %vm1126_vm12, %v2132_v37, %v2134_v38  ;;  %v2135_v48 = vsel %vm1126_vm12, %v2130_v33, %v2132_v37  ;;  %v2147_v50 = vsel %vm1739_vm5, %v2134_v38, 0 }
 0x754   : > { %v2141_v51 = vsel %vm1739_vm5, %v2135_v48, 0 }
 0x756   : > { %v2234_v41 = vpop.permute.xlu1 %2233  ;;  %v2236_v44 = vpop.permute.xlu0 %2235 }
 0x757   : > { %2964 = vmatmul.mubr.msk.bf16.vlgmr.msra.gmra.mrb[48].mxu1 %vm532_vm2, %v1698_v39  ;;  %v2239_v56 = vsel %vm1225_vm13, %v2234_v41, %v2236_v44 }
 0x758   : > { %2968 = vmatpush3.bf16.msra.mxu1 %v2043_v42  ;;  %2823 = vmatmul.mubr.msk.bf16.vlgmr.msra.gmra.mrb[48].mxu0 %vm532_vm2, %v1698_v39  ;;  %v2245_v58 = vsel %vm1739_vm5, %v2239_v56, 0 }
 0x759   : > { %2046 = vmatpush1.bf16.msra.mxu0 %v2037_v43  ;;  %2969 = vmatprep.mubr.msk.bf16.mxu1 %vm3043_vm1, %v3042_v6 }
 0x75a   : > { %2828 = vmatprep.subr.msk.bf16.mxu0 %vm1739_vm5, %v2136_v45  ;;  %2973 = vmatprep.subr.bf16.mxu1 %v3042_v6  ;;  %v2238_v46 = vpop.permute.xlu1 %2237  ;;  %v2338_v49 = vpop.permute.xlu0 %2337 }
 0x75b   : > { %2077 = vmatprep.mubr.bf16.mxu0 %v3044_v16  ;;  %v2240_v52 = vsel %vm1225_vm13, %v2236_v44, %v2238_v46  ;;  %v2251_v57 = vsel %vm1739_vm5, %v2238_v46, 0 }
 0x75e   : > { %v2340_v53 = vpop.permute.xlu1 %2339  ;;  %v2342_v54 = vpop.permute.xlu0 %2341 }
 0x75f   : > { %2970 = vmatmul.mubr.msk.bf16.vlgmr.msra.gmra.mrb[52].mxu1 %vm532_vm2, %v1699_v47  ;;  %v2344_v60 = vsel %vm1324_vm14, %v2340_v53, %v2342_v54  ;;  %v2343_v63 = vsel %vm1324_vm14, %v2338_v49, %v2340_v53  ;;  %v2355_v1 = vsel %vm1739_vm5, %v2342_v54, 0 }
 0x760   : > { %2974 = vmatpush3.bf16.msra.mxu1 %v2147_v50  ;;  %2826 = vmatmul.mubr.msk.bf16.vlgmr.msra.gmra.mrb[52].mxu0 %vm532_vm2, %v1699_v47  ;;  %v2349_v2 = vsel %vm1739_vm5, %v2343_v63, 0 }
 0x761   : > { %2150 = vmatpush1.bf16.msra.mxu0 %v2141_v51  ;;  %2975 = vmatprep.mubr.msk.bf16.mxu1 %vm3043_vm1, %v3042_v6 }
 0x762   : > { %2831 = vmatprep.subr.msk.bf16.mxu0 %vm1739_vm5, %v2240_v52  ;;  %2979 = vmatprep.subr.bf16.mxu1 %v3042_v6  ;;  %v2442_v59 = vpop.permute.xlu1 %2441  ;;  %v2444_v61 = vpop.permute.xlu0 %2443 }
 0x763   : > { %2181 = vmatprep.mubr.bf16.mxu0 %v3044_v16  ;;  %v2447_v9 = vsel %vm1423_vm15, %v2442_v59, %v2444_v61 }
 0x764   : > { %v2453_v14 = vsel %vm1739_vm5, %v2447_v9, 0 }
 0x766   : > { %v2446_v0 = vpop.permute.xlu1 %2445  ;;  %v2546_v3 = vpop.permute.xlu0 %2545 }
 0x767   : > { %2976 = vmatmul.mubr.msk.bf16.vlgmr.msra.gmra.mrb[56].mxu1 %vm532_vm2, %v1700_v55  ;;  %v2448_v4 = vsel %vm1423_vm15, %v2444_v61, %v2446_v0  ;;  %v2459_v13 = vsel %vm1739_vm5, %v2446_v0, 0 }
 0x768   : > { %2980 = vmatpush3.bf16.msra.mxu1 %v2251_v57  ;;  %2829 = vmatmul.mubr.msk.bf16.vlgmr.msra.gmra.mrb[56].mxu0 %vm532_vm2, %v1700_v55 }
 0x769   : > { %2254 = vmatpush1.bf16.msra.mxu0 %v2245_v58  ;;  %2981 = vmatprep.mubr.msk.bf16.mxu1 %vm3043_vm1, %v3042_v6 }
 0x76a   : > { %2834 = vmatprep.subr.msk.bf16.mxu0 %vm1739_vm5, %v2344_v60  ;;  %2985 = vmatprep.subr.bf16.mxu1 %v3042_v6  ;;  %v2548_v11 = vpop.permute.xlu1 %2547  ;;  %v2550_v12 = vpop.permute.xlu0 %2549 }
 0x76b   : > { %2285 = vmatprep.mubr.bf16.mxu0 %v3044_v16  ;;  %v2552_v15 = vsel %vm1522_vm3, %v2548_v11, %v2550_v12  ;;  %v2551_v18 = vsel %vm1522_vm3, %v2546_v3, %v2548_v11  ;;  %v2563_v19 = vsel %vm1739_vm5, %v2550_v12, 0 }
 0x76c   : > { %v2557_v20 = vsel %vm1739_vm5, %v2551_v18, 0 }
 0x76f   : > { %2982 = vmatmul.mubr.msk.bf16.vlgmr.msra.gmra.mrb[60].mxu1 %vm532_vm2, %v1701_v62 }
 0x770   : > { %2986 = vmatpush3.bf16.msra.mxu1 %v2355_v1  ;;  %2832 = vmatmul.mubr.msk.bf16.vlgmr.msra.gmra.mrb[60].mxu0 %vm532_vm2, %v1701_v62 }
 0x771   : > { %2358 = vmatpush1.bf16.msra.mxu0 %v2349_v2  ;;  %2987 = vmatprep.mubr.msk.bf16.mxu1 %vm3043_vm1, %v3042_v6 }
 0x772   : > { %2837 = vmatprep.subr.msk.bf16.mxu0 %vm1739_vm5, %v2448_v4  ;;  %2991 = vmatprep.subr.bf16.mxu1 %v3042_v6 }
 0x773   : > { %2389 = vmatprep.mubr.bf16.mxu0 %v3044_v16 }
 0x777   : > { %2988 = vmatmul.mubr.msk.bf16.vlgmr.msra.gmra.mrb[64].mxu1 %vm532_vm2, %v1702_v7 }
 0x778   : > { %2992 = vmatpush3.bf16.msra.mxu1 %v2459_v13  ;;  %2835 = vmatmul.mubr.msk.bf16.vlgmr.msra.gmra.mrb[64].mxu0 %vm532_vm2, %v1702_v7 }
 0x779   : > { %2462 = vmatpush1.bf16.msra.mxu0 %v2453_v14  ;;  %2993 = vmatprep.mubr.msk.bf16.mxu1 %vm3043_vm1, %v3042_v6 }
 0x77a   : > { %2840 = vmatprep.subr.msk.bf16.mxu0 %vm1739_vm5, %v2552_v15  ;;  %2997 = vmatprep.subr.bf16.mxu1 %v3042_v6 }
 0x77b   : > { %2493 = vmatprep.mubr.bf16.mxu0 %v3044_v16 }
 0x77f   : > { %2994 = vmatmul.mubr.msk.bf16.vlgmr.msra.gmra.mrb[68].mxu1 %vm532_vm2, %v1703_v17 }
 0x780   : > { %2998 = vmatpush3.bf16.msra.mxu1 %v2563_v19  ;;  %2838 = vmatmul.mubr.msk.bf16.vlgmr.msra.gmra.mrb[68].mxu0 %vm532_vm2, %v1703_v17 }
 0x781   : > { %2566 = vmatpush1.bf16.msra.mxu0 %v2557_v20  ;;  %2999 = vmatprep.mubr.msk.bf16.mxu1 %vm3043_vm1, %v3042_v6 }
 0x782   : > { %2597 = vmatprep.mubr.bf16.mxu0 %v3044_v16 }
 0x787   : > { %3000 = vmatmul.mubr.msk.bf16.vlgmr.msra.gmra.mrb[72].mxu1 %vm532_vm2, %v1704_v21 }
 0x788   : > { %2841 = vmatmul.mubr.msk.bf16.vlgmr.msra.gmra.mrb[72].mxu0 %vm532_vm2, %v1704_v21 }
 0x81a   : > { %v1824_v22 = vpop.f32.mrb[40].mxu1 }
 0x81b   : > { %v1783_v23 = vpop.f32.mrb[40].mxu0  ;;  %v2953_v24 = vpop.f32.mrb[41].mxu1 }
 0x81c   : > { %v1785_v25 = vpop.f32.mrb[41].mxu0  ;;  %v1827_v26 = vpop.f32.mrb[42].mxu1 }
 0x81d   : > { %v1787_v27 = vpop.f32.mrb[42].mxu0  ;;  %v2954_v28 = vpop.f32.mrb[43].mxu1 }
 0x81e   : > { %v1788_v29 = vpop.f32.mrb[43].mxu0 }
 0x822   : > { %v1915_v30 = vpop.f32.mrb[44].mxu1 }
 0x823   : > { %v1916_v6 = vadd.f32 %v1915_v30, %v1824_v22  ;;  %v1874_v31 = vpop.f32.mrb[44].mxu0  ;;  %v2959_v16 = vpop.f32.mrb[45].mxu1 }
 0x824   : > { %v1875_v32 = vadd.f32 %v1874_v31, %v1783_v23  ;;  %v1876_v33 = vpop.f32.mrb[45].mxu0  ;;  %v1918_v34 = vpop.f32.mrb[46].mxu1 }
 0x825   : > { %v1877_v35 = vadd.f32 %v1876_v33, %v1785_v25  ;;  %v1878_v36 = vpop.f32.mrb[46].mxu0  ;;  %v2960_v37 = vpop.f32.mrb[47].mxu1 }
 0x826   : > { %v1879_v38 = vpop.f32.mrb[47].mxu0 }
 0x82a   : > { %v2016_v39 = vpop.f32.mrb[48].mxu1 }
 0x82b   : > { %v2024_v40 = vadd.f32 %v2016_v39, %v1916_v6  ;;  %v1975_v41 = vpop.f32.mrb[48].mxu0  ;;  %v2965_v42 = vpop.f32.mrb[49].mxu1 }
 0x82c   : > { %v2022_v43 = vadd.f32 %v1975_v41, %v1875_v32  ;;  %v1977_v44 = vpop.f32.mrb[49].mxu0  ;;  %v2019_v45 = vpop.f32.mrb[50].mxu1 }
 0x82d   : > { %v2023_v46 = vadd.f32 %v1977_v44, %v1877_v35  ;;  %v1979_v47 = vpop.f32.mrb[50].mxu0  ;;  %v2966_v48 = vpop.f32.mrb[51].mxu1 }
 0x82e   : > { %v1980_v49 = vpop.f32.mrb[51].mxu0  ;;  %v2652_v44 = vpop.permute.xlu1 %2651 }
 0x832   : > { %v2120_v50 = vpop.f32.mrb[52].mxu1 }
 0x833   : > { %v2128_v51 = vadd.f32 %v2120_v50, %v2024_v40  ;;  %v2079_v52 = vpop.f32.mrb[52].mxu0  ;;  %v2971_v53 = vpop.f32.mrb[53].mxu1 }
 0x834   : > { %v2126_v54 = vadd.f32 %v2079_v52, %v2022_v43  ;;  %v2081_v55 = vpop.f32.mrb[53].mxu0  ;;  %v2123_v56 = vpop.f32.mrb[54].mxu1 }
 0x835   : > { %v2127_v57 = vadd.f32 %v2081_v55, %v2023_v46  ;;  %v2083_v58 = vpop.f32.mrb[54].mxu0  ;;  %v2972_v59 = vpop.f32.mrb[55].mxu1 }
 0x836   : > { %v2084_v60 = vpop.f32.mrb[55].mxu0 }
 0x83a   : > { %v2224_v61 = vpop.f32.mrb[56].mxu1 }
 0x83b   : > { %v2232_v62 = vadd.f32 %v2224_v61, %v2128_v51  ;;  %v2183_v63 = vpop.f32.mrb[56].mxu0  ;;  %v2977_v0 = vpop.f32.mrb[57].mxu1 }
 0x83c   : > { %v2230_v1 = vadd.f32 %v2183_v63, %v2126_v54  ;;  %v2185_v2 = vpop.f32.mrb[57].mxu0  ;;  %v2227_v3 = vpop.f32.mrb[58].mxu1 }
 0x83d   : > { %v2231_v4 = vadd.f32 %v2185_v2, %v2127_v57  ;;  %v2187_v7 = vpop.f32.mrb[58].mxu0  ;;  %v2978_v9 = vpop.f32.mrb[59].mxu1 }
 0x83e   : > { %v2188_v11 = vpop.f32.mrb[59].mxu0 }
 0x842   : > { %v2328_v12 = vpop.f32.mrb[60].mxu1 }
 0x843   : > { %v2336_v13 = vadd.f32 %v2328_v12, %v2232_v62  ;;  %v2287_v14 = vpop.f32.mrb[60].mxu0  ;;  %v2983_v15 = vpop.f32.mrb[61].mxu1 }
 0x844   : > { %v2334_v17 = vadd.f32 %v2287_v14, %v2230_v1  ;;  %v2289_v18 = vpop.f32.mrb[61].mxu0  ;;  %v2331_v19 = vpop.f32.mrb[62].mxu1  ;;  %v1706_v1 = vld [vmem:[%s3527_s12] sm:$0xff] }
 0x845   : > { %v2335_v20 = vadd.f32 %v2289_v18, %v2231_v4  ;;  %v2291_v21 = vpop.f32.mrb[62].mxu0  ;;  %v2984_v22 = vpop.f32.mrb[63].mxu1 }
 0x846   : > { %v2292_v23 = vpop.f32.mrb[63].mxu0  ;;  %v1707_v21 = vld [vmem:[%s3528_s13] sm:$0xff] }
 0x84a   : > { %v2432_v24 = vpop.f32.mrb[64].mxu1 }
 0x84b   : > { %v2440_v25 = vadd.f32 %v2432_v24, %v2336_v13  ;;  %v2391_v26 = vpop.f32.mrb[64].mxu0  ;;  %v2989_v27 = vpop.f32.mrb[65].mxu1 }
 0x84c   : > { %v2438_v28 = vadd.f32 %v2391_v26, %v2334_v17  ;;  %v2393_v29 = vpop.f32.mrb[65].mxu0  ;;  %v2435_v30 = vpop.f32.mrb[66].mxu1 }
 0x84d   : > { %v2439_v6 = vadd.f32 %v2393_v29, %v2335_v20  ;;  %v2395_v31 = vpop.f32.mrb[66].mxu0  ;;  %v2990_v16 = vpop.f32.mrb[67].mxu1 }
 0x84e   : > { %v2396_v32 = vpop.f32.mrb[67].mxu0 }
 0x852   : > { %v2536_v33 = vpop.f32.mrb[68].mxu1 }
 0x853   : > { %v2544_v34 = vadd.f32 %v2536_v33, %v2440_v25  ;;  %v2495_v35 = vpop.f32.mrb[68].mxu0  ;;  %v2995_v36 = vpop.f32.mrb[69].mxu1 }
 0x854   : > { %v2542_v37 = vadd.f32 %v2495_v35, %v2438_v28  ;;  %v2497_v38 = vpop.f32.mrb[69].mxu0  ;;  %v2539_v39 = vpop.f32.mrb[70].mxu1 }
 0x855   : > { %v2543_v40 = vadd.f32 %v2497_v38, %v2439_v6  ;;  %v2499_v41 = vpop.f32.mrb[70].mxu0  ;;  %v2996_v42 = vpop.f32.mrb[71].mxu1 }
 0x856   : > { %v2500_v43 = vpop.f32.mrb[71].mxu0 }
 0x85a   : > { %v2640_v45 = vpop.f32.mrb[72].mxu1 }
 0x85b   : > { %v2648_v46 = vadd.f32 %v2640_v45, %v2544_v34  ;;  %v2599_v47 = vpop.f32.mrb[72].mxu0  ;;  %v3001_v48 = vpop.f32.mrb[73].mxu1 }
 0x85c   : > { %v2646_v49 = vadd.f32 %v2599_v47, %v2542_v37  ;;  %v2601_v50 = vpop.f32.mrb[73].mxu0  ;;  %v2643_v51 = vpop.f32.mrb[74].mxu1 }
 0x85d   : > { %v2656_v52 = vadd.f32 %v2652_v44, %v2648_v46  ;;  %v2647_v53 = vadd.f32 %v2601_v50, %v2543_v40  ;;  %v2603_v54 = vpop.f32.mrb[74].mxu0  ;;  %v3002_v55 = vpop.f32.mrb[75].mxu1 }
 0x85e   : > { %v2654_v56 = vadd.f32 %v2652_v44, %v2646_v49  ;;  %v2604_v57 = vpop.f32.mrb[75].mxu0 }
 0x85f   : > { %v2655_v58 = vadd.f32 %v2652_v44, %v2647_v53  ;;  %v2659_v60 = vmul.f32 %v2656_v52, %v3315_v8 }
 0x860   : > { %v2657_v59 = vmul.f32 %v2654_v56, %v3313_v5 }
 0x861   : > { %v2658_v61 = vmul.f32 %v2655_v58, %v3317_v10  ;;  %v2661_v63 = vsel %vm524_vm0, %v2659_v60, 0.0 }
 0x863   : > { %v2660_v62 = vadd.f32 %v2658_v61, %v2657_v59 }
 0x865   : > { %v2662_v0 = vadd.f32 %v2661_v63, %v2660_v62 }
 0x867   : > { %2663 = vadd.xlane.f32.xlu0 %v2662_v0 }
 0x87d   : > { %2688 = vperm.xlu0 %3024, %v1706_v1  }
 0x8f4   : > { %v2664_v2 = vpop.xlane.xlu0 %2663 }
 0x8f5   : > { %v2665_v3 = vmul.f32 0.00390625, %v2664_v2 }
 0x8f7   : > { %v2666_v4 = vsub.f32 %v2654_v56, %v2665_v3  ;;  %v2667_v7 = vsub.f32 %v2655_v58, %v2665_v3  ;;  %v2668_v9 = vsub.f32 %v2656_v52, %v2665_v3 }
 0x8f9   : > { %v2669_v11 = vmul.f32 %v2666_v4, %v3313_v5  ;;  %v2670_v12 = vmul.f32 %v2667_v7, %v3317_v10  ;;  %v2671_v13 = vmul.f32 %v2668_v9, %v3315_v8 }
 0x8fb   : > { %v2672_v14 = vmul.f32 %v2669_v11, %v2669_v11  ;;  %v2673_v15 = vmul.f32 %v2670_v12, %v2670_v12  ;;  %v2674_v17 = vmul.f32 %v2671_v13, %v2671_v13 }
 0x8fc   : > { %v2689_v29 = vpop.permute.xlu0 %2688 }
 0x8fd   : > { %v2675_v18 = vadd.f32 %v2673_v15, %v2672_v14  ;;  %v2676_v19 = vsel %vm524_vm0, %v2674_v17, 0.0 }
 0x8ff   : > { %v2677_v20 = vadd.f32 %v2676_v19, %v2675_v18 }
 0x901   : > { %2678 = vadd.xlane.f32.xlu1 %v2677_v20 }
 0x912   : > { %2696 = vperm.xlu1 %3025, %v1707_v21  }
 0x98e   : > { %v2679_v22 = vpop.xlane.xlu1 %2678 }
 0x98f   : > { %v2680_v23 = vmul.f32 0.00390625, %v2679_v22 }
 0x991   : > { %v2681_v24 = vadd.f32 1e-05, %v2680_v23 }
 0x992   : > { %v2697_v16 = vpop.permute.xlu1 %2696 }
 0x993   : > { %3032 = vrsqrt.f32 %v2681_v24 }
 0x99d   : > { %v3033_v25 = vpop.eup %3032 }
 0x99e   : > { %v2683_v26 = vmul.f32 %v3033_v25, %v2666_v4  ;;  %v2684_v27 = vmul.f32 %v3033_v25, %v2667_v7  ;;  %v2685_v28 = vmul.f32 %v3033_v25, %v2668_v9 }
 0x9a0   : > { %v2691_v30 = vmul.f32 %v2689_v29, %v2683_v26  ;;  %v2692_v6 = vmul.f32 %v2689_v29, %v2684_v27  ;;  %v2693_v31 = vmul.f32 %v2689_v29, %v2685_v28 }
 0x9a2   : > { %v2699_v32 = vadd.f32 %v2697_v16, %v2691_v30  ;;  %v2700_v33 = vadd.f32 %v2697_v16, %v2692_v6  ;;  %v2701_v34 = vadd.f32 %v2697_v16, %v2693_v31 }
 0x9a4   : > { %vm2702_vm1 = vcmp.ge.f32.partialorder %v2699_v32, 0.0  ;;  %vm2703_vm2 = vcmp.ge.f32.partialorder %v2700_v33, 0.0  ;;  %vm2704_vm6 = vcmp.ge.f32.partialorder %v2701_v34, 0.0  ;;  %v2705_v35 = vmul.f32 0.01, %v2699_v32 }
 0x9a5   : > { %v2706_v36 = vmul.f32 0.01, %v2700_v33  ;;  %v2707_v37 = vmul.f32 0.01, %v2701_v34 }
 0x9a6   : > { %v2708_v38 = vsel %vm2702_vm1, %v2699_v32, %v2705_v35 }
 0x9a7   : > { %v2709_v39 = vsel %vm2703_vm2, %v2700_v33, %v2706_v36  ;;  %v2710_v40 = vsel %vm2704_vm6, %v2701_v34, %v2707_v37  ;;  %v2711_v41 = vmul.f32 %v2708_v38, %v3313_v5 }
 0x9a8   : > { %v2712_v42 = vmul.f32 %v2709_v39, %v3317_v10  ;;  %v2713_v43 = vmul.f32 %v2710_v40, %v3315_v8 }
 0x9a9   : > { %2714 = vst [vmem:[%s514_s22] sm:$0xff] %v2711_v41 }
 0x9aa   : > { %2715 = vst [vmem:[%s514_s22 + $0x8] sm:$0xff] %v2712_v42  ;;  %2716 = vst.msk [vmem:[%s514_s22 + $0x10] sm:$0xff] %vm524_vm0, %v2713_v43 }
 0x9ab PF: > { %s25_s18 = sadd.s32 1, %s3040_s18  }
 0x9ac   : > { %p22_p4 = scmp.ge.s32.totalorder %s25_s18, 4  }
 0x9ae   :  { %24 = sbr.rel (!%p22_p4) target bundleno = 1 (0x1), region = 113 }

</bundles_post_ra>
